<compile_context>
chip_gen: v6e
topology: v6e:2x2x1
jax: 0.10.0
libtpu: 0.0.40
codegen_flags: <defaults>
</compile_context>

<pallas_src>
import functools

import jax
import jax.numpy as jnp
from jax import lax
from jax.experimental import pallas as pl
from jax.experimental.pallas import tpu as pltpu

# ---- scaled-down stand-in dims (real BarlowTwins: ResNet50 / 8192-wide head) ----
ENC_DIM = 32          # encoder output channels (proj_input_dim)
ENC_PAD = 128         # lane-dense encoder width (channels ENC_DIM..127 == 0)
PROJ_HID = 64         # real hidden width of the projection MLP
PROJ_HID_PAD = 128    # lane-dense hidden width (cols PROJ_HID..127 == 0)
PROJ_DIM = 128        # projection dim
NUM_CLASSES = 10
CLS_PAD = 128         # lane-dense classifier width (cols NUM_CLASSES..127 == 0)

CIN = 3               # image channels
CIN_PAD = 8           # sublane-friendly padded input-channel count
B_TILE = 8            # batch tile (M >= 8 so projection matmuls fill sublanes)
TILE_H = 8            # image-row tile of the pooled-conv reduction grid axis


# ----------------------------- Pallas kernels ------------------------------

def _conv_pool_accumulate(img_ref, wconv_ref, bconv_ref, h_acc, *,
                          tile_h, width, hw):
    """One row-tile of conv3x3 + bias + ReLU with pooled-sum accumulation."""
    t = pl.program_id(1)

    @pl.when(t == 0)
    def _():
        h_acc[...] = jnp.zeros_like(h_acc)

    b_tile = img_ref.shape[0]
    cin = img_ref.shape[-1]
    rows = b_tile * tile_h * width

    # Halo-inclusive row window of the spatially padded image; the 9 taps are
    # built in VMEM (never materialized as a 9x im2col tensor in HBM).
    row0 = pl.multiple_of(t * tile_h, tile_h)
    img_tile = img_ref[:, pl.ds(row0, tile_h + 2), :, :]      # (Bt, th+2, W+2, Cin) bf16

    acc = jnp.zeros((rows, h_acc.shape[-1]), jnp.float32)
    for kh in range(3):                                        # unrolled, 9 MXU streams
        for kw in range(3):
            tap = img_tile[:, kh:kh + tile_h, kw:kw + width, :]
            tap2d = tap.reshape(rows, cin)                     # bf16 MXU operand
            acc = acc + jnp.dot(tap2d, wconv_ref[kh * 3 + kw],
                                preferred_element_type=jnp.float32)

    # bias + ReLU + pooled partial sums in f32 (v5e-safe elementwise path).
    y = jnp.maximum(acc + bconv_ref[...], 0.0)                 # (rows, ENC_PAD) f32
    h_acc[...] += jnp.sum(y.reshape(b_tile, tile_h * width, -1), axis=1)


def _train_kernel(img_ref, wconv_ref, bconv_ref, w1_ref, b1_ref, w2_ref, b2_ref,
                  h_ref, z_ref, h_acc, *, tile_h, width, hw):
    _conv_pool_accumulate(img_ref, wconv_ref, bconv_ref, h_acc,
                          tile_h=tile_h, width=width, hw=hw)

    @pl.when(pl.program_id(1) == pl.num_programs(1) - 1)
    def _():
        h = h_acc[...] * (1.0 / float(hw))                     # global average pool
        h_ref[...] = h                                         # lane-dense (B_TILE, 128)
        # projection head: Linear -> ReLU -> Linear; h stays resident in vregs.
        a = jnp.dot(h.astype(jnp.bfloat16), w1_ref[...],
                    preferred_element_type=jnp.float32) + b1_ref[...]
        a = jnp.maximum(a, 0.0)
        z_ref[...] = jnp.dot(a.astype(jnp.bfloat16), w2_ref[...],
                             preferred_element_type=jnp.float32) + b2_ref[...]


def _eval_kernel(img_ref, wconv_ref, bconv_ref, wcls_ref, bcls_ref,
                 logits_ref, h_acc, *, tile_h, width, hw):
    _conv_pool_accumulate(img_ref, wconv_ref, bconv_ref, h_acc,
                          tile_h=tile_h, width=width, hw=hw)

    @pl.when(pl.program_id(1) == pl.num_programs(1) - 1)
    def _():
        h = h_acc[...] * (1.0 / float(hw))
        logits_ref[...] = jnp.dot(h.astype(jnp.bfloat16), wcls_ref[...],
                                  preferred_element_type=jnp.float32) + bcls_ref[...]


# ----------------------------- host-side glue ------------------------------

def _run_train(img, wconv, bconv, w1, b1, w2, b2, *, b_pad, height, width):
    hw = height * width
    grid = (b_pad // B_TILE, height // TILE_H)
    kernel = functools.partial(_train_kernel, tile_h=TILE_H, width=width, hw=hw)
    flops = (2 * b_pad * hw * 9 * CIN_PAD * ENC_PAD
             + 2 * b_pad * ENC_PAD * PROJ_HID_PAD
             + 2 * b_pad * PROJ_HID_PAD * PROJ_DIM)
    bytes_accessed = (int(img.size) * img.dtype.itemsize
                      + sum(int(a.size) * a.dtype.itemsize
                            for a in (wconv, bconv, w1, b1, w2, b2))
                      + b_pad * (ENC_PAD + PROJ_DIM) * 4)
    return pl.pallas_call(
        kernel,
        out_shape=(jax.ShapeDtypeStruct((b_pad, ENC_PAD), jnp.float32),
                   jax.ShapeDtypeStruct((b_pad, PROJ_DIM), jnp.float32)),
        grid_spec=pltpu.PrefetchScalarGridSpec(
            num_scalar_prefetch=0,
            grid=grid,
            in_specs=[
                pl.BlockSpec((B_TILE, height + 2, width + 2, CIN_PAD),
                             lambda b, t: (b, 0, 0, 0)),
                pl.BlockSpec((9, CIN_PAD, ENC_PAD), lambda b, t: (0, 0, 0)),
                pl.BlockSpec((1, ENC_PAD), lambda b, t: (0, 0)),
                pl.BlockSpec((ENC_PAD, PROJ_HID_PAD), lambda b, t: (0, 0)),
                pl.BlockSpec((1, PROJ_HID_PAD), lambda b, t: (0, 0)),
                pl.BlockSpec((PROJ_HID_PAD, PROJ_DIM), lambda b, t: (0, 0)),
                pl.BlockSpec((1, PROJ_DIM), lambda b, t: (0, 0)),
            ],
            out_specs=(pl.BlockSpec((B_TILE, ENC_PAD), lambda b, t: (b, 0)),
                       pl.BlockSpec((B_TILE, PROJ_DIM), lambda b, t: (b, 0))),
            scratch_shapes=[pltpu.VMEM((B_TILE, ENC_PAD), jnp.float32)],
        ),
        compiler_params=pltpu.CompilerParams(
            dimension_semantics=("parallel", "arbitrary")),
        cost_estimate=pl.CostEstimate(flops=flops, transcendentals=0,
                                      bytes_accessed=bytes_accessed),
    )(img, wconv, bconv, w1, b1, w2, b2)


def _run_eval(img, wconv, bconv, wcls, bcls, *, b_pad, height, width):
    hw = height * width
    grid = (b_pad // B_TILE, height // TILE_H)
    kernel = functools.partial(_eval_kernel, tile_h=TILE_H, width=width, hw=hw)
    flops = 2 * b_pad * hw * 9 * CIN_PAD * ENC_PAD + 2 * b_pad * ENC_PAD * CLS_PAD
    bytes_accessed = (int(img.size) * img.dtype.itemsize
                      + sum(int(a.size) * a.dtype.itemsize
                            for a in (wconv, bconv, wcls, bcls))
                      + b_pad * CLS_PAD * 4)
    return pl.pallas_call(
        kernel,
        out_shape=jax.ShapeDtypeStruct((b_pad, CLS_PAD), jnp.float32),
        grid_spec=pltpu.PrefetchScalarGridSpec(
            num_scalar_prefetch=0,
            grid=grid,
            in_specs=[
                pl.BlockSpec((B_TILE, height + 2, width + 2, CIN_PAD),
                             lambda b, t: (b, 0, 0, 0)),
                pl.BlockSpec((9, CIN_PAD, ENC_PAD), lambda b, t: (0, 0, 0)),
                pl.BlockSpec((1, ENC_PAD), lambda b, t: (0, 0)),
                pl.BlockSpec((ENC_PAD, CLS_PAD), lambda b, t: (0, 0)),
                pl.BlockSpec((1, CLS_PAD), lambda b, t: (0, 0)),
            ],
            out_specs=pl.BlockSpec((B_TILE, CLS_PAD), lambda b, t: (b, 0)),
            scratch_shapes=[pltpu.VMEM((B_TILE, ENC_PAD), jnp.float32)],
        ),
        compiler_params=pltpu.CompilerParams(
            dimension_semantics=("parallel", "arbitrary")),
        cost_estimate=pl.CostEstimate(flops=flops, transcendentals=0,
                                      bytes_accessed=bytes_accessed),
    )(img, wconv, bconv, wcls, bcls)


class BarlowTwins:
    """JAX/Pallas port of the PyTorch BarlowTwins module."""

    def __init__(self, key, image_channels=CIN):
        assert image_channels <= CIN_PAD
        ks = jax.random.split(key, 7)
        s = 0.02

        # --- "real" (unpadded, f32) parameters; used by the pure-JAX reference ---
        self.w_conv = s * jax.random.normal(ks[0], (ENC_DIM, image_channels, 3, 3),
                                            jnp.float32)                 # OIHW
        self.b_conv = s * jax.random.normal(ks[1], (ENC_DIM,), jnp.float32)
        self.w1 = s * jax.random.normal(ks[2], (ENC_DIM, PROJ_HID), jnp.float32)
        self.b1 = s * jax.random.normal(ks[3], (PROJ_HID,), jnp.float32)
        self.w2 = s * jax.random.normal(ks[4], (PROJ_HID, PROJ_DIM), jnp.float32)
        self.b2 = s * jax.random.normal(ks[5], (PROJ_DIM,), jnp.float32)
        self.w_cls = s * jax.random.normal(ks[6], (ENC_DIM, NUM_CLASSES), jnp.float32)
        self.b_cls = jnp.zeros((NUM_CLASSES,), jnp.float32)

        # --- padded, bf16 kernel-side parameters (all pads exactly zero) ---
        wtaps = jnp.transpose(self.w_conv, (2, 3, 1, 0)).reshape(
            9, image_channels, ENC_DIM)                                  # (kh*3+kw, Cin, Cout)
        self.wconv_k = (jnp.zeros((9, CIN_PAD, ENC_PAD), jnp.float32)
                        .at[:, :image_channels, :ENC_DIM].set(wtaps)
                        .astype(jnp.bfloat16))
        self.bconv_k = (jnp.zeros((1, ENC_PAD), jnp.float32)
                        .at[0, :ENC_DIM].set(self.b_conv))
        self.w1_k = (jnp.zeros((ENC_PAD, PROJ_HID_PAD), jnp.float32)
                     .at[:ENC_DIM, :PROJ_HID].set(self.w1).astype(jnp.bfloat16))
        self.b1_k = (jnp.zeros((1, PROJ_HID_PAD), jnp.float32)
                     .at[0, :PROJ_HID].set(self.b1))
        self.w2_k = (jnp.zeros((PROJ_HID_PAD, PROJ_DIM), jnp.float32)
                     .at[:PROJ_HID, :].set(self.w2).astype(jnp.bfloat16))
        self.b2_k = self.b2.reshape(1, PROJ_DIM)
        self.wcls_k = (jnp.zeros((ENC_PAD, CLS_PAD), jnp.float32)
                       .at[:ENC_DIM, :NUM_CLASSES].set(self.w_cls)
                       .astype(jnp.bfloat16))
        self.bcls_k = (jnp.zeros((1, CLS_PAD), jnp.float32)
                       .at[0, :NUM_CLASSES].set(self.b_cls))

        self.image_channels = image_channels
        self.evaluation = False

    def _prepare_image(self, x_nchw, b_pad):
        # NCHW -> NHWC, spatial pad=1 (SAME 3x3 conv), zero-pad batch & channels,
        # cast to bf16 at the kernel boundary (halved DMA, bf16 MXU operand).
        x = jnp.transpose(x_nchw, (0, 2, 3, 1))
        batch, _, _, c = x.shape
        return jnp.pad(x, ((0, b_pad - batch), (1, 1), (1, 1),
                           (0, CIN_PAD - c))).astype(jnp.bfloat16)

    def __call__(self, x_nchw):
        batch, _, height, width = x_nchw.shape
        assert height % TILE_H == 0
        b_pad = max(B_TILE, ((batch + B_TILE - 1) // B_TILE) * B_TILE)
        img = self._prepare_image(x_nchw, b_pad)
        if not self.evaluation:
            h_pad, z_pad = _run_train(img, self.wconv_k, self.bconv_k,
                                      self.w1_k, self.b1_k, self.w2_k, self.b2_k,
                                      b_pad=b_pad, height=height, width=width)
            # h.view(h.size(0), -1) is a no-op for (B, ENC_DIM); strip padding.
            return h_pad[:batch, :ENC_DIM], z_pad[:batch, :PROJ_DIM]
        logits_pad = _run_eval(img, self.wconv_k, self.bconv_k,
                               self.wcls_k, self.bcls_k,
                               b_pad=b_pad, height=height, width=width)
        return logits_pad[:batch, :NUM_CLASSES]


# --------------------------------- main -------------------------------------

def _reference_forward(model, x_nchw):
    """Independent pure-JAX (f32, lax.conv) reference of the same forward."""
    y = lax.conv_general_dilated(
        x_nchw, model.w_conv, window_strides=(1, 1), padding="SAME",
        dimension_numbers=("NCHW", "OIHW", "NCHW"),
        precision=lax.Precision.HIGHEST)
    y = jnp.maximum(y + model.b_conv[None, :, None, None], 0.0)
    h = jnp.mean(y, axis=(2, 3))                                  # (B, ENC_DIM)
    a = jnp.maximum(h @ model.w1 + model.b1, 0.0)
    z = a @ model.w2 + model.b2
    logits = h @ model.w_cls + model.b_cls
    return h, z, logits


if __name__ == "__main__":
    key = jax.random.PRNGKey(0)
    k_x, k_p = jax.random.split(key)
    x = jax.random.normal(k_x, (2, 3, 16, 16), jnp.float32)       # NCHW, like PyTorch

    model = BarlowTwins(k_p, image_channels=3)

    # training forward: (h, z)
    h, z = model(x)
    h, z = jax.block_until_ready((h, z))
    assert h.shape == (2, ENC_DIM), h.shape
    assert z.shape == (2, PROJ_DIM), z.shape

    # eval forward: logits
    model.evaluation = True
    logits = jax.block_until_ready(model(x))
    assert logits.shape == (2, NUM_CLASSES), logits.shape
    model.evaluation = False

    h_ref, z_ref, logits_ref = _reference_forward(model, x)
    # bf16 MXU operands in the kernel vs f32 HIGHEST-precision reference.
    assert jnp.allclose(h, h_ref, rtol=3e-2, atol=3e-3), "encoder mismatch"
    assert jnp.allclose(z, z_ref, rtol=3e-2, atol=3e-3), "projection mismatch"
    assert jnp.allclose(logits, logits_ref, rtol=3e-2, atol=3e-3), "classifier mismatch"

    print("KERNEL_OK")
</pallas_src>

<mosaic_0001>
module attributes {stable_mosaic.version = 11 : i64} {
  func.func @_train_kernel(%arg0: i32, %arg1: i32, %arg2: memref<8x18x18x8xbf16, #tpu.memory_space<vmem>>, %arg3: memref<9x8x128xbf16, #tpu.memory_space<vmem>>, %arg4: memref<1x128xf32, #tpu.memory_space<vmem>>, %arg5: memref<128x128xbf16, #tpu.memory_space<vmem>>, %arg6: memref<1x128xf32, #tpu.memory_space<vmem>>, %arg7: memref<128x128xbf16, #tpu.memory_space<vmem>>, %arg8: memref<1x128xf32, #tpu.memory_space<vmem>>, %arg9: memref<8x128xf32, #tpu.memory_space<vmem>>, %arg10: memref<8x128xf32, #tpu.memory_space<vmem>>, %arg11: memref<8x128xf32, #tpu.memory_space<vmem>>) attributes {dimension_semantics = [#tpu.dimension_semantics<parallel>, #tpu.dimension_semantics<arbitrary>], iteration_bounds = array<i64: 1, 2>, scalar_prefetch = 0 : i64, scratch_operands = 1 : i64, tpu.core_type = #tpu.core_type<tc>, window_params = [{transform_indices = @transform_0, window_bounds = array<i64: 8, 18, 18, 8>}, {pipeline_mode = #tpu.pipeline_mode<synchronous>, transform_indices = @transform_1, window_bounds = array<i64: 9, 8, 128>}, {pipeline_mode = #tpu.pipeline_mode<synchronous>, transform_indices = @transform_2, window_bounds = array<i64: 1, 128>}, {pipeline_mode = #tpu.pipeline_mode<synchronous>, transform_indices = @transform_3, window_bounds = array<i64: 128, 128>}, {pipeline_mode = #tpu.pipeline_mode<synchronous>, transform_indices = @transform_4, window_bounds = array<i64: 1, 128>}, {pipeline_mode = #tpu.pipeline_mode<synchronous>, transform_indices = @transform_5, window_bounds = array<i64: 128, 128>}, {pipeline_mode = #tpu.pipeline_mode<synchronous>, transform_indices = @transform_6, window_bounds = array<i64: 1, 128>}, {transform_indices = @transform_7, window_bounds = array<i64: 8, 128>}, {transform_indices = @transform_8, window_bounds = array<i64: 8, 128>}]} {
    %c0_i32 = arith.constant 0 : i32
    %0 = arith.cmpi eq, %arg1, %c0_i32 : i32
    %1 = arith.extui %0 : i1 to i32
    %c0_i32_0 = arith.constant 0 : i32
    %2 = arith.cmpi ne, %1, %c0_i32_0 : i32
    scf.if %2 {
      %cst_40 = arith.constant 0.000000e+00 : f32
      %75 = vector.broadcast %cst_40 : f32 to vector<8x128xf32>
      %c0_41 = arith.constant 0 : index
      %c0_42 = arith.constant 0 : index
      %76 = vector.load %arg11[%c0_41, %c0_42] : memref<8x128xf32, #tpu.memory_space<vmem>>, vector<8x128xf32>
      tpu.vector_store %arg11[%c0_41, %c0_42], %75 {strides = array<i32>} : memref<8x128xf32, #tpu.memory_space<vmem>>, vector<8x128xf32>,
    } else {
    }
    %c8_i32 = arith.constant 8 : i32
    %3 = arith.muli %arg1, %c8_i32 : i32
    %4 = tpu.assume_multiple %3, 8 : i32
    %c0 = arith.constant 0 : index
    %5 = arith.index_cast %4 : i32 to index
    %c0_1 = arith.constant 0 : index
    %c0_2 = arith.constant 0 : index
    %6 = vector.load %arg2[%c0, %5, %c0_1, %c0_2] : memref<8x18x18x8xbf16, #tpu.memory_space<vmem>>, vector<8x10x18x8xbf16>
    %cst = arith.constant 0.000000e+00 : f32
    %7 = vector.broadcast %cst : f32 to vector<1024x128xf32>
    %8 = vector.extract_strided_slice %6 {offsets = [0, 0, 0, 0], sizes = [8, 8, 16, 8], strides = [1, 1, 1, 1]} : vector<8x10x18x8xbf16> to vector<8x8x16x8xbf16>
    %9 = vector.shape_cast %8 : vector<8x8x16x8xbf16> to vector<1024x8xbf16>
    %c0_3 = arith.constant 0 : index
    %c0_4 = arith.constant 0 : index
    %c0_5 = arith.constant 0 : index
    %10 = vector.load %arg3[%c0_3, %c0_4, %c0_5] : memref<9x8x128xbf16, #tpu.memory_space<vmem>>, vector<1x8x128xbf16>
    %11 = vector.shape_cast %10 : vector<1x8x128xbf16> to vector<8x128xbf16>
    %cst_6 = arith.constant dense<0.000000e+00> : vector<1024x128xf32>
    %12 = tpu.matmul %9, %11, %cst_6 {dimension_numbers = #tpu.dot_dimension_numbers<[1], [0], [0], [1], [0, 0, 1, 1], [], []>} : vector<1024x8xbf16>, vector<8x128xbf16>, vector<1024x128xf32> -> vector<1024x128xf32>
    %13 = arith.addf %7, %12 : vector<1024x128xf32>
    %14 = vector.extract_strided_slice %6 {offsets = [0, 0, 1, 0], sizes = [8, 8, 16, 8], strides = [1, 1, 1, 1]} : vector<8x10x18x8xbf16> to vector<8x8x16x8xbf16>
    %15 = vector.shape_cast %14 : vector<8x8x16x8xbf16> to vector<1024x8xbf16>
    %c1 = arith.constant 1 : index
    %c0_7 = arith.constant 0 : index
    %c0_8 = arith.constant 0 : index
    %16 = vector.load %arg3[%c1, %c0_7, %c0_8] : memref<9x8x128xbf16, #tpu.memory_space<vmem>>, vector<1x8x128xbf16>
    %17 = vector.shape_cast %16 : vector<1x8x128xbf16> to vector<8x128xbf16>
    %cst_9 = arith.constant dense<0.000000e+00> : vector<1024x128xf32>
    %18 = tpu.matmul %15, %17, %cst_9 {dimension_numbers = #tpu.dot_dimension_numbers<[1], [0], [0], [1], [0, 0, 1, 1], [], []>} : vector<1024x8xbf16>, vector<8x128xbf16>, vector<1024x128xf32> -> vector<1024x128xf32>
    %19 = arith.addf %13, %18 : vector<1024x128xf32>
    %20 = vector.extract_strided_slice %6 {offsets = [0, 0, 2, 0], sizes = [8, 8, 16, 8], strides = [1, 1, 1, 1]} : vector<8x10x18x8xbf16> to vector<8x8x16x8xbf16>
    %21 = vector.shape_cast %20 : vector<8x8x16x8xbf16> to vector<1024x8xbf16>
    %c2 = arith.constant 2 : index
    %c0_10 = arith.constant 0 : index
    %c0_11 = arith.constant 0 : index
    %22 = vector.load %arg3[%c2, %c0_10, %c0_11] : memref<9x8x128xbf16, #tpu.memory_space<vmem>>, vector<1x8x128xbf16>
    %23 = vector.shape_cast %22 : vector<1x8x128xbf16> to vector<8x128xbf16>
    %cst_12 = arith.constant dense<0.000000e+00> : vector<1024x128xf32>
    %24 = tpu.matmul %21, %23, %cst_12 {dimension_numbers = #tpu.dot_dimension_numbers<[1], [0], [0], [1], [0, 0, 1, 1], [], []>} : vector<1024x8xbf16>, vector<8x128xbf16>, vector<1024x128xf32> -> vector<1024x128xf32>
    %25 = arith.addf %19, %24 : vector<1024x128xf32>
    %26 = vector.extract_strided_slice %6 {offsets = [0, 1, 0, 0], sizes = [8, 8, 16, 8], strides = [1, 1, 1, 1]} : vector<8x10x18x8xbf16> to vector<8x8x16x8xbf16>
    %27 = vector.shape_cast %26 : vector<8x8x16x8xbf16> to vector<1024x8xbf16>
    %c3 = arith.constant 3 : index
    %c0_13 = arith.constant 0 : index
    %c0_14 = arith.constant 0 : index
    %28 = vector.load %arg3[%c3, %c0_13, %c0_14] : memref<9x8x128xbf16, #tpu.memory_space<vmem>>, vector<1x8x128xbf16>
    %29 = vector.shape_cast %28 : vector<1x8x128xbf16> to vector<8x128xbf16>
    %cst_15 = arith.constant dense<0.000000e+00> : vector<1024x128xf32>
    %30 = tpu.matmul %27, %29, %cst_15 {dimension_numbers = #tpu.dot_dimension_numbers<[1], [0], [0], [1], [0, 0, 1, 1], [], []>} : vector<1024x8xbf16>, vector<8x128xbf16>, vector<1024x128xf32> -> vector<1024x128xf32>
    %31 = arith.addf %25, %30 : vector<1024x128xf32>
    %32 = vector.extract_strided_slice %6 {offsets = [0, 1, 1, 0], sizes = [8, 8, 16, 8], strides = [1, 1, 1, 1]} : vector<8x10x18x8xbf16> to vector<8x8x16x8xbf16>
    %33 = vector.shape_cast %32 : vector<8x8x16x8xbf16> to vector<1024x8xbf16>
    %c4 = arith.constant 4 : index
    %c0_16 = arith.constant 0 : index
    %c0_17 = arith.constant 0 : index
    %34 = vector.load %arg3[%c4, %c0_16, %c0_17] : memref<9x8x128xbf16, #tpu.memory_space<vmem>>, vector<1x8x128xbf16>
    %35 = vector.shape_cast %34 : vector<1x8x128xbf16> to vector<8x128xbf16>
    %cst_18 = arith.constant dense<0.000000e+00> : vector<1024x128xf32>
    %36 = tpu.matmul %33, %35, %cst_18 {dimension_numbers = #tpu.dot_dimension_numbers<[1], [0], [0], [1], [0, 0, 1, 1], [], []>} : vector<1024x8xbf16>, vector<8x128xbf16>, vector<1024x128xf32> -> vector<1024x128xf32>
    %37 = arith.addf %31, %36 : vector<1024x128xf32>
    %38 = vector.extract_strided_slice %6 {offsets = [0, 1, 2, 0], sizes = [8, 8, 16, 8], strides = [1, 1, 1, 1]} : vector<8x10x18x8xbf16> to vector<8x8x16x8xbf16>
    %39 = vector.shape_cast %38 : vector<8x8x16x8xbf16> to vector<1024x8xbf16>
    %c5 = arith.constant 5 : index
    %c0_19 = arith.constant 0 : index
    %c0_20 = arith.constant 0 : index
    %40 = vector.load %arg3[%c5, %c0_19, %c0_20] : memref<9x8x128xbf16, #tpu.memory_space<vmem>>, vector<1x8x128xbf16>
    %41 = vector.shape_cast %40 : vector<1x8x128xbf16> to vector<8x128xbf16>
    %cst_21 = arith.constant dense<0.000000e+00> : vector<1024x128xf32>
    %42 = tpu.matmul %39, %41, %cst_21 {dimension_numbers = #tpu.dot_dimension_numbers<[1], [0], [0], [1], [0, 0, 1, 1], [], []>} : vector<1024x8xbf16>, vector<8x128xbf16>, vector<1024x128xf32> -> vector<1024x128xf32>
    %43 = arith.addf %37, %42 : vector<1024x128xf32>
    %44 = vector.extract_strided_slice %6 {offsets = [0, 2, 0, 0], sizes = [8, 8, 16, 8], strides = [1, 1, 1, 1]} : vector<8x10x18x8xbf16> to vector<8x8x16x8xbf16>
    %45 = vector.shape_cast %44 : vector<8x8x16x8xbf16> to vector<1024x8xbf16>
    %c6 = arith.constant 6 : index
    %c0_22 = arith.constant 0 : index
    %c0_23 = arith.constant 0 : index
    %46 = vector.load %arg3[%c6, %c0_22, %c0_23] : memref<9x8x128xbf16, #tpu.memory_space<vmem>>, vector<1x8x128xbf16>
    %47 = vector.shape_cast %46 : vector<1x8x128xbf16> to vector<8x128xbf16>
    %cst_24 = arith.constant dense<0.000000e+00> : vector<1024x128xf32>
    %48 = tpu.matmul %45, %47, %cst_24 {dimension_numbers = #tpu.dot_dimension_numbers<[1], [0], [0], [1], [0, 0, 1, 1], [], []>} : vector<1024x8xbf16>, vector<8x128xbf16>, vector<1024x128xf32> -> vector<1024x128xf32>
    %49 = arith.addf %43, %48 : vector<1024x128xf32>
    %50 = vector.extract_strided_slice %6 {offsets = [0, 2, 1, 0], sizes = [8, 8, 16, 8], strides = [1, 1, 1, 1]} : vector<8x10x18x8xbf16> to vector<8x8x16x8xbf16>
    %51 = vector.shape_cast %50 : vector<8x8x16x8xbf16> to vector<1024x8xbf16>
    %c7 = arith.constant 7 : index
    %c0_25 = arith.constant 0 : index
    %c0_26 = arith.constant 0 : index
    %52 = vector.load %arg3[%c7, %c0_25, %c0_26] : memref<9x8x128xbf16, #tpu.memory_space<vmem>>, vector<1x8x128xbf16>
    %53 = vector.shape_cast %52 : vector<1x8x128xbf16> to vector<8x128xbf16>
    %cst_27 = arith.constant dense<0.000000e+00> : vector<1024x128xf32>
    %54 = tpu.matmul %51, %53, %cst_27 {dimension_numbers = #tpu.dot_dimension_numbers<[1], [0], [0], [1], [0, 0, 1, 1], [], []>} : vector<1024x8xbf16>, vector<8x128xbf16>, vector<1024x128xf32> -> vector<1024x128xf32>
    %55 = arith.addf %49, %54 : vector<1024x128xf32>
    %56 = vector.extract_strided_slice %6 {offsets = [0, 2, 2, 0], sizes = [8, 8, 16, 8], strides = [1, 1, 1, 1]} : vector<8x10x18x8xbf16> to vector<8x8x16x8xbf16>
    %57 = vector.shape_cast %56 : vector<8x8x16x8xbf16> to vector<1024x8xbf16>
    %c8 = arith.constant 8 : index
    %c0_28 = arith.constant 0 : index
    %c0_29 = arith.constant 0 : index
    %58 = vector.load %arg3[%c8, %c0_28, %c0_29] : memref<9x8x128xbf16, #tpu.memory_space<vmem>>, vector<1x8x128xbf16>
    %59 = vector.shape_cast %58 : vector<1x8x128xbf16> to vector<8x128xbf16>
    %cst_30 = arith.constant dense<0.000000e+00> : vector<1024x128xf32>
    %60 = tpu.matmul %57, %59, %cst_30 {dimension_numbers = #tpu.dot_dimension_numbers<[1], [0], [0], [1], [0, 0, 1, 1], [], []>} : vector<1024x8xbf16>, vector<8x128xbf16>, vector<1024x128xf32> -> vector<1024x128xf32>
    %61 = arith.addf %55, %60 : vector<1024x128xf32>
    %c0_31 = arith.constant 0 : index
    %c0_32 = arith.constant 0 : index
    %62 = vector.load %arg4[%c0_31, %c0_32] : memref<1x128xf32, #tpu.memory_space<vmem>>, vector<1x128xf32>
    %63 = vector.broadcast %62 : vector<1x128xf32> to vector<1024x128xf32>
    %64 = arith.addf %61, %63 : vector<1024x128xf32>
    %cst_33 = arith.constant 0.000000e+00 : f32
    %65 = vector.broadcast %cst_33 : f32 to vector<1024x128xf32>
    %66 = arith.maximumf %64, %65 : vector<1024x128xf32>
    %c0_34 = arith.constant 0 : index
    %c0_35 = arith.constant 0 : index
    %67 = vector.load %arg11[%c0_34, %c0_35] : memref<8x128xf32, #tpu.memory_space<vmem>>, vector<8x128xf32>
    %68 = vector.shape_cast %66 : vector<1024x128xf32> to vector<8x128x128xf32>
    %cst_36 = arith.constant dense<0.000000e+00> : vector<8x128xf32>
    %69 = vector.multi_reduction <add>, %68, %cst_36 [1] : vector<8x128x128xf32> to vector<8x128xf32>
    %70 = arith.addf %67, %69 : vector<8x128xf32>
    %c0_37 = arith.constant 0 : index
    %c0_38 = arith.constant 0 : index
    %71 = vector.load %arg11[%c0_37, %c0_38] : memref<8x128xf32, #tpu.memory_space<vmem>>, vector<8x128xf32>
    tpu.vector_store %arg11[%c0_37, %c0_38], %70 {strides = array<i32>} : memref<8x128xf32, #tpu.memory_space<vmem>>, vector<8x128xf32>,
    %c1_i32 = arith.constant 1 : i32
    %72 = arith.cmpi eq, %arg1, %c1_i32 : i32
    %73 = arith.extui %72 : i1 to i32
    %c0_i32_39 = arith.constant 0 : i32
    %74 = arith.cmpi ne, %73, %c0_i32_39 : i32
    scf.if %74 {
      %c0_40 = arith.constant 0 : index
      %c0_41 = arith.constant 0 : index
      %75 = vector.load %arg11[%c0_40, %c0_41] : memref<8x128xf32, #tpu.memory_space<vmem>>, vector<8x128xf32>
      %cst_42 = arith.constant 3.906250e-03 : f32
      %76 = vector.broadcast %cst_42 : f32 to vector<8x128xf32>
      %77 = arith.mulf %75, %76 : vector<8x128xf32>
      %c0_43 = arith.constant 0 : index
      %c0_44 = arith.constant 0 : index
      %78 = vector.load %arg9[%c0_43, %c0_44] : memref<8x128xf32, #tpu.memory_space<vmem>>, vector<8x128xf32>
      tpu.vector_store %arg9[%c0_43, %c0_44], %77 {strides = array<i32>} : memref<8x128xf32, #tpu.memory_space<vmem>>, vector<8x128xf32>,
      %79 = arith.truncf %77 : vector<8x128xf32> to vector<8x128xbf16>
      %c0_45 = arith.constant 0 : index
      %c0_46 = arith.constant 0 : index
      %80 = vector.load %arg5[%c0_45, %c0_46] : memref<128x128xbf16, #tpu.memory_space<vmem>>, vector<128x128xbf16>
      %cst_47 = arith.constant dense<0.000000e+00> : vector<8x128xf32>
      %81 = tpu.matmul %79, %80, %cst_47 {dimension_numbers = #tpu.dot_dimension_numbers<[1], [0], [0], [1], [0, 0, 1, 1], [], []>} : vector<8x128xbf16>, vector<128x128xbf16>, vector<8x128xf32> -> vector<8x128xf32>
      %c0_48 = arith.constant 0 : index
      %c0_49 = arith.constant 0 : index
      %82 = vector.load %arg6[%c0_48, %c0_49] : memref<1x128xf32, #tpu.memory_space<vmem>>, vector<1x128xf32>
      %83 = vector.broadcast %82 : vector<1x128xf32> to vector<8x128xf32>
      %84 = arith.addf %81, %83 : vector<8x128xf32>
      %cst_50 = arith.constant 0.000000e+00 : f32
      %85 = vector.broadcast %cst_50 : f32 to vector<8x128xf32>
      %86 = arith.maximumf %84, %85 : vector<8x128xf32>
      %87 = arith.truncf %86 : vector<8x128xf32> to vector<8x128xbf16>
      %c0_51 = arith.constant 0 : index
      %c0_52 = arith.constant 0 : index
      %88 = vector.load %arg7[%c0_51, %c0_52] : memref<128x128xbf16, #tpu.memory_space<vmem>>, vector<128x128xbf16>
      %cst_53 = arith.constant dense<0.000000e+00> : vector<8x128xf32>
      %89 = tpu.matmul %87, %88, %cst_53 {dimension_numbers = #tpu.dot_dimension_numbers<[1], [0], [0], [1], [0, 0, 1, 1], [], []>} : vector<8x128xbf16>, vector<128x128xbf16>, vector<8x128xf32> -> vector<8x128xf32>
      %c0_54 = arith.constant 0 : index
      %c0_55 = arith.constant 0 : index
      %90 = vector.load %arg8[%c0_54, %c0_55] : memref<1x128xf32, #tpu.memory_space<vmem>>, vector<1x128xf32>
      %91 = vector.broadcast %90 : vector<1x128xf32> to vector<8x128xf32>
      %92 = arith.addf %89, %91 : vector<8x128xf32>
      %c0_56 = arith.constant 0 : index
      %c0_57 = arith.constant 0 : index
      %93 = vector.load %arg10[%c0_56, %c0_57] : memref<8x128xf32, #tpu.memory_space<vmem>>, vector<8x128xf32>
      tpu.vector_store %arg10[%c0_56, %c0_57], %92 {strides = array<i32>} : memref<8x128xf32, #tpu.memory_space<vmem>>, vector<8x128xf32>,
    } else {
    }
    return
  }
  func.func @transform_0(%arg0: i32, %arg1: i32) -> (i32, i32, i32, i32) {
    %c0_i32 = arith.constant 0 : i32
    %c0_i32_0 = arith.constant 0 : i32
    %c0_i32_1 = arith.constant 0 : i32
    %c0_i32_2 = arith.constant 0 : i32
    return %arg0, %c0_i32, %c0_i32_0, %c0_i32_1 : i32, i32, i32, i32
  }
  func.func @transform_1(%arg0: i32, %arg1: i32) -> (i32, i32, i32) {
    %c0_i32 = arith.constant 0 : i32
    %c0_i32_0 = arith.constant 0 : i32
    %c0_i32_1 = arith.constant 0 : i32
    %c0_i32_2 = arith.constant 0 : i32
    return %c0_i32, %c0_i32_0, %c0_i32_1 : i32, i32, i32
  }
  func.func @transform_2(%arg0: i32, %arg1: i32) -> (i32, i32) {
    %c0_i32 = arith.constant 0 : i32
    %c0_i32_0 = arith.constant 0 : i32
    %c0_i32_1 = arith.constant 0 : i32
    return %c0_i32, %c0_i32_0 : i32, i32
  }
  func.func @transform_3(%arg0: i32, %arg1: i32) -> (i32, i32) {
    %c0_i32 = arith.constant 0 : i32
    %c0_i32_0 = arith.constant 0 : i32
    %c0_i32_1 = arith.constant 0 : i32
    return %c0_i32, %c0_i32_0 : i32, i32
  }
  func.func @transform_4(%arg0: i32, %arg1: i32) -> (i32, i32) {
    %c0_i32 = arith.constant 0 : i32
    %c0_i32_0 = arith.constant 0 : i32
    %c0_i32_1 = arith.constant 0 : i32
    return %c0_i32, %c0_i32_0 : i32, i32
  }
  func.func @transform_5(%arg0: i32, %arg1: i32) -> (i32, i32) {
    %c0_i32 = arith.constant 0 : i32
    %c0_i32_0 = arith.constant 0 : i32
    %c0_i32_1 = arith.constant 0 : i32
    return %c0_i32, %c0_i32_0 : i32, i32
  }
  func.func @transform_6(%arg0: i32, %arg1: i32) -> (i32, i32) {
    %c0_i32 = arith.constant 0 : i32
    %c0_i32_0 = arith.constant 0 : i32
    %c0_i32_1 = arith.constant 0 : i32
    return %c0_i32, %c0_i32_0 : i32, i32
  }
  func.func @transform_7(%arg0: i32, %arg1: i32) -> (i32, i32) {
    %c0_i32 = arith.constant 0 : i32
    %c0_i32_0 = arith.constant 0 : i32
    return %arg0, %c0_i32 : i32, i32
  }
  func.func @transform_8(%arg0: i32, %arg1: i32) -> (i32, i32) {
    %c0_i32 = arith.constant 0 : i32
    %c0_i32_0 = arith.constant 0 : i32
    return %arg0, %c0_i32 : i32, i32
  }
}

</mosaic_0001>

<bundles_post_ra>
// kernel: tpu_custom_call.1
= control target key start
LH: loop header
LB: loop body
LE: loop exit
PB: predicated region body
PF: predicated region fallthrough
CT: control target
= control target key end

     0   :  { %14 = vsyncpa [#allocation4], 0  ;;  %s19344_s0 = inlined_call_operand.vmem [shape: bf16[8,18,18,8], index: 0, kind: input, shape index: {}]   ;;  %s19345_s1 = inlined_call_operand.vmem [shape: bf16[9,8,128], index: 1, kind: input, shape index: {}]   ;;  %s19346_s2 = inlined_call_operand.vmem [shape: f32[1,128], index: 2, kind: input, shape index: {}]   ;;  %s19347_s3 = inlined_call_operand.vmem [shape: bf16[128,128], index: 3, kind: input, shape index: {}]   ;;  %s19348_s4 = inlined_call_operand.vmem [shape: f32[1,128], index: 4, kind: input, shape index: {}]   ;;  %s19349_s5 = inlined_call_operand.vmem [shape: bf16[128,128], index: 5, kind: input, shape index: {}]   ;;  %s19350_s6 = inlined_call_operand.vmem [shape: f32[1,128], index: 6, kind: input, shape index: {}]   ;;  %s19351_s7 = inlined_call_operand.hbm [shape: f32[8,128], index: 7, kind: output, shape index: {0}]   ;;  %s19352_s8 = inlined_call_operand.hbm [shape: f32[8,128], index: 8, kind: output, shape index: {1}]  }
   0x1   :  { %15 = vsyncpa [#allocation6], 0  ;;  %s14620_s27 = smov 0   ;;  %s14622_s28 = smov 0  }
   0x2   :  { %s14624_s29 = smov 0  }
   0x3 LB: > { %s11361_s30 = sadd.s32 4294967295, %s14568_s29   ;;  %s30_s9 = sadd.s32 1, %s14564_s28  ;;  %s14568_s29 = sphi %s14624_s29, %s21_s29   ;;  %s14564_s28 = sphi %s14622_s28, %s20966_s28   ;;  %s14560_s27 = sphi %s14620_s27, %s20965_s27  }
   0x4   : > { %p31_p0 = scmp.ge.s32.totalorder %s30_s9, 2  ;;  %p11364_p1 = scmp.ge.s32.totalorder %s14568_s29, 1 }
   0x5   : > { %p281_p2 = scmp.lt.s32.totalorder %s14568_s29, 3 }
   0x6   : > { %s20968_s9 = smov (%p31_p0, %s30_s9), 0 }
   0x7   : > { %p282_p3 = pnand %p11364_p1, %p281_p2 }
   0x9   : > { %285 = sbr.rel (%p282_p3) target bundleno = 2018 (0x7e2), region = 48 }
   0xe   : > { %p11365_p4 = scmp.ne.s32.totalorder %s14560_s27, 0 }
  0x10   : > { %322 = sbr.rel (%p11365_p4) target bundleno = 23 (0x17), region = 52 }
  0x15   : > { %v14570_v0 = vmov 0.0  }
  0x16   : > { %323 = vst [vmem:[#allocation2] sm:$0xff] %v14570_v0 }
  0x17 PF: > { %v11369_v1 = vld [vmem:[%s19345_s1 + $0x4] sm:$0xf]  ;;  %vm2495_vm0 = vcmask 1043456   ;;  %s12299_s12 = smul.u32 96, %s14560_s27  ;;  %v14652_v3 = vld [vmem:[%s19345_s1] sm:$0xf] }
  0x18   : > { %14116 = vmatprep.subr.msk.bf16.mxu1 %vm2495_vm0, %v11369_v1  ;;  %14115 = vmatprep.subr.msk.bf16.mxu0 %vm2495_vm0, %v11369_v1  ;;  %v2497_v2 = vsel %vm2495_vm0, %v11369_v1, 0  ;;  %vm569_vm1 = vsmask.f32 3328  ;;  %vm570_vm2 = vsmask.f32 7440  ;;  %v19671_v30 = vmov 0 }
  0x19   : > { %14114 = vmatpush3.bf16.msra.mxu1 %v2497_v2  ;;  %12904 = vmatpush3.bf16.msra.mxu0 %v2497_v2  ;;  %s14657_s17 = scalar_lea.vmem %s19344_s0, %s12299_s12  ;;  %v14662_v4 = vld [vmem:[%s19345_s1 + $0x8] sm:$0xf]  ;;  %vm14678_vm3 = vmor %vm569_vm1, %vm570_vm2  ;;  %vm2302_vm4 = vcmask 64512   ;;  %v14695_v60 = vsel %vm2495_vm0, %v14652_v3, 0  ;;  %vm4168_vm5 = vcmask 1042432   ;;  %vm4169_vm6 = vcmask 1046532  }
  0x1a   : > { %v328_v5 = vld [vmem:[%s14657_s17] sm:$0xf]  ;;  %v329_v6 = vld [vmem:[%s14657_s17 + $0x4] sm:$0xf]  ;;  %v330_v7 = vld [vmem:[%s14657_s17 + $0x8] sm:$0x1]  ;;  %14117 = vmatprep.subr.msk.bf16.mxu1 %vm2495_vm0, %v14652_v3  ;;  %14118 = vmatprep.subr.msk.bf16.mxu0 %vm2495_vm0, %v14662_v4 }
  0x1b   : > { %v573_v8 = vshrl.u32 %v328_v5, 16  ;;  %v576_v9 = vshll.u32 %v328_v5, 16  ;;  %v582_v10 = vshll.u32 %v329_v6, 16  ;;  %v586_v11 = vshrl.u32 %v329_v6, 16  ;;  %v448_v12 = vld [vmem:[%s14657_s17 + $0x360] sm:$0xf]  ;;  %vm15439_vm7 = vmor %vm4168_vm5, %vm4169_vm6 }
  0x1c   : > { %v592_v13 = vshll.u32 %v330_v7, 16  ;;  %v449_v14 = vld [vmem:[%s14657_s17 + $0x364] sm:$0xf]  ;;  %v450_v15 = vld [vmem:[%s14657_s17 + $0x368] sm:$0x1]  ;;  %v1341_v21 = vshrl.u32 %v448_v12, 16 }
  0x1d   : > { %v575_v16 = vrot.slane %v573_v8, 4  ;;  %v578_v17 = vrot.slane %v576_v9, 5  ;;  %v584_v18 = vrot.slane %v582_v10, 5  ;;  %v588_v19 = vrot.slane %v586_v11, 4  ;;  %v331_v28 = vld [vmem:[%s14657_s17 + $0xc] sm:$0xf] }
  0x1e   : > { %v594_v20 = vrot.slane %v592_v13, 5  ;;  %v1344_v22 = vshll.u32 %v448_v12, 16  ;;  %v1350_v23 = vshll.u32 %v449_v14, 16  ;;  %v1354_v26 = vshrl.u32 %v449_v14, 16  ;;  %v332_v29 = vld [vmem:[%s14657_s17 + $0x10] sm:$0xf] }
  0x1f   : > { %v579_v24 = vor.u32 %v578_v17, %v575_v16  ;;  %v589_v25 = vor.u32 %v588_v19, %v584_v18  ;;  %v1360_v27 = vshll.u32 %v450_v15, 16  ;;  %v19672_v30 = vsel %vm14678_vm3, 4294967295, %v19671_v30  ;;  %v333_v39 = vld [vmem:[%s14657_s17 + $0x14] sm:$0x1]  ;;  %v451_v51 = vld [vmem:[%s14657_s17 + $0x36c] sm:$0xf] }
  0x20   : > { %19673 = vst [vmem:[#allocation9_spill] sm:$0xff] %v19672_v30  ;;  %v1343_v31 = vrot.slane %v1341_v21, 4  ;;  %v1346_v32 = vrot.slane %v1344_v22, 5  ;;  %v1352_v33 = vrot.slane %v1350_v23, 5  ;;  %v1356_v36 = vrot.slane %v1354_v26, 4  ;;  %p12274_p5 = scmp.ne.s32.totalorder %s14560_s27, 1 }
  0x21   : > { %v580_v34 = vrot.slane %v579_v24, 4  ;;  %v590_v35 = vrot.slane %v589_v25, 4  ;;  %v1362_v37 = vrot.slane %v1360_v27, 5  ;;  %v597_v40 = vshrl.u32 %v331_v28, 16  ;;  %v452_v56 = vld [vmem:[%s14657_s17 + $0x370] sm:$0xf] }
  0x22   : > { %v1347_v38 = vor.u32 %v1346_v32, %v1343_v31  ;;  %v600_v41 = vshll.u32 %v331_v28, 16  ;;  %v606_v42 = vshll.u32 %v332_v29, 16  ;;  %v1357_v45 = vor.u32 %v1356_v36, %v1352_v33  ;;  %v453_v59 = vld [vmem:[%s14657_s17 + $0x374] sm:$0x1]  ;;  %v334_v11 = vld [vmem:[%s14657_s17 + $0x18] sm:$0xf] }
  0x23   : > { %v585_v43 = vsel %vm14678_vm3, %v580_v34, %v584_v18  ;;  %v595_v44 = vsel %vm14678_vm3, %v590_v35, %v594_v20  ;;  %v610_v46 = vshrl.u32 %v332_v29, 16  ;;  %v599_v49 = vrot.slane %v597_v40, 4  ;;  %v335_v14 = vld [vmem:[%s14657_s17 + $0x1c] sm:$0xf]  ;;  %v336_v15 = vld [vmem:[%s14657_s17 + $0x20] sm:$0x1] }
  0x24   : > { %v11370_v47 = vcombine.low %v585_v43, %v595_v44  ;;  %v1348_v48 = vrot.slane %v1347_v38, 4  ;;  %v602_v50 = vrot.slane %v600_v41, 5  ;;  %v1358_v52 = vrot.slane %v1357_v45, 4  ;;  %v454_v20 = vld [vmem:[%s14657_s17 + $0x378] sm:$0xf] }
  0x25   : > { %v608_v53 = vrot.slane %v606_v42, 5  ;;  %v612_v54 = vrot.slane %v610_v46, 4  ;;  %v616_v55 = vshll.u32 %v333_v39, 16  ;;  %v1365_v0 = vshrl.u32 %v451_v51, 16  ;;  %v456_v38 = vld [vmem:[%s14657_s17 + $0x380] sm:$0x1] }
  0x26   : > { %12905 = vmatprep.mubr.msk.bf16.mxu0 %vm2302_vm4, %v11370_v47  ;;  %v1353_v57 = vsel %vm14678_vm3, %v1348_v48, %v1352_v33  ;;  %v603_v58 = vor.u32 %v602_v50, %v599_v49  ;;  %v1363_v61 = vsel %vm14678_vm3, %v1358_v52, %v1362_v37  ;;  %v1368_v5 = vshll.u32 %v451_v51, 16  ;;  %v455_v33 = vld [vmem:[%s14657_s17 + $0x37c] sm:$0xf]  ;;  %v337_v43 = vld [vmem:[%s14657_s17 + $0x24] sm:$0xf] }
  0x27   : > { %v613_v62 = vor.u32 %v612_v54, %v608_v53  ;;  %v618_v63 = vrot.slane %v616_v55, 5  ;;  %v11402_v1 = vcombine.low %v1353_v57, %v1363_v61  ;;  %v1374_v6 = vshll.u32 %v452_v56, 16  ;;  %v338_v52 = vld [vmem:[%s14657_s17 + $0x28] sm:$0xf]  ;;  %v339_v61 = vld [vmem:[%s14657_s17 + $0x2c] sm:$0x1] }
  0x28   : > { %v604_v2 = vrot.slane %v603_v58, 4  ;;  %v1367_v8 = vrot.slane %v1365_v0, 4  ;;  %v1378_v9 = vshrl.u32 %v452_v56, 16  ;;  %v1384_v10 = vshll.u32 %v453_v59, 16 }
  0x29   : > { %v614_v7 = vrot.slane %v613_v62, 4  ;;  %12969 = vmatprep.mubr.msk.bf16.mxu1 %vm2302_vm4, %v11402_v1  ;;  %v1370_v12 = vrot.slane %v1368_v5, 5  ;;  %v1376_v13 = vrot.slane %v1374_v6, 5  ;;  %v5006_v19 = vsel %vm2495_vm0, %v14662_v4, 0 }
  0x2a   : > { %v609_v3 = vsel %vm14678_vm3, %v604_v2, %v608_v53  ;;  %v1380_v17 = vrot.slane %v1378_v9, 4  ;;  %v1386_v18 = vrot.slane %v1384_v10, 5  ;;  %v621_v23 = vshrl.u32 %v334_v11, 16  ;;  %v458_v10 = vld [vmem:[%s14657_s17 + $0x388] sm:$0xf] }
  0x2b   : > { %v619_v16 = vsel %vm14678_vm3, %v614_v7, %v618_v63  ;;  %v1371_v22 = vor.u32 %v1370_v12, %v1367_v8  ;;  %v624_v24 = vshll.u32 %v334_v11, 16  ;;  %v630_v26 = vshll.u32 %v335_v14, 16  ;;  %v457_v63 = vld [vmem:[%s14657_s17 + $0x384] sm:$0xf] }
  0x2c   : > { %v14710_v21 = vcombine.low %v609_v3, %v619_v16  ;;  %v1381_v25 = vor.u32 %v1380_v17, %v1376_v13  ;;  %v634_v27 = vshrl.u32 %v335_v14, 16  ;;  %v640_v28 = vshll.u32 %v336_v15, 16  ;;  %v459_v16 = vld [vmem:[%s14657_s17 + $0x38c] sm:$0x1] }
  0x2d   : > { %v1372_v29 = vrot.slane %v1371_v22, 4  ;;  %v623_v31 = vrot.slane %v621_v23, 4  ;;  %v626_v32 = vrot.slane %v624_v24, 5  ;;  %v1389_v4 = vshrl.u32 %v454_v20, 16  ;;  %v340_v23 = vld [vmem:[%s14657_s17 + $0x30] sm:$0xf] }
  0x2e   : > { %19674 = vst [vmem:[#allocation10_spill] sm:$0xff] %v14710_v21  ;;  %12906 = vmatmul.mubr.msk.bf16.vlgmr.msra.gmra.mxu0 %vm2302_vm4, %v14710_v21  ;;  %v1382_v34 = vrot.slane %v1381_v25, 4  ;;  %v632_v35 = vrot.slane %v630_v26, 5  ;;  %v636_v36 = vrot.slane %v634_v27, 4  ;;  %v642_v37 = vrot.slane %v640_v28, 5 }
  0x2f   : > { %13164 = vmatpush3.bf16.msra.mxu0 %v5006_v19  ;;  %v1377_v39 = vsel %vm14678_vm3, %v1372_v29, %v1376_v13  ;;  %v627_v40 = vor.u32 %v626_v32, %v623_v31  ;;  %v1391_v41 = vrot.slane %v1389_v4, 4  ;;  %v1392_v42 = vshll.u32 %v454_v20, 16  ;;  %v341_v28 = vld [vmem:[%s14657_s17 + $0x34] sm:$0xf] }
  0x30   : > { %v1387_v44 = vsel %vm14678_vm3, %v1382_v34, %v1386_v18  ;;  %v637_v45 = vor.u32 %v636_v36, %v632_v35  ;;  %v1398_v46 = vshll.u32 %v455_v33, 16  ;;  %v1402_v47 = vshrl.u32 %v455_v33, 16 }
  0x31   : > { %v14721_v48 = vcombine.low %v1377_v39, %v1387_v44  ;;  %v628_v49 = vrot.slane %v627_v40, 4  ;;  %v1394_v50 = vrot.slane %v1392_v42, 5  ;;  %v1408_v51 = vshll.u32 %v456_v38, 16 }
  0x32   : > { %v638_v53 = vrot.slane %v637_v45, 4  ;;  %v1400_v54 = vrot.slane %v1398_v46, 5  ;;  %v1404_v55 = vrot.slane %v1402_v47, 4  ;;  %v645_v56 = vshrl.u32 %v337_v43, 16  ;;  %v461_v46 = vld [vmem:[%s14657_s17 + $0x394] sm:$0xf] }
  0x33   : > { %19675 = vst [vmem:[#allocation11_spill] sm:$0xff] %v14721_v48  ;;  %12970 = vmatmul.mubr.msk.bf16.vlgmr.msra.gmra.mxu1 %vm2302_vm4, %v14721_v48  ;;  %v633_v57 = vsel %vm14678_vm3, %v628_v49, %v632_v35  ;;  %v1395_v58 = vor.u32 %v1394_v50, %v1391_v41  ;;  %v1410_v59 = vrot.slane %v1408_v51, 5  ;;  %v648_v62 = vshll.u32 %v337_v43, 16  ;;  %v342_v35 = vld [vmem:[%s14657_s17 + $0x38] sm:$0x1] }
  0x34   : > { %13034 = vmatpush3.bf16.msra.mxu1 %v14695_v60  ;;  %v643_v0 = vsel %vm14678_vm3, %v638_v53, %v642_v37  ;;  %v1405_v1 = vor.u32 %v1404_v55, %v1400_v54  ;;  %v647_v2 = vrot.slane %v645_v56, 4  ;;  %v654_v5 = vshll.u32 %v338_v52, 16  ;;  %v460_v41 = vld [vmem:[%s14657_s17 + $0x390] sm:$0xf] }
  0x35   : > { %v14733_v6 = vcombine.low %v633_v57, %v643_v0  ;;  %v1396_v7 = vrot.slane %v1395_v58, 4  ;;  %v650_v8 = vrot.slane %v648_v62, 5  ;;  %v658_v9 = vshrl.u32 %v338_v52, 16  ;;  %v462_v58 = vld [vmem:[%s14657_s17 + $0x398] sm:$0x1] }
  0x36   : > { %v1406_v11 = vrot.slane %v1405_v1, 4  ;;  %v656_v3 = vrot.slane %v654_v5, 5  ;;  %v664_v12 = vshll.u32 %v339_v61, 16  ;;  %v1413_v13 = vshrl.u32 %v457_v63, 16 }
  0x37   : > { %19676 = vst [vmem:[#allocation12_spill] sm:$0xff] %v14733_v6  ;;  %12909 = vmatprep.mubr.msk.bf16.mxu0 %vm2302_vm4, %v14733_v6  ;;  %v1401_v60 = vsel %vm14678_vm3, %v1396_v7, %v1400_v54  ;;  %v651_v14 = vor.u32 %v650_v8, %v647_v2  ;;  %v660_v15 = vrot.slane %v658_v9, 4  ;;  %v1416_v17 = vshll.u32 %v457_v63, 16  ;;  %v343_v2 = vld [vmem:[%s14657_s17 + $0x3c] sm:$0xf] }
  0x38   : > { %v1411_v18 = vsel %vm14678_vm3, %v1406_v11, %v1410_v59  ;;  %v666_v19 = vrot.slane %v664_v12, 5  ;;  %v1415_v20 = vrot.slane %v1413_v13, 4  ;;  %v1422_v22 = vshll.u32 %v458_v10, 16  ;;  %v14304_v6 = vld [vmem:[%s14657_s17 + $0x1d0] sm:$0x1] }
  0x39   : > { %v14744_v24 = vcombine.low %v1401_v60, %v1411_v18  ;;  %v652_v25 = vrot.slane %v651_v14, 4  ;;  %v661_v26 = vor.u32 %v660_v15, %v656_v3  ;;  %v1418_v27 = vrot.slane %v1416_v17, 5  ;;  %v345_v15 = vld [vmem:[%s14657_s17 + $0x44] sm:$0x1] }
  0x3a   : > { %v1424_v29 = vrot.slane %v1422_v22, 5  ;;  %v1426_v31 = vshrl.u32 %v458_v10, 16  ;;  %v1432_v32 = vshll.u32 %v459_v16, 16  ;;  %v669_v36 = vshrl.u32 %v340_v23, 16  ;;  %v344_v10 = vld [vmem:[%s14657_s17 + $0x40] sm:$0xf] }
  0x3b   : > { %19677 = vst [vmem:[#allocation13_spill] sm:$0xff] %v14744_v24  ;;  %12973 = vmatprep.mubr.msk.bf16.mxu1 %vm2302_vm4, %v14744_v24  ;;  %v657_v33 = vsel %vm14678_vm3, %v652_v25, %v656_v3  ;;  %v662_v4 = vrot.slane %v661_v26, 4  ;;  %v1419_v34 = vor.u32 %v1418_v27, %v1415_v20  ;;  %v672_v39 = vshll.u32 %v340_v23, 16  ;;  %v463_v23 = vld [vmem:[%s14657_s17 + $0x39c] sm:$0xf] }
  0x3c   : > { %v1428_v37 = vrot.slane %v1426_v31, 4  ;;  %v1434_v38 = vrot.slane %v1432_v32, 5  ;;  %v678_v40 = vshll.u32 %v341_v28, 16  ;;  %v671_v44 = vrot.slane %v669_v36, 4  ;;  %v465_v36 = vld [vmem:[%s14657_s17 + $0x3a4] sm:$0x1] }
  0x3d   : > { %v667_v42 = vsel %vm14678_vm3, %v662_v4, %v666_v19  ;;  %v1420_v43 = vrot.slane %v1419_v34, 4  ;;  %v682_v45 = vshrl.u32 %v341_v28, 16  ;;  %v674_v50 = vrot.slane %v672_v39, 5  ;;  %v15335_v24 = vld [vmem:[%s14657_s17 + $0x2d0] sm:$0xf] }
  0x3e   : > { %v14756_v47 = vcombine.low %v657_v33, %v667_v42  ;;  %v1429_v49 = vor.u32 %v1428_v37, %v1424_v29  ;;  %v680_v51 = vrot.slane %v678_v40, 5  ;;  %v688_v54 = vshll.u32 %v342_v35, 16 }
  0x3f   : > { %v1425_v52 = vsel %vm14678_vm3, %v1420_v43, %v1424_v29  ;;  %v684_v53 = vrot.slane %v682_v45, 4  ;;  %v1437_v55 = vshrl.u32 %v460_v41, 16  ;;  %v675_v57 = vor.u32 %v674_v50, %v671_v44  ;;  %v464_v29 = vld [vmem:[%s14657_s17 + $0x3a0] sm:$0xf]  ;;  %v346_v43 = vld [vmem:[%s14657_s17 + $0x48] sm:$0xf] }
  0x40   : > { %19678 = vst [vmem:[#allocation14_spill] sm:$0xff] %v14756_v47  ;;  %12910 = vmatmul.mubr.msk.bf16.gmra.mxu0 %vm2302_vm4, %v14756_v47  ;;  %v1430_v56 = vrot.slane %v1429_v49, 4  ;;  %v1440_v59 = vshll.u32 %v460_v41, 16  ;;  %v1446_v61 = vshll.u32 %v461_v46, 16  ;;  %v690_v63 = vrot.slane %v688_v54, 5 }
  0x41   : > { %v685_v62 = vor.u32 %v684_v53, %v680_v51  ;;  %v1439_v0 = vrot.slane %v1437_v55, 4  ;;  %v1450_v1 = vshrl.u32 %v461_v46, 16  ;;  %v676_v7 = vrot.slane %v675_v57, 4  ;;  %v347_v54 = vld [vmem:[%s14657_s17 + $0x4c] sm:$0xf] }
  0x42   : > { %v1435_v5 = vsel %vm14678_vm3, %v1430_v56, %v1434_v38  ;;  %v1442_v8 = vrot.slane %v1440_v59, 5  ;;  %v1448_v9 = vrot.slane %v1446_v61, 5  ;;  %v1456_v13 = vshll.u32 %v462_v58, 16  ;;  %v348_v57 = vld [vmem:[%s14657_s17 + $0x50] sm:$0x1] }
  0x43   : > { %v14767_v11 = vcombine.low %v1425_v52, %v1435_v5  ;;  %v686_v3 = vrot.slane %v685_v62, 4  ;;  %v1452_v12 = vrot.slane %v1450_v1, 4  ;;  %v681_v60 = vsel %vm14678_vm3, %v676_v7, %v680_v51  ;;  %v466_v7 = vld [vmem:[%s14657_s17 + $0x3a8] sm:$0xf] }
  0x44   : > { %v1443_v14 = vor.u32 %v1442_v8, %v1439_v0  ;;  %v693_v16 = vshrl.u32 %v343_v2, 16  ;;  %v696_v17 = vshll.u32 %v343_v2, 16  ;;  %v1458_v20 = vrot.slane %v1456_v13, 5 }
  0x45   : > { %19679 = vst [vmem:[#allocation15_spill] sm:$0xff] %v14767_v11  ;;  %12974 = vmatmul.mubr.msk.bf16.gmra.mxu1 %vm2302_vm4, %v14767_v11  ;;  %v691_v18 = vsel %vm14678_vm3, %v686_v3, %v690_v63  ;;  %v1453_v19 = vor.u32 %v1452_v12, %v1448_v9  ;;  %v702_v22 = vshll.u32 %v344_v10, 16  ;;  %v706_v33 = vshrl.u32 %v344_v10, 16  ;;  %v467_v12 = vld [vmem:[%s14657_s17 + $0x3ac] sm:$0xf] }
  0x46   : > { %v14777_v25 = vcombine.low %v681_v60, %v691_v18  ;;  %v1444_v26 = vrot.slane %v1443_v14, 4  ;;  %v695_v27 = vrot.slane %v693_v16, 4  ;;  %v698_v28 = vrot.slane %v696_v17, 5  ;;  %v468_v16 = vld [vmem:[%s14657_s17 + $0x3b0] sm:$0x1] }
  0x47   : > { %v1454_v31 = vrot.slane %v1453_v19, 4  ;;  %v704_v32 = vrot.slane %v702_v22, 5  ;;  %v712_v4 = vshll.u32 %v345_v15, 16  ;;  %v1461_v37 = vshrl.u32 %v463_v23, 16 }
  0x48   : > { %19680 = vst [vmem:[#allocation16_spill] sm:$0xff] %v14777_v25  ;;  %12913 = vmatprep.mubr.msk.bf16.mxu0 %vm2302_vm4, %v14777_v25  ;;  %v1449_v34 = vsel %vm14678_vm3, %v1444_v26, %v1448_v9  ;;  %v699_v35 = vor.u32 %v698_v28, %v695_v27  ;;  %v1464_v38 = vshll.u32 %v463_v23, 16  ;;  %v708_v40 = vrot.slane %v706_v33, 4  ;;  %v349_v28 = vld [vmem:[%s14657_s17 + $0x54] sm:$0xf] }
  0x49   : > { %v1459_v39 = vsel %vm14678_vm3, %v1454_v31, %v1458_v20  ;;  %v714_v41 = vrot.slane %v712_v4, 5  ;;  %v1470_v42 = vshll.u32 %v464_v29, 16  ;;  %v1463_v46 = vrot.slane %v1461_v37, 4  ;;  %v350_v4 = vld [vmem:[%s14657_s17 + $0x58] sm:$0xf] }
  0x4a   : > { %v14788_v44 = vcombine.low %v1449_v34, %v1459_v39  ;;  %v700_v45 = vrot.slane %v699_v35, 4  ;;  %v1466_v49 = vrot.slane %v1464_v38, 5  ;;  %v709_v50 = vor.u32 %v708_v40, %v704_v32 }
  0x4b   : > { %v1472_v51 = vrot.slane %v1470_v42, 5  ;;  %v1474_v52 = vshrl.u32 %v464_v29, 16  ;;  %v1480_v53 = vshll.u32 %v465_v36, 16  ;;  %v717_v58 = vshrl.u32 %v346_v43, 16 }
  0x4c   : > { %19681 = vst [vmem:[#allocation17_spill] sm:$0xff] %v14788_v44  ;;  %12977 = vmatprep.mubr.msk.bf16.mxu1 %vm2302_vm4, %v14788_v44  ;;  %v705_v55 = vsel %vm14678_vm3, %v700_v45, %v704_v32  ;;  %v1467_v56 = vor.u32 %v1466_v49, %v1463_v46  ;;  %v710_v59 = vrot.slane %v709_v50, 4  ;;  %v720_v63 = vshll.u32 %v346_v43, 16  ;;  %v469_v50 = vld [vmem:[%s14657_s17 + $0x3b4] sm:$0xf] }
  0x4d   : > { %v1476_v61 = vrot.slane %v1474_v52, 4  ;;  %v1482_v62 = vrot.slane %v1480_v53, 5  ;;  %v719_v1 = vrot.slane %v717_v58, 4  ;;  %v726_v2 = vshll.u32 %v347_v54, 16 }
  0x4e   : > { %v1468_v0 = vrot.slane %v1467_v56, 4  ;;  %v730_v5 = vshrl.u32 %v347_v54, 16  ;;  %v715_v8 = vsel %vm14678_vm3, %v710_v59, %v714_v41  ;;  %v722_v10 = vrot.slane %v720_v63, 5  ;;  %v351_v41 = vld [vmem:[%s14657_s17 + $0x5c] sm:$0x1] }
  0x4f   : > { %v1477_v9 = vor.u32 %v1476_v61, %v1472_v51  ;;  %v736_v3 = vshll.u32 %v348_v57, 16  ;;  %v14800_v13 = vcombine.low %v705_v55, %v715_v8  ;;  %v728_v14 = vrot.slane %v726_v2, 5  ;;  %v470_v55 = vld [vmem:[%s14657_s17 + $0x3b8] sm:$0xf] }
  0x50   : > { %v1473_v60 = vsel %vm14678_vm3, %v1468_v0, %v1472_v51  ;;  %v732_v15 = vrot.slane %v730_v5, 4  ;;  %v723_v18 = vor.u32 %v722_v10, %v719_v1  ;;  %v1485_v20 = vshrl.u32 %v466_v7, 16 }
  0x51   : > { %19682 = vst [vmem:[#allocation18_spill] sm:$0xff] %v14800_v13  ;;  %v1478_v17 = vrot.slane %v1477_v9, 4  ;;  %v738_v19 = vrot.slane %v736_v3, 5  ;;  %12914 = vmatmul.mubr.msk.bf16.gmra.mxu0 %vm2302_vm4, %v14800_v13  ;;  %v1488_v23 = vshll.u32 %v466_v7, 16  ;;  %v1494_v26 = vshll.u32 %v467_v12, 16 }
  0x52   : > { %v733_v22 = vor.u32 %v732_v15, %v728_v14  ;;  %v1498_v27 = vshrl.u32 %v467_v12, 16  ;;  %v724_v31 = vrot.slane %v723_v18, 4  ;;  %v1487_v32 = vrot.slane %v1485_v20, 4  ;;  %v471_v7 = vld [vmem:[%s14657_s17 + $0x3bc] sm:$0x1] }
  0x53   : > { %v1483_v29 = vsel %vm14678_vm3, %v1478_v17, %v1482_v62  ;;  %v1504_v33 = vshll.u32 %v468_v16, 16  ;;  %v1490_v36 = vrot.slane %v1488_v23, 5  ;;  %v1496_v37 = vrot.slane %v1494_v26, 5  ;;  %v359_v18 = vld [vmem:[%s14657_s17 + $0xdc] sm:$0xf] }
  0x54   : > { %v14811_v34 = vcombine.low %v1473_v60, %v1483_v29  ;;  %v734_v35 = vrot.slane %v733_v22, 4  ;;  %v729_v38 = vsel %vm14678_vm3, %v724_v31, %v728_v14  ;;  %v1500_v39 = vrot.slane %v1498_v27, 4  ;;  %v358_v60 = vld [vmem:[%s14657_s17 + $0xd8] sm:$0xf]  ;;  %v360_v27 = vld [vmem:[%s14657_s17 + $0xe0] sm:$0x1] }
  0x55   : > { %v1506_v40 = vrot.slane %v1504_v33, 5  ;;  %v741_v42 = vshrl.u32 %v349_v28, 16  ;;  %v1491_v45 = vor.u32 %v1490_v36, %v1487_v32  ;;  %v744_v46 = vshll.u32 %v349_v28, 16 }
  0x56   : > { %19683 = vst [vmem:[#allocation19_spill] sm:$0xff] %v14811_v34  ;;  %12978 = vmatmul.mubr.msk.bf16.gmra.mxu1 %vm2302_vm4, %v14811_v34  ;;  %v739_v43 = vsel %vm14678_vm3, %v734_v35, %v738_v19  ;;  %v750_v49 = vshll.u32 %v350_v4, 16  ;;  %v1501_v52 = vor.u32 %v1500_v39, %v1496_v37  ;;  %v754_v54 = vshrl.u32 %v350_v4, 16  ;;  %v478_v35 = vld [vmem:[%s14657_s17 + $0x438] sm:$0xf] }
  0x57   : > { %v14821_v51 = vcombine.low %v729_v38, %v739_v43  ;;  %v743_v53 = vrot.slane %v741_v42, 4  ;;  %v1492_v56 = vrot.slane %v1491_v45, 4  ;;  %v746_v57 = vrot.slane %v744_v46, 5 }
  0x58   : > { %v752_v58 = vrot.slane %v750_v49, 5  ;;  %v760_v59 = vshll.u32 %v351_v41, 16  ;;  %v1502_v61 = vrot.slane %v1501_v52, 4  ;;  %v756_v62 = vrot.slane %v754_v54, 4 }
  0x59   : > { %19684 = vst [vmem:[#allocation20_spill] sm:$0xff] %v14821_v51  ;;  %12917 = vmatprep.mubr.msk.bf16.mxu0 %vm2302_vm4, %v14821_v51  ;;  %v1509_v63 = vshrl.u32 %v469_v50, 16  ;;  %v1512_v0 = vshll.u32 %v469_v50, 16  ;;  %v1497_v1 = vsel %vm14678_vm3, %v1492_v56, %v1496_v37  ;;  %v747_v2 = vor.u32 %v746_v57, %v743_v53  ;;  %v480_v50 = vld [vmem:[%s14657_s17 + $0x440] sm:$0x1] }
  0x5a   : > { %v762_v5 = vrot.slane %v760_v59, 5  ;;  %v1518_v8 = vshll.u32 %v470_v55, 16  ;;  %v1507_v9 = vsel %vm14678_vm3, %v1502_v61, %v1506_v40  ;;  %v757_v10 = vor.u32 %v756_v62, %v752_v58  ;;  %v479_v40 = vld [vmem:[%s14657_s17 + $0x43c] sm:$0xf]  ;;  %v14280_v51 = vld [vmem:[%s14657_s17 + $0xf8] sm:$0x1] }
  0x5b   : > { %v1511_v3 = vrot.slane %v1509_v63, 4  ;;  %v1514_v12 = vrot.slane %v1512_v0, 5  ;;  %v14832_v14 = vcombine.low %v1497_v1, %v1507_v9  ;;  %v748_v15 = vrot.slane %v747_v2, 4  ;;  %v362_v0 = vld [vmem:[%s14657_s17 + $0xe8] sm:$0xf] }
  0x5c   : > { %v1520_v16 = vrot.slane %v1518_v8, 5  ;;  %v1522_v17 = vshrl.u32 %v470_v55, 16  ;;  %v758_v19 = vrot.slane %v757_v10, 4  ;;  %v1528_v22 = vshll.u32 %v471_v7, 16 }
  0x5d   : > { %19685 = vst [vmem:[#allocation21_spill] sm:$0xff] %v14832_v14  ;;  %v1515_v20 = vor.u32 %v1514_v12, %v1511_v3  ;;  %12981 = vmatprep.mubr.msk.bf16.mxu1 %vm2302_vm4, %v14832_v14  ;;  %v753_v23 = vsel %vm14678_vm3, %v748_v15, %v752_v58  ;;  %v765_v28 = vshrl.u32 %v358_v60, 16  ;;  %v768_v29 = vshll.u32 %v358_v60, 16  ;;  %v361_v58 = vld [vmem:[%s14657_s17 + $0xe4] sm:$0xf] }
  0x5e   : > { %v1524_v26 = vrot.slane %v1522_v17, 4  ;;  %v763_v31 = vsel %vm14678_vm3, %v758_v19, %v762_v5  ;;  %v1530_v33 = vrot.slane %v1528_v22, 5  ;;  %v774_v4 = vshll.u32 %v359_v18, 16  ;;  %v363_v15 = vld [vmem:[%s14657_s17 + $0xec] sm:$0x1] }
  0x5f   : > { %v1516_v32 = vrot.slane %v1515_v20, 4  ;;  %v14843_v36 = vcombine.low %v753_v23, %v763_v31  ;;  %v767_v38 = vrot.slane %v765_v28, 4  ;;  %v770_v39 = vrot.slane %v768_v29, 5  ;;  %v481_v23 = vld [vmem:[%s14657_s17 + $0x444] sm:$0xf] }
  0x60   : > { %v1525_v37 = vor.u32 %v1524_v26, %v1520_v16  ;;  %v776_v42 = vrot.slane %v774_v4, 5  ;;  %v778_v43 = vshrl.u32 %v359_v18, 16  ;;  %v784_v45 = vshll.u32 %v360_v27, 16  ;;  %v482_v31 = vld [vmem:[%s14657_s17 + $0x448] sm:$0xf] }
  0x61   : > { %19686 = vst [vmem:[#allocation22_spill] sm:$0xff] %v14843_v36  ;;  %v1521_v41 = vsel %vm14678_vm3, %v1516_v32, %v1520_v16  ;;  %12918 = vmatmul.mubr.msk.bf16.gmra.mxu0 %vm2302_vm4, %v14843_v36  ;;  %v771_v49 = vor.u32 %v770_v39, %v767_v38  ;;  %v1533_v52 = vshrl.u32 %v478_v35, 16  ;;  %v1536_v53 = vshll.u32 %v478_v35, 16  ;;  %v483_v39 = vld [vmem:[%s14657_s17 + $0x44c] sm:$0x1] }
  0x62   : > { %v1526_v46 = vrot.slane %v1525_v37, 4  ;;  %v780_v54 = vrot.slane %v778_v43, 4  ;;  %v786_v55 = vrot.slane %v784_v45, 5  ;;  %v1542_v56 = vshll.u32 %v479_v40, 16  ;;  %v554_v14 = vld [vmem:[%s14657_s17 + $0x628] sm:$0xf] }
  0x63   : > { %v1546_v57 = vshrl.u32 %v479_v40, 16  ;;  %v772_v61 = vrot.slane %v771_v49, 4  ;;  %v1535_v62 = vrot.slane %v1533_v52, 4  ;;  %v1538_v63 = vrot.slane %v1536_v53, 5  ;;  %v364_v49 = vld [vmem:[%s14657_s17 + $0xf0] sm:$0xf] }
  0x64   : > { %v1531_v59 = vsel %vm14678_vm3, %v1526_v46, %v1530_v33  ;;  %v781_v2 = vor.u32 %v780_v54, %v776_v42  ;;  %v1544_v5 = vrot.slane %v1542_v56, 5  ;;  %v1552_v10 = vshll.u32 %v480_v50, 16 }
  0x65   : > { %v14855_v1 = vcombine.low %v1521_v41, %v1531_v59  ;;  %v1548_v7 = vrot.slane %v1546_v57, 4  ;;  %v777_v8 = vsel %vm14678_vm3, %v772_v61, %v776_v42  ;;  %v1539_v9 = vor.u32 %v1538_v63, %v1535_v62  ;;  %v366_v63 = vld [vmem:[%s14657_s17 + $0xf8] sm:$0x1] }
  0x66   : > { %v789_v3 = vshrl.u32 %v361_v58, 16  ;;  %v782_v12 = vrot.slane %v781_v2, 4  ;;  %v792_v16 = vshll.u32 %v361_v58, 16  ;;  %v798_v17 = vshll.u32 %v362_v0, 16 }
  0x67   : > { %19687 = vst [vmem:[#allocation23_spill] sm:$0xff] %v14855_v1  ;;  %12982 = vmatmul.mubr.msk.bf16.gmra.mxu1 %vm2302_vm4, %v14855_v1  ;;  %v1549_v60 = vor.u32 %v1548_v7, %v1544_v5  ;;  %v1540_v18 = vrot.slane %v1539_v9, 4  ;;  %v1554_v19 = vrot.slane %v1552_v10, 5  ;;  %v802_v22 = vshrl.u32 %v362_v0, 16  ;;  %v484_v9 = vld [vmem:[%s14657_s17 + $0x450] sm:$0xf] }
  0x68   : > { %v791_v20 = vrot.slane %v789_v3, 4  ;;  %v787_v26 = vsel %vm14678_vm3, %v782_v12, %v786_v55  ;;  %v794_v28 = vrot.slane %v792_v16, 5  ;;  %v800_v29 = vrot.slane %v798_v17, 5  ;;  %v365_v55 = vld [vmem:[%s14657_s17 + $0xf4] sm:$0xf] }
  0x69   : > { %v1550_v27 = vrot.slane %v1549_v60, 4  ;;  %v11378_v32 = vcombine.low %v777_v8, %v787_v26  ;;  %v1545_v33 = vsel %vm14678_vm3, %v1540_v18, %v1544_v5  ;;  %v804_v4 = vrot.slane %v802_v22, 4 }
  0x6a   : > { %v808_v35 = vshll.u32 %v363_v15, 16  ;;  %v795_v38 = vor.u32 %v794_v28, %v791_v20  ;;  %v1557_v40 = vshrl.u32 %v481_v23, 16  ;;  %v1560_v41 = vshll.u32 %v481_v23, 16  ;;  %v485_v15 = vld [vmem:[%s14657_s17 + $0x454] sm:$0xf] }
  0x6b   : > { %v1555_v37 = vsel %vm14678_vm3, %v1550_v27, %v1554_v19  ;;  %12921 = vmatprep.mubr.msk.bf16.mxu0 %vm2302_vm4, %v11378_v32  ;;  %v805_v43 = vor.u32 %v804_v4, %v800_v29  ;;  %v1566_v46 = vshll.u32 %v482_v31, 16  ;;  %v1570_v54 = vshrl.u32 %v482_v31, 16  ;;  %v486_v23 = vld [vmem:[%s14657_s17 + $0x458] sm:$0x1] }
  0x6c   : > { %v11410_v42 = vcombine.low %v1545_v33, %v1555_v37  ;;  %v810_v45 = vrot.slane %v808_v35, 5  ;;  %v796_v50 = vrot.slane %v795_v38, 4  ;;  %v1559_v52 = vrot.slane %v1557_v40, 4  ;;  %v367_v33 = vld [vmem:[%s14657_s17 + $0xfc] sm:$0xf] }
  0x6d   : > { %v1562_v53 = vrot.slane %v1560_v41, 5  ;;  %v806_v56 = vrot.slane %v805_v43, 4  ;;  %v1568_v57 = vrot.slane %v1566_v46, 5  ;;  %v1576_v58 = vshll.u32 %v483_v39, 16  ;;  %v368_v39 = vld [vmem:[%s14657_s17 + $0x100] sm:$0xf] }
  0x6e   : > { %12985 = vmatprep.mubr.msk.bf16.mxu1 %vm2302_vm4, %v11410_v42  ;;  %v801_v59 = vsel %vm14678_vm3, %v796_v50, %v800_v29  ;;  %v1572_v62 = vrot.slane %v1570_v54, 4  ;;  %v813_v0 = vshrl.u32 %v364_v49, 16  ;;  %v816_v7 = vshll.u32 %v364_v49, 16  ;;  %v369_v54 = vld [vmem:[%s14657_s17 + $0x104] sm:$0x1] }
  0x6f   : > { %v1563_v61 = vor.u32 %v1562_v53, %v1559_v52  ;;  %v811_v2 = vsel %vm14678_vm3, %v806_v56, %v810_v45  ;;  %v1578_v5 = vrot.slane %v1576_v58, 5  ;;  %v822_v8 = vshll.u32 %v365_v55, 16 }
  0x70   : > { %v14881_v10 = vcombine.low %v801_v59, %v811_v2  ;;  %v1573_v12 = vor.u32 %v1572_v62, %v1568_v57  ;;  %v815_v60 = vrot.slane %v813_v0, 4  ;;  %v818_v16 = vrot.slane %v816_v7, 5  ;;  %v487_v62 = vld [vmem:[%s14657_s17 + $0x45c] sm:$0xf]  ;;  %v488_v7 = vld [vmem:[%s14657_s17 + $0x460] sm:$0xf] }
  0x71   : > { %v1564_v3 = vrot.slane %v1563_v61, 4  ;;  %v824_v17 = vrot.slane %v822_v8, 5  ;;  %v826_v18 = vshrl.u32 %v365_v55, 16  ;;  %v832_v19 = vshll.u32 %v366_v63, 16 }
  0x72   : > { %19688 = vst [vmem:[#allocation24_spill] sm:$0xff] %v14881_v10  ;;  %12922 = vmatmul.mubr.msk.bf16.gmra.mxu0 %vm2302_vm4, %v14881_v10  ;;  %v1574_v22 = vrot.slane %v1573_v12, 4  ;;  %v1581_v26 = vshrl.u32 %v484_v9, 16  ;;  %v1584_v27 = vshll.u32 %v484_v9, 16  ;;  %v819_v28 = vor.u32 %v818_v16, %v815_v60  ;;  %v489_v16 = vld [vmem:[%s14657_s17 + $0x464] sm:$0x1] }
  0x73   : > { %v1569_v20 = vsel %vm14678_vm3, %v1564_v3, %v1568_v57  ;;  %v828_v29 = vrot.slane %v826_v18, 4  ;;  %v834_v31 = vrot.slane %v832_v19, 5  ;;  %v1590_v32 = vshll.u32 %v485_v15, 16 }
  0x74   : > { %v1579_v4 = vsel %vm14678_vm3, %v1574_v22, %v1578_v5  ;;  %v1583_v35 = vrot.slane %v1581_v26, 4  ;;  %v1586_v37 = vrot.slane %v1584_v27, 5  ;;  %v1594_v38 = vshrl.u32 %v485_v15, 16  ;;  %v370_v26 = vld [vmem:[%s14657_s17 + $0x108] sm:$0xf] }
  0x75   : > { %v14893_v40 = vcombine.low %v1569_v20, %v1579_v4  ;;  %v820_v41 = vrot.slane %v819_v28, 4  ;;  %v829_v42 = vor.u32 %v828_v29, %v824_v17  ;;  %v1592_v43 = vrot.slane %v1590_v32, 5 }
  0x76   : > { %v1587_v45 = vor.u32 %v1586_v37, %v1583_v35  ;;  %v1596_v46 = vrot.slane %v1594_v38, 4  ;;  %v1600_v49 = vshll.u32 %v486_v23, 16  ;;  %v837_v50 = vshrl.u32 %v367_v33, 16  ;;  %v371_v37 = vld [vmem:[%s14657_s17 + $0x10c] sm:$0xf] }
  0x77   : > { %19689 = vst [vmem:[#allocation25_spill] sm:$0xff] %v14893_v40  ;;  %12986 = vmatmul.mubr.msk.bf16.gmra.mxu1 %vm2302_vm4, %v14893_v40  ;;  %v825_v52 = vsel %vm14678_vm3, %v820_v41, %v824_v17  ;;  %v830_v53 = vrot.slane %v829_v42, 4  ;;  %v840_v55 = vshll.u32 %v367_v33, 16  ;;  %v846_v56 = vshll.u32 %v368_v39, 16 }
  0x78   : > { %v1588_v57 = vrot.slane %v1587_v45, 4  ;;  %v1597_v58 = vor.u32 %v1596_v46, %v1592_v43  ;;  %v1602_v59 = vrot.slane %v1600_v49, 5  ;;  %v839_v61 = vrot.slane %v837_v50, 4  ;;  %v372_v46 = vld [vmem:[%s14657_s17 + $0x110] sm:$0x1] }
  0x79   : > { %v835_v63 = vsel %vm14678_vm3, %v830_v53, %v834_v31  ;;  %v842_v0 = vrot.slane %v840_v55, 5  ;;  %v848_v2 = vrot.slane %v846_v56, 5  ;;  %v850_v5 = vshrl.u32 %v368_v39, 16  ;;  %v490_v50 = vld [vmem:[%s14657_s17 + $0x468] sm:$0xf] }
  0x7a   : > { %v14904_v8 = vcombine.low %v825_v52, %v835_v63  ;;  %v1593_v9 = vsel %vm14678_vm3, %v1588_v57, %v1592_v43  ;;  %v1598_v3 = vrot.slane %v1597_v58, 4  ;;  %v856_v12 = vshll.u32 %v369_v54, 16 }
  0x7b   : > { %v843_v60 = vor.u32 %v842_v0, %v839_v61  ;;  %v852_v15 = vrot.slane %v850_v5, 4  ;;  %v1605_v17 = vshrl.u32 %v487_v62, 16  ;;  %v1608_v18 = vshll.u32 %v487_v62, 16  ;;  %v491_v0 = vld [vmem:[%s14657_s17 + $0x46c] sm:$0xf] }
  0x7c   : > { %19690 = vst [vmem:[#allocation26_spill] sm:$0xff] %v14904_v8  ;;  %12925 = vmatprep.mubr.msk.bf16.mxu0 %vm2302_vm4, %v14904_v8  ;;  %v1603_v19 = vsel %vm14678_vm3, %v1598_v3, %v1602_v59  ;;  %v858_v20 = vrot.slane %v856_v12, 5  ;;  %v1614_v22 = vshll.u32 %v488_v7, 16  ;;  %v1618_v23 = vshrl.u32 %v488_v7, 16  ;;  %v492_v3 = vld [vmem:[%s14657_s17 + $0x470] sm:$0x1] }
  0x7d   : > { %v14914_v27 = vcombine.low %v1593_v9, %v1603_v19  ;;  %v844_v28 = vrot.slane %v843_v60, 4  ;;  %v853_v29 = vor.u32 %v852_v15, %v848_v2  ;;  %v1607_v31 = vrot.slane %v1605_v17, 4  ;;  %v373_v60 = vld [vmem:[%s14657_s17 + $0x114] sm:$0xf] }
  0x7e   : > { %v1610_v32 = vrot.slane %v1608_v18, 5  ;;  %v1616_v33 = vrot.slane %v1614_v22, 5  ;;  %v1620_v4 = vrot.slane %v1618_v23, 4  ;;  %v1624_v35 = vshll.u32 %v489_v16, 16 }
  0x7f   : > { %19691 = vst [vmem:[#allocation27_spill] sm:$0xff] %v14914_v27  ;;  %12989 = vmatprep.mubr.msk.bf16.mxu1 %vm2302_vm4, %v14914_v27  ;;  %v849_v38 = vsel %vm14678_vm3, %v844_v28, %v848_v2  ;;  %v854_v39 = vrot.slane %v853_v29, 4  ;;  %v861_v41 = vshrl.u32 %v370_v26, 16  ;;  %v864_v49 = vshll.u32 %v370_v26, 16  ;;  %v374_v29 = vld [vmem:[%s14657_s17 + $0x118] sm:$0xf] }
  0x80   : > { %v1611_v42 = vor.u32 %v1610_v32, %v1607_v31  ;;  %v1621_v43 = vor.u32 %v1620_v4, %v1616_v33  ;;  %v1626_v45 = vrot.slane %v1624_v35, 5  ;;  %v870_v54 = vshll.u32 %v371_v37, 16 }
  0x81   : > { %v859_v52 = vsel %vm14678_vm3, %v854_v39, %v858_v20  ;;  %v863_v53 = vrot.slane %v861_v41, 4  ;;  %v874_v55 = vshrl.u32 %v371_v37, 16  ;;  %v866_v59 = vrot.slane %v864_v49, 5  ;;  %v493_v39 = vld [vmem:[%s14657_s17 + $0x474] sm:$0xf] }
  0x82   : > { %v14925_v56 = vcombine.low %v849_v38, %v859_v52  ;;  %v1612_v57 = vrot.slane %v1611_v42, 4  ;;  %v1622_v58 = vrot.slane %v1621_v43, 4  ;;  %v872_v61 = vrot.slane %v870_v54, 5  ;;  %v375_v38 = vld [vmem:[%s14657_s17 + $0x11c] sm:$0x1] }
  0x83   : > { %v876_v62 = vrot.slane %v874_v55, 4  ;;  %v880_v63 = vshll.u32 %v372_v46, 16  ;;  %v1629_v2 = vshrl.u32 %v490_v50, 16  ;;  %v867_v9 = vor.u32 %v866_v59, %v863_v53 }
  0x84   : > { %19692 = vst [vmem:[#allocation28_spill] sm:$0xff] %v14925_v56  ;;  %12926 = vmatmul.mubr.msk.bf16.gmra.mxu0 %vm2302_vm4, %v14925_v56  ;;  %v1617_v5 = vsel %vm14678_vm3, %v1612_v57, %v1616_v33  ;;  %v1627_v7 = vsel %vm14678_vm3, %v1622_v58, %v1626_v45  ;;  %v1632_v12 = vshll.u32 %v490_v50, 16  ;;  %v1638_v22 = vshll.u32 %v491_v0, 16  ;;  %v494_v57 = vld [vmem:[%s14657_s17 + $0x478] sm:$0xf] }
  0x85   : > { %v14936_v15 = vcombine.low %v1617_v5, %v1627_v7  ;;  %v877_v16 = vor.u32 %v876_v62, %v872_v61  ;;  %v882_v17 = vrot.slane %v880_v63, 5  ;;  %v1631_v18 = vrot.slane %v1629_v2, 4  ;;  %v495_v63 = vld [vmem:[%s14657_s17 + $0x47c] sm:$0x1] }
  0x86   : > { %v868_v19 = vrot.slane %v867_v9, 4  ;;  %v1634_v20 = vrot.slane %v1632_v12, 5  ;;  %v1642_v23 = vshrl.u32 %v491_v0, 16  ;;  %v1648_v28 = vshll.u32 %v492_v3, 16 }
  0x87   : > { %19693 = vst [vmem:[#allocation29_spill] sm:$0xff] %v14936_v15  ;;  %12990 = vmatmul.mubr.msk.bf16.gmra.mxu1 %vm2302_vm4, %v14936_v15  ;;  %v878_v26 = vrot.slane %v877_v16, 4  ;;  %v885_v31 = vshrl.u32 %v373_v60, 16  ;;  %v888_v32 = vshll.u32 %v373_v60, 16  ;;  %v1640_v35 = vrot.slane %v1638_v22, 5 }
  0x88   : > { %v873_v33 = vsel %vm14678_vm3, %v868_v19, %v872_v61  ;;  %v1635_v4 = vor.u32 %v1634_v20, %v1631_v18  ;;  %v1644_v37 = vrot.slane %v1642_v23, 4  ;;  %v1650_v42 = vrot.slane %v1648_v28, 5  ;;  %v376_v16 = vld [vmem:[%s14657_s17 + $0x120] sm:$0xf]  ;;  %v377_v22 = vld [vmem:[%s14657_s17 + $0x124] sm:$0xf] }
  0x89   : > { %v883_v41 = vsel %vm14678_vm3, %v878_v26, %v882_v17  ;;  %v887_v43 = vrot.slane %v885_v31, 4  ;;  %v890_v45 = vrot.slane %v888_v32, 5  ;;  %v894_v52 = vshll.u32 %v374_v29, 16  ;;  %v378_v31 = vld [vmem:[%s14657_s17 + $0x128] sm:$0x1] }
  0x8a   : > { %v14947_v46 = vcombine.low %v873_v33, %v883_v41  ;;  %v1636_v49 = vrot.slane %v1635_v4, 4  ;;  %v1645_v50 = vor.u32 %v1644_v37, %v1640_v35  ;;  %v898_v54 = vshrl.u32 %v374_v29, 16 }
  0x8b   : > { %v891_v53 = vor.u32 %v890_v45, %v887_v43  ;;  %v904_v55 = vshll.u32 %v375_v38, 16  ;;  %v1653_v58 = vshrl.u32 %v493_v39, 16  ;;  %v896_v62 = vrot.slane %v894_v52, 5  ;;  %v497_v52 = vld [vmem:[%s14657_s17 + $0x484] sm:$0xf] }
  0x8c   : > { %19694 = vst [vmem:[#allocation30_spill] sm:$0xff] %v14947_v46  ;;  %12929 = vmatprep.mubr.msk.bf16.mxu0 %vm2302_vm4, %v14947_v46  ;;  %v1641_v59 = vsel %vm14678_vm3, %v1636_v49, %v1640_v35  ;;  %v1646_v61 = vrot.slane %v1645_v50, 4  ;;  %v1656_v0 = vshll.u32 %v493_v39, 16  ;;  %v900_v5 = vrot.slane %v898_v54, 4 }
  0x8d   : > { %v892_v2 = vrot.slane %v891_v53, 4  ;;  %v1655_v7 = vrot.slane %v1653_v58, 4  ;;  %v1662_v12 = vshll.u32 %v494_v57, 16  ;;  %v1666_v60 = vshrl.u32 %v494_v57, 16 }
  0x8e   : > { %v1651_v9 = vsel %vm14678_vm3, %v1646_v61, %v1650_v42  ;;  %v1658_v3 = vrot.slane %v1656_v0, 5  ;;  %v901_v18 = vor.u32 %v900_v5, %v896_v62  ;;  %v906_v19 = vrot.slane %v904_v55, 5  ;;  %v496_v42 = vld [vmem:[%s14657_s17 + $0x480] sm:$0xf] }
  0x8f   : > { %v14958_v17 = vcombine.low %v1641_v59, %v1651_v9  ;;  %v1672_v20 = vshll.u32 %v495_v63, 16  ;;  %v897_v23 = vsel %vm14678_vm3, %v892_v2, %v896_v62  ;;  %v1664_v28 = vrot.slane %v1662_v12, 5  ;;  %v498_v62 = vld [vmem:[%s14657_s17 + $0x488] sm:$0x1]  ;;  %v379_v9 = vld [vmem:[%s14657_s17 + $0x12c] sm:$0xf] }
  0x90   : > { %v1659_v26 = vor.u32 %v1658_v3, %v1655_v7  ;;  %v1668_v29 = vrot.slane %v1666_v60, 4  ;;  %v902_v32 = vrot.slane %v901_v18, 4  ;;  %v909_v4 = vshrl.u32 %v376_v16, 16  ;;  %v380_v18 = vld [vmem:[%s14657_s17 + $0x130] sm:$0xf] }
  0x91   : > { %19695 = vst [vmem:[#allocation31_spill] sm:$0xff] %v14958_v17  ;;  %12993 = vmatprep.mubr.msk.bf16.mxu1 %vm2302_vm4, %v14958_v17  ;;  %v1674_v33 = vrot.slane %v1672_v20, 5  ;;  %v912_v35 = vshll.u32 %v376_v16, 16  ;;  %v918_v39 = vshll.u32 %v377_v22, 16  ;;  %v922_v41 = vshrl.u32 %v377_v22, 16 }
  0x92   : > { %v1660_v37 = vrot.slane %v1659_v26, 4  ;;  %v1669_v38 = vor.u32 %v1668_v29, %v1664_v28  ;;  %v907_v43 = vsel %vm14678_vm3, %v902_v32, %v906_v19  ;;  %v911_v45 = vrot.slane %v909_v4, 4 }
  0x93   : > { %v914_v49 = vrot.slane %v912_v35, 5  ;;  %v928_v50 = vshll.u32 %v378_v31, 16  ;;  %v14970_v53 = vcombine.low %v897_v23, %v907_v43  ;;  %v920_v57 = vrot.slane %v918_v39, 5  ;;  %v381_v35 = vld [vmem:[%s14657_s17 + $0x134] sm:$0x1] }
  0x94   : > { %v1665_v54 = vsel %vm14678_vm3, %v1660_v37, %v1664_v28  ;;  %v1670_v55 = vrot.slane %v1669_v38, 4  ;;  %v924_v59 = vrot.slane %v922_v41, 4  ;;  %v1677_v63 = vshrl.u32 %v496_v42, 16  ;;  %v499_v38 = vld [vmem:[%s14657_s17 + $0x48c] sm:$0xf] }
  0x95   : > { %19696 = vst [vmem:[#allocation32_spill] sm:$0xff] %v14970_v53  ;;  %v915_v58 = vor.u32 %v914_v49, %v911_v45  ;;  %v930_v61 = vrot.slane %v928_v50, 5  ;;  %12930 = vmatmul.mubr.msk.bf16.gmra.mxu0 %vm2302_vm4, %v14970_v53  ;;  %v1680_v2 = vshll.u32 %v496_v42, 16  ;;  %v1686_v5 = vshll.u32 %v497_v52, 16  ;;  %v500_v45 = vld [vmem:[%s14657_s17 + $0x490] sm:$0xf] }
  0x96   : > { %v1675_v0 = vsel %vm14678_vm3, %v1670_v55, %v1674_v33  ;;  %v1690_v7 = vshrl.u32 %v497_v52, 16  ;;  %v925_v60 = vor.u32 %v924_v59, %v920_v57  ;;  %v1679_v16 = vrot.slane %v1677_v63, 4  ;;  %v501_v63 = vld [vmem:[%s14657_s17 + $0x494] sm:$0x1] }
  0x97   : > { %v14980_v3 = vcombine.low %v1665_v54, %v1675_v0  ;;  %v916_v12 = vrot.slane %v915_v58, 4  ;;  %v1682_v19 = vrot.slane %v1680_v2, 5  ;;  %v1688_v20 = vrot.slane %v1686_v5, 5 }
  0x98   : > { %v1692_v22 = vrot.slane %v1690_v7, 4  ;;  %v1696_v23 = vshll.u32 %v498_v62, 16  ;;  %v926_v28 = vrot.slane %v925_v60, 4  ;;  %v933_v29 = vshrl.u32 %v379_v9, 16  ;;  %v388_v60 = vld [vmem:[%s14657_s17 + $0x1b0] sm:$0xf] }
  0x99   : > { %19697 = vst [vmem:[#allocation33_spill] sm:$0xff] %v14980_v3  ;;  %12994 = vmatmul.mubr.msk.bf16.gmra.mxu1 %vm2302_vm4, %v14980_v3  ;;  %v921_v26 = vsel %vm14678_vm3, %v916_v12, %v920_v57  ;;  %v936_v31 = vshll.u32 %v379_v9, 16  ;;  %v1683_v32 = vor.u32 %v1682_v19, %v1679_v16  ;;  %v942_v37 = vshll.u32 %v380_v18, 16 }
  0x9a   : > { %v1693_v33 = vor.u32 %v1692_v22, %v1688_v20  ;;  %v1698_v4 = vrot.slane %v1696_v23, 5  ;;  %v931_v39 = vsel %vm14678_vm3, %v926_v28, %v930_v61  ;;  %v935_v41 = vrot.slane %v933_v29, 4  ;;  %v389_v23 = vld [vmem:[%s14657_s17 + $0x1b4] sm:$0xf] }
  0x9b   : > { %v938_v42 = vrot.slane %v936_v31, 5  ;;  %v946_v43 = vshrl.u32 %v380_v18, 16  ;;  %v14992_v49 = vcombine.low %v921_v26, %v931_v39  ;;  %v1684_v50 = vrot.slane %v1683_v32, 4  ;;  %v390_v32 = vld [vmem:[%s14657_s17 + $0x1b8] sm:$0x1] }
  0x9c   : > { %v1694_v52 = vrot.slane %v1693_v33, 4  ;;  %v944_v54 = vrot.slane %v942_v37, 5  ;;  %v952_v58 = vshll.u32 %v381_v35, 16  ;;  %v1701_v59 = vshrl.u32 %v499_v38, 16 }
  0x9d   : > { %19698 = vst [vmem:[#allocation34_spill] sm:$0xff] %v14992_v49  ;;  %v939_v55 = vor.u32 %v938_v42, %v935_v41  ;;  %v948_v57 = vrot.slane %v946_v43, 4  ;;  %12933 = vmatprep.mubr.msk.bf16.mxu0 %vm2302_vm4, %v14992_v49  ;;  %v1689_v61 = vsel %vm14678_vm3, %v1684_v50, %v1688_v20  ;;  %v1704_v0 = vshll.u32 %v499_v38, 16  ;;  %v508_v41 = vld [vmem:[%s14657_s17 + $0x510] sm:$0xf] }
  0x9e   : > { %v1699_v62 = vsel %vm14678_vm3, %v1694_v52, %v1698_v4  ;;  %v1710_v2 = vshll.u32 %v500_v45, 16  ;;  %v954_v12 = vrot.slane %v952_v58, 5  ;;  %v1703_v16 = vrot.slane %v1701_v59, 4  ;;  %v509_v52 = vld [vmem:[%s14657_s17 + $0x514] sm:$0xf] }
  0x9f   : > { %v15001_v5 = vcombine.low %v1689_v61, %v1699_v62  ;;  %v940_v7 = vrot.slane %v939_v55, 4  ;;  %v949_v9 = vor.u32 %v948_v57, %v944_v54  ;;  %v1706_v18 = vrot.slane %v1704_v0, 5 }
  0xa0   : > { %v1712_v19 = vrot.slane %v1710_v2, 5  ;;  %v1714_v22 = vshrl.u32 %v500_v45, 16  ;;  %v1720_v28 = vshll.u32 %v501_v63, 16  ;;  %v957_v33 = vshrl.u32 %v388_v60, 16 }
  0xa1   : > { %19699 = vst [vmem:[#allocation35_spill] sm:$0xff] %v15001_v5  ;;  %12997 = vmatprep.mubr.msk.bf16.mxu1 %vm2302_vm4, %v15001_v5  ;;  %v945_v20 = vsel %vm14678_vm3, %v940_v7, %v944_v54  ;;  %v950_v26 = vrot.slane %v949_v9, 4  ;;  %v1707_v29 = vor.u32 %v1706_v18, %v1703_v16  ;;  %v960_v4 = vshll.u32 %v388_v60, 16  ;;  %v510_v9 = vld [vmem:[%s14657_s17 + $0x518] sm:$0x1] }
  0xa2   : > { %v1716_v31 = vrot.slane %v1714_v22, 4  ;;  %v1722_v37 = vrot.slane %v1720_v28, 5  ;;  %v966_v38 = vshll.u32 %v389_v23, 16  ;;  %v970_v39 = vshrl.u32 %v389_v23, 16  ;;  %v391_v60 = vld [vmem:[%s14657_s17 + $0x1bc] sm:$0xf] }
  0xa3   : > { %v955_v35 = vsel %vm14678_vm3, %v950_v26, %v954_v12  ;;  %v1708_v43 = vrot.slane %v1707_v29, 4  ;;  %v959_v50 = vrot.slane %v957_v33, 4  ;;  %v962_v54 = vrot.slane %v960_v4, 5 }
  0xa4   : > { %v15013_v42 = vcombine.low %v945_v20, %v955_v35  ;;  %v1717_v45 = vor.u32 %v1716_v31, %v1712_v19  ;;  %v968_v55 = vrot.slane %v966_v38, 5  ;;  %v972_v57 = vrot.slane %v970_v39, 4  ;;  %v392_v20 = vld [vmem:[%s14657_s17 + $0x1c0] sm:$0xf]  ;;  %v393_v38 = vld [vmem:[%s14657_s17 + $0x1c4] sm:$0x1] }
  0xa5   : > { %v976_v58 = vshll.u32 %v390_v32, 16  ;;  %v1713_v59 = vsel %vm14678_vm3, %v1708_v43, %v1712_v19  ;;  %v1725_v62 = vshrl.u32 %v508_v41, 16  ;;  %v1728_v63 = vshll.u32 %v508_v41, 16  ;;  %v511_v43 = vld [vmem:[%s14657_s17 + $0x51c] sm:$0xf] }
  0xa6   : > { %19700 = vst [vmem:[#allocation36_spill] sm:$0xff] %v15013_v42  ;;  %12934 = vmatmul.mubr.msk.bf16.gmra.mxu0 %vm2302_vm4, %v15013_v42  ;;  %v1718_v61 = vrot.slane %v1717_v45, 4  ;;  %v963_v0 = vor.u32 %v962_v54, %v959_v50  ;;  %v973_v2 = vor.u32 %v972_v57, %v968_v55  ;;  %v1734_v12 = vshll.u32 %v509_v52, 16  ;;  %v512_v57 = vld [vmem:[%s14657_s17 + $0x520] sm:$0xf] }
  0xa7   : > { %v978_v7 = vrot.slane %v976_v58, 5  ;;  %v1727_v18 = vrot.slane %v1725_v62, 4  ;;  %v1730_v22 = vrot.slane %v1728_v63, 5  ;;  %v1738_v23 = vshrl.u32 %v509_v52, 16 }
  0xa8   : > { %v1723_v16 = vsel %vm14678_vm3, %v1718_v61, %v1722_v37  ;;  %v964_v19 = vrot.slane %v963_v0, 4  ;;  %v974_v28 = vrot.slane %v973_v2, 4  ;;  %v1736_v29 = vrot.slane %v1734_v12, 5  ;;  %v513_v12 = vld [vmem:[%s14657_s17 + $0x524] sm:$0x1] }
  0xa9   : > { %v15025_v26 = vcombine.low %v1713_v59, %v1723_v16  ;;  %v1731_v31 = vor.u32 %v1730_v22, %v1727_v18  ;;  %v1740_v32 = vrot.slane %v1738_v23, 4  ;;  %v1744_v33 = vshll.u32 %v510_v9, 16 }
  0xaa   : > { %v981_v4 = vshrl.u32 %v391_v60, 16  ;;  %v969_v35 = vsel %vm14678_vm3, %v964_v19, %v968_v55  ;;  %v979_v37 = vsel %vm14678_vm3, %v974_v28, %v978_v7  ;;  %v984_v39 = vshll.u32 %v391_v60, 16  ;;  %v394_v19 = vld [vmem:[%s14657_s17 + $0x1c8] sm:$0xf] }
  0xab   : > { %19701 = vst [vmem:[#allocation37_spill] sm:$0xff] %v15025_v26  ;;  %12998 = vmatmul.mubr.msk.bf16.gmra.mxu1 %vm2302_vm4, %v15025_v26  ;;  %v990_v41 = vshll.u32 %v392_v20, 16  ;;  %v11386_v45 = vcombine.low %v969_v35, %v979_v37  ;;  %v1732_v50 = vrot.slane %v1731_v31, 4  ;;  %v1741_v52 = vor.u32 %v1740_v32, %v1736_v29 }
  0xac   : > { %v1746_v54 = vrot.slane %v1744_v33, 5  ;;  %v983_v58 = vrot.slane %v981_v4, 4  ;;  %v986_v59 = vrot.slane %v984_v39, 5  ;;  %v994_v62 = vshrl.u32 %v392_v20, 16  ;;  %v395_v33 = vld [vmem:[%s14657_s17 + $0x1cc] sm:$0xf] }
  0xad   : > { %v992_v61 = vrot.slane %v990_v41, 5  ;;  %12937 = vmatprep.mubr.msk.bf16.mxu0 %vm2302_vm4, %v11386_v45  ;;  %v1737_v55 = vsel %vm14678_vm3, %v1732_v50, %v1736_v29  ;;  %v1742_v63 = vrot.slane %v1741_v52, 4  ;;  %v1000_v0 = vshll.u32 %v393_v38, 16 }
  0xae   : > { %v1749_v2 = vshrl.u32 %v511_v43, 16  ;;  %v987_v7 = vor.u32 %v986_v59, %v983_v58  ;;  %v996_v9 = vrot.slane %v994_v62, 4  ;;  %v1752_v60 = vshll.u32 %v511_v43, 16  ;;  %v396_v43 = vld [vmem:[%s14657_s17 + $0x1d0] sm:$0x1] }
  0xaf   : > { %v1758_v16 = vshll.u32 %v512_v57, 16  ;;  %v1747_v18 = vsel %vm14678_vm3, %v1742_v63, %v1746_v54  ;;  %v1002_v22 = vrot.slane %v1000_v0, 5  ;;  %v1762_v20 = vshrl.u32 %v512_v57, 16  ;;  %v514_v58 = vld [vmem:[%s14657_s17 + $0x528] sm:$0xf] }
  0xb0   : > { %v1751_v23 = vrot.slane %v1749_v2, 4  ;;  %v11418_v28 = vcombine.low %v1737_v55, %v1747_v18  ;;  %v988_v31 = vrot.slane %v987_v7, 4  ;;  %v997_v29 = vor.u32 %v996_v9, %v992_v61  ;;  %v515_v0 = vld [vmem:[%s14657_s17 + $0x52c] sm:$0xf] }
  0xb1   : > { %v1754_v32 = vrot.slane %v1752_v60, 5  ;;  %v1760_v4 = vrot.slane %v1758_v16, 5  ;;  %v1764_v35 = vrot.slane %v1762_v20, 4  ;;  %v1768_v37 = vshll.u32 %v513_v12, 16  ;;  %v11819_v12 = vld [vmem:[%s19345_s1 + $0xc] sm:$0xf] }
  0xb2   : > { %13001 = vmatprep.mubr.msk.bf16.mxu1 %vm2302_vm4, %v11418_v28  ;;  %v993_v38 = vsel %vm14678_vm3, %v988_v31, %v992_v61  ;;  %v998_v39 = vrot.slane %v997_v29, 4  ;;  %v1005_v45 = vshrl.u32 %v394_v19, 16  ;;  %v1008_v54 = vshll.u32 %v394_v19, 16  ;;  %14119 = vmatprep.subr.msk.bf16.mxu1 %vm2495_vm0, %v11819_v12  ;;  %v516_v19 = vld [vmem:[%s14657_s17 + $0x530] sm:$0x1] }
  0xb3   : > { %v1755_v41 = vor.u32 %v1754_v32, %v1751_v23  ;;  %v1765_v50 = vor.u32 %v1764_v35, %v1760_v4  ;;  %v1770_v52 = vrot.slane %v1768_v37, 5  ;;  %v1014_v57 = vshll.u32 %v395_v33, 16  ;;  %v397_v29 = vld [vmem:[%s14657_s17 + $0x1d4] sm:$0xf]  ;;  %v398_v37 = vld [vmem:[%s14657_s17 + $0x1d8] sm:$0xf] }
  0xb4   : > { %v1003_v59 = vsel %vm14678_vm3, %v998_v39, %v1002_v22  ;;  %v1007_v55 = vrot.slane %v1005_v45, 4  ;;  %v1018_v63 = vshrl.u32 %v395_v33, 16  ;;  %v1010_v7 = vrot.slane %v1008_v54, 5 }
  0xb5   : > { %v1756_v62 = vrot.slane %v1755_v41, 4  ;;  %v15052_v2 = vcombine.low %v993_v38, %v1003_v59  ;;  %v1766_v61 = vrot.slane %v1765_v50, 4  ;;  %v1016_v9 = vrot.slane %v1014_v57, 5 }
  0xb6   : > { %v1020_v16 = vrot.slane %v1018_v63, 4  ;;  %v1024_v18 = vshll.u32 %v396_v43, 16  ;;  %v1773_v22 = vshrl.u32 %v514_v58, 16  ;;  %v1011_v20 = vor.u32 %v1010_v7, %v1007_v55  ;;  %v517_v63 = vld [vmem:[%s14657_s17 + $0x534] sm:$0xf] }
  0xb7   : > { %19702 = vst [vmem:[#allocation38_spill] sm:$0xff] %v15052_v2  ;;  %v1761_v60 = vsel %vm14678_vm3, %v1756_v62, %v1760_v4  ;;  %12938 = vmatmul.mubr.msk.bf16.gmra.mxu0 %vm2302_vm4, %v15052_v2  ;;  %v1771_v23 = vsel %vm14678_vm3, %v1766_v61, %v1770_v52  ;;  %v1776_v28 = vshll.u32 %v514_v58, 16  ;;  %v1782_v31 = vshll.u32 %v515_v0, 16  ;;  %v399_v62 = vld [vmem:[%s14657_s17 + $0x1dc] sm:$0x1] }
  0xb8   : > { %v15066_v32 = vcombine.low %v1761_v60, %v1771_v23  ;;  %v1021_v33 = vor.u32 %v1020_v16, %v1016_v9  ;;  %v1026_v4 = vrot.slane %v1024_v18, 5  ;;  %v1775_v35 = vrot.slane %v1773_v22, 4  ;;  %v518_v60 = vld [vmem:[%s14657_s17 + $0x538] sm:$0xf] }
  0xb9   : > { %v1012_v38 = vrot.slane %v1011_v20, 4  ;;  %v1778_v39 = vrot.slane %v1776_v28, 5  ;;  %v1784_v41 = vrot.slane %v1782_v31, 5  ;;  %v1786_v43 = vshrl.u32 %v515_v0, 16 }
  0xba   : > { %19703 = vst [vmem:[#allocation39_spill] sm:$0xff] %v15066_v32  ;;  %13002 = vmatmul.mubr.msk.bf16.gmra.mxu1 %vm2302_vm4, %v15066_v32  ;;  %v1022_v45 = vrot.slane %v1021_v33, 4  ;;  %v1792_v50 = vshll.u32 %v516_v19, 16  ;;  %v1029_v52 = vshrl.u32 %v397_v29, 16  ;;  %v1032_v54 = vshll.u32 %v397_v29, 16 }
  0xbb   : > { %v1017_v57 = vsel %vm14678_vm3, %v1012_v38, %v1016_v9  ;;  %v1779_v58 = vor.u32 %v1778_v39, %v1775_v35  ;;  %v1788_v59 = vrot.slane %v1786_v43, 4  ;;  %v1038_v55 = vshll.u32 %v398_v37, 16  ;;  %v11892_v9 = vld [vmem:[%s19345_s1 + $0x10] sm:$0xf] }
  0xbc   : > { %v1027_v61 = vsel %vm14678_vm3, %v1022_v45, %v1026_v4  ;;  %v1794_v0 = vrot.slane %v1792_v50, 5  ;;  %v1031_v7 = vrot.slane %v1029_v52, 4  ;;  %v1034_v12 = vrot.slane %v1032_v54, 5  ;;  %14120 = vmatprep.subr.msk.bf16.mxu0 %vm2495_vm0, %v11892_v9  ;;  %v519_v4 = vld [vmem:[%s14657_s17 + $0x53c] sm:$0x1] }
  0xbd   : > { %v15078_v16 = vcombine.low %v1017_v57, %v1027_v61  ;;  %v1780_v18 = vrot.slane %v1779_v58, 4  ;;  %v1789_v22 = vor.u32 %v1788_v59, %v1784_v41  ;;  %v1040_v23 = vrot.slane %v1038_v55, 5  ;;  %v401_v58 = vld [vmem:[%s14657_s17 + $0x1e4] sm:$0xf]  ;;  %v428_v32 = vld [vmem:[%s14657_s17 + $0x2b0] sm:$0xf] }
  0xbe   : > { %v1035_v20 = vor.u32 %v1034_v12, %v1031_v7  ;;  %v1042_v19 = vshrl.u32 %v398_v37, 16  ;;  %v1048_v28 = vshll.u32 %v399_v62, 16  ;;  %v1797_v31 = vshrl.u32 %v517_v63, 16  ;;  %v400_v37 = vld [vmem:[%s14657_s17 + $0x1e0] sm:$0xf] }
  0xbf   : > { %19704 = vst [vmem:[#allocation40_spill] sm:$0xff] %v15078_v16  ;;  %12941 = vmatprep.mubr.msk.bf16.mxu0 %vm2302_vm4, %v15078_v16  ;;  %v1785_v29 = vsel %vm14678_vm3, %v1780_v18, %v1784_v41  ;;  %v1790_v33 = vrot.slane %v1789_v22, 4  ;;  %v1800_v35 = vshll.u32 %v517_v63, 16  ;;  %v1806_v38 = vshll.u32 %v518_v60, 16  ;;  %v402_v12 = vld [vmem:[%s14657_s17 + $0x1e8] sm:$0x1] }
  0xc0   : > { %v1036_v39 = vrot.slane %v1035_v20, 4  ;;  %v1044_v43 = vrot.slane %v1042_v19, 4  ;;  %v1799_v45 = vrot.slane %v1797_v31, 4  ;;  %v1810_v57 = vshrl.u32 %v518_v60, 16 }
  0xc1   : > { %v1795_v50 = vsel %vm14678_vm3, %v1790_v33, %v1794_v0  ;;  %v1802_v52 = vrot.slane %v1800_v35, 5  ;;  %v1808_v54 = vrot.slane %v1806_v38, 5  ;;  %v1050_v41 = vrot.slane %v1048_v28, 5  ;;  %v521_v38 = vld [vmem:[%s14657_s17 + $0x544] sm:$0xf] }
  0xc2   : > { %v15093_v59 = vcombine.low %v1785_v29, %v1795_v50  ;;  %v1045_v62 = vor.u32 %v1044_v43, %v1040_v23  ;;  %v1816_v55 = vshll.u32 %v519_v4, 16  ;;  %v1041_v63 = vsel %vm14678_vm3, %v1036_v39, %v1040_v23  ;;  %v520_v29 = vld [vmem:[%s14657_s17 + $0x540] sm:$0xf] }
  0xc3   : > { %v1803_v61 = vor.u32 %v1802_v52, %v1799_v45  ;;  %v1812_v7 = vrot.slane %v1810_v57, 4  ;;  %v1053_v18 = vshrl.u32 %v400_v37, 16  ;;  %v1056_v22 = vshll.u32 %v400_v37, 16  ;;  %v522_v57 = vld [vmem:[%s14657_s17 + $0x548] sm:$0x1] }
  0xc4   : > { %19705 = vst [vmem:[#allocation41_spill] sm:$0xff] %v15093_v59  ;;  %13005 = vmatprep.mubr.msk.bf16.mxu1 %vm2302_vm4, %v15093_v59  ;;  %v1046_v0 = vrot.slane %v1045_v62, 4  ;;  %v1818_v60 = vrot.slane %v1816_v55, 5  ;;  %v1062_v9 = vshll.u32 %v401_v58, 16  ;;  %v1066_v31 = vshrl.u32 %v401_v58, 16 }
  0xc5   : > { %v1804_v20 = vrot.slane %v1803_v61, 4  ;;  %v1813_v19 = vor.u32 %v1812_v7, %v1808_v54  ;;  %v1055_v28 = vrot.slane %v1053_v18, 4  ;;  %v1058_v33 = vrot.slane %v1056_v22, 5  ;;  %v403_v7 = vld [vmem:[%s14657_s17 + $0x1ec] sm:$0xf] }
  0xc6   : > { %v1051_v23 = vsel %vm14678_vm3, %v1046_v0, %v1050_v41  ;;  %v1064_v4 = vrot.slane %v1062_v9, 5  ;;  %v1072_v35 = vshll.u32 %v402_v12, 16  ;;  %v1068_v37 = vrot.slane %v1066_v31, 4  ;;  %v404_v22 = vld [vmem:[%s14657_s17 + $0x1f0] sm:$0xf] }
  0xc7   : > { %v15104_v39 = vcombine.low %v1041_v63, %v1051_v23  ;;  %v1809_v43 = vsel %vm14678_vm3, %v1804_v20, %v1808_v54  ;;  %v1814_v45 = vrot.slane %v1813_v19, 4  ;;  %v1059_v50 = vor.u32 %v1058_v33, %v1055_v28 }
  0xc8   : > { %v1074_v52 = vrot.slane %v1072_v35, 5  ;;  %v1821_v58 = vshrl.u32 %v520_v29, 16  ;;  %v1824_v62 = vshll.u32 %v520_v29, 16  ;;  %v1069_v55 = vor.u32 %v1068_v37, %v1064_v4  ;;  %v405_v29 = vld [vmem:[%s14657_s17 + $0x1f4] sm:$0x1] }
  0xc9   : > { %19706 = vst [vmem:[#allocation42_spill] sm:$0xff] %v15104_v39  ;;  %12942 = vmatmul.mubr.msk.bf16.gmra.mxu0 %vm2302_vm4, %v15104_v39  ;;  %v1819_v41 = vsel %vm14678_vm3, %v1814_v45, %v1818_v60  ;;  %v1830_v63 = vshll.u32 %v521_v38, 16  ;;  %v1834_v61 = vshrl.u32 %v521_v38, 16  ;;  %v1060_v12 = vrot.slane %v1059_v50, 4  ;;  %v523_v37 = vld [vmem:[%s14657_s17 + $0x54c] sm:$0xf] }
  0xca   : > { %v15114_v54 = vcombine.low %v1809_v43, %v1819_v41  ;;  %v1823_v18 = vrot.slane %v1821_v58, 4  ;;  %v1826_v0 = vrot.slane %v1824_v62, 5  ;;  %v1070_v9 = vrot.slane %v1069_v55, 4  ;;  %v524_v41 = vld [vmem:[%s14657_s17 + $0x550] sm:$0xf] }
  0xcb   : > { %v1832_v20 = vrot.slane %v1830_v63, 5  ;;  %v1836_v19 = vrot.slane %v1834_v61, 4  ;;  %v1840_v28 = vshll.u32 %v522_v57, 16  ;;  %v1065_v60 = vsel %vm14678_vm3, %v1060_v12, %v1064_v4  ;;  %v525_v12 = vld [vmem:[%s14657_s17 + $0x554] sm:$0x1] }
  0xcc   : > { %19707 = vst [vmem:[#allocation43_spill] sm:$0xff] %v15114_v54  ;;  %13006 = vmatmul.mubr.msk.bf16.gmra.mxu1 %vm2302_vm4, %v15114_v54  ;;  %v1827_v31 = vor.u32 %v1826_v0, %v1823_v18  ;;  %v1077_v23 = vshrl.u32 %v403_v7, 16  ;;  %v1080_v33 = vshll.u32 %v403_v7, 16  ;;  %v1075_v35 = vsel %vm14678_vm3, %v1070_v9, %v1074_v52  ;;  %v419_v54 = vld [vmem:[%s14657_s17 + $0x28c] sm:$0xf] }
  0xcd   : > { %v1837_v38 = vor.u32 %v1836_v19, %v1832_v20  ;;  %v1842_v43 = vrot.slane %v1840_v28, 5  ;;  %v1086_v45 = vshll.u32 %v404_v22, 16  ;;  %v15125_v50 = vcombine.low %v1065_v60, %v1075_v35 }
  0xce   : > { %v1828_v57 = vrot.slane %v1827_v31, 4  ;;  %v1079_v58 = vrot.slane %v1077_v23, 4  ;;  %v1082_v62 = vrot.slane %v1080_v33, 5  ;;  %v1090_v63 = vshrl.u32 %v404_v22, 16  ;;  %v406_v22 = vld [vmem:[%s14657_s17 + $0x1f8] sm:$0xf] }
  0xcf   : > { %19708 = vst [vmem:[#allocation44_spill] sm:$0xff] %v15125_v50  ;;  %v1838_v4 = vrot.slane %v1837_v38, 4  ;;  %v1088_v55 = vrot.slane %v1086_v45, 5  ;;  %v1096_v61 = vshll.u32 %v405_v29, 16  ;;  %12945 = vmatprep.mubr.msk.bf16.mxu0 %vm2302_vm4, %v15125_v50  ;;  %v1845_v18 = vshrl.u32 %v523_v37, 16 }
  0xd0   : > { %v1833_v52 = vsel %vm14678_vm3, %v1828_v57, %v1832_v20  ;;  %v1083_v7 = vor.u32 %v1082_v62, %v1079_v58  ;;  %v1848_v0 = vshll.u32 %v523_v37, 16  ;;  %v1092_v19 = vrot.slane %v1090_v63, 4  ;;  %v407_v57 = vld [vmem:[%s14657_s17 + $0x1fc] sm:$0xf]  ;;  %v408_v58 = vld [vmem:[%s14657_s17 + $0x200] sm:$0x1] }
  0xd1   : > { %v1843_v9 = vsel %vm14678_vm3, %v1838_v4, %v1842_v43  ;;  %v1098_v28 = vrot.slane %v1096_v61, 5  ;;  %v1854_v60 = vshll.u32 %v524_v41, 16  ;;  %v1847_v23 = vrot.slane %v1845_v18, 4 }
  0xd2   : > { %v15136_v31 = vcombine.low %v1833_v52, %v1843_v9  ;;  %v1084_v29 = vrot.slane %v1083_v7, 4  ;;  %v1850_v33 = vrot.slane %v1848_v0, 5  ;;  %v1093_v35 = vor.u32 %v1092_v19, %v1088_v55  ;;  %v526_v0 = vld [vmem:[%s14657_s17 + $0x558] sm:$0xf] }
  0xd3   : > { %v1856_v20 = vrot.slane %v1854_v60, 5  ;;  %v1858_v38 = vshrl.u32 %v524_v41, 16  ;;  %v1864_v45 = vshll.u32 %v525_v12, 16  ;;  %v1101_v62 = vshrl.u32 %v406_v22, 16 }
  0xd4   : > { %19709 = vst [vmem:[#allocation45_spill] sm:$0xff] %v15136_v31  ;;  %13009 = vmatprep.mubr.msk.bf16.mxu1 %vm2302_vm4, %v15136_v31  ;;  %v1089_v43 = vsel %vm14678_vm3, %v1084_v29, %v1088_v55  ;;  %v1851_v37 = vor.u32 %v1850_v33, %v1847_v23  ;;  %v1094_v4 = vrot.slane %v1093_v35, 4  ;;  %v1104_v52 = vshll.u32 %v406_v22, 16  ;;  %v527_v29 = vld [vmem:[%s14657_s17 + $0x55c] sm:$0xf] }
  0xd5   : > { %v1860_v63 = vrot.slane %v1858_v38, 4  ;;  %v1866_v61 = vrot.slane %v1864_v45, 5  ;;  %v1103_v41 = vrot.slane %v1101_v62, 4  ;;  %v1110_v18 = vshll.u32 %v407_v57, 16  ;;  %v528_v38 = vld [vmem:[%s14657_s17 + $0x560] sm:$0x1] }
  0xd6   : > { %v1852_v7 = vrot.slane %v1851_v37, 4  ;;  %v1114_v12 = vshrl.u32 %v407_v57, 16  ;;  %v1099_v9 = vsel %vm14678_vm3, %v1094_v4, %v1098_v28  ;;  %v1106_v60 = vrot.slane %v1104_v52, 5 }
  0xd7   : > { %v1861_v19 = vor.u32 %v1860_v63, %v1856_v20  ;;  %v1120_v55 = vshll.u32 %v408_v58, 16  ;;  %v15148_v23 = vcombine.low %v1089_v43, %v1099_v9  ;;  %v1112_v35 = vrot.slane %v1110_v18, 5  ;;  %v409_v63 = vld [vmem:[%s14657_s17 + $0x204] sm:$0xf] }
  0xd8   : > { %v1857_v33 = vsel %vm14678_vm3, %v1852_v7, %v1856_v20  ;;  %v1116_v22 = vrot.slane %v1114_v12, 4  ;;  %v1107_v57 = vor.u32 %v1106_v60, %v1103_v41  ;;  %v1869_v62 = vshrl.u32 %v526_v0, 16  ;;  %v410_v12 = vld [vmem:[%s14657_s17 + $0x208] sm:$0xf] }
  0xd9   : > { %19710 = vst [vmem:[#allocation46_spill] sm:$0xff] %v15148_v23  ;;  %v1862_v45 = vrot.slane %v1861_v19, 4  ;;  %v1122_v37 = vrot.slane %v1120_v55, 5  ;;  %12946 = vmatmul.mubr.msk.bf16.gmra.mxu0 %vm2302_vm4, %v15148_v23  ;;  %v1872_v58 = vshll.u32 %v526_v0, 16  ;;  %v1878_v4 = vshll.u32 %v527_v29, 16 }
  0xda   : > { %v1117_v28 = vor.u32 %v1116_v22, %v1112_v35  ;;  %v1882_v43 = vshrl.u32 %v527_v29, 16  ;;  %v1108_v52 = vrot.slane %v1107_v57, 4  ;;  %v1871_v7 = vrot.slane %v1869_v62, 4  ;;  %v411_v22 = vld [vmem:[%s14657_s17 + $0x20c] sm:$0x1] }
  0xdb   : > { %v1867_v20 = vsel %vm14678_vm3, %v1862_v45, %v1866_v61  ;;  %v1888_v18 = vshll.u32 %v528_v38, 16  ;;  %v1874_v19 = vrot.slane %v1872_v58, 5  ;;  %v1880_v60 = vrot.slane %v1878_v4, 5  ;;  %v529_v57 = vld [vmem:[%s14657_s17 + $0x564] sm:$0xf] }
  0xdc   : > { %v15159_v41 = vcombine.low %v1857_v33, %v1867_v20  ;;  %v1118_v9 = vrot.slane %v1117_v28, 4  ;;  %v1113_v0 = vsel %vm14678_vm3, %v1108_v52, %v1112_v35  ;;  %v1884_v55 = vrot.slane %v1882_v43, 4  ;;  %v530_v4 = vld [vmem:[%s14657_s17 + $0x568] sm:$0xf] }
  0xdd   : > { %v1890_v29 = vrot.slane %v1888_v18, 5  ;;  %v1125_v31 = vshrl.u32 %v409_v63, 16  ;;  %v1875_v38 = vor.u32 %v1874_v19, %v1871_v7  ;;  %v1128_v33 = vshll.u32 %v409_v63, 16 }
  0xde   : > { %19711 = vst [vmem:[#allocation47_spill] sm:$0xff] %v15159_v41  ;;  %13010 = vmatmul.mubr.msk.bf16.gmra.mxu1 %vm2302_vm4, %v15159_v41  ;;  %v1123_v61 = vsel %vm14678_vm3, %v1118_v9, %v1122_v37  ;;  %v1134_v45 = vshll.u32 %v410_v12, 16  ;;  %v1885_v28 = vor.u32 %v1884_v55, %v1880_v60  ;;  %v1138_v35 = vshrl.u32 %v410_v12, 16  ;;  %v531_v12 = vld [vmem:[%s14657_s17 + $0x56c] sm:$0x1] }
  0xdf   : > { %v15169_v62 = vcombine.low %v1113_v0, %v1123_v61  ;;  %v1127_v58 = vrot.slane %v1125_v31, 4  ;;  %v1876_v43 = vrot.slane %v1875_v38, 4  ;;  %v1130_v20 = vrot.slane %v1128_v33, 5 }
  0xe0   : > { %v1136_v52 = vrot.slane %v1134_v45, 5  ;;  %v1144_v18 = vshll.u32 %v411_v22, 16  ;;  %v1886_v37 = vrot.slane %v1885_v28, 4  ;;  %v1140_v7 = vrot.slane %v1138_v35, 4  ;;  %v418_v45 = vld [vmem:[%s14657_s17 + $0x288] sm:$0xf] }
  0xe1   : > { %19712 = vst [vmem:[#allocation48_spill] sm:$0xff] %v15169_v62  ;;  %12949 = vmatprep.mubr.msk.bf16.mxu0 %vm2302_vm4, %v15169_v62  ;;  %v1893_v63 = vshrl.u32 %v529_v57, 16  ;;  %v1896_v9 = vshll.u32 %v529_v57, 16  ;;  %v1881_v19 = vsel %vm14678_vm3, %v1876_v43, %v1880_v60  ;;  %v1131_v0 = vor.u32 %v1130_v20, %v1127_v58 }
  0xe2   : > { %v1146_v31 = vrot.slane %v1144_v18, 5  ;;  %v1902_v55 = vshll.u32 %v530_v4, 16  ;;  %v1891_v61 = vsel %vm14678_vm3, %v1886_v37, %v1890_v29  ;;  %v1141_v22 = vor.u32 %v1140_v7, %v1136_v52  ;;  %v420_v18 = vld [vmem:[%s14657_s17 + $0x290] sm:$0x1] }
  0xe3   : > { %v1895_v38 = vrot.slane %v1893_v63, 4  ;;  %v1898_v33 = vrot.slane %v1896_v9, 5  ;;  %v15180_v28 = vcombine.low %v1881_v19, %v1891_v61  ;;  %v1132_v35 = vrot.slane %v1131_v0, 4  ;;  %v538_v0 = vld [vmem:[%s14657_s17 + $0x5e8] sm:$0xf] }
  0xe4   : > { %v1904_v41 = vrot.slane %v1902_v55, 5  ;;  %v1906_v57 = vshrl.u32 %v530_v4, 16  ;;  %v1142_v60 = vrot.slane %v1141_v22, 4  ;;  %v1912_v43 = vshll.u32 %v531_v12, 16 }
  0xe5   : > { %19713 = vst [vmem:[#allocation49_spill] sm:$0xff] %v15180_v28  ;;  %v1899_v58 = vor.u32 %v1898_v33, %v1895_v38  ;;  %13013 = vmatprep.mubr.msk.bf16.mxu1 %vm2302_vm4, %v15180_v28  ;;  %v1137_v29 = vsel %vm14678_vm3, %v1132_v35, %v1136_v52  ;;  %v1149_v37 = vshrl.u32 %v418_v45, 16  ;;  %v1152_v7 = vshll.u32 %v418_v45, 16  ;;  %v539_v38 = vld [vmem:[%s14657_s17 + $0x5ec] sm:$0xf] }
  0xe6   : > { %v1908_v20 = vrot.slane %v1906_v57, 4  ;;  %v1147_v63 = vsel %vm14678_vm3, %v1142_v60, %v1146_v31  ;;  %v1914_v4 = vrot.slane %v1912_v43, 5  ;;  %v1158_v19 = vshll.u32 %v419_v54, 16  ;;  %v540_v60 = vld [vmem:[%s14657_s17 + $0x5f0] sm:$0x1] }
  0xe7   : > { %v1900_v9 = vrot.slane %v1899_v58, 4  ;;  %v15191_v12 = vcombine.low %v1137_v29, %v1147_v63  ;;  %v1151_v61 = vrot.slane %v1149_v37, 4  ;;  %v1154_v22 = vrot.slane %v1152_v7, 5  ;;  %v421_v63 = vld [vmem:[%s14657_s17 + $0x294] sm:$0xf] }
  0xe8   : > { %v1909_v55 = vor.u32 %v1908_v20, %v1904_v41  ;;  %v1160_v33 = vrot.slane %v1158_v19, 5  ;;  %v1162_v45 = vshrl.u32 %v419_v54, 16  ;;  %v1168_v35 = vshll.u32 %v420_v18, 16  ;;  %v422_v19 = vld [vmem:[%s14657_s17 + $0x298] sm:$0xf] }
  0xe9   : > { %19714 = vst [vmem:[#allocation50_spill] sm:$0xff] %v15191_v12  ;;  %v1905_v52 = vsel %vm14678_vm3, %v1900_v9, %v1904_v41  ;;  %12950 = vmatmul.mubr.msk.bf16.gmra.mxu0 %vm2302_vm4, %v15191_v12  ;;  %v1155_v57 = vor.u32 %v1154_v22, %v1151_v61  ;;  %v1917_v58 = vshrl.u32 %v538_v0, 16  ;;  %v1920_v43 = vshll.u32 %v538_v0, 16 }
  0xea   : > { %v1910_v31 = vrot.slane %v1909_v55, 4  ;;  %v1164_v29 = vrot.slane %v1162_v45, 4  ;;  %v1170_v20 = vrot.slane %v1168_v35, 5  ;;  %v1926_v37 = vshll.u32 %v539_v38, 16 }
  0xeb   : > { %v1930_v7 = vshrl.u32 %v539_v38, 16  ;;  %v1156_v54 = vrot.slane %v1155_v57, 4  ;;  %v1919_v18 = vrot.slane %v1917_v58, 4  ;;  %v1922_v9 = vrot.slane %v1920_v43, 5  ;;  %v423_v57 = vld [vmem:[%s14657_s17 + $0x29c] sm:$0x1] }
  0xec   : > { %v1915_v41 = vsel %vm14678_vm3, %v1910_v31, %v1914_v4  ;;  %v1165_v55 = vor.u32 %v1164_v29, %v1160_v33  ;;  %v1928_v61 = vrot.slane %v1926_v37, 5  ;;  %v1936_v38 = vshll.u32 %v540_v60, 16 }
  0xed   : > { %v15203_v28 = vcombine.low %v1905_v52, %v1915_v41  ;;  %v1932_v22 = vrot.slane %v1930_v7, 4  ;;  %v1161_v0 = vsel %vm14678_vm3, %v1156_v54, %v1160_v33  ;;  %v1923_v45 = vor.u32 %v1922_v9, %v1919_v18  ;;  %v541_v41 = vld [vmem:[%s14657_s17 + $0x5f4] sm:$0xf] }
  0xee   : > { %v1173_v35 = vshrl.u32 %v421_v63, 16  ;;  %v1166_v4 = vrot.slane %v1165_v55, 4  ;;  %v1176_v58 = vshll.u32 %v421_v63, 16  ;;  %v1182_v52 = vshll.u32 %v422_v19, 16 }
  0xef   : > { %19715 = vst [vmem:[#allocation51_spill] sm:$0xff] %v15203_v28  ;;  %13014 = vmatmul.mubr.msk.bf16.gmra.mxu1 %vm2302_vm4, %v15203_v28  ;;  %v1933_v31 = vor.u32 %v1932_v22, %v1928_v61  ;;  %v1924_v43 = vrot.slane %v1923_v45, 4  ;;  %v1938_v29 = vrot.slane %v1936_v38, 5  ;;  %v1186_v7 = vshrl.u32 %v422_v19, 16  ;;  %v542_v28 = vld [vmem:[%s14657_s17 + $0x5f8] sm:$0xf] }
  0xf0   : > { %v1175_v37 = vrot.slane %v1173_v35, 4  ;;  %v1171_v33 = vsel %vm14678_vm3, %v1166_v4, %v1170_v20  ;;  %v1178_v54 = vrot.slane %v1176_v58, 5  ;;  %v1184_v18 = vrot.slane %v1182_v52, 5  ;;  %v543_v19 = vld [vmem:[%s14657_s17 + $0x5fc] sm:$0x1] }
  0xf1   : > { %v1934_v60 = vrot.slane %v1933_v31, 4  ;;  %v11394_v9 = vcombine.low %v1161_v0, %v1171_v33  ;;  %v1929_v55 = vsel %vm14678_vm3, %v1924_v43, %v1928_v61  ;;  %v1188_v22 = vrot.slane %v1186_v7, 4  ;;  %v424_v58 = vld [vmem:[%s14657_s17 + $0x2a0] sm:$0xf]  ;;  %v425_v33 = vld [vmem:[%s14657_s17 + $0x2a4] sm:$0xf] }
  0xf2   : > { %v1192_v63 = vshll.u32 %v423_v57, 16  ;;  %v1179_v38 = vor.u32 %v1178_v54, %v1175_v37  ;;  %v1941_v35 = vshrl.u32 %v541_v41, 16  ;;  %v1944_v0 = vshll.u32 %v541_v41, 16 }
  0xf3   : > { %v1939_v45 = vsel %vm14678_vm3, %v1934_v60, %v1938_v29  ;;  %12953 = vmatprep.mubr.msk.bf16.mxu0 %vm2302_vm4, %v11394_v9  ;;  %v1189_v4 = vor.u32 %v1188_v22, %v1184_v18  ;;  %v1950_v43 = vshll.u32 %v542_v28, 16  ;;  %v1954_v57 = vshrl.u32 %v542_v28, 16 }
  0xf4   : > { %v11426_v20 = vcombine.low %v1929_v55, %v1939_v45  ;;  %v1194_v31 = vrot.slane %v1192_v63, 5  ;;  %v1180_v52 = vrot.slane %v1179_v38, 4  ;;  %v1943_v61 = vrot.slane %v1941_v35, 4  ;;  %v426_v55 = vld [vmem:[%s14657_s17 + $0x2a8] sm:$0x1] }
  0xf5   : > { %v1190_v29 = vrot.slane %v1189_v4, 4  ;;  %v1946_v37 = vrot.slane %v1944_v0, 5  ;;  %v1960_v7 = vshll.u32 %v543_v19, 16  ;;  %v1952_v54 = vrot.slane %v1950_v43, 5  ;;  %v544_v38 = vld [vmem:[%s14657_s17 + $0x600] sm:$0xf] }
  0xf6   : > { %13017 = vmatprep.mubr.msk.bf16.mxu1 %vm2302_vm4, %v11426_v20  ;;  %v1185_v60 = vsel %vm14678_vm3, %v1180_v52, %v1184_v18  ;;  %v1956_v9 = vrot.slane %v1954_v57, 4  ;;  %v1197_v41 = vshrl.u32 %v424_v58, 16  ;;  %v1200_v28 = vshll.u32 %v424_v58, 16  ;;  %v545_v57 = vld [vmem:[%s14657_s17 + $0x604] sm:$0xf] }
  0xf7   : > { %v1195_v22 = vsel %vm14678_vm3, %v1190_v29, %v1194_v31  ;;  %v1947_v63 = vor.u32 %v1946_v37, %v1943_v61  ;;  %v1962_v45 = vrot.slane %v1960_v7, 5  ;;  %v1206_v4 = vshll.u32 %v425_v33, 16 }
  0xf8   : > { %v15229_v35 = vcombine.low %v1185_v60, %v1195_v22  ;;  %v1957_v20 = vor.u32 %v1956_v9, %v1952_v54  ;;  %v1199_v19 = vrot.slane %v1197_v41, 4  ;;  %v1202_v0 = vrot.slane %v1200_v28, 5  ;;  %v546_v41 = vld [vmem:[%s14657_s17 + $0x608] sm:$0x1]  ;;  %v427_v22 = vld [vmem:[%s14657_s17 + $0x2ac] sm:$0xf] }
  0xf9   : > { %v1948_v18 = vrot.slane %v1947_v63, 4  ;;  %v1210_v52 = vshrl.u32 %v425_v33, 16  ;;  %v1216_v43 = vshll.u32 %v426_v55, 16  ;;  %v1208_v61 = vrot.slane %v1206_v4, 5 }
  0xfa   : > { %19716 = vst [vmem:[#allocation52_spill] sm:$0xff] %v15229_v35  ;;  %12954 = vmatmul.mubr.msk.bf16.gmra.mxu0 %vm2302_vm4, %v15229_v35  ;;  %v1958_v31 = vrot.slane %v1957_v20, 4  ;;  %v1965_v29 = vshrl.u32 %v544_v38, 16  ;;  %v1968_v58 = vshll.u32 %v544_v38, 16  ;;  %v1203_v7 = vor.u32 %v1202_v0, %v1199_v19  ;;  %v15374_v35 = vld [vmem:[%s14657_s17 + $0x2dc] sm:$0xf] }
  0xfb   : > { %v1953_v37 = vsel %vm14678_vm3, %v1948_v18, %v1952_v54  ;;  %v1212_v60 = vrot.slane %v1210_v52, 4  ;;  %v1218_v9 = vrot.slane %v1216_v43, 5  ;;  %v1974_v28 = vshll.u32 %v545_v57, 16  ;;  %v429_v43 = vld [vmem:[%s14657_s17 + $0x2b4] sm:$0x1] }
  0xfc   : > { %v1963_v33 = vsel %vm14678_vm3, %v1958_v31, %v1962_v45  ;;  %v1967_v55 = vrot.slane %v1965_v29, 4  ;;  %v1970_v63 = vrot.slane %v1968_v58, 5  ;;  %v1204_v4 = vrot.slane %v1203_v7, 4  ;;  %v15248_v7 = vpop.f32.mrf.mxu0 }
  0xfd   : > { %v15240_v20 = vcombine.low %v1953_v37, %v1963_v33  ;;  %v1213_v59 = vor.u32 %v1212_v60, %v1208_v61  ;;  %v1978_v38 = vshrl.u32 %v545_v57, 16  ;;  %v1976_v54 = vrot.slane %v1974_v28, 5  ;;  %v548_v28 = vld [vmem:[%s14657_s17 + $0x610] sm:$0xf] }
  0xfe   : > { %v1971_v26 = vor.u32 %v1970_v63, %v1967_v55  ;;  %v1984_v19 = vshll.u32 %v546_v41, 16  ;;  %v1221_v18 = vshrl.u32 %v427_v22, 16  ;;  %v1209_v45 = vsel %vm14678_vm3, %v1204_v4, %v1208_v61  ;;  %v547_v63 = vld [vmem:[%s14657_s17 + $0x60c] sm:$0xf] }
  0xff   : > { %19717 = vst [vmem:[#allocation53_spill] sm:$0xff] %v15240_v20  ;;  %13018 = vmatmul.mubr.msk.bf16.gmra.mxu1 %vm2302_vm4, %v15240_v20  ;;  %v1214_v0 = vrot.slane %v1213_v59, 4  ;;  %v1980_v52 = vrot.slane %v1978_v38, 4  ;;  %v1224_v31 = vshll.u32 %v427_v22, 16  ;;  %v1230_v37 = vshll.u32 %v428_v32, 16 }
 0x100   : > { %v1972_v29 = vrot.slane %v1971_v26, 4  ;;  %v1986_v58 = vrot.slane %v1984_v19, 5  ;;  %v1223_v57 = vrot.slane %v1221_v18, 4  ;;  %v1234_v55 = vshrl.u32 %v428_v32, 16  ;;  %v15258_v18 = vpop.f32.mrf.mxu1 }
 0x101   : > { %v1219_v60 = vsel %vm14678_vm3, %v1214_v0, %v1218_v9  ;;  %v1981_v41 = vor.u32 %v1980_v52, %v1976_v54  ;;  %v1226_v33 = vrot.slane %v1224_v31, 5  ;;  %v1232_v59 = vrot.slane %v1230_v37, 5  ;;  %19719 = vst [vmem:[#allocation55_spill] sm:$0xff] %v15258_v18  ;;  %v549_v9 = vld [vmem:[%s14657_s17 + $0x614] sm:$0x1]  ;;  %v15263_v31 = vpop.f32.mrf.mxu0 }
 0x102   : > { %v15254_v61 = vcombine.low %v1209_v45, %v1219_v60  ;;  %v1240_v4 = vshll.u32 %v429_v43, 16  ;;  %v1977_v26 = vsel %vm14678_vm3, %v1972_v29, %v1976_v54  ;;  %v1236_v19 = vrot.slane %v1234_v55, 4  ;;  %v430_v37 = vld [vmem:[%s14657_s17 + $0x2b8] sm:$0xf]  ;;  %v15273_v17 = vpop.f32.mrf.mxu1  ;;  %v14253_v18 = vld [vmem:[%s14657_s17 + $0x1c] sm:$0xf] }
 0x103   : > { %v1982_v22 = vrot.slane %v1981_v41, 4  ;;  %v1227_v38 = vor.u32 %v1226_v33, %v1223_v57  ;;  %v1989_v0 = vshrl.u32 %v547_v63, 16  ;;  %v1992_v45 = vshll.u32 %v547_v63, 16  ;;  %19721 = vst [vmem:[#allocation57_spill] sm:$0xff] %v15273_v17 }
 0x104   : > { %19718 = vst [vmem:[#allocation54_spill] sm:$0xff] %v15254_v61  ;;  %12957 = vmatprep.mubr.msk.bf16.mxu0 %vm2302_vm4, %v15254_v61  ;;  %v1242_v32 = vrot.slane %v1240_v4, 5  ;;  %v1998_v52 = vshll.u32 %v548_v28, 16  ;;  %v1237_v29 = vor.u32 %v1236_v19, %v1232_v59  ;;  %v2002_v57 = vshrl.u32 %v548_v28, 16  ;;  %v431_v4 = vld [vmem:[%s14657_s17 + $0x2bc] sm:$0xf]  ;;  %v15286_v15 = vpop.f32.mrf.mxu1 }
 0x105   : > { %v1987_v54 = vsel %vm14678_vm3, %v1982_v22, %v1986_v58  ;;  %v1228_v43 = vrot.slane %v1227_v38, 4  ;;  %v1991_v41 = vrot.slane %v1989_v0, 4  ;;  %v1994_v33 = vrot.slane %v1992_v45, 5  ;;  %v432_v28 = vld [vmem:[%s14657_s17 + $0x2c0] sm:$0x1]  ;;  %v15278_v38 = vpop.f32.mrf.mxu0  ;;  %19723 = vst [vmem:[#allocation59_spill] sm:$0xff] %v15286_v15 }
 0x106   : > { %v15268_v60 = vcombine.low %v1977_v26, %v1987_v54  ;;  %v2000_v55 = vrot.slane %v1998_v52, 5  ;;  %v1238_v20 = vrot.slane %v1237_v29, 4  ;;  %v2004_v5 = vrot.slane %v2002_v57, 4  ;;  %v551_v57 = vld [vmem:[%s14657_s17 + $0x61c] sm:$0xf]  ;;  %v15303_v1 = vpop.f32.mrf.mxu1 }
 0x107   : > { %v1233_v63 = vsel %vm14678_vm3, %v1228_v43, %v1232_v59  ;;  %v2008_v3 = vshll.u32 %v549_v9, 16  ;;  %v1995_v58 = vor.u32 %v1994_v33, %v1991_v41  ;;  %v1245_v26 = vshrl.u32 %v430_v37, 16  ;;  %v550_v9 = vld [vmem:[%s14657_s17 + $0x618] sm:$0xf]  ;;  %19725 = vst [vmem:[#allocation61_spill] sm:$0xff] %v15303_v1 }
 0x108   : > { %19720 = vst [vmem:[#allocation56_spill] sm:$0xff] %v15268_v60  ;;  %13021 = vmatprep.mubr.msk.bf16.mxu1 %vm2302_vm4, %v15268_v60  ;;  %v1248_v22 = vshll.u32 %v430_v37, 16  ;;  %v1243_v19 = vsel %vm14678_vm3, %v1238_v20, %v1242_v32  ;;  %v2005_v0 = vor.u32 %v2004_v5, %v2000_v55  ;;  %v1254_v45 = vshll.u32 %v431_v4, 16  ;;  %v552_v20 = vld [vmem:[%s14657_s17 + $0x620] sm:$0x1] }
 0x109   : > { %v2010_v59 = vrot.slane %v2008_v3, 5  ;;  %v15283_v52 = vcombine.low %v1233_v63, %v1243_v19  ;;  %v1996_v54 = vrot.slane %v1995_v58, 4  ;;  %v1247_v43 = vrot.slane %v1245_v26, 4  ;;  %v15293_v58 = vpop.f32.mrf.mxu0  ;;  %v433_v19 = vld [vmem:[%s14657_s17 + $0x2c4] sm:$0xf] }
 0x10a   : > { %v1250_v29 = vrot.slane %v1248_v22, 5  ;;  %v2006_v41 = vrot.slane %v2005_v0, 4  ;;  %v1256_v33 = vrot.slane %v1254_v45, 5  ;;  %v1258_v37 = vshrl.u32 %v431_v4, 16 }
 0x10b   : > { %19722 = vst [vmem:[#allocation58_spill] sm:$0xff] %v15283_v52  ;;  %v1264_v60 = vshll.u32 %v432_v28, 16  ;;  %12958 = vmatmul.mubr.msk.bf16.gmra.mxu0 %vm2302_vm4, %v15283_v52  ;;  %v2001_v3 = vsel %vm14678_vm3, %v1996_v54, %v2000_v55  ;;  %v2013_v32 = vshrl.u32 %v550_v9, 16  ;;  %v2016_v63 = vshll.u32 %v550_v9, 16  ;;  %v15301_v55 = vld [vmem:[%s14657_s17 + $0x2c8] sm:$0xf] }
 0x10c   : > { %v1251_v5 = vor.u32 %v1250_v29, %v1247_v43  ;;  %v2011_v26 = vsel %vm14678_vm3, %v2006_v41, %v2010_v59  ;;  %v1260_v4 = vrot.slane %v1258_v37, 4  ;;  %v2022_v22 = vshll.u32 %v551_v57, 16  ;;  %v15310_v41 = vld [vmem:[%s14657_s17 + $0x2cc] sm:$0x1] }
 0x10d   : > { %v1266_v28 = vrot.slane %v1264_v60, 5  ;;  %v15298_v0 = vcombine.low %v2001_v3, %v2011_v26  ;;  %v2015_v27 = vrot.slane %v2013_v32, 4  ;;  %v2018_v40 = vrot.slane %v2016_v63, 5 }
 0x10e   : > { %v1252_v45 = vrot.slane %v1251_v5, 4  ;;  %v1261_v54 = vor.u32 %v1260_v4, %v1256_v33  ;;  %v2024_v43 = vrot.slane %v2022_v22, 5  ;;  %v2026_v9 = vshrl.u32 %v551_v57, 16  ;;  %v15312_v5 = vpop.f32.mrf.mxu0 }
 0x10f   : > { %19724 = vst [vmem:[#allocation60_spill] sm:$0xff] %v15298_v0  ;;  %v2032_v29 = vshll.u32 %v552_v20, 16  ;;  %13022 = vmatmul.mubr.msk.bf16.gmra.mxu1 %vm2302_vm4, %v15298_v0  ;;  %v2019_v59 = vor.u32 %v2018_v40, %v2015_v27  ;;  %v1269_v37 = vshrl.u32 %v433_v19, 16  ;;  %v1272_v3 = vshll.u32 %v433_v19, 16 }
 0x110   : > { %v1257_v60 = vsel %vm14678_vm3, %v1252_v45, %v1256_v33  ;;  %v1262_v32 = vrot.slane %v1261_v54, 4  ;;  %v2028_v57 = vrot.slane %v2026_v9, 4  ;;  %v1278_v63 = vshll.u32 %v15301_v55, 16  ;;  %v553_v33 = vld [vmem:[%s14657_s17 + $0x624] sm:$0xf]  ;;  %v15321_v54 = vpop.f32.mrf.mxu1 }
 0x111   : > { %v2034_v20 = vrot.slane %v2032_v29, 5  ;;  %v2020_v26 = vrot.slane %v2019_v59, 4  ;;  %v1271_v4 = vrot.slane %v1269_v37, 4  ;;  %v1274_v22 = vrot.slane %v1272_v3, 5  ;;  %19726 = vst [vmem:[#allocation62_spill] sm:$0xff] %v15321_v54  ;;  %v15326_v37 = vpop.f32.mrf.mxu0 }
 0x112   : > { %v1282_v0 = vshrl.u32 %v15301_v55, 16  ;;  %v1267_v40 = vsel %vm14678_vm3, %v1262_v32, %v1266_v28  ;;  %v2029_v27 = vor.u32 %v2028_v57, %v2024_v43  ;;  %v1280_v45 = vrot.slane %v1278_v63, 5  ;;  %v555_v59 = vld [vmem:[%s14657_s17 + $0x62c] sm:$0x1] }
 0x113   : > { %v1288_v19 = vshll.u32 %v15310_v41, 16  ;;  %v15323_v9 = vcombine.low %v1257_v60, %v1267_v40  ;;  %v1275_v29 = vor.u32 %v1274_v22, %v1271_v4  ;;  %v2025_v3 = vsel %vm14678_vm3, %v2020_v26, %v2024_v43  ;;  %v15337_v43 = vpop.f32.mrf.mxu1 }
 0x114   : > { %v1284_v34 = vrot.slane %v1282_v0, 4  ;;  %v2030_v44 = vrot.slane %v2029_v27, 4  ;;  %v2037_v32 = vshrl.u32 %v553_v33, 16  ;;  %v2040_v60 = vshll.u32 %v553_v33, 16  ;;  %19728 = vst [vmem:[#allocation64_spill] sm:$0xff] %v15337_v43 }
 0x115   : > { %19727 = vst [vmem:[#allocation63_spill] sm:$0xff] %v15323_v9  ;;  %v1290_v28 = vrot.slane %v1288_v19, 5  ;;  %12961 = vmatprep.mubr.msk.bf16.mxu0 %vm2302_vm4, %v15323_v9  ;;  %v1276_v57 = vrot.slane %v1275_v29, 4  ;;  %v2046_v40 = vshll.u32 %v554_v14, 16  ;;  %v2050_v22 = vshrl.u32 %v554_v14, 16  ;;  %v15346_v29 = vpop.f32.mrf.mxu0 }
 0x116   : > { %v1285_v63 = vor.u32 %v1284_v34, %v1280_v45  ;;  %v2035_v0 = vsel %vm14678_vm3, %v2030_v44, %v2034_v20  ;;  %v2039_v4 = vrot.slane %v2037_v32, 4  ;;  %v2056_v11 = vshll.u32 %v555_v59, 16  ;;  %v15344_v19 = vld [vmem:[%s14657_s17 + $0x2d4] sm:$0xf]  ;;  %v15349_v59 = vld [vmem:[%s14657_s17 + $0x2d8] sm:$0x1] }
 0x117   : > { %v15339_v26 = vcombine.low %v2025_v3, %v2035_v0  ;;  %v1281_v27 = vsel %vm14678_vm3, %v1276_v57, %v1280_v45  ;;  %v2042_v33 = vrot.slane %v2040_v60, 5  ;;  %v2048_v44 = vrot.slane %v2046_v40, 5 }
 0x118   : > { %v1286_v34 = vrot.slane %v1285_v63, 4  ;;  %v2052_v20 = vrot.slane %v2050_v22, 4  ;;  %v2058_v14 = vrot.slane %v2056_v11, 5  ;;  %v1293_v45 = vshrl.u32 %v15335_v24, 16  ;;  %v556_v63 = vld [vmem:[%s14657_s17 + $0x630] sm:$0xf]  ;;  %v15362_v22 = vpop.f32.mrf.mxu1 }
 0x119   : > { %19729 = vst [vmem:[#allocation65_spill] sm:$0xff] %v15339_v26  ;;  %13025 = vmatprep.mubr.msk.bf16.mxu1 %vm2302_vm4, %v15339_v26  ;;  %v2043_v32 = vor.u32 %v2042_v33, %v2039_v4  ;;  %v1296_v57 = vshll.u32 %v15335_v24, 16  ;;  %v1302_v11 = vshll.u32 %v15344_v19, 16  ;;  %v1306_v0 = vshrl.u32 %v15344_v19, 16  ;;  %19731 = vst [vmem:[#allocation67_spill] sm:$0xff] %v15362_v22  ;;  %v15366_v33 = vpop.f32.mrf.mxu0 }
 0x11a   : > { %v1291_v3 = vsel %vm14678_vm3, %v1286_v34, %v1290_v28  ;;  %v2053_v40 = vor.u32 %v2052_v20, %v2048_v44  ;;  %v1295_v48 = vrot.slane %v1293_v45, 4  ;;  %v1312_v4 = vshll.u32 %v15349_v59, 16  ;;  %v557_v34 = vld [vmem:[%s14657_s17 + $0x634] sm:$0xf]  ;;  %v558_v45 = vld [vmem:[%s14657_s17 + $0x638] sm:$0x1] }
 0x11b   : > { %v15358_v60 = vcombine.low %v1281_v27, %v1291_v3  ;;  %v2044_v26 = vrot.slane %v2043_v32, 4  ;;  %v1298_v28 = vrot.slane %v1296_v57, 5  ;;  %v1304_v20 = vrot.slane %v1302_v11, 5 }
 0x11c   : > { %v2054_v27 = vrot.slane %v2053_v40, 4  ;;  %v1308_v3 = vrot.slane %v1306_v0, 4  ;;  %v2061_v9 = vshrl.u32 %v556_v63, 16  ;;  %v1314_v61 = vrot.slane %v1312_v4, 5  ;;  %v15378_v40 = vpop.f32.mrf.mxu1 }
 0x11d   : > { %19730 = vst [vmem:[#allocation66_spill] sm:$0xff] %v15358_v60  ;;  %12962 = vmatmul.mubr.msk.bf16.gmra.mxu0 %vm2302_vm4, %v15358_v60  ;;  %v2049_v52 = vsel %vm14678_vm3, %v2044_v26, %v2048_v44  ;;  %v1299_v32 = vor.u32 %v1298_v28, %v1295_v48  ;;  %v2064_v57 = vshll.u32 %v556_v63, 16  ;;  %v2070_v60 = vshll.u32 %v557_v34, 16  ;;  %19732 = vst [vmem:[#allocation68_spill] sm:$0xff] %v15378_v40  ;;  %v15383_v48 = vld [vmem:[%s14657_s17 + $0x2e0] sm:$0xf]  ;;  %v15385_v44 = vpop.f32.mrf.mxu0 }
 0x11e   : > { %v2059_v12 = vsel %vm14678_vm3, %v2054_v27, %v2058_v14  ;;  %v1309_v62 = vor.u32 %v1308_v3, %v1304_v20  ;;  %v2063_v22 = vrot.slane %v2061_v9, 4  ;;  %v2074_v26 = vshrl.u32 %v557_v34, 16  ;;  %v15393_v34 = vld [vmem:[%s14657_s17 + $0x2e4] sm:$0x1] }
 0x11f   : > { %v15380_v11 = vcombine.low %v2049_v52, %v2059_v12  ;;  %v1300_v0 = vrot.slane %v1299_v32, 4  ;;  %v2066_v43 = vrot.slane %v2064_v57, 5  ;;  %v2072_v28 = vrot.slane %v2070_v60, 5  ;;  %v15400_v57 = vpop.f32.mrf.mxu1 }
 0x120   : > { %v1310_v63 = vrot.slane %v1309_v62, 4  ;;  %v2080_v4 = vshll.u32 %v558_v45, 16  ;;  %v1317_v14 = vshrl.u32 %v15374_v35, 16  ;;  %v2076_v9 = vrot.slane %v2074_v26, 4  ;;  %v559_v45 = vld [vmem:[%s14657_s17 + $0x63c] sm:$0xf]  ;;  %v15405_v26 = vpop.f32.mrf.mxu0 }
 0x121   : > { %19733 = vst [vmem:[#allocation69_spill] sm:$0xff] %v15380_v11  ;;  %13026 = vmatmul.mubr.msk.bf16.gmra.mxu1 %vm2302_vm4, %v15380_v11  ;;  %v1305_v12 = vsel %vm14678_vm3, %v1300_v0, %v1304_v20  ;;  %v2067_v52 = vor.u32 %v2066_v43, %v2063_v22  ;;  %v1320_v27 = vshll.u32 %v15374_v35, 16  ;;  %v1326_v32 = vshll.u32 %v15383_v48, 16  ;;  %19734 = vst [vmem:[#allocation70_spill] sm:$0xff] %v15400_v57  ;;  %v560_v0 = vld [vmem:[%s14657_s17 + $0x640] sm:$0xf]  ;;  %v15414_v57 = vpop.f32.mrf.mxu1 }
 0x122   : > { %v1315_v62 = vsel %vm14678_vm3, %v1310_v63, %v1314_v61  ;;  %v2082_v60 = vrot.slane %v2080_v4, 5  ;;  %v1319_v3 = vrot.slane %v1317_v14, 4  ;;  %v2077_v43 = vor.u32 %v2076_v9, %v2072_v28  ;;  %19736 = vst [vmem:[#allocation72_spill] sm:$0xff] %v15414_v57  ;;  %v15418_v15 = vpop.f32.mrf.mxu0 }
 0x123   : > { %v15402_v11 = vcombine.low %v1305_v12, %v1315_v62  ;;  %v2068_v20 = vrot.slane %v2067_v52, 4  ;;  %v1322_v22 = vrot.slane %v1320_v27, 5  ;;  %v1328_v40 = vrot.slane %v1326_v32, 5  ;;  %v561_v27 = vld [vmem:[%s14657_s17 + $0x644] sm:$0x1] }
 0x124   : > { %v1330_v54 = vshrl.u32 %v15383_v48, 16  ;;  %v1336_v61 = vshll.u32 %v15393_v34, 16  ;;  %v2078_v4 = vrot.slane %v2077_v43, 4  ;;  %v2085_v12 = vshrl.u32 %v559_v45, 16  ;;  %v14246_v43 = vld [vmem:[%s14657_s17 + $0x8] sm:$0x1] }
 0x125   : > { %19735 = vst [vmem:[#allocation71_spill] sm:$0xff] %v15402_v11  ;;  %12965 = vmatprep.mubr.msk.bf16.mxu0 %vm2302_vm4, %v15402_v11  ;;  %v2073_v63 = vsel %vm14678_vm3, %v2068_v20, %v2072_v28  ;;  %v1323_v14 = vor.u32 %v1322_v22, %v1319_v3  ;;  %v2088_v62 = vshll.u32 %v559_v45, 16  ;;  %v2094_v32 = vshll.u32 %v560_v0, 16  ;;  %v15424_v45 = vld [vmem:[%s14657_s17 + $0x10] sm:$0xf] }
 0x126   : > { %v1332_v52 = vrot.slane %v1330_v54, 4  ;;  %v1338_v9 = vrot.slane %v1336_v61, 5  ;;  %v2083_v1 = vsel %vm14678_vm3, %v2078_v4, %v2082_v60  ;;  %v2087_v11 = vrot.slane %v2085_v12, 4  ;;  %v15431_v4 = vpop.f32.mrf.mxu1 }
 0x127   : > { %v1324_v23 = vrot.slane %v1323_v14, 4  ;;  %v2098_v50 = vshrl.u32 %v560_v0, 16  ;;  %v15420_v28 = vcombine.low %v2073_v63, %v2083_v1  ;;  %v2090_v20 = vrot.slane %v2088_v62, 5  ;;  %19738 = vst [vmem:[#allocation74_spill] sm:$0xff] %v15431_v4 }
 0x128   : > { %v1333_v3 = vor.u32 %v1332_v52, %v1328_v40  ;;  %v2096_v54 = vrot.slane %v2094_v32, 5  ;;  %v4176_v22 = vrot.slane %v14246_v43, 5  ;;  %v4180_v61 = vrot.slane %v15424_v45, 5  ;;  %v14248_v52 = vld [vmem:[%s14657_s17] sm:$0xf] }
 0x129   : > { %19737 = vst [vmem:[#allocation73_spill] sm:$0xff] %v15420_v28  ;;  %v2100_v57 = vrot.slane %v2098_v50, 4  ;;  %v2104_v60 = vshll.u32 %v561_v27, 16  ;;  %13029 = vmatprep.mubr.msk.bf16.mxu1 %vm2302_vm4, %v15420_v28  ;;  %v1329_v1 = vsel %vm14678_vm3, %v1324_v23, %v1328_v40  ;;  %v2091_v63 = vor.u32 %v2090_v20, %v2087_v11  ;;  %v15434_v50 = vpop.f32.mrf.mxu0  ;;  %v14249_v27 = vld [vmem:[%s14657_s17 + $0x14] sm:$0x1] }
 0x12a   : > { %v1334_v0 = vrot.slane %v1333_v3, 4  ;;  %v11626_v62 = vrot.slane %v14248_v52, 9  ;;  %v4183_v32 = vrot.slane %v14249_v27, 5  ;;  %v19739_v40 = vmov 0  ;;  %v14250_v11 = vld [vmem:[%s14657_s17 + $0x4] sm:$0xf] }
 0x12b   : > { %v2101_v14 = vor.u32 %v2100_v57, %v2096_v54  ;;  %v2106_v12 = vrot.slane %v2104_v60, 5  ;;  %v2092_v23 = vrot.slane %v2091_v63, 4  ;;  %v19740_v40 = vsel %vm15439_vm7, 4294967295, %v19739_v40  ;;  %v14251_v60 = vld [vmem:[%s14657_s17 + $0xc] sm:$0xf]  ;;  %v15451_v63 = vpop.f32.mrf.mxu1 }
 0x12c   : > { %v1339_v43 = vsel %vm14678_vm3, %v1334_v0, %v1338_v9  ;;  %19741 = vst [vmem:[#allocation75_spill] sm:$0xff] %v19740_v40  ;;  %v4173_v3 = vrot.slane %v14250_v11, 5  ;;  %v11627_v28 = vrot.slane %v14251_v60, 9  ;;  %v4182_v4 = vrot.slane %v4180_v61, 4  ;;  %19743 = vst [vmem:[#allocation77_spill] sm:$0xff] %v15451_v63 }
 0x12d   : > { %v15444_v20 = vcombine.low %v1329_v1, %v1339_v43  ;;  %v2102_v57 = vrot.slane %v2101_v14, 4  ;;  %v2097_v27 = vsel %vm14678_vm3, %v2092_v23, %v2096_v54  ;;  %v11498_v14 = vcombine.low %v14248_v52, %v14250_v11  ;;  %v15457_v43 = vpop.f32.mrf.mxu0  ;;  %v14254_v52 = vld [vmem:[%s14657_s17 + $0x20] sm:$0x1] }
 0x12e   : > { %v4174_v9 = vsel %vm15439_vm7, %v11626_v62, %v4173_v3  ;;  %v4175_v0 = vrot.slane %v4173_v3, 4  ;;  %v4181_v62 = vsel %vm15439_vm7, %v11627_v28, %v4180_v61  ;;  %v4184_v23 = vsel %vm15439_vm7, %v4182_v4, %v4183_v32 }
 0x12f   : > { %19742 = vst [vmem:[#allocation76_spill] sm:$0xff] %v15444_v20  ;;  %12966 = vmatmul.mubr.msk.bf16.gmra.mxu0 %vm2302_vm4, %v15444_v20  ;;  %v2107_v1 = vsel %vm14678_vm3, %v2102_v57, %v2106_v12  ;;  %v14252_v20 = vld [vmem:[%s14657_s17 + $0x18] sm:$0xf]  ;;  %v4187_v12 = vrot.slane %v14253_v18, 5  ;;  %v4190_v11 = vrot.slane %v14254_v52, 5  ;;  %v15477_v28 = vcombine.low %v4181_v62, %v4184_v23  ;;  %v15481_v32 = vpop.f32.mrf.mxu0 }
 0x130   : > { %v15459_v17 = vcombine.low %v2097_v27, %v2107_v1  ;;  %v4177_v54 = vsel %vm15439_vm7, %v4175_v0, %v4176_v22  ;;  %v11628_v63 = vrot.slane %v14252_v20, 9  ;;  %v14255_v22 = vld [vmem:[%s14657_s17 + $0x28] sm:$0xf]  ;;  %v15473_v27 = vpop.f32.mrf.mxu1  ;;  %v15495_v16 = vcombine.low %v14251_v60, %v15424_v45 }
 0x131   : > { %v11691_v3 = vcombine.low %v4174_v9, %v4177_v54  ;;  %v4194_v57 = vrot.slane %v14255_v22, 5  ;;  %19745 = vst [vmem:[#allocation79_spill] sm:$0xff] %v15473_v27  ;;  %19746 = vst [vmem:[#allocation80_spill] sm:$0xff] %v15477_v28  ;;  %v4189_v4 = vrot.slane %v4187_v12, 4  ;;  %v14256_v9 = vld [vmem:[%s14657_s17 + $0x24] sm:$0xf] }
 0x132   : > { %19744 = vst [vmem:[#allocation78_spill] sm:$0xff] %v15459_v17  ;;  %13030 = vmatmul.mubr.msk.bf16.gmra.mxu1 %vm2302_vm4, %v15459_v17  ;;  %v4188_v61 = vsel %vm15439_vm7, %v11628_v63, %v4187_v12  ;;  %v11629_v0 = vrot.slane %v14256_v9, 9  ;;  %v14257_v54 = vld [vmem:[%s14657_s17 + $0x2c] sm:$0x1]  ;;  %v14258_v17 = vld [vmem:[%s14657_s17 + $0x34] sm:$0xf]  ;;  %v15499_v42 = vpop.f32.mrf.mxu1  ;;  %v15539_v53 = vcombine.low %v14256_v9, %v14255_v22 }
 0x133   : > { %13035 = vmatprep.mubr.msk.bf16.mxu1 %vm2302_vm4, %v11498_v14  ;;  %13165 = vmatprep.mubr.msk.bf16.mxu0 %vm2302_vm4, %v11691_v3  ;;  %v4196_v1 = vrot.slane %v4194_v57, 4  ;;  %v4197_v52 = vrot.slane %v14257_v54, 5  ;;  %v4201_v27 = vrot.slane %v14258_v17, 5  ;;  %v14259_v14 = vld [vmem:[%s19345_s1 + $0x10] sm:$0xf]  ;;  %v4191_v23 = vsel %vm15439_vm7, %v4189_v4, %v4190_v11  ;;  %19747 = vst [vmem:[#allocation81_spill] sm:$0xff] %v15495_v16  ;;  %v15505_v11 = vpop.f32.mrf.mxu0 }
 0x134   : > { %v6666_v62 = vsel %vm2495_vm0, %v14259_v14, 0  ;;  %v14260_v63 = vld [vmem:[%s14657_s17 + $0x30] sm:$0xf]  ;;  %v14261_v12 = vld [vmem:[%s14657_s17 + $0x38] sm:$0x1]  ;;  %v15497_v54 = vcombine.low %v4188_v61, %v4191_v23  ;;  %19749 = vst [vmem:[#allocation83_spill] sm:$0xff] %v15499_v42  ;;  %v15503_v14 = vcombine.low %v14252_v20, %v14253_v18  ;;  %v4195_v60 = vsel %vm15439_vm7, %v11629_v0, %v4194_v57  ;;  %v15525_v57 = vpop.f32.mrf.mxu1 }
 0x135   : > { %v11630_v3 = vrot.slane %v14260_v63, 9  ;;  %v4204_v39 = vrot.slane %v14261_v12, 5  ;;  %v4203_v2 = vrot.slane %v4201_v27, 4  ;;  %v14262_v4 = vld [vmem:[%s19345_s1 + $0xc] sm:$0xf]  ;;  %v4198_v18 = vsel %vm15439_vm7, %v4196_v1, %v4197_v52  ;;  %19751 = vst [vmem:[#allocation85_spill] sm:$0xff] %v15525_v57  ;;  %v15531_v1 = vpop.f32.mrf.mxu0 }
 0x136   : > { %19748 = vst [vmem:[#allocation82_spill] sm:$0xff] %v15497_v54  ;;  %19750 = vst [vmem:[#allocation84_spill] sm:$0xff] %v15503_v14  ;;  %v5748_v45 = vsel %vm2495_vm0, %v14262_v4, 0  ;;  %v14263_v20 = vld [vmem:[%s14657_s17 + $0x40] sm:$0xf]  ;;  %v15529_v0 = vcombine.low %v4195_v60, %v4198_v18  ;;  %v15541_v60 = vpop.f32.mrf.mxu1  ;;  %v15545_v18 = vcombine.low %v14260_v63, %v14258_v17  ;;  %vm11021_vm8 = vcmask 1041409  }
 0x137   : > { %13166 = vmatmul.mubr.msk.bf16.vlgmr.msra.gmra.mxu0 %vm2302_vm4, %v15477_v28  ;;  %v4208_v61 = vrot.slane %v14263_v20, 5  ;;  %v4202_v23 = vsel %vm15439_vm7, %v11630_v3, %v4201_v27  ;;  %v14264_v12 = vld [vmem:[%s14657_s17 + $0x4c] sm:$0xf]  ;;  %v14265_v52 = vld [vmem:[%s14657_s17 + $0x3c] sm:$0xf]  ;;  %19754 = vst [vmem:[#allocation88_spill] sm:$0xff] %v15539_v53 }
 0x138   : > { %13424 = vmatpush3.bf16.msra.mxu0 %v6666_v62  ;;  %13169 = vmatprep.mubr.msk.bf16.mxu0 %vm2302_vm4, %v15497_v54  ;;  %v4205_v62 = vsel %vm15439_vm7, %v4203_v2, %v4204_v39  ;;  %v4215_v4 = vrot.slane %v14264_v12, 5  ;;  %19752 = vst [vmem:[#allocation86_spill] sm:$0xff] %v15529_v0  ;;  %v11631_v2 = vrot.slane %v14265_v52, 9  ;;  %v14266_v3 = vld [vmem:[%s14657_s17 + $0x44] sm:$0x1]  ;;  %19755 = vst [vmem:[#allocation89_spill] sm:$0xff] %v15541_v60 }
 0x139   : > { %v15533_v27 = vcombine.low %v4202_v23, %v4205_v62  ;;  %v4210_v39 = vrot.slane %v4208_v61, 4  ;;  %v4211_v54 = vrot.slane %v14266_v3, 5  ;;  %v14267_v28 = vld [vmem:[%s14657_s17 + $0x48] sm:$0xf]  ;;  %19756 = vst [vmem:[#allocation90_spill] sm:$0xff] %v15545_v18  ;;  %v15547_v23 = vpop.f32.mrf.mxu0  ;;  %v15580_v10 = vcombine.low %v14265_v52, %v14263_v20 }
 0x13a   : > { %13036 = vmatmul.mubr.msk.bf16.vlgmr.msra.gmra.mxu1 %vm2302_vm4, %v15495_v16  ;;  %v11632_v42 = vrot.slane %v14267_v28, 9  ;;  %v4217_v57 = vrot.slane %v4215_v4, 4  ;;  %v4209_v62 = vsel %vm15439_vm7, %v11631_v2, %v4208_v61  ;;  %v14269_v9 = vld [vmem:[%s14657_s17 + $0x58] sm:$0xf]  ;;  %v15566_v61 = vpop.f32.mrf.mxu1  ;;  %v14275_v52 = vld [vmem:[%s14657_s17 + $0xe8] sm:$0xf] }
 0x13b   : > { %13294 = vmatpush3.bf16.msra.mxu1 %v5748_v45  ;;  %13039 = vmatprep.mubr.msk.bf16.mxu1 %vm2302_vm4, %v15503_v14  ;;  %19753 = vst [vmem:[#allocation87_spill] sm:$0xff] %v15533_v27  ;;  %v14268_v45 = vld [vmem:[%s14657_s17 + $0x50] sm:$0x1]  ;;  %v4212_v22 = vsel %vm15439_vm7, %v4210_v39, %v4211_v54  ;;  %v4222_v3 = vrot.slane %v14269_v9, 5  ;;  %19757 = vst [vmem:[#allocation91_spill] sm:$0xff] %v15566_v61  ;;  %v15572_v2 = vpop.f32.mrf.mxu0  ;;  %vm11023_vm9 = vcmask 1042434  }
 0x13c   : > { %v4218_v49 = vrot.slane %v14268_v45, 5  ;;  %v4216_v17 = vsel %vm15439_vm7, %v11632_v42, %v4215_v4  ;;  %v15561_v45 = vld [vmem:[%s14657_s17 + $0xdc] sm:$0xf]  ;;  %v15570_v54 = vcombine.low %v4209_v62, %v4212_v22  ;;  %v14273_v60 = vld [vmem:[%s14657_s17 + $0xd8] sm:$0xf]  ;;  %19760 = vst [vmem:[#allocation94_spill] sm:$0xff] %v15580_v10  ;;  %v15582_v62 = vpop.f32.mrf.mxu1  ;;  %v15586_v22 = vcombine.low %v14267_v28, %v14264_v12 }
 0x13d   : > { %v14272_v39 = vld [vmem:[%s14657_s17 + $0x5c] sm:$0x1]  ;;  %v11634_v46 = vrot.slane %v14273_v60, 9  ;;  %v14274_v61 = vld [vmem:[%s14657_s17 + $0xe0] sm:$0x1]  ;;  %19761 = vst [vmem:[#allocation95_spill] sm:$0xff] %v15582_v62 }
 0x13e   : > { %v4219_v63 = vsel %vm15439_vm7, %v4217_v57, %v4218_v49  ;;  %19758 = vst [vmem:[#allocation92_spill] sm:$0xff] %v15570_v54  ;;  %v14271_v49 = vld [vmem:[%s14657_s17 + $0x54] sm:$0xf]  ;;  %v4224_v57 = vrot.slane %v4222_v3, 4  ;;  %v4232_v8 = vrot.slane %v14274_v61, 5  ;;  %19762 = vst [vmem:[#allocation96_spill] sm:$0xff] %v15586_v22 }
 0x13f   : > { %13170 = vmatmul.mubr.msk.bf16.gmra.mxu0 %vm2302_vm4, %v15529_v0  ;;  %v15574_v42 = vcombine.low %v4216_v17, %v4219_v63  ;;  %v11633_v4 = vrot.slane %v14271_v49, 9  ;;  %v4225_v0 = vrot.slane %v14272_v39, 5  ;;  %v15588_v17 = vpop.f32.mrf.mxu0  ;;  %v4236_v61 = vrot.slane %v14275_v52, 5  ;;  %v14276_v39 = vld [vmem:[%s14657_s17 + $0xf4] sm:$0xf] }
 0x140   : > { %13173 = vmatprep.mubr.msk.bf16.mxu0 %vm2302_vm4, %v15533_v27  ;;  %v4229_v27 = vrot.slane %v15561_v45, 5  ;;  %v14279_v62 = vld [vmem:[%s14657_s17 + $0xf0] sm:$0xf]  ;;  %vm11025_vm10 = vcmask 1043459   ;;  %vm11027_vm11 = vcmask 1044484   ;;  %vm11029_vm12 = vcmask 1045509  }
 0x141   : > { %19759 = vst [vmem:[#allocation93_spill] sm:$0xff] %v15574_v42  ;;  %v4223_v63 = vsel %vm15439_vm7, %v11633_v4, %v4222_v3  ;;  %v4226_v20 = vsel %vm15439_vm7, %v4224_v57, %v4225_v0  ;;  %v15604_v3 = vpop.f32.mrf.mxu1  ;;  %v15610_v4 = vpop.f32.mrf.mxu0  ;;  %v11636_v30 = vrot.slane %v14279_v62, 9  ;;  %vm11031_vm13 = vcmask 1046534  }
 0x142   : > { %13040 = vmatmul.mubr.msk.bf16.gmra.mxu1 %vm2302_vm4, %v15539_v53  ;;  %v4231_v56 = vrot.slane %v4229_v27, 4  ;;  %v4230_v28 = vsel %vm15439_vm7, %v11634_v46, %v4229_v27  ;;  %19763 = vst [vmem:[#allocation97_spill] sm:$0xff] %v15604_v3  ;;  %v15608_v0 = vcombine.low %v4223_v63, %v4226_v20  ;;  %v14277_v46 = vld [vmem:[%s14657_s17 + $0xe4] sm:$0xf]  ;;  %v4246_v3 = vrot.slane %v14280_v51, 5 }
 0x143   : > { %13043 = vmatprep.mubr.msk.bf16.mxu1 %vm2302_vm4, %v15545_v18  ;;  %v11635_v27 = vrot.slane %v14277_v46, 9  ;;  %v11506_v63 = vcombine.low %v14273_v60, %v15561_v45  ;;  %v14282_v45 = vld [vmem:[%s14657_s17 + $0x10c] sm:$0xf]  ;;  %v14286_v18 = vld [vmem:[%s14657_s17 + $0x110] sm:$0x1]  ;;  %v15651_v13 = vcombine.low %v14277_v46, %v14275_v52  ;;  %vm11033_vm14 = vcmask 1047559  }
 0x144   : > { %v4233_v12 = vsel %vm15439_vm7, %v4231_v56, %v4232_v8  ;;  %19764 = vst [vmem:[#allocation98_spill] sm:$0xff] %v15608_v0  ;;  %v14278_v8 = vld [vmem:[%s14657_s17 + $0xec] sm:$0x1]  ;;  %v15623_v20 = vpop.f32.mrf.mxu0  ;;  %v14287_v52 = vld [vmem:[%s14657_s17 + $0x118] sm:$0xf] }
 0x145   : > { %v11699_v57 = vcombine.low %v4230_v28, %v4233_v12  ;;  %v4239_v56 = vrot.slane %v14278_v8, 5  ;;  %v4237_v28 = vsel %vm15439_vm7, %v11635_v27, %v4236_v61  ;;  %v4257_v8 = vrot.slane %v14282_v45, 5  ;;  %19770 = vst [vmem:[#allocation104_spill] sm:$0xff] %v15651_v13 }
 0x146   : > { %v4264_v46 = vrot.slane %v14287_v52, 5 }
 0x147   : > { %13174 = vmatmul.mubr.msk.bf16.gmra.mxu0 %vm2302_vm4, %v15570_v54  ;;  %v4243_v54 = vrot.slane %v14276_v39, 5 }
 0x148   : > { %13177 = vmatprep.mubr.msk.bf16.mxu0 %vm2302_vm4, %v15574_v42  ;;  %v4238_v42 = vrot.slane %v4236_v61, 4 }
 0x149   : > { %v4245_v36 = vrot.slane %v4243_v54, 4  ;;  %v4244_v12 = vsel %vm15439_vm7, %v11636_v30, %v4243_v54  ;;  %v14283_v30 = vld [vmem:[%s14657_s17 + $0xfc] sm:$0xf] }
 0x14a   : > { %13044 = vmatmul.mubr.msk.bf16.gmra.mxu1 %vm2302_vm4, %v15580_v10  ;;  %v15616_v10 = vcombine.low %v14271_v49, %v14269_v9  ;;  %v4240_v51 = vsel %vm15439_vm7, %v4238_v42, %v4239_v56  ;;  %v14281_v9 = vld [vmem:[%s14657_s17 + $0x100] sm:$0xf]  ;;  %v11637_v54 = vrot.slane %v14283_v30, 9 }
 0x14b   : > { %13047 = vmatprep.mubr.msk.bf16.mxu1 %vm2302_vm4, %v15586_v22  ;;  %v15618_v22 = vpop.f32.mrf.mxu1  ;;  %v4250_v49 = vrot.slane %v14281_v9, 5  ;;  %v4247_v60 = vsel %vm15439_vm7, %v4245_v36, %v4246_v3  ;;  %v15641_v42 = vcombine.low %v4237_v28, %v4240_v51  ;;  %v14284_v36 = vld [vmem:[%s14657_s17 + $0x104] sm:$0x1]  ;;  %v15657_v28 = vcombine.low %v14279_v62, %v14276_v39 }
 0x14c   : > { %19765 = vst [vmem:[#allocation99_spill] sm:$0xff] %v15616_v10  ;;  %19766 = vst [vmem:[#allocation100_spill] sm:$0xff] %v15618_v22  ;;  %v15645_v27 = vcombine.low %v4244_v12, %v4247_v60  ;;  %v4253_v3 = vrot.slane %v14284_v36, 5  ;;  %v14288_v60 = vld [vmem:[%s14657_s17 + $0x124] sm:$0xf]  ;;  %v15689_v53 = vcombine.low %v14283_v30, %v14281_v9 }
 0x14d   : > { %v15638_v61 = vpop.f32.mrf.mxu1  ;;  %19768 = vst [vmem:[#allocation102_spill] sm:$0xff] %v15641_v42  ;;  %v4252_v56 = vrot.slane %v4250_v49, 4  ;;  %19772 = vst [vmem:[#allocation106_spill] sm:$0xff] %v15657_v28  ;;  %v4251_v12 = vsel %vm15439_vm7, %v11637_v54, %v4250_v49  ;;  %v4271_v36 = vrot.slane %v14288_v60, 5  ;;  %v14293_v30 = vld [vmem:[%s14657_s17 + $0x130] sm:$0xf] }
 0x14e   : > { %19767 = vst [vmem:[#allocation101_spill] sm:$0xff] %v15638_v61  ;;  %19769 = vst [vmem:[#allocation103_spill] sm:$0xff] %v15645_v27  ;;  %v4260_v61 = vrot.slane %v14286_v18, 5 }
 0x14f   : > { %13178 = vmatmul.mubr.msk.bf16.gmra.mxu0 %vm2302_vm4, %v15608_v0  ;;  %v14285_v0 = vld [vmem:[%s14657_s17 + $0x108] sm:$0xf]  ;;  %v4254_v18 = vsel %vm15439_vm7, %v4252_v56, %v4253_v3  ;;  %19776 = vst [vmem:[#allocation110_spill] sm:$0xff] %v15689_v53 }
 0x150   : > { %13181 = vmatprep.mubr.msk.bf16.mxu0 %vm2302_vm4, %v11699_v57  ;;  %v15643_v57 = vpop.f32.mrf.mxu0  ;;  %v11638_v22 = vrot.slane %v14285_v0, 9  ;;  %v15679_v54 = vcombine.low %v4251_v12, %v4254_v18  ;;  %v15695_v18 = vcombine.low %v14285_v0, %v14282_v45 }
 0x152   : > { %13048 = vmatmul.mubr.msk.bf16.gmra.mxu1 %vm2302_vm4, %v15616_v10  ;;  %v4259_v10 = vrot.slane %v4257_v8, 4  ;;  %v15659_v51 = vpop.f32.mrf.mxu0  ;;  %v4258_v62 = vsel %vm15439_vm7, %v11638_v22, %v4257_v8  ;;  %19774 = vst [vmem:[#allocation108_spill] sm:$0xff] %v15679_v54  ;;  %v14289_v22 = vld [vmem:[%s14657_s17 + $0x114] sm:$0xf]  ;;  %19778 = vst [vmem:[#allocation112_spill] sm:$0xff] %v15695_v18 }
 0x153   : > { %13051 = vmatprep.mubr.msk.bf16.mxu1 %vm2302_vm4, %v11506_v63  ;;  %v15653_v63 = vpop.f32.mrf.mxu1  ;;  %v11639_v8 = vrot.slane %v14289_v22, 9  ;;  %v15730_v47 = vcombine.low %v14289_v22, %v14287_v52  ;;  %v14299_v22 = vld [vmem:[%s14657_s17 + $0x1c0] sm:$0xf] }
 0x154   : > { %19771 = vst [vmem:[#allocation105_spill] sm:$0xff] %v15653_v63  ;;  %v4261_v39 = vsel %vm15439_vm7, %v4259_v10, %v4260_v61  ;;  %v15681_v56 = vpop.f32.mrf.mxu0  ;;  %v4266_v10 = vrot.slane %v4264_v46, 4  ;;  %v14290_v61 = vld [vmem:[%s14657_s17 + $0x11c] sm:$0x1] }
 0x155   : > { %v15675_v49 = vpop.f32.mrf.mxu1  ;;  %v15683_v3 = vcombine.low %v4258_v62, %v4261_v39  ;;  %v4265_v39 = vsel %vm15439_vm7, %v11639_v8, %v4264_v46  ;;  %19782 = vst [vmem:[#allocation116_spill] sm:$0xff] %v15730_v47 }
 0x156   : > { %19773 = vst [vmem:[#allocation107_spill] sm:$0xff] %v15675_v49  ;;  %v14292_v49 = vld [vmem:[%s14657_s17 + $0x128] sm:$0x1]  ;;  %v15697_v62 = vpop.f32.mrf.mxu0 }
 0x157   : > { %13182 = vmatmul.mubr.msk.bf16.gmra.mxu0 %vm2302_vm4, %v15641_v42  ;;  %19775 = vst [vmem:[#allocation109_spill] sm:$0xff] %v15683_v3  ;;  %v14291_v42 = vld [vmem:[%s14657_s17 + $0x120] sm:$0xf]  ;;  %v4274_v25 = vrot.slane %v14292_v49, 5  ;;  %v15691_v12 = vpop.f32.mrf.mxu1  ;;  %v4278_v49 = vrot.slane %v14293_v30, 5 }
 0x158   : > { %13185 = vmatprep.mubr.msk.bf16.mxu0 %vm2302_vm4, %v15645_v27  ;;  %v4267_v27 = vrot.slane %v14290_v61, 5  ;;  %v11640_v63 = vrot.slane %v14291_v42, 9  ;;  %19777 = vst [vmem:[#allocation111_spill] sm:$0xff] %v15691_v12  ;;  %v15711_v61 = vld [vmem:[%s14657_s17 + $0x1b4] sm:$0xf]  ;;  %v15722_v8 = vpop.f32.mrf.mxu0 }
 0x159   : > { %v15716_v46 = vpop.f32.mrf.mxu1  ;;  %v14297_v12 = vld [vmem:[%s14657_s17 + $0x1b0] sm:$0xf] }
 0x15a   : > { %13052 = vmatmul.mubr.msk.bf16.gmra.mxu1 %vm2302_vm4, %v15651_v13  ;;  %v4273_v13 = vrot.slane %v4271_v36, 4  ;;  %v4268_v9 = vsel %vm15439_vm7, %v4266_v10, %v4267_v27  ;;  %v4272_v0 = vsel %vm15439_vm7, %v11640_v63, %v4271_v36  ;;  %19779 = vst [vmem:[#allocation113_spill] sm:$0xff] %v15716_v46  ;;  %v4280_v36 = vrot.slane %v4278_v49, 4  ;;  %v14296_v10 = vld [vmem:[%s14657_s17 + $0x134] sm:$0x1] }
 0x15b   : > { %13055 = vmatprep.mubr.msk.bf16.mxu1 %vm2302_vm4, %v15657_v28  ;;  %v15720_v27 = vcombine.low %v4265_v39, %v4268_v9  ;;  %v11642_v28 = vrot.slane %v14297_v12, 9  ;;  %v14298_v46 = vld [vmem:[%s14657_s17 + $0x1b8] sm:$0x1]  ;;  %v15732_v39 = vpop.f32.mrf.mxu1  ;;  %v15736_v9 = vcombine.low %v14291_v42, %v14288_v60 }
 0x15c   : > { %v4275_v45 = vsel %vm15439_vm7, %v4273_v13, %v4274_v25  ;;  %v14295_v25 = vld [vmem:[%s14657_s17 + $0x12c] sm:$0xf]  ;;  %v4288_v14 = vrot.slane %v14298_v46, 5  ;;  %19783 = vst [vmem:[#allocation117_spill] sm:$0xff] %v15732_v39  ;;  %v4292_v46 = vrot.slane %v14299_v22, 5 }
 0x15d   : > { %19780 = vst [vmem:[#allocation114_spill] sm:$0xff] %v15720_v27  ;;  %v15724_v63 = vcombine.low %v4272_v0, %v4275_v45  ;;  %v11641_v13 = vrot.slane %v14295_v25, 9  ;;  %19784 = vst [vmem:[#allocation118_spill] sm:$0xff] %v15736_v9  ;;  %v15738_v0 = vpop.f32.mrf.mxu0  ;;  %v14303_v39 = vld [vmem:[%s14657_s17 + $0x1c8] sm:$0xf]  ;;  %v15766_v16 = vcombine.low %v14295_v25, %v14293_v30 }
 0x15e   : > { %v14305_v30 = vld [vmem:[%s14657_s17 + $0x1d8] sm:$0xf] }
 0x15f   : > { %13186 = vmatmul.mubr.msk.bf16.gmra.mxu0 %vm2302_vm4, %v15679_v54  ;;  %19781 = vst [vmem:[#allocation115_spill] sm:$0xff] %v15724_v63  ;;  %v4281_v54 = vrot.slane %v14296_v10, 5  ;;  %v4279_v45 = vsel %vm15439_vm7, %v11641_v13, %v4278_v49  ;;  %v14300_v10 = vld [vmem:[%s14657_s17 + $0x1cc] sm:$0xf]  ;;  %v15754_v49 = vpop.f32.mrf.mxu1  ;;  %v15760_v13 = vpop.f32.mrf.mxu0  ;;  %19788 = vst [vmem:[#allocation122_spill] sm:$0xff] %v15766_v16  ;;  %v4306_v25 = vrot.slane %v14305_v30, 5 }
 0x160   : > { %13189 = vmatprep.mubr.msk.bf16.mxu0 %vm2302_vm4, %v15683_v3  ;;  %v4285_v3 = vrot.slane %v15711_v61, 5  ;;  %19785 = vst [vmem:[#allocation119_spill] sm:$0xff] %v15754_v49  ;;  %19787 = vst [vmem:[#allocation121_spill] sm:$0xff] %v15760_v13  ;;  %v4302_v49 = vrot.slane %v14304_v6, 5 }
 0x161   : > { %v4282_v52 = vsel %vm15439_vm7, %v4280_v36, %v4281_v54 }
 0x162   : > { %13056 = vmatmul.mubr.msk.bf16.gmra.mxu1 %vm2302_vm4, %v15689_v53  ;;  %v4287_v53 = vrot.slane %v4285_v3, 4  ;;  %v4286_v42 = vsel %vm15439_vm7, %v11642_v28, %v4285_v3  ;;  %v15758_v54 = vcombine.low %v4279_v45, %v4282_v52  ;;  %v14301_v28 = vld [vmem:[%s14657_s17 + $0x1bc] sm:$0xf]  ;;  %v11514_v45 = vcombine.low %v14297_v12, %v15711_v61  ;;  %v14306_v61 = vld [vmem:[%s14657_s17 + $0x1e4] sm:$0xf] }
 0x163   : > { %13059 = vmatprep.mubr.msk.bf16.mxu1 %vm2302_vm4, %v15695_v18  ;;  %v11643_v3 = vrot.slane %v14301_v28, 9  ;;  %v11644_v18 = vrot.slane %v14303_v39, 9  ;;  %v15801_v13 = vcombine.low %v14301_v28, %v14299_v22  ;;  %v14311_v28 = vld [vmem:[%s14657_s17 + $0x1f0] sm:$0xf] }
 0x164   : > { %v4289_v60 = vsel %vm15439_vm7, %v4287_v53, %v4288_v14  ;;  %19786 = vst [vmem:[#allocation120_spill] sm:$0xff] %v15758_v54  ;;  %v14302_v53 = vld [vmem:[%s14657_s17 + $0x1c4] sm:$0x1] }
 0x165   : > { %v11707_v36 = vcombine.low %v4286_v42, %v4289_v60  ;;  %v4295_v14 = vrot.slane %v14302_v53, 5  ;;  %v4293_v42 = vsel %vm15439_vm7, %v11643_v3, %v4292_v46  ;;  %v4313_v53 = vrot.slane %v14306_v61, 5  ;;  %19795 = vst [vmem:[#allocation129_spill] sm:$0xff] %v15801_v13 }
 0x166   : > { %v15773_v52 = vpop.f32.mrf.mxu0 }
 0x167   : > { %13190 = vmatmul.mubr.msk.bf16.gmra.mxu0 %vm2302_vm4, %v15720_v27  ;;  %v4299_v27 = vrot.slane %v14300_v10, 5  ;;  %19790 = vst [vmem:[#allocation124_spill] sm:$0xff] %v15773_v52  ;;  %v14310_v52 = vld [vmem:[%s14657_s17 + $0x1e8] sm:$0x1] }
 0x168   : > { %13193 = vmatprep.mubr.msk.bf16.mxu0 %vm2302_vm4, %v15724_v63  ;;  %v4294_v63 = vrot.slane %v4292_v46, 4 }
 0x169   : > { %v4300_v60 = vsel %vm15439_vm7, %v11644_v18, %v4299_v27  ;;  %v14307_v18 = vld [vmem:[%s14657_s17 + $0x1d4] sm:$0xf] }
 0x16a   : > { %13060 = vmatmul.mubr.msk.bf16.gmra.mxu1 %vm2302_vm4, %v15730_v47  ;;  %v4301_v47 = vrot.slane %v4299_v27, 4  ;;  %v4296_v6 = vsel %vm15439_vm7, %v4294_v63, %v4295_v14  ;;  %v11645_v27 = vrot.slane %v14307_v18, 9  ;;  %v4308_v14 = vrot.slane %v4306_v25, 4 }
 0x16b   : > { %13063 = vmatprep.mubr.msk.bf16.mxu1 %vm2302_vm4, %v15736_v9  ;;  %v15768_v9 = vpop.f32.mrf.mxu1  ;;  %v15791_v63 = vcombine.low %v4293_v42, %v4296_v6  ;;  %v15807_v42 = vcombine.low %v14303_v39, %v14300_v10 }
 0x16c   : > { %19789 = vst [vmem:[#allocation123_spill] sm:$0xff] %v15768_v9  ;;  %v4303_v12 = vsel %vm15439_vm7, %v4301_v47, %v4302_v49  ;;  %v14308_v47 = vld [vmem:[%s14657_s17 + $0x1dc] sm:$0x1] }
 0x16d   : > { %v15788_v46 = vpop.f32.mrf.mxu1  ;;  %19792 = vst [vmem:[#allocation126_spill] sm:$0xff] %v15791_v63  ;;  %v15795_v3 = vcombine.low %v4300_v60, %v4303_v12  ;;  %v4309_v49 = vrot.slane %v14308_v47, 5  ;;  %19797 = vst [vmem:[#allocation131_spill] sm:$0xff] %v15807_v42  ;;  %v4307_v60 = vsel %vm15439_vm7, %v11645_v27, %v4306_v25  ;;  %v14312_v12 = vld [vmem:[%s14657_s17 + $0x1fc] sm:$0xf] }
 0x16e   : > { %19791 = vst [vmem:[#allocation125_spill] sm:$0xff] %v15788_v46  ;;  %v4316_v46 = vrot.slane %v14310_v52, 5  ;;  %v4320_v52 = vrot.slane %v14311_v28, 5  ;;  %v4327_v47 = vrot.slane %v14312_v12, 5 }
 0x16f   : > { %13194 = vmatmul.mubr.msk.bf16.gmra.mxu0 %vm2302_vm4, %v15758_v54  ;;  %19794 = vst [vmem:[#allocation128_spill] sm:$0xff] %v15795_v3  ;;  %v14309_v54 = vld [vmem:[%s14657_s17 + $0x1e0] sm:$0xf]  ;;  %v4310_v22 = vsel %vm15439_vm7, %v4308_v14, %v4309_v49 }
 0x170   : > { %13197 = vmatprep.mubr.msk.bf16.mxu0 %vm2302_vm4, %v11707_v36  ;;  %v15793_v36 = vpop.f32.mrf.mxu0  ;;  %v11646_v9 = vrot.slane %v14309_v54, 9  ;;  %v15829_v27 = vcombine.low %v4307_v60, %v4310_v22  ;;  %v15845_v22 = vcombine.low %v14309_v54, %v14306_v61 }
 0x171   : > { %19793 = vst [vmem:[#allocation127_spill] sm:$0xff] %v15793_v36  ;;  %v15839_v36 = vcombine.low %v14307_v18, %v14305_v30  ;;  %v14317_v18 = vld [vmem:[%s14657_s17 + $0x208] sm:$0xf] }
 0x172   : > { %13064 = vmatmul.mubr.msk.bf16.gmra.mxu1 %vm2302_vm4, %v15766_v16  ;;  %v4315_v16 = vrot.slane %v4313_v53, 4  ;;  %v15809_v6 = vpop.f32.mrf.mxu0  ;;  %v4314_v39 = vsel %vm15439_vm7, %v11646_v9, %v4313_v53  ;;  %19800 = vst [vmem:[#allocation134_spill] sm:$0xff] %v15829_v27  ;;  %v14313_v9 = vld [vmem:[%s14657_s17 + $0x1ec] sm:$0xf]  ;;  %19805 = vst [vmem:[#allocation139_spill] sm:$0xff] %v15845_v22 }
 0x173   : > { %13067 = vmatprep.mubr.msk.bf16.mxu1 %vm2302_vm4, %v11514_v45  ;;  %v15803_v45 = vpop.f32.mrf.mxu1  ;;  %19798 = vst [vmem:[#allocation132_spill] sm:$0xff] %v15809_v6  ;;  %v11647_v53 = vrot.slane %v14313_v9, 9  ;;  %19803 = vst [vmem:[#allocation137_spill] sm:$0xff] %v15839_v36 }
 0x174   : > { %19796 = vst [vmem:[#allocation130_spill] sm:$0xff] %v15803_v45  ;;  %v4317_v10 = vsel %vm15439_vm7, %v4315_v16, %v4316_v46  ;;  %v15831_v14 = vpop.f32.mrf.mxu0  ;;  %v4322_v16 = vrot.slane %v4320_v52, 4  ;;  %v14314_v46 = vld [vmem:[%s14657_s17 + $0x1f4] sm:$0x1] }
 0x175   : > { %v15825_v25 = vpop.f32.mrf.mxu1  ;;  %19801 = vst [vmem:[#allocation135_spill] sm:$0xff] %v15831_v14  ;;  %v15833_v49 = vcombine.low %v4314_v39, %v4317_v10  ;;  %v4321_v10 = vsel %vm15439_vm7, %v11647_v53, %v4320_v52  ;;  %v15880_v14 = vcombine.low %v14313_v9, %v14311_v28  ;;  %v14323_v9 = vld [vmem:[%s14657_s17 + $0x298] sm:$0xf] }
 0x176   : > { %19799 = vst [vmem:[#allocation133_spill] sm:$0xff] %v15825_v25  ;;  %v14316_v25 = vld [vmem:[%s14657_s17 + $0x200] sm:$0x1] }
 0x177   : > { %13198 = vmatmul.mubr.msk.bf16.gmra.mxu0 %vm2302_vm4, %v15791_v63  ;;  %19802 = vst [vmem:[#allocation136_spill] sm:$0xff] %v15833_v49  ;;  %v14315_v63 = vld [vmem:[%s14657_s17 + $0x1f8] sm:$0xf]  ;;  %v4330_v6 = vrot.slane %v14316_v25, 5  ;;  %v15841_v60 = vpop.f32.mrf.mxu1  ;;  %v15847_v39 = vpop.f32.mrf.mxu0  ;;  %v4334_v25 = vrot.slane %v14317_v18, 5  ;;  %19811 = vst [vmem:[#allocation145_spill] sm:$0xff] %v15880_v14 }
 0x178   : > { %13201 = vmatprep.mubr.msk.bf16.mxu0 %vm2302_vm4, %v15795_v3  ;;  %v4323_v3 = vrot.slane %v14314_v46, 5  ;;  %v11648_v45 = vrot.slane %v14315_v63, 9  ;;  %19804 = vst [vmem:[#allocation138_spill] sm:$0xff] %v15841_v60  ;;  %19806 = vst [vmem:[#allocation140_spill] sm:$0xff] %v15847_v39  ;;  %v15861_v46 = vld [vmem:[%s14657_s17 + $0x28c] sm:$0xf] }
 0x179   : > { %v15872_v53 = vpop.f32.mrf.mxu0  ;;  %v14321_v60 = vld [vmem:[%s14657_s17 + $0x288] sm:$0xf] }
 0x17a   : > { %13068 = vmatmul.mubr.msk.bf16.gmra.mxu1 %vm2302_vm4, %v15801_v13  ;;  %v4329_v13 = vrot.slane %v4327_v47, 4  ;;  %v4324_v30 = vsel %vm15439_vm7, %v4322_v16, %v4323_v3  ;;  %v4328_v54 = vsel %vm15439_vm7, %v11648_v45, %v4327_v47  ;;  %v15866_v52 = vpop.f32.mrf.mxu1  ;;  %19809 = vst [vmem:[#allocation143_spill] sm:$0xff] %v15872_v53  ;;  %v4336_v47 = vrot.slane %v4334_v25, 4  ;;  %v14320_v16 = vld [vmem:[%s14657_s17 + $0x20c] sm:$0x1] }
 0x17b   : > { %13071 = vmatprep.mubr.msk.bf16.mxu1 %vm2302_vm4, %v15807_v42  ;;  %19807 = vst [vmem:[#allocation141_spill] sm:$0xff] %v15866_v52  ;;  %v15870_v3 = vcombine.low %v4321_v10, %v4324_v30  ;;  %v11650_v42 = vrot.slane %v14321_v60, 9  ;;  %v14322_v52 = vld [vmem:[%s14657_s17 + $0x290] sm:$0x1]  ;;  %v15886_v30 = vcombine.low %v14315_v63, %v14312_v12 }
 0x17c   : > { %v4331_v61 = vsel %vm15439_vm7, %v4329_v13, %v4330_v6  ;;  %v14319_v13 = vld [vmem:[%s14657_s17 + $0x204] sm:$0xf]  ;;  %v4344_v39 = vrot.slane %v14322_v52, 5  ;;  %v15882_v10 = vpop.f32.mrf.mxu1  ;;  %v4348_v52 = vrot.slane %v14323_v9, 5 }
 0x17d   : > { %19808 = vst [vmem:[#allocation142_spill] sm:$0xff] %v15870_v3  ;;  %v15874_v45 = vcombine.low %v4328_v54, %v4331_v61  ;;  %v11649_v6 = vrot.slane %v14319_v13, 9  ;;  %19812 = vst [vmem:[#allocation146_spill] sm:$0xff] %v15882_v10  ;;  %v15888_v54 = vpop.f32.mrf.mxu0  ;;  %v14327_v10 = vld [vmem:[%s14657_s17 + $0x2a0] sm:$0xf]  ;;  %v15916_v53 = vcombine.low %v14319_v13, %v14317_v18 }
 0x17e   : > { %19813 = vst [vmem:[#allocation147_spill] sm:$0xff] %v15886_v30  ;;  %19814 = vst [vmem:[#allocation148_spill] sm:$0xff] %v15888_v54  ;;  %v14328_v54 = vld [vmem:[%s14657_s17 + $0x2a8] sm:$0x1]  ;;  %v14329_v13 = vld [vmem:[%s14657_s17 + $0x2b0] sm:$0xf] }
 0x17f   : > { %13202 = vmatmul.mubr.msk.bf16.gmra.mxu0 %vm2302_vm4, %v15829_v27  ;;  %19810 = vst [vmem:[#allocation144_spill] sm:$0xff] %v15874_v45  ;;  %v4337_v27 = vrot.slane %v14320_v16, 5  ;;  %v4335_v61 = vsel %vm15439_vm7, %v11649_v6, %v4334_v25  ;;  %v14324_v16 = vld [vmem:[%s14657_s17 + $0x2a4] sm:$0xf]  ;;  %v15904_v25 = vpop.f32.mrf.mxu1  ;;  %v15910_v6 = vpop.f32.mrf.mxu0  ;;  %19818 = vst [vmem:[#allocation152_spill] sm:$0xff] %v15916_v53 }
 0x180   : > { %13205 = vmatprep.mubr.msk.bf16.mxu0 %vm2302_vm4, %v15833_v49  ;;  %v4341_v49 = vrot.slane %v15861_v46, 5  ;;  %19815 = vst [vmem:[#allocation149_spill] sm:$0xff] %v15904_v25  ;;  %19817 = vst [vmem:[#allocation151_spill] sm:$0xff] %v15910_v6  ;;  %v4358_v25 = vrot.slane %v14328_v54, 5  ;;  %v4362_v54 = vrot.slane %v14329_v13, 5 }
 0x181   : > { %v4338_v28 = vsel %vm15439_vm7, %v4336_v47, %v4337_v27  ;;  %v14325_v47 = vld [vmem:[%s14657_s17 + $0x29c] sm:$0x1]  ;;  %v14334_v6 = vld [vmem:[%s14657_s17 + $0x2c0] sm:$0x1]  ;;  %v19956_v40 = vld [vmem:[#allocation143_spill] sm:$0xff] }
 0x182   : > { %13072 = vmatmul.mubr.msk.bf16.gmra.mxu1 %vm2302_vm4, %v15839_v36  ;;  %v4343_v36 = vrot.slane %v4341_v49, 4  ;;  %v4342_v63 = vsel %vm15439_vm7, %v11650_v42, %v4341_v49  ;;  %v15908_v27 = vcombine.low %v4335_v61, %v4338_v28  ;;  %v4351_v42 = vrot.slane %v14325_v47, 5 }
 0x183   : > { %13075 = vmatprep.mubr.msk.bf16.mxu1 %vm2302_vm4, %v15845_v22  ;;  %v11652_v22 = vrot.slane %v14327_v10, 9  ;;  %v11522_v61 = vcombine.low %v14321_v60, %v15861_v46  ;;  %v14330_v46 = vld [vmem:[%s14657_s17 + $0x2bc] sm:$0xf] }
 0x184   : > { %v4345_v12 = vsel %vm15439_vm7, %v4343_v36, %v4344_v39  ;;  %19816 = vst [vmem:[#allocation150_spill] sm:$0xff] %v15908_v27  ;;  %v4350_v39 = vrot.slane %v4348_v52, 4  ;;  %v4369_v47 = vrot.slane %v14330_v46, 5 }
 0x185   : > { %v11715_v49 = vcombine.low %v4342_v63, %v4345_v12 }
 0x186   : > { %v4352_v18 = vsel %vm15439_vm7, %v4350_v39, %v4351_v42 }
 0x187   : > { %13206 = vmatmul.mubr.msk.bf16.gmra.mxu0 %vm2302_vm4, %v15870_v3  ;;  %v4355_v3 = vrot.slane %v14324_v16, 5 }
 0x188   : > { %13209 = vmatprep.mubr.msk.bf16.mxu0 %vm2302_vm4, %v15874_v45  ;;  %v14326_v45 = vld [vmem:[%s14657_s17 + $0x294] sm:$0xf] }
 0x189   : > { %v11651_v36 = vrot.slane %v14326_v45, 9  ;;  %v15923_v28 = vpop.f32.mrf.mxu0  ;;  %v4356_v12 = vsel %vm15439_vm7, %v11652_v22, %v4355_v3  ;;  %v15951_v21 = vcombine.low %v14326_v45, %v14323_v9  ;;  %v4376_v9 = vrot.slane %v15301_v55, 5 }
 0x18a   : > { %13076 = vmatmul.mubr.msk.bf16.gmra.mxu1 %vm2302_vm4, %v15880_v14  ;;  %v4357_v14 = vrot.slane %v4355_v3, 4  ;;  %19820 = vst [vmem:[#allocation154_spill] sm:$0xff] %v15923_v28  ;;  %v14332_v3 = vld [vmem:[%s14657_s17 + $0x2ac] sm:$0xf]  ;;  %v4371_v28 = vrot.slane %v4369_v47, 4  ;;  %v4379_v55 = vrot.slane %v15310_v41, 5 }
 0x18b   : > { %13079 = vmatprep.mubr.msk.bf16.mxu1 %vm2302_vm4, %v15886_v30  ;;  %v15918_v30 = vpop.f32.mrf.mxu1  ;;  %v4349_v63 = vsel %vm15439_vm7, %v11651_v36, %v4348_v52  ;;  %v14331_v36 = vld [vmem:[%s14657_s17 + $0x2b4] sm:$0x1]  ;;  %19824 = vst [vmem:[#allocation158_spill] sm:$0xff] %v15951_v21 }
 0x18c   : > { %19819 = vst [vmem:[#allocation153_spill] sm:$0xff] %v15918_v30  ;;  %v4359_v60 = vsel %vm15439_vm7, %v4357_v14, %v4358_v25  ;;  %v15941_v42 = vcombine.low %v4349_v63, %v4352_v18  ;;  %v4365_v39 = vrot.slane %v14331_v36, 5  ;;  %v11653_v14 = vrot.slane %v14332_v3, 9 }
 0x18d   : > { %v15938_v52 = vpop.f32.mrf.mxu1  ;;  %v15946_v22 = vcombine.low %v4356_v12, %v4359_v60  ;;  %v4364_v25 = vrot.slane %v4362_v54, 4  ;;  %v11656_v36 = vrot.slane %v15335_v24, 9 }
 0x18e   : > { %19821 = vst [vmem:[#allocation155_spill] sm:$0xff] %v15938_v52  ;;  %19822 = vst [vmem:[#allocation156_spill] sm:$0xff] %v15941_v42  ;;  %v4363_v18 = vsel %vm15439_vm7, %v11653_v14, %v4362_v54  ;;  %v4386_v14 = vrot.slane %v15349_v59, 5 }
 0x18f   : > { %13210 = vmatmul.mubr.msk.bf16.gmra.mxu0 %vm2302_vm4, %v15908_v27  ;;  %19823 = vst [vmem:[#allocation157_spill] sm:$0xff] %v15946_v22  ;;  %v14333_v27 = vld [vmem:[%s14657_s17 + $0x2b8] sm:$0xf]  ;;  %v15953_v52 = vpop.f32.mrf.mxu1  ;;  %v4366_v45 = vsel %vm15439_vm7, %v4364_v25, %v4365_v39  ;;  %v15989_v25 = vcombine.low %v14332_v3, %v14329_v13  ;;  %v4390_v13 = vrot.slane %v15383_v48, 5 }
 0x190   : > { %13213 = vmatprep.mubr.msk.bf16.mxu0 %vm2302_vm4, %v11715_v49  ;;  %v15943_v49 = vpop.f32.mrf.mxu0  ;;  %v11654_v30 = vrot.slane %v14333_v27, 9  ;;  %19825 = vst [vmem:[#allocation159_spill] sm:$0xff] %v15953_v52  ;;  %v15979_v54 = vcombine.low %v4363_v18, %v4366_v45  ;;  %v15995_v18 = vcombine.low %v14333_v27, %v14330_v46  ;;  %v16011_v46 = vld [vmem:[%s14657_s17 + $0x364] sm:$0xf] }
 0x191   : > { %v15975_v12 = vpop.f32.mrf.mxu1  ;;  %19830 = vst [vmem:[#allocation164_spill] sm:$0xff] %v15989_v25 }
 0x192   : > { %13080 = vmatmul.mubr.msk.bf16.gmra.mxu1 %vm2302_vm4, %v15916_v53  ;;  %v4372_v53 = vrot.slane %v14334_v6, 5  ;;  %v15959_v63 = vpop.f32.mrf.mxu0  ;;  %v4370_v6 = vsel %vm15439_vm7, %v11654_v30, %v4369_v47  ;;  %19827 = vst [vmem:[#allocation161_spill] sm:$0xff] %v15975_v12  ;;  %19828 = vst [vmem:[#allocation162_spill] sm:$0xff] %v15979_v54  ;;  %v14335_v47 = vld [vmem:[%s14657_s17 + $0x2c4] sm:$0xf] }
 0x193   : > { %13083 = vmatprep.mubr.msk.bf16.mxu1 %vm2302_vm4, %v11522_v61  ;;  %v15957_v61 = vcombine.low %v14327_v10, %v14324_v16  ;;  %v4383_v16 = vrot.slane %v15344_v19, 5  ;;  %19832 = vst [vmem:[#allocation166_spill] sm:$0xff] %v15995_v18 }
 0x194   : > { %v4373_v10 = vsel %vm15439_vm7, %v4371_v28, %v4372_v53  ;;  %v15981_v60 = vpop.f32.mrf.mxu0  ;;  %v11655_v53 = vrot.slane %v14335_v47, 9  ;;  %v4378_v28 = vrot.slane %v4376_v9, 4 }
 0x195   : > { %19826 = vst [vmem:[#allocation160_spill] sm:$0xff] %v15957_v61  ;;  %v15984_v30 = vcombine.low %v4370_v6, %v4373_v10  ;;  %v4385_v39 = vrot.slane %v4383_v16, 4  ;;  %v4384_v3 = vsel %vm15439_vm7, %v11656_v36, %v4383_v16  ;;  %v4397_v6 = vrot.slane %v16011_v46, 5 }
 0x196   : > { %v4377_v45 = vsel %vm15439_vm7, %v11655_v53, %v4376_v9  ;;  %v4380_v59 = vsel %vm15439_vm7, %v4378_v28, %v4379_v55  ;;  %v4393_v16 = vrot.slane %v15393_v34, 5  ;;  %v11657_v28 = vrot.slane %v15374_v35, 9 }
 0x197   : > { %13214 = vmatmul.mubr.msk.bf16.gmra.mxu0 %vm2302_vm4, %v15941_v42  ;;  %19829 = vst [vmem:[#allocation163_spill] sm:$0xff] %v15984_v30  ;;  %v4387_v27 = vsel %vm15439_vm7, %v4385_v39, %v4386_v14  ;;  %v16020_v10 = vcombine.low %v4377_v45, %v4380_v59  ;;  %v4392_v36 = vrot.slane %v4390_v13, 4  ;;  %v14337_v39 = vld [vmem:[%s14657_s17 + $0x368] sm:$0x1]  ;;  %v4399_v42 = vrot.slane %v4397_v6, 4 }
 0x198   : > { %13217 = vmatprep.mubr.msk.bf16.mxu0 %vm2302_vm4, %v15946_v22  ;;  %v15991_v22 = vpop.f32.mrf.mxu1  ;;  %v16025_v53 = vcombine.low %v4384_v3, %v4387_v27  ;;  %v4400_v14 = vrot.slane %v14337_v39, 5  ;;  %v16039_v34 = vcombine.low %v15335_v24, %v15344_v19  ;;  %v4391_v3 = vsel %vm15439_vm7, %v11657_v28, %v4390_v13  ;;  %v14340_v27 = vld [vmem:[%s14657_s17 + $0x370] sm:$0xf]  ;;  %v14341_v39 = vld [vmem:[%s14657_s17 + $0x37c] sm:$0xf] }
 0x199   : > { %19831 = vst [vmem:[#allocation165_spill] sm:$0xff] %v15991_v22  ;;  %v15997_v41 = vpop.f32.mrf.mxu0  ;;  %19835 = vst [vmem:[#allocation169_spill] sm:$0xff] %v16020_v10 }
 0x19a   : > { %13084 = vmatmul.mubr.msk.bf16.gmra.mxu1 %vm2302_vm4, %v15951_v21  ;;  %19833 = vst [vmem:[#allocation167_spill] sm:$0xff] %v15997_v41  ;;  %19837 = vst [vmem:[#allocation171_spill] sm:$0xff] %v16025_v53  ;;  %v4401_v19 = vsel %vm15439_vm7, %v4399_v42, %v4400_v14 }
 0x19b   : > { %13087 = vmatprep.mubr.msk.bf16.mxu1 %vm2302_vm4, %v15957_v61  ;;  %v16022_v55 = vpop.f32.mrf.mxu0  ;;  %19840 = vst [vmem:[#allocation174_spill] sm:$0xff] %v16039_v34 }
 0x19c   : > { %19836 = vst [vmem:[#allocation170_spill] sm:$0xff] %v16022_v55 }
 0x19d   : > { %v16041_v59 = vpop.f32.mrf.mxu0 }
 0x19e   : > { %v16016_v9 = vpop.f32.mrf.mxu1  ;;  %19841 = vst [vmem:[#allocation175_spill] sm:$0xff] %v16041_v59 }
 0x19f   : > { %13218 = vmatmul.mubr.msk.bf16.gmra.mxu0 %vm2302_vm4, %v15979_v54  ;;  %19834 = vst [vmem:[#allocation168_spill] sm:$0xff] %v16016_v9  ;;  %v14339_v9 = vld [vmem:[%s14657_s17 + $0x2c8] sm:$0xf]  ;;  %v16063_v28 = vpop.f32.mrf.mxu0 }
 0x1a0   : > { %13221 = vmatprep.mubr.msk.bf16.mxu0 %vm2302_vm4, %v15984_v30  ;;  %v14338_v30 = vld [vmem:[%s14657_s17 + $0x360] sm:$0xf]  ;;  %v16031_v22 = vcombine.low %v14335_v47, %v14339_v9  ;;  %v16033_v45 = vpop.f32.mrf.mxu1  ;;  %v4394_v47 = vsel %vm15439_vm7, %v4392_v36, %v4393_v16  ;;  %v4404_v9 = vrot.slane %v14340_v27, 5  ;;  %19844 = vst [vmem:[#allocation178_spill] sm:$0xff] %v16063_v28  ;;  %v14342_v36 = vld [vmem:[%s14657_s17 + $0x374] sm:$0x1] }
 0x1a1   : > { %v11658_v54 = vrot.slane %v14338_v30, 9  ;;  %19839 = vst [vmem:[#allocation173_spill] sm:$0xff] %v16033_v45  ;;  %v16061_v16 = vcombine.low %v4391_v3, %v4394_v47  ;;  %v14344_v45 = vld [vmem:[%s14657_s17 + $0x378] sm:$0xf]  ;;  %v11530_v47 = vcombine.low %v14338_v30, %v16011_v46  ;;  %v14347_v46 = vld [vmem:[%s14657_s17 + $0x394] sm:$0xf] }
 0x1a2   : > { %13088 = vmatmul.mubr.msk.bf16.gmra.mxu1 %vm2302_vm4, %v15989_v25  ;;  %19838 = vst [vmem:[#allocation172_spill] sm:$0xff] %v16031_v22  ;;  %v16057_v13 = vpop.f32.mrf.mxu1  ;;  %v4406_v14 = vrot.slane %v4404_v9, 4  ;;  %v11660_v12 = vrot.slane %v14344_v45, 9  ;;  %v14351_v25 = vld [vmem:[%s14657_s17 + $0x398] sm:$0x1] }
 0x1a3   : > { %13091 = vmatprep.mubr.msk.bf16.mxu1 %vm2302_vm4, %v15995_v18  ;;  %v4398_v24 = vsel %vm15439_vm7, %v11658_v54, %v4397_v6  ;;  %19842 = vst [vmem:[#allocation176_spill] sm:$0xff] %v16057_v13  ;;  %19843 = vst [vmem:[#allocation177_spill] sm:$0xff] %v16061_v16  ;;  %v4407_v54 = vrot.slane %v14342_v36, 5  ;;  %v14404_v28 = vld [vmem:[%s14657_s17 + $0x558] sm:$0xf] }
 0x1a4   : > { %v11723_v6 = vcombine.low %v4398_v24, %v4401_v19  ;;  %v16073_v3 = vpop.f32.mrf.mxu1  ;;  %v11680_v59 = vrot.slane %v14404_v28, 9 }
 0x1a5   : > { %19846 = vst [vmem:[#allocation180_spill] sm:$0xff] %v16073_v3  ;;  %v14350_v3 = vld [vmem:[%s14657_s17 + $0x390] sm:$0xf] }
 0x1a6   : > { %v11662_v18 = vrot.slane %v14350_v3, 9 }
 0x1a7   : > { %13222 = vmatmul.mubr.msk.bf16.gmra.mxu0 %vm2302_vm4, %v16020_v10  ;;  %v4411_v10 = vrot.slane %v14341_v39, 5 }
 0x1a8   : > { %13225 = vmatprep.mubr.msk.bf16.mxu0 %vm2302_vm4, %v16025_v53  ;;  %v14343_v53 = vld [vmem:[%s14657_s17 + $0x36c] sm:$0xf] }
 0x1a9   : > { %v11659_v42 = vrot.slane %v14343_v53, 9  ;;  %v4413_v52 = vrot.slane %v4411_v10, 4  ;;  %v16078_v24 = vpop.f32.mrf.mxu0  ;;  %v4412_v36 = vsel %vm15439_vm7, %v11660_v12, %v4411_v10  ;;  %v14349_v10 = vld [vmem:[%s14657_s17 + $0x384] sm:$0xf]  ;;  %v16106_v61 = vcombine.low %v14343_v53, %v14340_v27  ;;  %v14352_v53 = vld [vmem:[%s14657_s17 + $0x3a0] sm:$0xf] }
 0x1aa   : > { %13092 = vmatmul.mubr.msk.bf16.gmra.mxu1 %vm2302_vm4, %v16031_v22  ;;  %v14345_v22 = vld [vmem:[%s14657_s17 + $0x380] sm:$0x1]  ;;  %19847 = vst [vmem:[#allocation181_spill] sm:$0xff] %v16078_v24  ;;  %v4432_v27 = vrot.slane %v14352_v53, 5 }
 0x1ab   : > { %13095 = vmatprep.mubr.msk.bf16.mxu1 %vm2302_vm4, %v16039_v34  ;;  %v4414_v13 = vrot.slane %v14345_v22, 5  ;;  %v16071_v34 = vcombine.low %v15374_v35, %v15383_v48  ;;  %v4405_v19 = vsel %vm15439_vm7, %v11659_v42, %v4404_v9  ;;  %v4408_v35 = vsel %vm15439_vm7, %v4406_v14, %v4407_v54  ;;  %v14346_v48 = vld [vmem:[%s14657_s17 + $0x388] sm:$0xf]  ;;  %v14348_v42 = vld [vmem:[%s14657_s17 + $0x38c] sm:$0x1]  ;;  %19852 = vst [vmem:[#allocation186_spill] sm:$0xff] %v16106_v61 }
 0x1ac   : > { %v4418_v22 = vrot.slane %v14346_v48, 5  ;;  %v16096_v54 = vcombine.low %v4405_v19, %v4408_v35  ;;  %v4421_v14 = vrot.slane %v14348_v42, 5  ;;  %v16112_v19 = vcombine.low %v14344_v45, %v14341_v39  ;;  %v14353_v39 = vld [vmem:[%s14657_s17 + $0x3ac] sm:$0xf] }
 0x1ad   : > { %19845 = vst [vmem:[#allocation179_spill] sm:$0xff] %v16071_v34  ;;  %v4415_v30 = vsel %vm15439_vm7, %v4413_v52, %v4414_v13  ;;  %v11661_v52 = vrot.slane %v14349_v10, 9  ;;  %v4439_v42 = vrot.slane %v14353_v39, 5 }
 0x1ae   : > { %19849 = vst [vmem:[#allocation183_spill] sm:$0xff] %v16096_v54  ;;  %v16101_v12 = vcombine.low %v4412_v36, %v4415_v30  ;;  %v4420_v13 = vrot.slane %v4418_v22, 4  ;;  %19854 = vst [vmem:[#allocation188_spill] sm:$0xff] %v16112_v19 }
 0x1af   : > { %13226 = vmatmul.mubr.msk.bf16.gmra.mxu0 %vm2302_vm4, %v16061_v16  ;;  %v4425_v16 = vrot.slane %v14347_v46, 5  ;;  %v16093_v9 = vpop.f32.mrf.mxu1  ;;  %v4419_v36 = vsel %vm15439_vm7, %v11661_v52, %v4418_v22 }
 0x1b0   : > { %13229 = vmatprep.mubr.msk.bf16.mxu0 %vm2302_vm4, %v11723_v6  ;;  %19848 = vst [vmem:[#allocation182_spill] sm:$0xff] %v16093_v9  ;;  %v16098_v6 = vpop.f32.mrf.mxu0  ;;  %19851 = vst [vmem:[#allocation185_spill] sm:$0xff] %v16101_v12  ;;  %v4428_v9 = vrot.slane %v14351_v25, 5  ;;  %v4422_v25 = vsel %vm15439_vm7, %v4420_v13, %v4421_v14  ;;  %v14355_v13 = vld [vmem:[%s14657_s17 + $0x39c] sm:$0xf] }
 0x1b1   : > { %19850 = vst [vmem:[#allocation184_spill] sm:$0xff] %v16098_v6  ;;  %v4426_v30 = vsel %vm15439_vm7, %v11662_v18, %v4425_v16  ;;  %v16134_v14 = vcombine.low %v4419_v36, %v4422_v25  ;;  %v16141_v18 = vld [vmem:[%s19345_s1 + $0x14] sm:$0xf]  ;;  %v14356_v36 = vld [vmem:[%s14657_s17 + $0x3a8] sm:$0xf]  ;;  %v16199_v24 = vcombine.low %v14355_v13, %v14352_v53 }
 0x1b2   : > { %13096 = vmatmul.mubr.msk.bf16.gmra.mxu1 %vm2302_vm4, %v16071_v34  ;;  %v4427_v34 = vrot.slane %v4425_v16, 4  ;;  %v16114_v35 = vpop.f32.mrf.mxu0  ;;  %14121 = vmatprep.subr.msk.bf16.mxu1 %vm2495_vm0, %v16141_v18  ;;  %v11664_v25 = vrot.slane %v14356_v36, 9 }
 0x1b3   : > { %13099 = vmatprep.mubr.msk.bf16.mxu1 %vm2302_vm4, %v11530_v47  ;;  %v16108_v47 = vpop.f32.mrf.mxu1  ;;  %19855 = vst [vmem:[#allocation189_spill] sm:$0xff] %v16114_v35  ;;  %19857 = vst [vmem:[#allocation191_spill] sm:$0xff] %v16134_v14 }
 0x1b4   : > { %19853 = vst [vmem:[#allocation187_spill] sm:$0xff] %v16108_v47  ;;  %v4429_v45 = vsel %vm15439_vm7, %v4427_v34, %v4428_v9  ;;  %v16136_v52 = vpop.f32.mrf.mxu0  ;;  %v14354_v34 = vld [vmem:[%s14657_s17 + $0x3a4] sm:$0x1]  ;;  %v14357_v47 = vld [vmem:[%s14657_s17 + $0x3b0] sm:$0x1]  ;;  %19868 = vst [vmem:[#allocation202_spill] sm:$0xff] %v16199_v24 }
 0x1b5   : > { %v16130_v22 = vpop.f32.mrf.mxu1  ;;  %19858 = vst [vmem:[#allocation192_spill] sm:$0xff] %v16136_v52  ;;  %v4435_v16 = vrot.slane %v14354_v34, 5  ;;  %v16144_v9 = vcombine.low %v4426_v30, %v4429_v45  ;;  %v16156_v30 = vcombine.low %v14349_v10, %v14346_v48  ;;  %v16164_v34 = vcombine.low %v14350_v3, %v14347_v46  ;;  %v14362_v52 = vld [vmem:[%s14657_s17 + $0x438] sm:$0xf] }
 0x1b6   : > { %19856 = vst [vmem:[#allocation190_spill] sm:$0xff] %v16130_v22  ;;  %v4441_v22 = vrot.slane %v4439_v42, 4  ;;  %v4440_v3 = vsel %vm15439_vm7, %v11664_v25, %v4439_v42  ;;  %v14360_v42 = vld [vmem:[%s14657_s17 + $0x3bc] sm:$0x1]  ;;  %v11666_v35 = vrot.slane %v14362_v52, 9 }
 0x1b7   : > { %13230 = vmatmul.mubr.msk.bf16.gmra.mxu0 %vm2302_vm4, %v16096_v54  ;;  %19859 = vst [vmem:[#allocation193_spill] sm:$0xff] %v16144_v9  ;;  %v4434_v54 = vrot.slane %v4432_v27, 4  ;;  %19860 = vst [vmem:[#allocation194_spill] sm:$0xff] %v16156_v30  ;;  %v16158_v45 = vpop.f32.mrf.mxu1 }
 0x1b8   : > { %13233 = vmatprep.mubr.msk.bf16.mxu0 %vm2302_vm4, %v16101_v12  ;;  %v11663_v12 = vrot.slane %v14355_v13, 9  ;;  %19861 = vst [vmem:[#allocation195_spill] sm:$0xff] %v16158_v45  ;;  %19862 = vst [vmem:[#allocation196_spill] sm:$0xff] %v16164_v34  ;;  %v14364_v13 = vld [vmem:[%s14657_s17 + $0x448] sm:$0xf] }
 0x1b9   : > { %v4436_v10 = vsel %vm15439_vm7, %v4434_v54, %v4435_v16  ;;  %v4449_v16 = vrot.slane %v14360_v42, 5  ;;  %v14365_v42 = vld [vmem:[%s14657_s17 + $0x454] sm:$0xf] }
 0x1ba   : > { %13100 = vmatmul.mubr.msk.bf16.gmra.mxu1 %vm2302_vm4, %v16106_v61  ;;  %v16154_v61 = vld [vmem:[%s19345_s1 + $0x18] sm:$0xf]  ;;  %v16166_v21 = vpop.f32.mrf.mxu0  ;;  %v4433_v48 = vsel %vm15439_vm7, %v11663_v12, %v4432_v27 }
 0x1bb   : > { %13103 = vmatprep.mubr.msk.bf16.mxu1 %vm2302_vm4, %v16112_v19  ;;  %v4442_v19 = vrot.slane %v14357_v47, 5  ;;  %14122 = vmatprep.subr.msk.bf16.mxu0 %vm2495_vm0, %v16154_v61  ;;  %19863 = vst [vmem:[#allocation197_spill] sm:$0xff] %v16166_v21  ;;  %v14358_v47 = vld [vmem:[%s14657_s17 + $0x3b8] sm:$0xf]  ;;  %v16189_v54 = vcombine.low %v4433_v48, %v4436_v10  ;;  %v16205_v10 = vcombine.low %v14356_v36, %v14353_v39 }
 0x1bc   : > { %v4446_v45 = vrot.slane %v14358_v47, 5  ;;  %v16191_v27 = vpop.f32.mrf.mxu0 }
 0x1bd   : > { %v4443_v46 = vsel %vm15439_vm7, %v4441_v22, %v4442_v19  ;;  %19865 = vst [vmem:[#allocation199_spill] sm:$0xff] %v16189_v54  ;;  %19866 = vst [vmem:[#allocation200_spill] sm:$0xff] %v16191_v27  ;;  %v14361_v22 = vld [vmem:[%s14657_s17 + $0x3b4] sm:$0xf] }
 0x1be   : > { %v16194_v19 = vcombine.low %v4440_v3, %v4443_v46  ;;  %v11665_v25 = vrot.slane %v14361_v22, 9  ;;  %v4448_v21 = vrot.slane %v4446_v45, 4  ;;  %19870 = vst [vmem:[#allocation204_spill] sm:$0xff] %v16205_v10  ;;  %v16207_v3 = vpop.f32.mrf.mxu0  ;;  %v16235_v27 = vcombine.low %v14361_v22, %v14358_v47  ;;  %v14370_v22 = vld [vmem:[%s14657_s17 + $0x460] sm:$0xf] }
 0x1bf   : > { %13234 = vmatmul.mubr.msk.bf16.gmra.mxu0 %vm2302_vm4, %v16134_v14  ;;  %v16180_v14 = vld [vmem:[%s14657_s17 + $0x43c] sm:$0xf]  ;;  %v16185_v12 = vpop.f32.mrf.mxu1  ;;  %19871 = vst [vmem:[#allocation205_spill] sm:$0xff] %v16207_v3  ;;  %v14369_v3 = vld [vmem:[%s14657_s17 + $0x458] sm:$0x1] }
 0x1c0   : > { %13237 = vmatprep.mubr.msk.bf16.mxu0 %vm2302_vm4, %v16144_v9  ;;  %v4453_v9 = vrot.slane %v16180_v14, 5  ;;  %19864 = vst [vmem:[#allocation198_spill] sm:$0xff] %v16185_v12  ;;  %19867 = vst [vmem:[#allocation201_spill] sm:$0xff] %v16194_v19  ;;  %v14363_v12 = vld [vmem:[%s14657_s17 + $0x440] sm:$0x1]  ;;  %v4447_v46 = vsel %vm15439_vm7, %v11665_v25, %v4446_v45  ;;  %v4450_v53 = vsel %vm15439_vm7, %v4448_v21, %v4449_v16  ;;  %v16229_v16 = vpop.f32.mrf.mxu0 }
 0x1c1   : > { %v4456_v6 = vrot.slane %v14363_v12, 5  ;;  %v16201_v48 = vpop.f32.mrf.mxu1  ;;  %v4460_v12 = vrot.slane %v14364_v13, 5  ;;  %v16227_v21 = vcombine.low %v4447_v46, %v4450_v53  ;;  %19874 = vst [vmem:[#allocation208_spill] sm:$0xff] %v16229_v16  ;;  %v14366_v25 = vld [vmem:[%s14657_s17 + $0x44c] sm:$0x1]  ;;  %19875 = vst [vmem:[#allocation209_spill] sm:$0xff] %v16235_v27  ;;  %v11538_v46 = vcombine.low %v14362_v52, %v16180_v14 }
 0x1c2   : > { %13104 = vmatmul.mubr.msk.bf16.gmra.mxu1 %vm2302_vm4, %v16156_v30  ;;  %v4455_v30 = vrot.slane %v4453_v9, 4  ;;  %19869 = vst [vmem:[#allocation203_spill] sm:$0xff] %v16201_v48  ;;  %v4454_v39 = vsel %vm15439_vm7, %v11666_v35, %v4453_v9  ;;  %v4463_v35 = vrot.slane %v14366_v25, 5  ;;  %v14368_v48 = vld [vmem:[%s14657_s17 + $0x450] sm:$0xf] }
 0x1c3   : > { %13107 = vmatprep.mubr.msk.bf16.mxu1 %vm2302_vm4, %v16164_v34  ;;  %v16223_v45 = vpop.f32.mrf.mxu1  ;;  %19873 = vst [vmem:[#allocation207_spill] sm:$0xff] %v16227_v21  ;;  %v11668_v34 = vrot.slane %v14368_v48, 9  ;;  %v14371_v52 = vld [vmem:[%s14657_s17 + $0x46c] sm:$0xf] }
 0x1c4   : > { %v4457_v36 = vsel %vm15439_vm7, %v4455_v30, %v4456_v6  ;;  %19872 = vst [vmem:[#allocation206_spill] sm:$0xff] %v16223_v45  ;;  %v4462_v30 = vrot.slane %v4460_v12, 4  ;;  %v4470_v45 = vrot.slane %v14369_v3, 5  ;;  %v4474_v3 = vrot.slane %v14370_v22, 5 }
 0x1c5   : > { %v11731_v9 = vcombine.low %v4454_v39, %v4457_v36  ;;  %v4481_v25 = vrot.slane %v14371_v52, 5 }
 0x1c6   : > { %v4464_v47 = vsel %vm15439_vm7, %v4462_v30, %v4463_v35 }
 0x1c7   : > { %13238 = vmatmul.mubr.msk.bf16.gmra.mxu0 %vm2302_vm4, %v16189_v54  ;;  %v4467_v54 = vrot.slane %v14365_v42, 5 }
 0x1c8   : > { %13241 = vmatprep.mubr.msk.bf16.mxu0 %vm2302_vm4, %v16194_v19  ;;  %v14367_v19 = vld [vmem:[%s14657_s17 + $0x444] sm:$0xf] }
 0x1c9   : > { %v11667_v6 = vrot.slane %v14367_v19, 9  ;;  %v4468_v36 = vsel %vm15439_vm7, %v11668_v34, %v4467_v54  ;;  %v16270_v16 = vcombine.low %v14367_v19, %v14364_v13  ;;  %v14376_v13 = vld [vmem:[%s14657_s17 + $0x478] sm:$0xf] }
 0x1ca   : > { %13108 = vmatmul.mubr.msk.bf16.gmra.mxu1 %vm2302_vm4, %v16199_v24  ;;  %v4469_v24 = vrot.slane %v4467_v54, 4  ;;  %v14373_v54 = vld [vmem:[%s14657_s17 + $0x45c] sm:$0xf] }
 0x1cb   : > { %13111 = vmatprep.mubr.msk.bf16.mxu1 %vm2302_vm4, %v16205_v10  ;;  %v16237_v10 = vpop.f32.mrf.mxu1  ;;  %v16242_v53 = vpop.f32.mrf.mxu0  ;;  %v4461_v39 = vsel %vm15439_vm7, %v11667_v6, %v4460_v12  ;;  %v14372_v6 = vld [vmem:[%s14657_s17 + $0x464] sm:$0x1]  ;;  %19882 = vst [vmem:[#allocation216_spill] sm:$0xff] %v16270_v16 }
 0x1cc   : > { %19876 = vst [vmem:[#allocation210_spill] sm:$0xff] %v16237_v10  ;;  %19877 = vst [vmem:[#allocation211_spill] sm:$0xff] %v16242_v53  ;;  %v4471_v14 = vsel %vm15439_vm7, %v4469_v24, %v4470_v45  ;;  %v16260_v35 = vcombine.low %v4461_v39, %v4464_v47  ;;  %v4477_v30 = vrot.slane %v14372_v6, 5  ;;  %v11669_v24 = vrot.slane %v14373_v54, 9  ;;  %v14375_v53 = vld [vmem:[%s14657_s17 + $0x470] sm:$0x1] }
 0x1cd   : > { %v16265_v34 = vcombine.low %v4468_v36, %v4471_v14  ;;  %v4476_v45 = vrot.slane %v4474_v3, 4  ;;  %v16276_v39 = vcombine.low %v14368_v48, %v14365_v42  ;;  %v14377_v14 = vld [vmem:[%s14657_s17 + $0x484] sm:$0xf] }
 0x1ce   : > { %19879 = vst [vmem:[#allocation213_spill] sm:$0xff] %v16260_v35  ;;  %v4475_v36 = vsel %vm15439_vm7, %v11669_v24, %v4474_v3  ;;  %v4495_v6 = vrot.slane %v14377_v14, 5 }
 0x1cf   : > { %13242 = vmatmul.mubr.msk.bf16.gmra.mxu0 %vm2302_vm4, %v16227_v21  ;;  %v16257_v12 = vpop.f32.mrf.mxu1  ;;  %19881 = vst [vmem:[#allocation215_spill] sm:$0xff] %v16265_v34  ;;  %v14374_v21 = vld [vmem:[%s14657_s17 + $0x468] sm:$0xf]  ;;  %19884 = vst [vmem:[#allocation218_spill] sm:$0xff] %v16276_v39  ;;  %v4478_v19 = vsel %vm15439_vm7, %v4476_v45, %v4477_v30  ;;  %v14378_v45 = vld [vmem:[%s14657_s17 + $0x47c] sm:$0x1] }
 0x1d0   : > { %13245 = vmatprep.mubr.msk.bf16.mxu0 %vm2302_vm4, %v11731_v9  ;;  %19878 = vst [vmem:[#allocation212_spill] sm:$0xff] %v16257_v12  ;;  %v16262_v9 = vpop.f32.mrf.mxu0  ;;  %v11670_v10 = vrot.slane %v14374_v21, 9  ;;  %v4484_v12 = vrot.slane %v14375_v53, 5  ;;  %v4488_v53 = vrot.slane %v14376_v13, 5  ;;  %v16298_v30 = vcombine.low %v4475_v36, %v4478_v19 }
 0x1d1   : > { %19880 = vst [vmem:[#allocation214_spill] sm:$0xff] %v16262_v9  ;;  %v16308_v9 = vcombine.low %v14373_v54, %v14370_v22  ;;  %v16314_v19 = vcombine.low %v14374_v21, %v14371_v52  ;;  %v14382_v54 = vld [vmem:[%s14657_s17 + $0x490] sm:$0xf] }
 0x1d2   : > { %13112 = vmatmul.mubr.msk.bf16.gmra.mxu1 %vm2302_vm4, %v16235_v27  ;;  %v4483_v27 = vrot.slane %v4481_v25, 4  ;;  %v16278_v47 = vpop.f32.mrf.mxu0  ;;  %v4482_v48 = vsel %vm15439_vm7, %v11670_v10, %v4481_v25  ;;  %19887 = vst [vmem:[#allocation221_spill] sm:$0xff] %v16298_v30  ;;  %v4491_v10 = vrot.slane %v14378_v45, 5  ;;  %v16330_v45 = vld [vmem:[%s14657_s17 + $0x514] sm:$0xf] }
 0x1d3   : > { %13115 = vmatprep.mubr.msk.bf16.mxu1 %vm2302_vm4, %v11538_v46  ;;  %v16272_v46 = vpop.f32.mrf.mxu1  ;;  %19885 = vst [vmem:[#allocation219_spill] sm:$0xff] %v16278_v47  ;;  %19890 = vst [vmem:[#allocation224_spill] sm:$0xff] %v16308_v9 }
 0x1d4   : > { %19883 = vst [vmem:[#allocation217_spill] sm:$0xff] %v16272_v46  ;;  %v4485_v42 = vsel %vm15439_vm7, %v4483_v27, %v4484_v12  ;;  %v16300_v24 = vpop.f32.mrf.mxu0  ;;  %v14379_v27 = vld [vmem:[%s14657_s17 + $0x474] sm:$0xf]  ;;  %19892 = vst [vmem:[#allocation226_spill] sm:$0xff] %v16314_v19 }
 0x1d5   : > { %v16294_v3 = vpop.f32.mrf.mxu1  ;;  %19888 = vst [vmem:[#allocation222_spill] sm:$0xff] %v16300_v24  ;;  %v16303_v25 = vcombine.low %v4482_v48, %v4485_v42  ;;  %v11671_v12 = vrot.slane %v14379_v27, 9  ;;  %v16349_v24 = vcombine.low %v14379_v27, %v14376_v13  ;;  %v14388_v27 = vld [vmem:[%s14657_s17 + $0x520] sm:$0xf] }
 0x1d6   : > { %19886 = vst [vmem:[#allocation220_spill] sm:$0xff] %v16294_v3  ;;  %v14381_v3 = vld [vmem:[%s14657_s17 + $0x488] sm:$0x1] }
 0x1d7   : > { %13246 = vmatmul.mubr.msk.bf16.gmra.mxu0 %vm2302_vm4, %v16260_v35  ;;  %19889 = vst [vmem:[#allocation223_spill] sm:$0xff] %v16303_v25  ;;  %v14380_v35 = vld [vmem:[%s14657_s17 + $0x480] sm:$0xf]  ;;  %v4498_v47 = vrot.slane %v14381_v3, 5  ;;  %v16310_v36 = vpop.f32.mrf.mxu1  ;;  %v4489_v42 = vsel %vm15439_vm7, %v11671_v12, %v4488_v53  ;;  %v4502_v3 = vrot.slane %v14382_v54, 5  ;;  %19898 = vst [vmem:[#allocation232_spill] sm:$0xff] %v16349_v24 }
 0x1d8   : > { %13249 = vmatprep.mubr.msk.bf16.mxu0 %vm2302_vm4, %v16265_v34  ;;  %v4490_v34 = vrot.slane %v4488_v53, 4  ;;  %v11672_v46 = vrot.slane %v14380_v35, 9  ;;  %19891 = vst [vmem:[#allocation225_spill] sm:$0xff] %v16310_v36  ;;  %v14386_v36 = vld [vmem:[%s14657_s17 + $0x510] sm:$0xf] }
 0x1da   : > { %13116 = vmatmul.mubr.msk.bf16.gmra.mxu1 %vm2302_vm4, %v16270_v16  ;;  %v4497_v16 = vrot.slane %v4495_v6, 4  ;;  %v4492_v22 = vsel %vm15439_vm7, %v4490_v34, %v4491_v10  ;;  %v4496_v21 = vsel %vm15439_vm7, %v11672_v46, %v4495_v6  ;;  %v14384_v46 = vld [vmem:[%s14657_s17 + $0x494] sm:$0x1] }
 0x1db   : > { %13119 = vmatprep.mubr.msk.bf16.mxu1 %vm2302_vm4, %v16276_v39  ;;  %v16339_v34 = vcombine.low %v4489_v42, %v4492_v22  ;;  %v4505_v6 = vrot.slane %v14384_v46, 5  ;;  %v11674_v39 = vrot.slane %v14386_v36, 9 }
 0x1dc   : > { %v4499_v52 = vsel %vm15439_vm7, %v4497_v16, %v4498_v47  ;;  %v14385_v47 = vld [vmem:[%s14657_s17 + $0x48c] sm:$0xf] }
 0x1dd   : > { %v16316_v48 = vpop.f32.mrf.mxu0  ;;  %19895 = vst [vmem:[#allocation229_spill] sm:$0xff] %v16339_v34  ;;  %v16344_v16 = vcombine.low %v4496_v21, %v4499_v52  ;;  %v11673_v12 = vrot.slane %v14385_v47, 9  ;;  %v16357_v21 = vcombine.low %v14380_v35, %v14377_v14  ;;  %v14389_v14 = vld [vmem:[%s14657_s17 + $0x52c] sm:$0xf] }
 0x1de   : > { %19893 = vst [vmem:[#allocation227_spill] sm:$0xff] %v16316_v48 }
 0x1df   : > { %13250 = vmatmul.mubr.msk.bf16.gmra.mxu0 %vm2302_vm4, %v16298_v30  ;;  %v16341_v10 = vpop.f32.mrf.mxu0  ;;  %19897 = vst [vmem:[#allocation231_spill] sm:$0xff] %v16344_v16  ;;  %v4504_v30 = vrot.slane %v4502_v3, 4  ;;  %19901 = vst [vmem:[#allocation235_spill] sm:$0xff] %v16357_v21  ;;  %v4503_v52 = vsel %vm15439_vm7, %v11673_v12, %v4502_v3 }
 0x1e0   : > { %13253 = vmatprep.mubr.msk.bf16.mxu0 %vm2302_vm4, %v16303_v25  ;;  %v4509_v25 = vrot.slane %v16330_v45, 5  ;;  %19896 = vst [vmem:[#allocation230_spill] sm:$0xff] %v16341_v10 }
 0x1e1   : > { %v16335_v53 = vpop.f32.mrf.mxu1  ;;  %v16355_v22 = vpop.f32.mrf.mxu0  ;;  %v4506_v13 = vsel %vm15439_vm7, %v4504_v30, %v4505_v6  ;;  %v14390_v6 = vld [vmem:[%s14657_s17 + $0x524] sm:$0x1] }
 0x1e2   : > { %13120 = vmatmul.mubr.msk.bf16.gmra.mxu1 %vm2302_vm4, %v16308_v9  ;;  %19894 = vst [vmem:[#allocation228_spill] sm:$0xff] %v16335_v53  ;;  %v4511_v9 = vrot.slane %v4509_v25, 4  ;;  %v14387_v53 = vld [vmem:[%s14657_s17 + $0x518] sm:$0x1]  ;;  %19900 = vst [vmem:[#allocation234_spill] sm:$0xff] %v16355_v22  ;;  %v4510_v46 = vsel %vm15439_vm7, %v11674_v39, %v4509_v25  ;;  %v16379_v30 = vcombine.low %v4503_v52, %v4506_v13  ;;  %v4519_v39 = vrot.slane %v14390_v6, 5 }
 0x1e3   : > { %13123 = vmatprep.mubr.msk.bf16.mxu1 %vm2302_vm4, %v16314_v19  ;;  %v4512_v48 = vrot.slane %v14387_v53, 5  ;;  %v16351_v42 = vpop.f32.mrf.mxu1  ;;  %v4516_v53 = vrot.slane %v14388_v27, 5  ;;  %v16375_v12 = vpop.f32.mrf.mxu0  ;;  %v11546_v52 = vcombine.low %v14386_v36, %v16330_v45  ;;  %v16410_v45 = vld [vmem:[%s14657_s17 + $0x544] sm:$0xf] }
 0x1e4   : > { %19899 = vst [vmem:[#allocation233_spill] sm:$0xff] %v16351_v42  ;;  %19903 = vst [vmem:[#allocation237_spill] sm:$0xff] %v16375_v12  ;;  %v14392_v42 = vld [vmem:[%s14657_s17 + $0x528] sm:$0xf]  ;;  %v16387_v12 = vcombine.low %v14385_v47, %v14382_v54 }
 0x1e5   : > { %v4513_v35 = vsel %vm15439_vm7, %v4511_v9, %v4512_v48  ;;  %v16373_v3 = vpop.f32.mrf.mxu1  ;;  %19904 = vst [vmem:[#allocation238_spill] sm:$0xff] %v16379_v30  ;;  %v4518_v48 = vrot.slane %v4516_v53, 4  ;;  %v11676_v19 = vrot.slane %v14392_v42, 9 }
 0x1e6   : > { %19902 = vst [vmem:[#allocation236_spill] sm:$0xff] %v16373_v3  ;;  %v11739_v25 = vcombine.low %v4510_v46, %v4513_v35  ;;  %19906 = vst [vmem:[#allocation240_spill] sm:$0xff] %v16387_v12  ;;  %v16400_v46 = vld [vmem:[%s14657_s17 + $0x538] sm:$0xf] }
 0x1e7   : > { %13254 = vmatmul.mubr.msk.bf16.gmra.mxu0 %vm2302_vm4, %v16339_v34  ;;  %v4523_v34 = vrot.slane %v14389_v14, 5  ;;  %v16385_v10 = vpop.f32.mrf.mxu1  ;;  %v4530_v54 = vrot.slane %v16400_v46, 5 }
 0x1e8   : > { %13257 = vmatprep.mubr.msk.bf16.mxu0 %vm2302_vm4, %v16344_v16  ;;  %v14391_v16 = vld [vmem:[%s14657_s17 + $0x51c] sm:$0xf]  ;;  %19905 = vst [vmem:[#allocation239_spill] sm:$0xff] %v16385_v10  ;;  %v14398_v10 = vld [vmem:[%s14657_s17 + $0x540] sm:$0xf] }
 0x1e9   : > { %v11675_v9 = vrot.slane %v14391_v16, 9  ;;  %v4525_v22 = vrot.slane %v4523_v34, 4  ;;  %v4524_v35 = vsel %vm15439_vm7, %v11676_v19, %v4523_v34  ;;  %v14396_v19 = vld [vmem:[%s14657_s17 + $0x53c] sm:$0x1] }
 0x1ea   : > { %13124 = vmatmul.mubr.msk.bf16.gmra.mxu1 %vm2302_vm4, %v16349_v24  ;;  %v14393_v24 = vld [vmem:[%s14657_s17 + $0x530] sm:$0x1]  ;;  %v4533_v34 = vrot.slane %v14396_v19, 5 }
 0x1eb   : > { %13127 = vmatprep.mubr.msk.bf16.mxu1 %vm2302_vm4, %v16357_v21  ;;  %v4526_v3 = vrot.slane %v14393_v24, 5  ;;  %v4517_v13 = vsel %vm15439_vm7, %v11675_v9, %v4516_v53  ;;  %v4520_v24 = vsel %vm15439_vm7, %v4518_v48, %v4519_v39  ;;  %v4537_v53 = vrot.slane %v16410_v45, 5  ;;  %v14397_v9 = vld [vmem:[%s14657_s17 + $0x534] sm:$0xf] }
 0x1ec   : > { %v11677_v48 = vrot.slane %v14397_v9, 9 }
 0x1ed   : > { %v4527_v36 = vsel %vm15439_vm7, %v4525_v22, %v4526_v3 }
 0x1ee   : > { %v16425_v3 = vcombine.low %v4524_v35, %v4527_v36  ;;  %v16438_v35 = vcombine.low %v14392_v42, %v14389_v14 }
 0x1ef   : > { %v16389_v21 = vpop.f32.mrf.mxu0  ;;  %13258 = vmatmul.mubr.msk.bf16.gmra.mxu0 %vm2302_vm4, %v16379_v30  ;;  %v4532_v30 = vrot.slane %v4530_v54, 4 }
 0x1f0   : > { %19907 = vst [vmem:[#allocation241_spill] sm:$0xff] %v16389_v21  ;;  %13261 = vmatprep.mubr.msk.bf16.mxu0 %vm2302_vm4, %v11739_v25  ;;  %v16420_v25 = vcombine.low %v4517_v13, %v4520_v24  ;;  %19913 = vst [vmem:[#allocation247_spill] sm:$0xff] %v16425_v3  ;;  %v16434_v24 = vcombine.low %v14391_v16, %v14388_v27  ;;  %v16449_v16 = vld [vmem:[%s14657_s17 + $0x550] sm:$0xf] }
 0x1f1   : > { %v16403_v47 = vpop.f32.mrf.mxu0  ;;  %19917 = vst [vmem:[#allocation251_spill] sm:$0xff] %v16438_v35  ;;  %v4544_v27 = vrot.slane %v16449_v16, 5 }
 0x1f2   : > { %19908 = vst [vmem:[#allocation242_spill] sm:$0xff] %v16403_v47  ;;  %v16413_v6 = vpop.f32.mrf.mxu1  ;;  %13128 = vmatmul.mubr.msk.bf16.gmra.mxu1 %vm2302_vm4, %v16387_v12  ;;  %19911 = vst [vmem:[#allocation245_spill] sm:$0xff] %v16420_v25  ;;  %v11678_v12 = vrot.slane %v14398_v10, 9  ;;  %v4539_v47 = vrot.slane %v4537_v53, 4 }
 0x1f3   : > { %19909 = vst [vmem:[#allocation243_spill] sm:$0xff] %v16413_v6  ;;  %v16417_v39 = vpop.f32.mrf.mxu0  ;;  %13131 = vmatprep.mubr.msk.bf16.mxu1 %vm2302_vm4, %v11546_v52  ;;  %19916 = vst [vmem:[#allocation250_spill] sm:$0xff] %v16434_v24  ;;  %v4546_v21 = vrot.slane %v4544_v27, 4 }
 0x1f4   : > { %19910 = vst [vmem:[#allocation244_spill] sm:$0xff] %v16417_v39  ;;  %v16423_v22 = vpop.f32.mrf.mxu1  ;;  %v14399_v39 = vld [vmem:[%s14657_s17 + $0x548] sm:$0x1]  ;;  %v4538_v42 = vsel %vm15439_vm7, %v11678_v12, %v4537_v53 }
 0x1f5   : > { %19912 = vst [vmem:[#allocation246_spill] sm:$0xff] %v16423_v22  ;;  %v16428_v6 = vpop.f32.mrf.mxu0  ;;  %v4540_v52 = vrot.slane %v14399_v39, 5  ;;  %v4531_v22 = vsel %vm15439_vm7, %v11677_v48, %v4530_v54  ;;  %v4534_v39 = vsel %vm15439_vm7, %v4532_v30, %v4533_v34  ;;  %v14402_v30 = vld [vmem:[%s14657_s17 + $0x554] sm:$0x1] }
 0x1f6   : > { %19914 = vst [vmem:[#allocation248_spill] sm:$0xff] %v16428_v6  ;;  %v16432_v13 = vpop.f32.mrf.mxu1  ;;  %v4547_v34 = vrot.slane %v14402_v30, 5  ;;  %v16466_v12 = vcombine.low %v4531_v22, %v4534_v39  ;;  %v16477_v22 = vcombine.low %v14397_v9, %v16400_v46 }
 0x1f7   : > { %19915 = vst [vmem:[#allocation249_spill] sm:$0xff] %v16432_v13  ;;  %v13167_v19 = vpop.f32.mrf.mxu0  ;;  %13262 = vmatmul.mubr.msk.bf16.gmra.mxu0 %vm2302_vm4, %v16420_v25  ;;  %v4541_v14 = vsel %vm15439_vm7, %v4539_v47, %v4540_v52  ;;  %v14403_v52 = vld [vmem:[%s14657_s17 + $0x54c] sm:$0xf] }
 0x1f8   : > { %v16440_v36 = vpop.f32.mrf.mxu1  ;;  %13265 = vmatprep.mubr.msk.bf16.mxu0 %vm2302_vm4, %v16425_v3  ;;  %v16457_v3 = vld [vmem:[%s14657_s17 + $0x55c] sm:$0xf]  ;;  %19919 = vst [vmem:[#allocation253_spill] sm:$0xff] %v16466_v12  ;;  %v16468_v53 = vcombine.low %v4538_v42, %v4541_v14  ;;  %v11679_v6 = vrot.slane %v14403_v52, 9  ;;  %v4548_v9 = vsel %vm15439_vm7, %v4546_v21, %v4547_v34 }
 0x1f9   : > { %19918 = vst [vmem:[#allocation252_spill] sm:$0xff] %v16440_v36  ;;  %v5042_v13 = vpop.f32.mrf.mxu0  ;;  %v4551_v54 = vrot.slane %v16457_v3, 5 }
 0x1fa   : > { %v13037_v48 = vpop.f32.mrf.mxu1  ;;  %13132 = vmatmul.mubr.msk.bf16.gmra.mxu1 %vm2302_vm4, %v16434_v24  ;;  %19920 = vst [vmem:[#allocation254_spill] sm:$0xff] %v16468_v53  ;;  %v4545_v46 = vsel %vm15439_vm7, %v11679_v6, %v4544_v27  ;;  %v16505_v6 = vld [vmem:[%s14657_s17 + $0x5ec] sm:$0xf] }
 0x1fb   : > { %v3602_v25 = vadd.f32 %v13037_v48, %v15248_v7  ;;  %v13168_v36 = vpop.f32.mrf.mxu0  ;;  %13135 = vmatprep.mubr.msk.bf16.mxu1 %vm2302_vm4, %v16438_v35  ;;  %v4553_v7 = vrot.slane %v4551_v54, 4  ;;  %v14405_v48 = vld [vmem:[%s14657_s17 + $0x560] sm:$0x1]  ;;  %v4565_v21 = vrot.slane %v16505_v6, 5 }
 0x1fc   : > { %v3593_v47 = vpop.f32.mrf.mxu1  ;;  %v4554_v41 = vrot.slane %v14405_v48, 5  ;;  %v14409_v48 = vld [vmem:[%s14657_s17 + $0x564] sm:$0xf] }
 0x1fd   : > { %v16472_v24 = vadd.f32 %v13167_v19, %v3602_v25  ;;  %v3594_v30 = vadd.f32 %v3593_v47, %v15263_v31  ;;  %v5045_v55 = vpop.f32.mrf.mxu0  ;;  %v16485_v31 = vcombine.low %v14398_v10, %v16410_v45 }
 0x1fe   : > { %v13038_v35 = vpop.f32.mrf.mxu1  ;;  %v4555_v47 = vsel %vm15439_vm7, %v4553_v7, %v4554_v41  ;;  %v16516_v41 = vcombine.low %v4545_v46, %v4548_v9 }
 0x1ff   : > { %v16479_v39 = vadd.f32 %v5042_v13, %v3594_v30  ;;  %v3605_v42 = vadd.f32 %v13038_v35, %v15278_v38  ;;  %v13171_v14 = vpop.f32.mrf.mxu0  ;;  %13266 = vmatmul.mubr.msk.bf16.gmra.mxu0 %vm2302_vm4, %v16466_v12  ;;  %19921 = vst [vmem:[#allocation255_spill] sm:$0xff] %v16485_v31  ;;  %v4552_v38 = vsel %vm15439_vm7, %v11680_v59, %v4551_v54  ;;  %v16496_v13 = vld [vmem:[%s14657_s17 + $0x568] sm:$0xf]  ;;  %v14408_v59 = vld [vmem:[%s14657_s17 + $0x56c] sm:$0x1] }
 0x200   : > { %v3596_v25 = vpop.f32.mrf.mxu1  ;;  %13269 = vmatprep.mubr.msk.bf16.mxu0 %vm2302_vm4, %v16468_v53  ;;  %v4558_v19 = vrot.slane %v16496_v13, 5  ;;  %v4561_v54 = vrot.slane %v14408_v59, 5  ;;  %19923 = vst [vmem:[#allocation257_spill] sm:$0xff] %v16516_v41  ;;  %v16518_v7 = vcombine.low %v4552_v38, %v4555_v47  ;;  %v16522_v53 = vld [vmem:[%s14657_s17 + $0x5e8] sm:$0xf]  ;;  %v4567_v59 = vrot.slane %v4565_v21, 4 }
 0x201   : > { %v16499_v10 = vadd.f32 %v13168_v36, %v3605_v42  ;;  %v3597_v45 = vadd.f32 %v3596_v25, %v15293_v58  ;;  %v5058_v35 = vpop.f32.mrf.mxu0  ;;  %v11681_v42 = vrot.slane %v14409_v48, 9  ;;  %v14411_v12 = vld [vmem:[%s14657_s17 + $0x5f0] sm:$0x1]  ;;  %v16530_v38 = vcombine.low %v14403_v52, %v16449_v16  ;;  %v16549_v52 = vld [vmem:[%s14657_s17 + $0x5f8] sm:$0xf] }
 0x202   : > { %v13041_v27 = vpop.f32.mrf.mxu1  ;;  %13136 = vmatmul.mubr.msk.bf16.gmra.mxu1 %vm2302_vm4, %v16477_v22  ;;  %19924 = vst [vmem:[#allocation258_spill] sm:$0xff] %v16518_v7  ;;  %v4560_v25 = vrot.slane %v4558_v19, 4  ;;  %v4568_v46 = vrot.slane %v14411_v12, 5 }
 0x203   : > { %v16511_v36 = vadd.f32 %v5045_v55, %v3597_v45  ;;  %v3618_v58 = vadd.f32 %v13041_v27, %v15312_v5  ;;  %v13172_v34 = vpop.f32.mrf.mxu0  ;;  %13139 = vmatprep.mubr.msk.bf16.mxu1 %vm2302_vm4, %v16485_v31  ;;  %v11682_v55 = vrot.slane %v16522_v53, 9  ;;  %19925 = vst [vmem:[#allocation259_spill] sm:$0xff] %v16530_v38  ;;  %v4559_v16 = vsel %vm15439_vm7, %v11681_v42, %v4558_v19  ;;  %v16558_v19 = vld [vmem:[%s14657_s17 + $0x604] sm:$0xf] }
 0x204   : > { %v3609_v30 = vpop.f32.mrf.mxu1  ;;  %v4562_v12 = vsel %vm15439_vm7, %v4560_v25, %v4561_v54  ;;  %v4579_v54 = vrot.slane %v16558_v19, 5 }
 0x205   : > { %19922 = vst [vmem:[#allocation256_spill] sm:$0xff] %v16511_v36  ;;  %v16525_v45 = vadd.f32 %v13171_v14, %v3618_v58  ;;  %v3610_v5 = vadd.f32 %v3609_v30, %v15326_v37  ;;  %v5061_v27 = vpop.f32.mrf.mxu0  ;;  %v16538_v37 = vcombine.low %v14404_v28, %v16457_v3  ;;  %v4569_v30 = vsel %vm15439_vm7, %v4567_v59, %v4568_v46  ;;  %v14415_v46 = vld [vmem:[%s14657_s17 + $0x5f4] sm:$0xf] }
 0x206   : > { %v13042_v9 = vpop.f32.mrf.mxu1 }
 0x207   : > { %v16532_v47 = vadd.f32 %v5058_v35, %v3610_v5  ;;  %v3621_v31 = vadd.f32 %v13042_v9, %v15346_v29  ;;  %v13175_v36 = vpop.f32.mrf.mxu0  ;;  %13270 = vmatmul.mubr.msk.bf16.gmra.mxu0 %vm2302_vm4, %v16516_v41  ;;  %v4566_v29 = vsel %vm15439_vm7, %v11682_v55, %v4565_v21  ;;  %v4572_v35 = vrot.slane %v16549_v52, 5  ;;  %v14414_v21 = vld [vmem:[%s14657_s17 + $0x5fc] sm:$0x1] }
 0x208   : > { %v3612_v14 = vpop.f32.mrf.mxu1  ;;  %13273 = vmatprep.mubr.msk.bf16.mxu0 %vm2302_vm4, %v16518_v7  ;;  %v4575_v25 = vrot.slane %v14414_v21, 5  ;;  %v16569_v55 = vcombine.low %v4559_v16, %v4562_v12  ;;  %v11747_v59 = vcombine.low %v4566_v29, %v4569_v30  ;;  %v11683_v9 = vrot.slane %v14415_v46, 9  ;;  %v14416_v7 = vld [vmem:[%s14657_s17 + $0x600] sm:$0xf] }
 0x209   : > { %v16552_v28 = vadd.f32 %v13172_v34, %v3621_v31  ;;  %v3613_v3 = vadd.f32 %v3612_v14, %v15366_v33  ;;  %v5074_v58 = vpop.f32.mrf.mxu0  ;;  %v4574_v14 = vrot.slane %v4572_v35, 4  ;;  %v11684_v41 = vrot.slane %v14416_v7, 9 }
 0x20a   : > { %v13045_v42 = vpop.f32.mrf.mxu1  ;;  %13140 = vmatmul.mubr.msk.bf16.gmra.mxu1 %vm2302_vm4, %v16530_v38  ;;  %19928 = vst [vmem:[#allocation262_spill] sm:$0xff] %v16569_v55  ;;  %v16578_v16 = vcombine.low %v14409_v48, %v16496_v13  ;;  %v4573_v13 = vsel %vm15439_vm7, %v11683_v9, %v4572_v35  ;;  %v16604_v35 = vld [vmem:[%s14657_s17 + $0x61c] sm:$0xf] }
 0x20b   : > { %19926 = vst [vmem:[#allocation260_spill] sm:$0xff] %v16552_v28  ;;  %v16564_v31 = vadd.f32 %v5061_v27, %v3613_v3  ;;  %v3634_v33 = vadd.f32 %v13045_v42, %v15385_v44  ;;  %v13176_v34 = vpop.f32.mrf.mxu0  ;;  %13143 = vmatprep.mubr.msk.bf16.mxu1 %vm2302_vm4, %v16538_v37  ;;  %v4581_v44 = vrot.slane %v4579_v54, 4  ;;  %v14417_v42 = vld [vmem:[%s14657_s17 + $0x608] sm:$0x1]  ;;  %v4576_v48 = vsel %vm15439_vm7, %v4574_v14, %v4575_v25 }
 0x20c   : > { %v3625_v5 = vpop.f32.mrf.mxu1  ;;  %v4582_v21 = vrot.slane %v14417_v42, 5  ;;  %v4593_v25 = vrot.slane %v16604_v35, 5  ;;  %v16614_v14 = vcombine.low %v4573_v13, %v4576_v48  ;;  %v14421_v42 = vld [vmem:[%s14657_s17 + $0x60c] sm:$0xf]  ;;  %v16625_v13 = vcombine.low %v14415_v46, %v16549_v52 }
 0x20d   : > { %19927 = vst [vmem:[#allocation261_spill] sm:$0xff] %v16564_v31  ;;  %v16573_v28 = vadd.f32 %v13175_v36, %v3634_v33  ;;  %v3626_v27 = vadd.f32 %v3625_v5, %v15405_v26  ;;  %v5077_v3 = vpop.f32.mrf.mxu0  ;;  %v11554_v26 = vcombine.low %v16522_v53, %v16505_v6 }
 0x20e   : > { %v13046_v31 = vpop.f32.mrf.mxu1  ;;  %v4583_v5 = vsel %vm15439_vm7, %v4581_v44, %v4582_v21  ;;  %19930 = vst [vmem:[#allocation264_spill] sm:$0xff] %v16614_v14  ;;  %v11685_v21 = vrot.slane %v14421_v42, 9 }
 0x20f   : > { %v16580_v12 = vadd.f32 %v5074_v58, %v3626_v27  ;;  %v3637_v29 = vadd.f32 %v13046_v31, %v15418_v15  ;;  %v13179_v30 = vpop.f32.mrf.mxu0  ;;  %13274 = vmatmul.mubr.msk.bf16.gmra.mxu0 %vm2302_vm4, %v16569_v55  ;;  %v4580_v15 = vsel %vm15439_vm7, %v11684_v41, %v4579_v54  ;;  %v16595_v58 = vld [vmem:[%s14657_s17 + $0x610] sm:$0xf]  ;;  %v14420_v41 = vld [vmem:[%s14657_s17 + $0x614] sm:$0x1] }
 0x210   : > { %v3628_v36 = vpop.f32.mrf.mxu1  ;;  %13277 = vmatprep.mubr.msk.bf16.mxu0 %vm2302_vm4, %v11747_v59  ;;  %v4586_v31 = vrot.slane %v16595_v58, 5  ;;  %v4589_v54 = vrot.slane %v14420_v41, 5  ;;  %v16616_v44 = vcombine.low %v4580_v15, %v4583_v5 }
 0x211   : > { %v16598_v33 = vadd.f32 %v13176_v34, %v3637_v29  ;;  %v3629_v53 = vadd.f32 %v3628_v36, %v15434_v50  ;;  %v5090_v6 = vpop.f32.mrf.mxu0  ;;  %v14422_v36 = vld [vmem:[%s14657_s17 + $0x618] sm:$0xf] }
 0x212   : > { %v13049_v59 = vpop.f32.mrf.mxu1  ;;  %13144 = vmatmul.mubr.msk.bf16.gmra.mxu1 %vm2302_vm4, %v16578_v16  ;;  %19931 = vst [vmem:[#allocation265_spill] sm:$0xff] %v16616_v44  ;;  %v4588_v29 = vrot.slane %v4586_v31, 4  ;;  %v11686_v55 = vrot.slane %v14422_v36, 9  ;;  %v4587_v52 = vsel %vm15439_vm7, %v11685_v21, %v4586_v31  ;;  %v16653_v31 = vld [vmem:[%s14657_s17 + $0x634] sm:$0xf] }
 0x213   : > { %19929 = vst [vmem:[#allocation263_spill] sm:$0xff] %v16598_v33  ;;  %v16610_v34 = vadd.f32 %v5077_v3, %v3629_v53  ;;  %v3650_v50 = vadd.f32 %v13049_v59, %v15457_v43  ;;  %v13180_v9 = vpop.f32.mrf.mxu0  ;;  %13147 = vmatprep.mubr.msk.bf16.mxu1 %vm2302_vm4, %v11554_v26  ;;  %v4595_v43 = vrot.slane %v4593_v25, 4  ;;  %v14423_v59 = vld [vmem:[%s14657_s17 + $0x620] sm:$0x1] }
 0x214   : > { %v3641_v27 = vpop.f32.mrf.mxu1  ;;  %v4596_v41 = vrot.slane %v14423_v59, 5  ;;  %v4590_v46 = vsel %vm15439_vm7, %v4588_v29, %v4589_v54  ;;  %v4607_v54 = vrot.slane %v16653_v31, 5 }
 0x215   : > { %v16620_v33 = vadd.f32 %v13179_v30, %v3650_v50  ;;  %v3642_v3 = vadd.f32 %v3641_v27, %v15481_v32  ;;  %v5093_v53 = vpop.f32.mrf.mxu0  ;;  %v16633_v32 = vcombine.low %v14416_v7, %v16558_v19 }
 0x216   : > { %v13050_v26 = vpop.f32.mrf.mxu1 }
 0x217   : > { %v16627_v48 = vadd.f32 %v5090_v6, %v3642_v3  ;;  %v3653_v15 = vadd.f32 %v13050_v26, %v15505_v11  ;;  %v13183_v5 = vpop.f32.mrf.mxu0  ;;  %13278 = vmatmul.mubr.msk.bf16.gmra.mxu0 %vm2302_vm4, %v16614_v14  ;;  %19932 = vst [vmem:[#allocation266_spill] sm:$0xff] %v16633_v32  ;;  %v4594_v11 = vsel %vm15439_vm7, %v11686_v55, %v4593_v25  ;;  %v16644_v6 = vld [vmem:[%s14657_s17 + $0x628] sm:$0xf]  ;;  %v14426_v55 = vld [vmem:[%s14657_s17 + $0x62c] sm:$0x1] }
 0x218   : > { %v3644_v30 = vpop.f32.mrf.mxu1  ;;  %13281 = vmatprep.mubr.msk.bf16.mxu0 %vm2302_vm4, %v16616_v44  ;;  %v4600_v50 = vrot.slane %v16644_v6, 5  ;;  %v4597_v3 = vsel %vm15439_vm7, %v4595_v43, %v4596_v41  ;;  %v4603_v25 = vrot.slane %v14426_v55, 5  ;;  %v16664_v43 = vcombine.low %v4587_v52, %v4590_v46  ;;  %v14427_v26 = vld [vmem:[%s14657_s17 + $0x624] sm:$0xf]  ;;  %v14428_v44 = vld [vmem:[%s14657_s17 + $0x630] sm:$0xf] }
 0x219   : > { %v16647_v7 = vadd.f32 %v13180_v9, %v3653_v15  ;;  %v3645_v19 = vadd.f32 %v3644_v30, %v15531_v1  ;;  %v5106_v27 = vpop.f32.mrf.mxu0  ;;  %v16666_v41 = vcombine.low %v4594_v11, %v4597_v3  ;;  %v11687_v15 = vrot.slane %v14427_v26, 9 }
 0x21a   : > { %v13053_v21 = vpop.f32.mrf.mxu1  ;;  %13148 = vmatmul.mubr.msk.bf16.gmra.mxu1 %vm2302_vm4, %v16625_v13  ;;  %19934 = vst [vmem:[#allocation268_spill] sm:$0xff] %v16664_v43  ;;  %v4602_v30 = vrot.slane %v4600_v50, 4  ;;  %v11688_v14 = vrot.slane %v14428_v44, 9  ;;  %v16675_v52 = vcombine.low %v14421_v42, %v16595_v58  ;;  %v14430_v42 = vld [vmem:[%s14657_s17 + $0x640] sm:$0xf] }
 0x21b   : > { %v16659_v9 = vadd.f32 %v5093_v53, %v3645_v19  ;;  %v3666_v1 = vadd.f32 %v13053_v21, %v15547_v23  ;;  %v13184_v29 = vpop.f32.mrf.mxu0  ;;  %13151 = vmatprep.mubr.msk.bf16.mxu1 %vm2302_vm4, %v16633_v32  ;;  %19935 = vst [vmem:[#allocation269_spill] sm:$0xff] %v16666_v41  ;;  %v4609_v19 = vrot.slane %v4607_v54, 4  ;;  %v14429_v21 = vld [vmem:[%s14657_s17 + $0x638] sm:$0x1] }
 0x21c   : > { %v3657_v59 = vpop.f32.mrf.mxu1  ;;  %v4604_v58 = vsel %vm15439_vm7, %v4602_v30, %v4603_v25 }
 0x21d   : > { %19933 = vst [vmem:[#allocation267_spill] sm:$0xff] %v16659_v9  ;;  %v16670_v55 = vadd.f32 %v13183_v5, %v3666_v1  ;;  %v3658_v53 = vadd.f32 %v3657_v59, %v15572_v2  ;;  %v5109_v23 = vpop.f32.mrf.mxu0  ;;  %v4610_v9 = vrot.slane %v14429_v21, 5  ;;  %v16683_v5 = vcombine.low %v14422_v36, %v16604_v35 }
 0x21e   : > { %v13054_v32 = vpop.f32.mrf.mxu1  ;;  %v4601_v1 = vsel %vm15439_vm7, %v11687_v15, %v4600_v50  ;;  %v4608_v36 = vsel %vm15439_vm7, %v11688_v14, %v4607_v54  ;;  %v14431_v15 = vld [vmem:[%s14657_s17 + $0x644] sm:$0x1] }
 0x21f   : > { %v16677_v46 = vadd.f32 %v5106_v27, %v3658_v53  ;;  %v3669_v11 = vadd.f32 %v13054_v32, %v15588_v17  ;;  %v13187_v3 = vpop.f32.mrf.mxu0  ;;  %13282 = vmatmul.mubr.msk.bf16.gmra.mxu0 %vm2302_vm4, %v16664_v43  ;;  %v4614_v17 = vrot.slane %v14430_v42, 5  ;;  %v4611_v59 = vsel %vm15439_vm7, %v4609_v19, %v4610_v9  ;;  %v14432_v9 = vld [vmem:[%s14657_s17 + $0x63c] sm:$0xf] }
 0x220   : > { %v3660_v2 = vpop.f32.mrf.mxu1  ;;  %13285 = vmatprep.mubr.msk.bf16.mxu0 %vm2302_vm4, %v16666_v41  ;;  %v4617_v30 = vrot.slane %v14431_v15, 5  ;;  %v16709_v54 = vcombine.low %v4608_v36, %v4611_v59  ;;  %v11689_v19 = vrot.slane %v14432_v9, 9  ;;  %v16724_v36 = vcombine.low %v14428_v44, %v16653_v31 }
 0x221   : > { %v16692_v32 = vadd.f32 %v13184_v29, %v3669_v11  ;;  %v3661_v27 = vadd.f32 %v3660_v2, %v15610_v4  ;;  %v5122_v35 = vpop.f32.mrf.mxu0  ;;  %v16706_v4 = vcombine.low %v4601_v1, %v4604_v58  ;;  %v4616_v21 = vrot.slane %v4614_v17, 4 }
 0x222   : > { %v13057_v53 = vpop.f32.mrf.mxu1  ;;  %13152 = vmatmul.mubr.msk.bf16.gmra.mxu1 %vm2302_vm4, %v16675_v52  ;;  %19937 = vst [vmem:[#allocation271_spill] sm:$0xff] %v16709_v54 }
 0x223   : > { %v16701_v50 = vadd.f32 %v5109_v23, %v3661_v27  ;;  %v3682_v25 = vadd.f32 %v13057_v53, %v15623_v20  ;;  %v13188_v29 = vpop.f32.mrf.mxu0  ;;  %13155 = vmatprep.mubr.msk.bf16.mxu1 %vm2302_vm4, %v16683_v5  ;;  %19936 = vst [vmem:[#allocation270_spill] sm:$0xff] %v16706_v4  ;;  %v16716_v27 = vcombine.low %v14427_v26, %v16644_v6 }
 0x224   : > { %v3673_v14 = vpop.f32.mrf.mxu1  ;;  %v4618_v6 = vsel %vm15439_vm7, %v4616_v21, %v4617_v30 }
 0x225   : > { %v16712_v11 = vadd.f32 %v13187_v3, %v3682_v25  ;;  %v3674_v23 = vadd.f32 %v3673_v14, %v15643_v57  ;;  %v5125_v2 = vpop.f32.mrf.mxu0  ;;  %v4615_v57 = vsel %vm15439_vm7, %v11689_v19, %v4614_v17  ;;  %v16747_v19 = vcombine.low %v14432_v9, %v14430_v42 }
 0x226   : > { %v13058_v20 = vpop.f32.mrf.mxu1  ;;  %v16742_v17 = vcombine.low %v4615_v57, %v4618_v6 }
 0x227   : > { %v16718_v53 = vadd.f32 %v5122_v35, %v3674_v23  ;;  %v3685_v1 = vadd.f32 %v13058_v20, %v15659_v51  ;;  %v13191_v58 = vpop.f32.mrf.mxu0  ;;  %13286 = vmatmul.mubr.msk.bf16.gmra.mxu0 %vm2302_vm4, %v16706_v4  ;;  %v19939_v20 = vld [vmem:[#allocation10_spill] sm:$0xff]  ;;  %v19954_v4 = vld [vmem:[#allocation88_spill] sm:$0xff] }
 0x228   : > { %v3676_v3 = vpop.f32.mrf.mxu1  ;;  %13289 = vmatprep.mubr.msk.bf16.mxu0 %vm2302_vm4, %v16709_v54  ;;  %19938 = vst [vmem:[#allocation272_spill] sm:$0xff] %v16742_v17 }
 0x229   : > { %v16732_v26 = vadd.f32 %v13188_v29, %v3685_v1  ;;  %v3677_v51 = vadd.f32 %v3676_v3, %v15681_v56  ;;  %v5138_v35 = vpop.f32.mrf.mxu0  ;;  %v19941_v3 = vld [vmem:[#allocation124_spill] sm:$0xff] }
 0x22a   : > { %v13061_v59 = vpop.f32.mrf.mxu1  ;;  %13156 = vmatmul.mubr.msk.bf16.gmra.mxu1 %vm2302_vm4, %v16716_v27 }
 0x22b   : > { %v16737_v44 = vadd.f32 %v5125_v2, %v3677_v51  ;;  %v3698_v31 = vadd.f32 %v13061_v59, %v15697_v62  ;;  %v13192_v25 = vpop.f32.mrf.mxu0  ;;  %13159 = vmatprep.mubr.msk.bf16.mxu1 %vm2302_vm4, %v16724_v36  ;;  %v19942_v51 = vld [vmem:[#allocation81_spill] sm:$0xff] }
 0x22c   : > { %v3689_v15 = vpop.f32.mrf.mxu1 }
 0x22d   : > { %v16744_v29 = vadd.f32 %v13191_v58, %v3698_v31  ;;  %v3690_v56 = vadd.f32 %v3689_v15, %v15722_v8  ;;  %v5141_v30 = vpop.f32.mrf.mxu0  ;;  %v19940_v8 = vld [vmem:[#allocation121_spill] sm:$0xff]  ;;  %v19944_v31 = vld [vmem:[#allocation127_spill] sm:$0xff] }
 0x22e   : > { %v13062_v14 = vpop.f32.mrf.mxu1 }
 0x22f   : > { %v16749_v21 = vadd.f32 %v5138_v35, %v3690_v56  ;;  %v3701_v23 = vadd.f32 %v13062_v14, %v15738_v0  ;;  %v13195_v62 = vpop.f32.mrf.mxu0  ;;  %13290 = vmatmul.mubr.msk.bf16.gmra.mxu0 %vm2302_vm4, %v16742_v17  ;;  %v8198_v56 = vsel %vm2495_vm0, %v16154_v61, 0  ;;  %v16772_v14 = vld [vmem:[%s14657_s17 + $0x60] sm:$0xf] }
 0x230   : > { %v3692_v2 = vpop.f32.mrf.mxu1  ;;  %13425 = vmatprep.mubr.msk.bf16.mxu0 %vm2302_vm4, %v19939_v20  ;;  %v19946_v20 = vld [vmem:[#allocation132_spill] sm:$0xff]  ;;  %v6424_v61 = vshrl.u32 %v16772_v14, 16 }
 0x231   : > { %v16756_v1 = vadd.f32 %v13192_v25, %v3701_v23  ;;  %v3693_v58 = vadd.f32 %v3692_v2, %v19940_v8  ;;  %v5154_v42 = vpop.f32.mrf.mxu0  ;;  %v16775_v23 = vld [vmem:[%s14657_s17 + $0x64] sm:$0xf] }
 0x232   : > { %v13065_v9 = vpop.f32.mrf.mxu1  ;;  %13160 = vmatmul.mubr.msk.bf16.gmra.mxu1 %vm2302_vm4, %v16747_v19 }
 0x233   : > { %v16761_v0 = vadd.f32 %v5141_v30, %v3693_v58  ;;  %v3714_v57 = vadd.f32 %v13065_v9, %v19941_v3  ;;  %v13196_v6 = vpop.f32.mrf.mxu0  ;;  %13295 = vmatprep.mubr.msk.bf16.mxu1 %vm2302_vm4, %v19942_v51  ;;  %v19947_v9 = vld [vmem:[#allocation12_spill] sm:$0xff]  ;;  %v6427_v51 = vshll.u32 %v16772_v14, 16 }
 0x234   : > { %v3705_v35 = vpop.f32.mrf.mxu1 }
 0x235   : > { %v16766_v59 = vadd.f32 %v13195_v62, %v3714_v57  ;;  %v3706_v25 = vadd.f32 %v3705_v35, %v19944_v31  ;;  %v5157_v15 = vpop.f32.mrf.mxu0  ;;  %v7456_v62 = vsel %vm2495_vm0, %v16141_v18, 0  ;;  %v19948_v57 = vld [vmem:[#allocation14_spill] sm:$0xff]  ;;  %v6433_v35 = vshll.u32 %v16775_v23, 16 }
 0x236   : > { %v13066_v30 = vpop.f32.mrf.mxu1 }
 0x237   : > { %19943 = vst [vmem:[#allocation10_spill] sm:$0xff] %v16766_v59  ;;  %v16777_v2 = vadd.f32 %v5154_v42, %v3706_v25  ;;  %v3717_v8 = vadd.f32 %v13066_v30, %v19946_v20  ;;  %v13199_v58 = vpop.f32.mrf.mxu0  ;;  %13426 = vmatmul.mubr.msk.bf16.vlgmr.msra.gmra.mxu0 %vm2302_vm4, %v19947_v9  ;;  %v6437_v42 = vshrl.u32 %v16775_v23, 16  ;;  %v19950_v25 = vld [vmem:[#allocation135_spill] sm:$0xff]  ;;  %v19951_v9 = vld [vmem:[#allocation84_spill] sm:$0xff]  ;;  %v6435_v43 = vrot.slane %v6433_v35, 5 }
 0x238   : > { %v3708_v3 = vpop.f32.mrf.mxu1  ;;  %13684 = vmatpush3.bf16.msra.mxu0 %v8198_v56  ;;  %13429 = vmatprep.mubr.msk.bf16.mxu0 %vm2302_vm4, %v19948_v57  ;;  %v19953_v57 = vld [vmem:[#allocation140_spill] sm:$0xff]  ;;  %v354_v59 = vld [vmem:[%s14657_s17 + $0x68] sm:$0x1] }
 0x239   : > { %19945 = vst [vmem:[#allocation121_spill] sm:$0xff] %v16777_v2  ;;  %v16790_v31 = vadd.f32 %v13196_v6, %v3717_v8  ;;  %v3709_v30 = vadd.f32 %v3708_v3, %v19950_v25  ;;  %v5170_v20 = vpop.f32.mrf.mxu0  ;;  %v6426_v6 = vrot.slane %v6424_v61, 4  ;;  %v6429_v8 = vrot.slane %v6427_v51, 5  ;;  %v19960_v61 = vld [vmem:[#allocation18_spill] sm:$0xff] }
 0x23a   : > { %v13069_v18 = vpop.f32.mrf.mxu1  ;;  %13296 = vmatmul.mubr.msk.bf16.vlgmr.msra.gmra.mxu1 %vm2302_vm4, %v19951_v9  ;;  %v6439_v3 = vrot.slane %v6437_v42, 4 }
 0x23b   : > { %19949 = vst [vmem:[#allocation124_spill] sm:$0xff] %v16790_v31  ;;  %v16795_v56 = vadd.f32 %v5157_v15, %v3709_v30  ;;  %v3730_v17 = vadd.f32 %v13069_v18, %v19953_v57  ;;  %13554 = vmatpush3.bf16.msra.mxu1 %v7456_v62  ;;  %v13200_v54 = vpop.f32.mrf.mxu0  ;;  %13299 = vmatprep.mubr.msk.bf16.mxu1 %vm2302_vm4, %v19954_v4  ;;  %v19958_v57 = vld [vmem:[#allocation148_spill] sm:$0xff] }
 0x23c   : > { %v3721_v41 = vpop.f32.mrf.mxu1  ;;  %v6430_v51 = vor.u32 %v6429_v8, %v6426_v6 }
 0x23d   : > { %19952 = vst [vmem:[#allocation81_spill] sm:$0xff] %v16795_v56  ;;  %v16800_v25 = vadd.f32 %v13199_v58, %v3730_v17  ;;  %v3722_v31 = vadd.f32 %v3721_v41, %v19956_v40  ;;  %v5173_v2 = vpop.f32.mrf.mxu0  ;;  %v19959_v56 = vld [vmem:[#allocation16_spill] sm:$0xff]  ;;  %v6440_v17 = vor.u32 %v6439_v3, %v6435_v43  ;;  %v6443_v58 = vshll.u32 %v354_v59, 16  ;;  %v19962_v40 = vld [vmem:[#allocation151_spill] sm:$0xff] }
 0x23e   : > { %v13070_v15 = vpop.f32.mrf.mxu1  ;;  %v6431_v8 = vrot.slane %v6430_v51, 4 }
 0x23f   : > { %19955 = vst [vmem:[#allocation127_spill] sm:$0xff] %v16800_v25  ;;  %v16804_v30 = vadd.f32 %v5170_v20, %v3722_v31  ;;  %v3733_v62 = vadd.f32 %v13070_v15, %v19958_v57  ;;  %v13203_v18 = vpop.f32.mrf.mxu0  ;;  %13430 = vmatmul.mubr.msk.bf16.gmra.mxu0 %vm2302_vm4, %v19959_v56  ;;  %v19963_v20 = vld [vmem:[#allocation90_spill] sm:$0xff]  ;;  %v6441_v59 = vrot.slane %v6440_v17, 4 }
 0x240   : > { %v3724_v4 = vpop.f32.mrf.mxu1  ;;  %13433 = vmatprep.mubr.msk.bf16.mxu0 %vm2302_vm4, %v19960_v61  ;;  %v19965_v57 = vld [vmem:[#allocation154_spill] sm:$0xff] }
 0x241   : > { %19957 = vst [vmem:[#allocation132_spill] sm:$0xff] %v16804_v30  ;;  %v16811_v42 = vadd.f32 %v13200_v54, %v3733_v62  ;;  %v3725_v41 = vadd.f32 %v3724_v4, %v19962_v40  ;;  %v5186_v35 = vpop.f32.mrf.mxu0  ;;  %v19966_v25 = vld [vmem:[#allocation94_spill] sm:$0xff]  ;;  %v6445_v54 = vrot.slane %v6443_v58, 5 }
 0x242   : > { %v13073_v31 = vpop.f32.mrf.mxu1  ;;  %13300 = vmatmul.mubr.msk.bf16.gmra.mxu1 %vm2302_vm4, %v19963_v20  ;;  %v20156_v20 = vld [vmem:[#allocation202_spill] sm:$0xff] }
 0x243   : > { %19961 = vst [vmem:[#allocation135_spill] sm:$0xff] %v16811_v42  ;;  %v16816_v15 = vadd.f32 %v5173_v2, %v3725_v41  ;;  %v3746_v56 = vadd.f32 %v13073_v31, %v19965_v57  ;;  %v13204_v30 = vpop.f32.mrf.mxu0  ;;  %13303 = vmatprep.mubr.msk.bf16.mxu1 %vm2302_vm4, %v19966_v25  ;;  %v19969_v31 = vld [vmem:[#allocation20_spill] sm:$0xff]  ;;  %v384_v25 = vld [vmem:[%s14657_s17 + $0x140] sm:$0x1] }
 0x244   : > { %v3737_v6 = vpop.f32.mrf.mxu1 }
 0x245   : > { %19964 = vst [vmem:[#allocation84_spill] sm:$0xff] %v16816_v15  ;;  %v16821_v3 = vadd.f32 %v13203_v18, %v3746_v56  ;;  %v3738_v4 = vadd.f32 %v3737_v6, %v15943_v49  ;;  %v5189_v62 = vpop.f32.mrf.mxu0  ;;  %v19970_v15 = vld [vmem:[#allocation22_spill] sm:$0xff]  ;;  %v6436_v56 = vsel %vm14678_vm3, %v6431_v8, %v6435_v43  ;;  %v6446_v49 = vsel %vm14678_vm3, %v6441_v59, %v6445_v54 }
 0x246   : > { %v13074_v40 = vpop.f32.mrf.mxu1  ;;  %v16845_v43 = vcombine.low %v6436_v56, %v6446_v49  ;;  %v19979_v59 = vld [vmem:[#allocation170_spill] sm:$0xff] }
 0x247   : > { %19967 = vst [vmem:[#allocation140_spill] sm:$0xff] %v16821_v3  ;;  %v16824_v61 = vadd.f32 %v5186_v35, %v3738_v4  ;;  %v3749_v2 = vadd.f32 %v13074_v40, %v15959_v63  ;;  %v13207_v41 = vpop.f32.mrf.mxu0  ;;  %13434 = vmatmul.mubr.msk.bf16.gmra.mxu0 %vm2302_vm4, %v19969_v31  ;;  %v19973_v35 = vld [vmem:[#allocation96_spill] sm:$0xff]  ;;  %v19975_v4 = vld [vmem:[#allocation167_spill] sm:$0xff] }
 0x248   : > { %v3740_v57 = vpop.f32.mrf.mxu1  ;;  %13437 = vmatprep.mubr.msk.bf16.mxu0 %vm2302_vm4, %v19970_v15  ;;  %v19976_v31 = vld [vmem:[#allocation99_spill] sm:$0xff]  ;;  %19977 = vst [vmem:[#allocation154_spill] sm:$0xff] %v16845_v43 }
 0x249   : > { %19968 = vst [vmem:[#allocation143_spill] sm:$0xff] %v16824_v61  ;;  %v16835_v18 = vadd.f32 %v13204_v30, %v3749_v2  ;;  %v3741_v17 = vadd.f32 %v3740_v57, %v15981_v60  ;;  %v5202_v58 = vpop.f32.mrf.mxu0  ;;  %v16852_v57 = vcombine.low %v16772_v14, %v16775_v23 }
 0x24a   : > { %v13077_v63 = vpop.f32.mrf.mxu1  ;;  %13304 = vmatmul.mubr.msk.bf16.gmra.mxu1 %vm2302_vm4, %v19973_v35 }
 0x24b   : > { %19972 = vst [vmem:[#allocation148_spill] sm:$0xff] %v16835_v18  ;;  %v16840_v6 = vadd.f32 %v5189_v62, %v3741_v17  ;;  %v3762_v40 = vadd.f32 %v13077_v63, %v19975_v4  ;;  %v13208_v15 = vpop.f32.mrf.mxu0  ;;  %13307 = vmatprep.mubr.msk.bf16.mxu1 %vm2302_vm4, %v19976_v31  ;;  %19980 = vst [vmem:[#allocation170_spill] sm:$0xff] %v16852_v57  ;;  %v19982_v17 = vld [vmem:[#allocation175_spill] sm:$0xff]  ;;  %v20000_v31 = vld [vmem:[#allocation110_spill] sm:$0xff] }
 0x24c   : > { %v3753_v8 = vpop.f32.mrf.mxu1 }
 0x24d   : > { %19974 = vst [vmem:[#allocation151_spill] sm:$0xff] %v16840_v6  ;;  %v16847_v30 = vadd.f32 %v13207_v41, %v3762_v40  ;;  %v3754_v60 = vadd.f32 %v3753_v8, %v19979_v59  ;;  %v5205_v54 = vpop.f32.mrf.mxu0  ;;  %v19983_v41 = vld [vmem:[#allocation24_spill] sm:$0xff]  ;;  %v19985_v40 = vld [vmem:[#allocation178_spill] sm:$0xff]  ;;  %v19987_v59 = vld [vmem:[#allocation181_spill] sm:$0xff] }
 0x24e   : > { %v13078_v2 = vpop.f32.mrf.mxu1 }
 0x24f   : > { %19978 = vst [vmem:[#allocation167_spill] sm:$0xff] %v16847_v30  ;;  %v16854_v62 = vadd.f32 %v5202_v58, %v3754_v60  ;;  %v3765_v63 = vadd.f32 %v13078_v2, %v19982_v17  ;;  %v13211_v4 = vpop.f32.mrf.mxu0  ;;  %13438 = vmatmul.mubr.msk.bf16.gmra.mxu0 %vm2302_vm4, %v16845_v43  ;;  %v19988_v17 = vld [vmem:[#allocation104_spill] sm:$0xff] }
 0x250   : > { %v3756_v56 = vpop.f32.mrf.mxu1  ;;  %13441 = vmatprep.mubr.msk.bf16.mxu0 %vm2302_vm4, %v19983_v41 }
 0x251   : > { %19981 = vst [vmem:[#allocation273_spill] sm:$0xff] %v16854_v62  ;;  %v16861_v49 = vadd.f32 %v13208_v15, %v3765_v63  ;;  %v3757_v8 = vadd.f32 %v3756_v56, %v19985_v40  ;;  %v5218_v14 = vpop.f32.mrf.mxu0  ;;  %v19990_v15 = vld [vmem:[#allocation184_spill] sm:$0xff]  ;;  %v16875_v56 = vld [vmem:[%s14657_s17 + $0x138] sm:$0xf]  ;;  %v16878_v40 = vld [vmem:[%s14657_s17 + $0x13c] sm:$0xf] }
 0x252   : > { %v13081_v23 = vpop.f32.mrf.mxu1  ;;  %13308 = vmatmul.mubr.msk.bf16.gmra.mxu1 %vm2302_vm4, %v16852_v57 }
 0x253   : > { %19984 = vst [vmem:[#allocation175_spill] sm:$0xff] %v16861_v49  ;;  %v16866_v58 = vadd.f32 %v5205_v54, %v3757_v8  ;;  %v3778_v60 = vadd.f32 %v13081_v23, %v19987_v59  ;;  %v13212_v2 = vpop.f32.mrf.mxu0  ;;  %13311 = vmatprep.mubr.msk.bf16.mxu1 %vm2302_vm4, %v19988_v17  ;;  %v19992_v54 = vld [vmem:[#allocation189_spill] sm:$0xff]  ;;  %v19993_v59 = vld [vmem:[#allocation26_spill] sm:$0xff] }
 0x254   : > { %v3769_v43 = vpop.f32.mrf.mxu1 }
 0x255   : > { %19986 = vst [vmem:[#allocation24_spill] sm:$0xff] %v16866_v58  ;;  %v16871_v62 = vadd.f32 %v13211_v4, %v3778_v60  ;;  %v3770_v63 = vadd.f32 %v3769_v43, %v19990_v15  ;;  %v5221_v41 = vpop.f32.mrf.mxu0  ;;  %v19994_v58 = vld [vmem:[#allocation28_spill] sm:$0xff]  ;;  %v6448_v43 = vshrl.u32 %v16875_v56, 16  ;;  %v6451_v4 = vshll.u32 %v16875_v56, 16 }
 0x256   : > { %v13082_v49 = vpop.f32.mrf.mxu1  ;;  %v6461_v60 = vshrl.u32 %v16878_v40, 16  ;;  %v6457_v15 = vshll.u32 %v16878_v40, 16 }
 0x257   : > { %19989 = vst [vmem:[#allocation178_spill] sm:$0xff] %v16871_v62  ;;  %v16880_v30 = vadd.f32 %v5218_v14, %v3770_v63  ;;  %v3781_v8 = vadd.f32 %v13082_v49, %v19992_v54  ;;  %v13215_v23 = vpop.f32.mrf.mxu0  ;;  %13442 = vmatmul.mubr.msk.bf16.gmra.mxu0 %vm2302_vm4, %v19993_v59  ;;  %v19996_v63 = vld [vmem:[#allocation192_spill] sm:$0xff]  ;;  %v19997_v59 = vld [vmem:[#allocation106_spill] sm:$0xff]  ;;  %v6450_v61 = vrot.slane %v6448_v43, 4 }
 0x258   : > { %v3772_v17 = vpop.f32.mrf.mxu1  ;;  %13445 = vmatprep.mubr.msk.bf16.mxu0 %vm2302_vm4, %v19994_v58  ;;  %v19999_v58 = vld [vmem:[#allocation197_spill] sm:$0xff]  ;;  %v20006_v43 = vld [vmem:[#allocation32_spill] sm:$0xff] }
 0x259   : > { %19991 = vst [vmem:[#allocation181_spill] sm:$0xff] %v16880_v30  ;;  %v16891_v14 = vadd.f32 %v13212_v2, %v3781_v8  ;;  %v3773_v49 = vadd.f32 %v3772_v17, %v19996_v63  ;;  %v5234_v54 = vpop.f32.mrf.mxu0  ;;  %v6453_v2 = vrot.slane %v6451_v4, 5  ;;  %v6459_v8 = vrot.slane %v6457_v15, 5  ;;  %v20002_v63 = vld [vmem:[#allocation200_spill] sm:$0xff] }
 0x25a   : > { %v13085_v30 = vpop.f32.mrf.mxu1  ;;  %13312 = vmatmul.mubr.msk.bf16.gmra.mxu1 %vm2302_vm4, %v19997_v59 }
 0x25b   : > { %19995 = vst [vmem:[#allocation104_spill] sm:$0xff] %v16891_v14  ;;  %v16896_v62 = vadd.f32 %v5221_v41, %v3773_v49  ;;  %v3794_v6 = vadd.f32 %v13085_v30, %v19999_v58  ;;  %v13216_v57 = vpop.f32.mrf.mxu0  ;;  %13315 = vmatprep.mubr.msk.bf16.mxu1 %vm2302_vm4, %v20000_v31  ;;  %v6463_v14 = vrot.slane %v6461_v60, 4  ;;  %v20004_v49 = vld [vmem:[#allocation205_spill] sm:$0xff]  ;;  %v6454_v4 = vor.u32 %v6453_v2, %v6450_v61 }
 0x25c   : > { %v3785_v18 = vpop.f32.mrf.mxu1 }
 0x25d   : > { %19998 = vst [vmem:[#allocation184_spill] sm:$0xff] %v16896_v62  ;;  %v16901_v17 = vadd.f32 %v13215_v23, %v3794_v6  ;;  %v3786_v3 = vadd.f32 %v3785_v18, %v20002_v63  ;;  %v5237_v35 = vpop.f32.mrf.mxu0  ;;  %v20005_v62 = vld [vmem:[#allocation30_spill] sm:$0xff]  ;;  %v6464_v6 = vor.u32 %v6463_v14, %v6459_v8  ;;  %v6467_v23 = vshll.u32 %v384_v25, 16  ;;  %v20008_v18 = vld [vmem:[#allocation208_spill] sm:$0xff] }
 0x25e   : > { %v13086_v59 = vpop.f32.mrf.mxu1  ;;  %v6455_v14 = vrot.slane %v6454_v4, 4 }
 0x25f   : > { %20001 = vst [vmem:[#allocation189_spill] sm:$0xff] %v16901_v17  ;;  %v16905_v41 = vadd.f32 %v5234_v54, %v3786_v3  ;;  %v3797_v30 = vadd.f32 %v13086_v59, %v20004_v49  ;;  %v13219_v58 = vpop.f32.mrf.mxu0  ;;  %13446 = vmatmul.mubr.msk.bf16.gmra.mxu0 %vm2302_vm4, %v20005_v62  ;;  %v20009_v54 = vld [vmem:[#allocation112_spill] sm:$0xff]  ;;  %v20011_v49 = vld [vmem:[#allocation211_spill] sm:$0xff]  ;;  %v6465_v25 = vrot.slane %v6464_v6, 4  ;;  %v20020_v6 = vld [vmem:[#allocation222_spill] sm:$0xff] }
 0x260   : > { %v3788_v31 = vpop.f32.mrf.mxu1  ;;  %13449 = vmatprep.mubr.msk.bf16.mxu0 %vm2302_vm4, %v20006_v43  ;;  %v20012_v17 = vld [vmem:[#allocation116_spill] sm:$0xff] }
 0x261   : > { %20003 = vst [vmem:[#allocation192_spill] sm:$0xff] %v16905_v41  ;;  %v16912_v60 = vadd.f32 %v13216_v57, %v3797_v30  ;;  %v3789_v15 = vadd.f32 %v3788_v31, %v20008_v18  ;;  %v5250_v63 = vpop.f32.mrf.mxu0  ;;  %v6469_v57 = vrot.slane %v6467_v23, 5  ;;  %v20014_v31 = vld [vmem:[#allocation214_spill] sm:$0xff] }
 0x262   : > { %v13089_v3 = vpop.f32.mrf.mxu1  ;;  %13316 = vmatmul.mubr.msk.bf16.gmra.mxu1 %vm2302_vm4, %v20009_v54  ;;  %v414_v54 = vld [vmem:[%s14657_s17 + $0x218] sm:$0x1] }
 0x263   : > { %20007 = vst [vmem:[#allocation197_spill] sm:$0xff] %v16912_v60  ;;  %v16917_v59 = vadd.f32 %v5237_v35, %v3789_v15  ;;  %v3810_v62 = vadd.f32 %v13089_v3, %v20011_v49  ;;  %v13220_v41 = vpop.f32.mrf.mxu0  ;;  %13319 = vmatprep.mubr.msk.bf16.mxu1 %vm2302_vm4, %v20012_v17  ;;  %v20016_v35 = vld [vmem:[#allocation219_spill] sm:$0xff]  ;;  %v20017_v3 = vld [vmem:[#allocation34_spill] sm:$0xff]  ;;  %v20018_v17 = vld [vmem:[#allocation36_spill] sm:$0xff] }
 0x264   : > { %v3801_v61 = vpop.f32.mrf.mxu1 }
 0x265   : > { %20010 = vst [vmem:[#allocation200_spill] sm:$0xff] %v16917_v59  ;;  %v16922_v2 = vadd.f32 %v13219_v58, %v3810_v62  ;;  %v3802_v30 = vadd.f32 %v3801_v61, %v20014_v31  ;;  %v5253_v18 = vpop.f32.mrf.mxu0  ;;  %v6460_v62 = vsel %vm14678_vm3, %v6455_v14, %v6459_v8  ;;  %v6470_v58 = vsel %vm14678_vm3, %v6465_v25, %v6469_v57  ;;  %v20021_v61 = vld [vmem:[#allocation118_spill] sm:$0xff] }
 0x266   : > { %v13090_v43 = vpop.f32.mrf.mxu1  ;;  %v16946_v8 = vcombine.low %v6460_v62, %v6470_v58  ;;  %v20027_v25 = vld [vmem:[#allocation230_spill] sm:$0xff] }
 0x267   : > { %20013 = vst [vmem:[#allocation205_spill] sm:$0xff] %v16922_v2  ;;  %v16925_v60 = vadd.f32 %v5250_v63, %v3802_v30  ;;  %v3813_v15 = vadd.f32 %v13090_v43, %v20016_v35  ;;  %v13223_v59 = vpop.f32.mrf.mxu0  ;;  %13450 = vmatmul.mubr.msk.bf16.gmra.mxu0 %vm2302_vm4, %v20017_v3  ;;  %v20023_v30 = vld [vmem:[#allocation227_spill] sm:$0xff]  ;;  %v20024_v3 = vld [vmem:[#allocation122_spill] sm:$0xff] }
 0x268   : > { %v3804_v49 = vpop.f32.mrf.mxu1  ;;  %13453 = vmatprep.mubr.msk.bf16.mxu0 %vm2302_vm4, %v20018_v17  ;;  %20025 = vst [vmem:[#allocation219_spill] sm:$0xff] %v16946_v8 }
 0x269   : > { %20015 = vst [vmem:[#allocation208_spill] sm:$0xff] %v16925_v60  ;;  %v16936_v4 = vadd.f32 %v13220_v41, %v3813_v15  ;;  %v3805_v23 = vadd.f32 %v3804_v49, %v20020_v6  ;;  %v5266_v63 = vpop.f32.mrf.mxu0  ;;  %v16953_v6 = vcombine.low %v16875_v56, %v16878_v40 }
 0x26a   : > { %v13093_v43 = vpop.f32.mrf.mxu1  ;;  %13320 = vmatmul.mubr.msk.bf16.gmra.mxu1 %vm2302_vm4, %v20021_v61 }
 0x26b   : > { %20019 = vst [vmem:[#allocation211_spill] sm:$0xff] %v16936_v4  ;;  %v16941_v31 = vadd.f32 %v5253_v18, %v3805_v23  ;;  %v3826_v35 = vadd.f32 %v13093_v43, %v20023_v30  ;;  %v13224_v17 = vpop.f32.mrf.mxu0  ;;  %13323 = vmatprep.mubr.msk.bf16.mxu1 %vm2302_vm4, %v20024_v3  ;;  %20028 = vst [vmem:[#allocation227_spill] sm:$0xff] %v16953_v6  ;;  %v20030_v23 = vld [vmem:[#allocation234_spill] sm:$0xff]  ;;  %v20048_v3 = vld [vmem:[#allocation137_spill] sm:$0xff] }
 0x26c   : > { %v3817_v14 = vpop.f32.mrf.mxu1 }
 0x26d   : > { %20022 = vst [vmem:[#allocation214_spill] sm:$0xff] %v16941_v31  ;;  %v16948_v41 = vadd.f32 %v13223_v59, %v3826_v35  ;;  %v3818_v57 = vadd.f32 %v3817_v14, %v20027_v25  ;;  %v5269_v15 = vpop.f32.mrf.mxu0  ;;  %v20031_v59 = vld [vmem:[#allocation38_spill] sm:$0xff]  ;;  %v20033_v35 = vld [vmem:[#allocation237_spill] sm:$0xff] }
 0x26e   : > { %v13094_v49 = vpop.f32.mrf.mxu1  ;;  %v20035_v25 = vld [vmem:[#allocation241_spill] sm:$0xff] }
 0x26f   : > { %20026 = vst [vmem:[#allocation222_spill] sm:$0xff] %v16948_v41  ;;  %v16955_v18 = vadd.f32 %v5266_v63, %v3818_v57  ;;  %v3829_v43 = vadd.f32 %v13094_v49, %v20030_v23  ;;  %v13227_v30 = vpop.f32.mrf.mxu0  ;;  %13454 = vmatmul.mubr.msk.bf16.gmra.mxu0 %vm2302_vm4, %v16946_v8  ;;  %v20036_v23 = vld [vmem:[#allocation129_spill] sm:$0xff] }
 0x270   : > { %v3820_v62 = vpop.f32.mrf.mxu1  ;;  %13457 = vmatprep.mubr.msk.bf16.mxu0 %vm2302_vm4, %v20031_v59 }
 0x271   : > { %20029 = vst [vmem:[#allocation230_spill] sm:$0xff] %v16955_v18  ;;  %v16962_v58 = vadd.f32 %v13224_v17, %v3829_v43  ;;  %v3821_v14 = vadd.f32 %v3820_v62, %v20033_v35  ;;  %v5282_v56 = vpop.f32.mrf.mxu0  ;;  %v20038_v17 = vld [vmem:[#allocation242_spill] sm:$0xff]  ;;  %v16976_v62 = vld [vmem:[%s14657_s17 + $0x210] sm:$0xf]  ;;  %v16979_v35 = vld [vmem:[%s14657_s17 + $0x214] sm:$0xf] }
 0x272   : > { %v13097_v40 = vpop.f32.mrf.mxu1  ;;  %13324 = vmatmul.mubr.msk.bf16.gmra.mxu1 %vm2302_vm4, %v16953_v6 }
 0x273   : > { %20032 = vst [vmem:[#allocation234_spill] sm:$0xff] %v16962_v58  ;;  %v16967_v63 = vadd.f32 %v5269_v15, %v3821_v14  ;;  %v3842_v57 = vadd.f32 %v13097_v40, %v20035_v25  ;;  %v13228_v49 = vpop.f32.mrf.mxu0  ;;  %13327 = vmatprep.mubr.msk.bf16.mxu1 %vm2302_vm4, %v20036_v23  ;;  %v20040_v15 = vld [vmem:[#allocation244_spill] sm:$0xff] }
 0x274   : > { %v3833_v8 = vpop.f32.mrf.mxu1  ;;  %v20041_v25 = vld [vmem:[#allocation40_spill] sm:$0xff] }
 0x275   : > { %20034 = vst [vmem:[#allocation38_spill] sm:$0xff] %v16967_v63  ;;  %v16972_v18 = vadd.f32 %v13227_v30, %v3842_v57  ;;  %v3834_v43 = vadd.f32 %v3833_v8, %v20038_v17  ;;  %v5285_v59 = vpop.f32.mrf.mxu0  ;;  %v20042_v63 = vld [vmem:[#allocation42_spill] sm:$0xff]  ;;  %v6472_v8 = vshrl.u32 %v16976_v62, 16  ;;  %v6475_v30 = vshll.u32 %v16976_v62, 16 }
 0x276   : > { %v13098_v58 = vpop.f32.mrf.mxu1  ;;  %v6485_v57 = vshrl.u32 %v16979_v35, 16  ;;  %v6481_v17 = vshll.u32 %v16979_v35, 16 }
 0x277   : > { %20037 = vst [vmem:[#allocation237_spill] sm:$0xff] %v16972_v18  ;;  %v16981_v41 = vadd.f32 %v5282_v56, %v3834_v43  ;;  %v3845_v14 = vadd.f32 %v13098_v58, %v20040_v15  ;;  %v13231_v40 = vpop.f32.mrf.mxu0  ;;  %13458 = vmatmul.mubr.msk.bf16.gmra.mxu0 %vm2302_vm4, %v20041_v25  ;;  %v20044_v43 = vld [vmem:[#allocation248_spill] sm:$0xff]  ;;  %v20045_v25 = vld [vmem:[#allocation131_spill] sm:$0xff]  ;;  %v6474_v60 = vrot.slane %v6472_v8, 4  ;;  %v20054_v8 = vld [vmem:[#allocation46_spill] sm:$0xff] }
 0x278   : > { %v3836_v23 = vpop.f32.mrf.mxu1  ;;  %13461 = vmatprep.mubr.msk.bf16.mxu0 %vm2302_vm4, %v20042_v63  ;;  %v20047_v63 = vld [vmem:[#allocation55_spill] sm:$0xff] }
 0x279   : > { %20039 = vst [vmem:[#allocation241_spill] sm:$0xff] %v16981_v41  ;;  %v16992_v56 = vadd.f32 %v13228_v49, %v3845_v14  ;;  %v3837_v58 = vadd.f32 %v3836_v23, %v20044_v43  ;;  %v5298_v15 = vpop.f32.mrf.mxu0  ;;  %v6477_v49 = vrot.slane %v6475_v30, 5  ;;  %v6483_v14 = vrot.slane %v6481_v17, 5  ;;  %v20050_v43 = vld [vmem:[#allocation57_spill] sm:$0xff] }
 0x27a   : > { %v13101_v41 = vpop.f32.mrf.mxu1  ;;  %13328 = vmatmul.mubr.msk.bf16.gmra.mxu1 %vm2302_vm4, %v20045_v25 }
 0x27b   : > { %20043 = vst [vmem:[#allocation129_spill] sm:$0xff] %v16992_v56  ;;  %v16997_v18 = vadd.f32 %v5285_v59, %v3837_v58  ;;  %v3858_v31 = vadd.f32 %v13101_v41, %v20047_v63  ;;  %v13232_v6 = vpop.f32.mrf.mxu0  ;;  %13331 = vmatprep.mubr.msk.bf16.mxu1 %vm2302_vm4, %v20048_v3  ;;  %v6487_v56 = vrot.slane %v6485_v57, 4  ;;  %v20052_v58 = vld [vmem:[#allocation59_spill] sm:$0xff]  ;;  %v6478_v30 = vor.u32 %v6477_v49, %v6474_v60 }
 0x27c   : > { %v3849_v4 = vpop.f32.mrf.mxu1 }
 0x27d   : > { %20046 = vst [vmem:[#allocation242_spill] sm:$0xff] %v16997_v18  ;;  %v17002_v23 = vadd.f32 %v13231_v40, %v3858_v31  ;;  %v3850_v2 = vadd.f32 %v3849_v4, %v20050_v43  ;;  %v5301_v61 = vpop.f32.mrf.mxu0  ;;  %v20053_v18 = vld [vmem:[#allocation44_spill] sm:$0xff]  ;;  %v6488_v31 = vor.u32 %v6487_v56, %v6483_v14  ;;  %v6491_v40 = vshll.u32 %v414_v54, 16  ;;  %v20056_v4 = vld [vmem:[#allocation61_spill] sm:$0xff] }
 0x27e   : > { %v13102_v25 = vpop.f32.mrf.mxu1  ;;  %v6479_v56 = vrot.slane %v6478_v30, 4 }
 0x27f   : > { %20049 = vst [vmem:[#allocation244_spill] sm:$0xff] %v17002_v23  ;;  %v17006_v59 = vadd.f32 %v5298_v15, %v3850_v2  ;;  %v3861_v41 = vadd.f32 %v13102_v25, %v20052_v58  ;;  %v13235_v63 = vpop.f32.mrf.mxu0  ;;  %13462 = vmatmul.mubr.msk.bf16.gmra.mxu0 %vm2302_vm4, %v20053_v18  ;;  %v20057_v15 = vld [vmem:[#allocation139_spill] sm:$0xff]  ;;  %v20059_v58 = vld [vmem:[#allocation62_spill] sm:$0xff]  ;;  %v20060_v23 = vld [vmem:[#allocation145_spill] sm:$0xff]  ;;  %v6489_v54 = vrot.slane %v6488_v31, 4 }
 0x280   : > { %v3852_v3 = vpop.f32.mrf.mxu1  ;;  %13465 = vmatprep.mubr.msk.bf16.mxu0 %vm2302_vm4, %v20054_v8  ;;  %v20068_v31 = vld [vmem:[#allocation68_spill] sm:$0xff] }
 0x281   : > { %20051 = vst [vmem:[#allocation248_spill] sm:$0xff] %v17006_v59  ;;  %v17013_v57 = vadd.f32 %v13232_v6, %v3861_v41  ;;  %v3853_v17 = vadd.f32 %v3852_v3, %v20056_v4  ;;  %v5314_v43 = vpop.f32.mrf.mxu0  ;;  %v6493_v6 = vrot.slane %v6491_v40, 5  ;;  %v20062_v3 = vld [vmem:[#allocation64_spill] sm:$0xff] }
 0x282   : > { %v13105_v2 = vpop.f32.mrf.mxu1  ;;  %13332 = vmatmul.mubr.msk.bf16.gmra.mxu1 %vm2302_vm4, %v20057_v15  ;;  %v444_v15 = vld [vmem:[%s14657_s17 + $0x2f0] sm:$0x1] }
 0x283   : > { %20055 = vst [vmem:[#allocation55_spill] sm:$0xff] %v17013_v57  ;;  %v17018_v25 = vadd.f32 %v5301_v61, %v3853_v17  ;;  %v3874_v18 = vadd.f32 %v13105_v2, %v20059_v58  ;;  %v13236_v59 = vpop.f32.mrf.mxu0  ;;  %13335 = vmatprep.mubr.msk.bf16.mxu1 %vm2302_vm4, %v20060_v23  ;;  %v20064_v61 = vld [vmem:[#allocation67_spill] sm:$0xff]  ;;  %v20065_v2 = vld [vmem:[#allocation48_spill] sm:$0xff]  ;;  %v20066_v23 = vld [vmem:[#allocation50_spill] sm:$0xff] }
 0x284   : > { %v3865_v60 = vpop.f32.mrf.mxu1 }
 0x285   : > { %20058 = vst [vmem:[#allocation57_spill] sm:$0xff] %v17018_v25  ;;  %v17023_v49 = vadd.f32 %v13235_v63, %v3874_v18  ;;  %v3866_v41 = vadd.f32 %v3865_v60, %v20062_v3  ;;  %v5317_v4 = vpop.f32.mrf.mxu0  ;;  %v6484_v18 = vsel %vm14678_vm3, %v6479_v56, %v6483_v14  ;;  %v6494_v63 = vsel %vm14678_vm3, %v6489_v54, %v6493_v6  ;;  %v20069_v60 = vld [vmem:[#allocation147_spill] sm:$0xff]  ;;  %v20075_v54 = vld [vmem:[#allocation72_spill] sm:$0xff] }
 0x286   : > { %v13106_v8 = vpop.f32.mrf.mxu1  ;;  %v17047_v14 = vcombine.low %v6484_v18, %v6494_v63 }
 0x287   : > { %20061 = vst [vmem:[#allocation59_spill] sm:$0xff] %v17023_v49  ;;  %v17026_v57 = vadd.f32 %v5314_v43, %v3866_v41  ;;  %v3877_v17 = vadd.f32 %v13106_v8, %v20064_v61  ;;  %v13239_v25 = vpop.f32.mrf.mxu0  ;;  %13466 = vmatmul.mubr.msk.bf16.gmra.mxu0 %vm2302_vm4, %v20065_v2  ;;  %v20071_v41 = vld [vmem:[#allocation70_spill] sm:$0xff]  ;;  %v20072_v2 = vld [vmem:[#allocation152_spill] sm:$0xff] }
 0x288   : > { %v3868_v58 = vpop.f32.mrf.mxu1  ;;  %13469 = vmatprep.mubr.msk.bf16.mxu0 %vm2302_vm4, %v20066_v23  ;;  %20073 = vst [vmem:[#allocation67_spill] sm:$0xff] %v17047_v14 }
 0x289   : > { %20063 = vst [vmem:[#allocation61_spill] sm:$0xff] %v17026_v57  ;;  %v17037_v30 = vadd.f32 %v13236_v59, %v3877_v17  ;;  %v3869_v40 = vadd.f32 %v3868_v58, %v20068_v31  ;;  %v5330_v43 = vpop.f32.mrf.mxu0  ;;  %v17054_v31 = vcombine.low %v16976_v62, %v16979_v35 }
 0x28a   : > { %v13109_v8 = vpop.f32.mrf.mxu1  ;;  %13336 = vmatmul.mubr.msk.bf16.gmra.mxu1 %vm2302_vm4, %v20069_v60 }
 0x28b   : > { %20067 = vst [vmem:[#allocation62_spill] sm:$0xff] %v17037_v30  ;;  %v17042_v3 = vadd.f32 %v5317_v4, %v3869_v40  ;;  %v3890_v61 = vadd.f32 %v13109_v8, %v20071_v41  ;;  %v13240_v23 = vpop.f32.mrf.mxu0  ;;  %13339 = vmatprep.mubr.msk.bf16.mxu1 %vm2302_vm4, %v20072_v2  ;;  %20076 = vst [vmem:[#allocation70_spill] sm:$0xff] %v17054_v31  ;;  %v20078_v40 = vld [vmem:[#allocation74_spill] sm:$0xff]  ;;  %v20096_v2 = vld [vmem:[#allocation164_spill] sm:$0xff] }
 0x28c   : > { %v3881_v56 = vpop.f32.mrf.mxu1 }
 0x28d   : > { %20070 = vst [vmem:[#allocation64_spill] sm:$0xff] %v17042_v3  ;;  %v17049_v59 = vadd.f32 %v13239_v25, %v3890_v61  ;;  %v3882_v6 = vadd.f32 %v3881_v56, %v20075_v54  ;;  %v5333_v17 = vpop.f32.mrf.mxu0  ;;  %v20079_v25 = vld [vmem:[#allocation52_spill] sm:$0xff]  ;;  %v20081_v61 = vld [vmem:[#allocation77_spill] sm:$0xff]  ;;  %v20083_v54 = vld [vmem:[#allocation79_spill] sm:$0xff] }
 0x28e   : > { %v13110_v58 = vpop.f32.mrf.mxu1 }
 0x28f   : > { %20074 = vst [vmem:[#allocation68_spill] sm:$0xff] %v17049_v59  ;;  %v17056_v4 = vadd.f32 %v5330_v43, %v3882_v6  ;;  %v3893_v8 = vadd.f32 %v13110_v58, %v20078_v40  ;;  %v13243_v41 = vpop.f32.mrf.mxu0  ;;  %13470 = vmatmul.mubr.msk.bf16.gmra.mxu0 %vm2302_vm4, %v17047_v14  ;;  %v20084_v40 = vld [vmem:[#allocation158_spill] sm:$0xff] }
 0x290   : > { %v3884_v18 = vpop.f32.mrf.mxu1  ;;  %13473 = vmatprep.mubr.msk.bf16.mxu0 %vm2302_vm4, %v20079_v25 }
 0x291   : > { %20077 = vst [vmem:[#allocation72_spill] sm:$0xff] %v17056_v4  ;;  %v17063_v63 = vadd.f32 %v13240_v23, %v3893_v8  ;;  %v3885_v56 = vadd.f32 %v3884_v18, %v20081_v61  ;;  %v5346_v62 = vpop.f32.mrf.mxu0  ;;  %v20086_v23 = vld [vmem:[#allocation83_spill] sm:$0xff] }
 0x292   : > { %v13113_v35 = vpop.f32.mrf.mxu1  ;;  %13340 = vmatmul.mubr.msk.bf16.gmra.mxu1 %vm2302_vm4, %v17054_v31  ;;  %v17077_v18 = vld [vmem:[%s14657_s17 + $0x2e8] sm:$0xf]  ;;  %v17080_v61 = vld [vmem:[%s14657_s17 + $0x2ec] sm:$0xf] }
 0x293   : > { %20080 = vst [vmem:[#allocation74_spill] sm:$0xff] %v17063_v63  ;;  %v17068_v43 = vadd.f32 %v5333_v17, %v3885_v56  ;;  %v3906_v6 = vadd.f32 %v13113_v35, %v20083_v54  ;;  %v13244_v58 = vpop.f32.mrf.mxu0  ;;  %13343 = vmatprep.mubr.msk.bf16.mxu1 %vm2302_vm4, %v20084_v40  ;;  %v20088_v17 = vld [vmem:[#allocation85_spill] sm:$0xff]  ;;  %v20089_v54 = vld [vmem:[#allocation54_spill] sm:$0xff] }
 0x294   : > { %v3897_v14 = vpop.f32.mrf.mxu1 }
 0x295   : > { %20082 = vst [vmem:[#allocation52_spill] sm:$0xff] %v17068_v43  ;;  %v17073_v4 = vadd.f32 %v13243_v41, %v3906_v6  ;;  %v3898_v8 = vadd.f32 %v3897_v14, %v20086_v23  ;;  %v5349_v25 = vpop.f32.mrf.mxu0  ;;  %v20090_v43 = vld [vmem:[#allocation58_spill] sm:$0xff]  ;;  %v6496_v14 = vshrl.u32 %v17077_v18, 16  ;;  %v6499_v41 = vshll.u32 %v17077_v18, 16 }
 0x296   : > { %v13114_v63 = vpop.f32.mrf.mxu1  ;;  %v6509_v6 = vshrl.u32 %v17080_v61, 16  ;;  %v6505_v23 = vshll.u32 %v17080_v61, 16 }
 0x297   : > { %20085 = vst [vmem:[#allocation77_spill] sm:$0xff] %v17073_v4  ;;  %v17082_v59 = vadd.f32 %v5346_v62, %v3898_v8  ;;  %v3909_v56 = vadd.f32 %v13114_v63, %v20088_v17  ;;  %v13247_v35 = vpop.f32.mrf.mxu0  ;;  %13474 = vmatmul.mubr.msk.bf16.gmra.mxu0 %vm2302_vm4, %v20089_v54  ;;  %v20092_v8 = vld [vmem:[#allocation89_spill] sm:$0xff]  ;;  %v20093_v54 = vld [vmem:[#allocation160_spill] sm:$0xff]  ;;  %v6498_v57 = vrot.slane %v6496_v14, 4  ;;  %v20102_v14 = vld [vmem:[#allocation66_spill] sm:$0xff] }
 0x298   : > { %v3900_v40 = vpop.f32.mrf.mxu1  ;;  %13477 = vmatprep.mubr.msk.bf16.mxu0 %vm2302_vm4, %v20090_v43  ;;  %v20095_v43 = vld [vmem:[#allocation91_spill] sm:$0xff] }
 0x299   : > { %20087 = vst [vmem:[#allocation79_spill] sm:$0xff] %v17082_v59  ;;  %v17093_v62 = vadd.f32 %v13244_v58, %v3909_v56  ;;  %v3901_v63 = vadd.f32 %v3900_v40, %v20092_v8  ;;  %v5362_v17 = vpop.f32.mrf.mxu0  ;;  %v6501_v58 = vrot.slane %v6499_v41, 5  ;;  %v6507_v56 = vrot.slane %v6505_v23, 5  ;;  %v20098_v8 = vld [vmem:[#allocation95_spill] sm:$0xff] }
 0x29a   : > { %v13117_v59 = vpop.f32.mrf.mxu1  ;;  %13344 = vmatmul.mubr.msk.bf16.gmra.mxu1 %vm2302_vm4, %v20093_v54 }
 0x29b   : > { %20091 = vst [vmem:[#allocation158_spill] sm:$0xff] %v17093_v62  ;;  %v17098_v4 = vadd.f32 %v5349_v25, %v3901_v63  ;;  %v3922_v3 = vadd.f32 %v13117_v59, %v20095_v43  ;;  %v13248_v31 = vpop.f32.mrf.mxu0  ;;  %13347 = vmatprep.mubr.msk.bf16.mxu1 %vm2302_vm4, %v20096_v2  ;;  %v6511_v62 = vrot.slane %v6509_v6, 4  ;;  %v20100_v63 = vld [vmem:[#allocation97_spill] sm:$0xff]  ;;  %v6502_v41 = vor.u32 %v6501_v58, %v6498_v57 }
 0x29c   : > { %v3913_v30 = vpop.f32.mrf.mxu1 }
 0x29d   : > { %20094 = vst [vmem:[#allocation83_spill] sm:$0xff] %v17098_v4  ;;  %v17103_v40 = vadd.f32 %v13247_v35, %v3922_v3  ;;  %v3914_v49 = vadd.f32 %v3913_v30, %v20098_v8  ;;  %v5365_v60 = vpop.f32.mrf.mxu0  ;;  %v20101_v4 = vld [vmem:[#allocation63_spill] sm:$0xff]  ;;  %v6512_v3 = vor.u32 %v6511_v62, %v6507_v56  ;;  %v6515_v35 = vshll.u32 %v444_v15, 16  ;;  %v20104_v30 = vld [vmem:[#allocation100_spill] sm:$0xff] }
 0x29e   : > { %v13118_v54 = vpop.f32.mrf.mxu1  ;;  %v6503_v62 = vrot.slane %v6502_v41, 4 }
 0x29f   : > { %20097 = vst [vmem:[#allocation85_spill] sm:$0xff] %v17103_v40  ;;  %v17107_v25 = vadd.f32 %v5362_v17, %v3914_v49  ;;  %v3925_v59 = vadd.f32 %v13118_v54, %v20100_v63  ;;  %v13251_v43 = vpop.f32.mrf.mxu0  ;;  %13478 = vmatmul.mubr.msk.bf16.gmra.mxu0 %vm2302_vm4, %v20101_v4  ;;  %v20105_v17 = vld [vmem:[#allocation166_spill] sm:$0xff]  ;;  %v20107_v63 = vld [vmem:[#allocation101_spill] sm:$0xff]  ;;  %v20108_v40 = vld [vmem:[#allocation172_spill] sm:$0xff]  ;;  %v6513_v15 = vrot.slane %v6512_v3, 4 }
 0x2a0   : > { %v3916_v2 = vpop.f32.mrf.mxu1  ;;  %13481 = vmatprep.mubr.msk.bf16.mxu0 %vm2302_vm4, %v20102_v14  ;;  %v20116_v3 = vld [vmem:[#allocation111_spill] sm:$0xff] }
 0x2a1   : > { %20099 = vst [vmem:[#allocation89_spill] sm:$0xff] %v17107_v25  ;;  %v17114_v6 = vadd.f32 %v13248_v31, %v3925_v59  ;;  %v3917_v23 = vadd.f32 %v3916_v2, %v20104_v30  ;;  %v5378_v8 = vpop.f32.mrf.mxu0  ;;  %v6517_v31 = vrot.slane %v6515_v35, 5  ;;  %v20110_v2 = vld [vmem:[#allocation105_spill] sm:$0xff] }
 0x2a2   : > { %v13121_v49 = vpop.f32.mrf.mxu1  ;;  %13348 = vmatmul.mubr.msk.bf16.gmra.mxu1 %vm2302_vm4, %v20105_v17 }
 0x2a3   : > { %20103 = vst [vmem:[#allocation91_spill] sm:$0xff] %v17114_v6  ;;  %v17119_v54 = vadd.f32 %v5365_v60, %v3917_v23  ;;  %v3938_v4 = vadd.f32 %v13121_v49, %v20107_v63  ;;  %v13252_v25 = vpop.f32.mrf.mxu0  ;;  %13351 = vmatprep.mubr.msk.bf16.mxu1 %vm2302_vm4, %v20108_v40  ;;  %v20112_v60 = vld [vmem:[#allocation107_spill] sm:$0xff]  ;;  %v20114_v40 = vld [vmem:[#allocation76_spill] sm:$0xff] }
 0x2a4   : > { %v3929_v57 = vpop.f32.mrf.mxu1  ;;  %v20113_v49 = vld [vmem:[#allocation71_spill] sm:$0xff] }
 0x2a5   : > { %20106 = vst [vmem:[#allocation95_spill] sm:$0xff] %v17119_v54  ;;  %v17124_v58 = vadd.f32 %v13251_v43, %v3938_v4  ;;  %v3930_v59 = vadd.f32 %v3929_v57, %v20110_v2  ;;  %v5381_v30 = vpop.f32.mrf.mxu0  ;;  %v6508_v4 = vsel %vm14678_vm3, %v6503_v62, %v6507_v56  ;;  %v6518_v43 = vsel %vm14678_vm3, %v6513_v15, %v6517_v31  ;;  %v20117_v57 = vld [vmem:[#allocation174_spill] sm:$0xff]  ;;  %v20123_v15 = vld [vmem:[#allocation117_spill] sm:$0xff] }
 0x2a6   : > { %v13122_v14 = vpop.f32.mrf.mxu1  ;;  %v17148_v56 = vcombine.low %v6508_v4, %v6518_v43 }
 0x2a7   : > { %20109 = vst [vmem:[#allocation97_spill] sm:$0xff] %v17124_v58  ;;  %v17127_v6 = vadd.f32 %v5378_v8, %v3930_v59  ;;  %v3941_v23 = vadd.f32 %v13122_v14, %v20112_v60  ;;  %v13255_v54 = vpop.f32.mrf.mxu0  ;;  %13482 = vmatmul.mubr.msk.bf16.gmra.mxu0 %vm2302_vm4, %v20113_v49  ;;  %v20119_v59 = vld [vmem:[#allocation113_spill] sm:$0xff]  ;;  %v20120_v49 = vld [vmem:[#allocation179_spill] sm:$0xff] }
 0x2a8   : > { %v3932_v63 = vpop.f32.mrf.mxu1  ;;  %13485 = vmatprep.mubr.msk.bf16.mxu0 %vm2302_vm4, %v20114_v40  ;;  %20121 = vst [vmem:[#allocation107_spill] sm:$0xff] %v17148_v56 }
 0x2a9   : > { %20111 = vst [vmem:[#allocation100_spill] sm:$0xff] %v17127_v6  ;;  %v17138_v41 = vadd.f32 %v13252_v25, %v3941_v23  ;;  %v3933_v35 = vadd.f32 %v3932_v63, %v20116_v3  ;;  %v5394_v8 = vpop.f32.mrf.mxu0  ;;  %v17155_v3 = vcombine.low %v17077_v18, %v17080_v61 }
 0x2aa   : > { %v13125_v14 = vpop.f32.mrf.mxu1  ;;  %13352 = vmatmul.mubr.msk.bf16.gmra.mxu1 %vm2302_vm4, %v20117_v57  ;;  %v20152_v57 = vld [vmem:[#allocation153_spill] sm:$0xff] }
 0x2ab   : > { %20115 = vst [vmem:[#allocation101_spill] sm:$0xff] %v17138_v41  ;;  %v17143_v2 = vadd.f32 %v5381_v30, %v3933_v35  ;;  %v3954_v60 = vadd.f32 %v13125_v14, %v20119_v59  ;;  %v13256_v40 = vpop.f32.mrf.mxu0  ;;  %13355 = vmatprep.mubr.msk.bf16.mxu1 %vm2302_vm4, %v20120_v49  ;;  %20124 = vst [vmem:[#allocation113_spill] sm:$0xff] %v17155_v3  ;;  %v20126_v35 = vld [vmem:[#allocation119_spill] sm:$0xff]  ;;  %v20144_v49 = vld [vmem:[#allocation194_spill] sm:$0xff] }
 0x2ac   : > { %v3945_v62 = vpop.f32.mrf.mxu1 }
 0x2ad   : > { %20118 = vst [vmem:[#allocation105_spill] sm:$0xff] %v17143_v2  ;;  %v17150_v25 = vadd.f32 %v13255_v54, %v3954_v60  ;;  %v3946_v31 = vadd.f32 %v3945_v62, %v20123_v15  ;;  %v5397_v23 = vpop.f32.mrf.mxu0  ;;  %v20127_v54 = vld [vmem:[#allocation11_spill] sm:$0xff]  ;;  %v20131_v15 = vld [vmem:[#allocation125_spill] sm:$0xff] }
 0x2ae   : > { %v13126_v63 = vpop.f32.mrf.mxu1  ;;  %v20129_v60 = vld [vmem:[#allocation123_spill] sm:$0xff] }
 0x2af   : > { %20122 = vst [vmem:[#allocation111_spill] sm:$0xff] %v17150_v25  ;;  %v17157_v30 = vadd.f32 %v5394_v8, %v3946_v31  ;;  %v3957_v14 = vadd.f32 %v13126_v63, %v20126_v35  ;;  %v13259_v59 = vpop.f32.mrf.mxu0  ;;  %13486 = vmatmul.mubr.msk.bf16.gmra.mxu0 %vm2302_vm4, %v17148_v56  ;;  %v20132_v35 = vld [vmem:[#allocation186_spill] sm:$0xff] }
 0x2b0   : > { %v3948_v4 = vpop.f32.mrf.mxu1  ;;  %13489 = vmatprep.mubr.msk.bf16.mxu0 %vm2302_vm4, %v20127_v54 }
 0x2b1   : > { %20125 = vst [vmem:[#allocation117_spill] sm:$0xff] %v17157_v30  ;;  %v17164_v43 = vadd.f32 %v13256_v40, %v3957_v14  ;;  %v3949_v62 = vadd.f32 %v3948_v4, %v20129_v60  ;;  %v5410_v18 = vpop.f32.mrf.mxu0  ;;  %v20134_v40 = vld [vmem:[#allocation130_spill] sm:$0xff] }
 0x2b2   : > { %v13129_v61 = vpop.f32.mrf.mxu1  ;;  %13356 = vmatmul.mubr.msk.bf16.gmra.mxu1 %vm2302_vm4, %v17155_v3  ;;  %v17178_v4 = vld [vmem:[%s14657_s17 + $0x3c0] sm:$0xf]  ;;  %v17181_v60 = vld [vmem:[%s14657_s17 + $0x3c4] sm:$0xf] }
 0x2b3   : > { %20128 = vst [vmem:[#allocation119_spill] sm:$0xff] %v17164_v43  ;;  %v17169_v8 = vadd.f32 %v5397_v23, %v3949_v62  ;;  %v3970_v31 = vadd.f32 %v13129_v61, %v20131_v15  ;;  %v13260_v63 = vpop.f32.mrf.mxu0  ;;  %13359 = vmatprep.mubr.msk.bf16.mxu1 %vm2302_vm4, %v20132_v35  ;;  %v20136_v23 = vld [vmem:[#allocation133_spill] sm:$0xff] }
 0x2b4   : > { %v3961_v56 = vpop.f32.mrf.mxu1  ;;  %v20137_v15 = vld [vmem:[#allocation13_spill] sm:$0xff] }
 0x2b5   : > { %20130 = vst [vmem:[#allocation11_spill] sm:$0xff] %v17169_v8  ;;  %v17174_v30 = vadd.f32 %v13259_v59, %v3970_v31  ;;  %v3962_v14 = vadd.f32 %v3961_v56, %v20134_v40  ;;  %v5413_v54 = vpop.f32.mrf.mxu0  ;;  %v20138_v8 = vld [vmem:[#allocation15_spill] sm:$0xff]  ;;  %v6520_v56 = vshrl.u32 %v17178_v4, 16  ;;  %v6523_v59 = vshll.u32 %v17178_v4, 16 }
 0x2b6   : > { %v13130_v43 = vpop.f32.mrf.mxu1  ;;  %v6533_v31 = vshrl.u32 %v17181_v60, 16  ;;  %v6529_v40 = vshll.u32 %v17181_v60, 16 }
 0x2b7   : > { %20133 = vst [vmem:[#allocation123_spill] sm:$0xff] %v17174_v30  ;;  %v17183_v25 = vadd.f32 %v5410_v18, %v3962_v14  ;;  %v3973_v62 = vadd.f32 %v13130_v43, %v20136_v23  ;;  %v13263_v61 = vpop.f32.mrf.mxu0  ;;  %13490 = vmatmul.mubr.msk.bf16.gmra.mxu0 %vm2302_vm4, %v20137_v15  ;;  %v20140_v14 = vld [vmem:[#allocation138_spill] sm:$0xff]  ;;  %v20141_v30 = vld [vmem:[#allocation188_spill] sm:$0xff] }
 0x2b8   : > { %v3964_v35 = vpop.f32.mrf.mxu1  ;;  %13493 = vmatprep.mubr.msk.bf16.mxu0 %vm2302_vm4, %v20138_v8  ;;  %v20143_v8 = vld [vmem:[#allocation141_spill] sm:$0xff]  ;;  %v6535_v41 = vrot.slane %v6533_v31, 4 }
 0x2b9   : > { %20135 = vst [vmem:[#allocation125_spill] sm:$0xff] %v17183_v25  ;;  %v17194_v18 = vadd.f32 %v13260_v63, %v3973_v62  ;;  %v3965_v43 = vadd.f32 %v3964_v35, %v20140_v14  ;;  %v5426_v23 = vpop.f32.mrf.mxu0  ;;  %v17207_v63 = vld [vmem:[%s19345_s1 + $0x1c] sm:$0xf]  ;;  %v6522_v35 = vrot.slane %v6520_v56, 4  ;;  %v6525_v14 = vrot.slane %v6523_v59, 5 }
 0x2ba   : > { %v13133_v25 = vpop.f32.mrf.mxu1  ;;  %13360 = vmatmul.mubr.msk.bf16.gmra.mxu1 %vm2302_vm4, %v20141_v30  ;;  %14123 = vmatprep.subr.msk.bf16.mxu1 %vm2495_vm0, %v17207_v63  ;;  %v20148_v59 = vld [vmem:[#allocation149_spill] sm:$0xff] }
 0x2bb   : > { %20139 = vst [vmem:[#allocation186_spill] sm:$0xff] %v17194_v18  ;;  %v17199_v15 = vadd.f32 %v5413_v54, %v3965_v43  ;;  %v3986_v2 = vadd.f32 %v13133_v25, %v20143_v8  ;;  %v13264_v3 = vpop.f32.mrf.mxu0  ;;  %13363 = vmatprep.mubr.msk.bf16.mxu1 %vm2302_vm4, %v20144_v49  ;;  %v6531_v18 = vrot.slane %v6529_v40, 5  ;;  %v20146_v25 = vld [vmem:[#allocation146_spill] sm:$0xff] }
 0x2bc   : > { %v3977_v62 = vpop.f32.mrf.mxu1  ;;  %v17218_v49 = vld [vmem:[%s19345_s1 + $0x20] sm:$0xf] }
 0x2bd   : > { %20142 = vst [vmem:[#allocation130_spill] sm:$0xff] %v17199_v15  ;;  %v17211_v54 = vadd.f32 %v13263_v61, %v3986_v2  ;;  %v3978_v8 = vadd.f32 %v3977_v62, %v20146_v25  ;;  %v5429_v43 = vpop.f32.mrf.mxu0  ;;  %v474_v15 = vld [vmem:[%s14657_s17 + $0x3c8] sm:$0x1]  ;;  %14124 = vmatprep.subr.msk.bf16.mxu0 %vm2495_vm0, %v17218_v49  ;;  %v20149_v2 = vld [vmem:[#allocation17_spill] sm:$0xff]  ;;  %v6526_v25 = vor.u32 %v6525_v14, %v6522_v35 }
 0x2be   : > { %v13134_v30 = vpop.f32.mrf.mxu1  ;;  %v20150_v62 = vld [vmem:[#allocation19_spill] sm:$0xff]  ;;  %v6539_v6 = vshll.u32 %v474_v15, 16 }
 0x2bf   : > { %20145 = vst [vmem:[#allocation133_spill] sm:$0xff] %v17211_v54  ;;  %v17222_v56 = vadd.f32 %v5426_v23, %v3978_v8  ;;  %v3989_v31 = vadd.f32 %v13134_v30, %v20148_v59  ;;  %v13267_v40 = vpop.f32.mrf.mxu0  ;;  %13494 = vmatmul.mubr.msk.bf16.gmra.mxu0 %vm2302_vm4, %v20149_v2  ;;  %v6536_v54 = vor.u32 %v6535_v41, %v6531_v18  ;;  %v20153_v8 = vld [vmem:[#allocation196_spill] sm:$0xff]  ;;  %v20155_v59 = vld [vmem:[#allocation155_spill] sm:$0xff]  ;;  %v6527_v41 = vrot.slane %v6526_v25, 4 }
 0x2c0   : > { %v3980_v61 = vpop.f32.mrf.mxu1  ;;  %13497 = vmatprep.mubr.msk.bf16.mxu0 %vm2302_vm4, %v20150_v62 }
 0x2c1   : > { %20147 = vst [vmem:[#allocation138_spill] sm:$0xff] %v17222_v56  ;;  %v17229_v58 = vadd.f32 %v13264_v3, %v3989_v31  ;;  %v3981_v17 = vadd.f32 %v3980_v61, %v20152_v57  ;;  %v5442_v42 = vpop.f32.mrf.mxu0  ;;  %v6537_v15 = vrot.slane %v6536_v54, 4  ;;  %v6541_v3 = vrot.slane %v6539_v6, 5  ;;  %v20158_v57 = vld [vmem:[#allocation159_spill] sm:$0xff] }
 0x2c2   : > { %v13137_v23 = vpop.f32.mrf.mxu1  ;;  %13364 = vmatmul.mubr.msk.bf16.gmra.mxu1 %vm2302_vm4, %v20153_v8  ;;  %v6532_v6 = vsel %vm14678_vm3, %v6527_v41, %v6531_v18  ;;  %v504_v8 = vld [vmem:[%s14657_s17 + $0x4a0] sm:$0x1] }
 0x2c3   : > { %20151 = vst [vmem:[#allocation141_spill] sm:$0xff] %v17229_v58  ;;  %v17234_v30 = vadd.f32 %v5429_v43, %v3981_v17  ;;  %v4002_v2 = vadd.f32 %v13137_v23, %v20155_v59  ;;  %v13268_v56 = vpop.f32.mrf.mxu0  ;;  %13367 = vmatprep.mubr.msk.bf16.mxu1 %vm2302_vm4, %v20156_v20  ;;  %v20160_v17 = vld [vmem:[#allocation161_spill] sm:$0xff]  ;;  %v20162_v20 = vld [vmem:[#allocation23_spill] sm:$0xff]  ;;  %v6542_v54 = vsel %vm14678_vm3, %v6537_v15, %v6541_v3 }
 0x2c4   : > { %v3993_v35 = vpop.f32.mrf.mxu1  ;;  %v20161_v23 = vld [vmem:[#allocation21_spill] sm:$0xff]  ;;  %v17263_v18 = vcombine.low %v6532_v6, %v6542_v54 }
 0x2c5   : > { %20154 = vst [vmem:[#allocation146_spill] sm:$0xff] %v17234_v30  ;;  %v17239_v14 = vadd.f32 %v13267_v40, %v4002_v2  ;;  %v3994_v31 = vadd.f32 %v3993_v35, %v20158_v57  ;;  %v5445_v61 = vpop.f32.mrf.mxu0  ;;  %v20165_v35 = vld [vmem:[#allocation204_spill] sm:$0xff]  ;;  %v20171_v15 = vld [vmem:[#allocation173_spill] sm:$0xff] }
 0x2c6   : > { %v13138_v62 = vpop.f32.mrf.mxu1  ;;  %20169 = vst [vmem:[#allocation161_spill] sm:$0xff] %v17263_v18 }
 0x2c7   : > { %20157 = vst [vmem:[#allocation149_spill] sm:$0xff] %v17239_v14  ;;  %v17242_v58 = vadd.f32 %v5442_v42, %v3994_v31  ;;  %v4005_v43 = vadd.f32 %v13138_v62, %v20160_v17  ;;  %v13271_v30 = vpop.f32.mrf.mxu0  ;;  %13498 = vmatmul.mubr.msk.bf16.gmra.mxu0 %vm2302_vm4, %v20161_v23  ;;  %v20164_v42 = vld [vmem:[#allocation165_spill] sm:$0xff]  ;;  %v20167_v31 = vld [vmem:[#allocation168_spill] sm:$0xff] }
 0x2c8   : > { %v3996_v59 = vpop.f32.mrf.mxu1  ;;  %13501 = vmatprep.mubr.msk.bf16.mxu0 %vm2302_vm4, %v20162_v20  ;;  %v20168_v23 = vld [vmem:[#allocation209_spill] sm:$0xff] }
 0x2c9   : > { %20159 = vst [vmem:[#allocation153_spill] sm:$0xff] %v17242_v58  ;;  %v17253_v40 = vadd.f32 %v13268_v56, %v4005_v43  ;;  %v3997_v2 = vadd.f32 %v3996_v59, %v20164_v42  ;;  %v5458_v25 = vpop.f32.mrf.mxu0  ;;  %v17270_v42 = vcombine.low %v17178_v4, %v17181_v60 }
 0x2ca   : > { %v13141_v62 = vpop.f32.mrf.mxu1  ;;  %13368 = vmatmul.mubr.msk.bf16.gmra.mxu1 %vm2302_vm4, %v20165_v35 }
 0x2cb   : > { %20163 = vst [vmem:[#allocation155_spill] sm:$0xff] %v17253_v40  ;;  %v17258_v57 = vadd.f32 %v5445_v61, %v3997_v2  ;;  %v4018_v17 = vadd.f32 %v13141_v62, %v20167_v31  ;;  %v13272_v20 = vpop.f32.mrf.mxu0  ;;  %13371 = vmatprep.mubr.msk.bf16.mxu1 %vm2302_vm4, %v20168_v23  ;;  %20172 = vst [vmem:[#allocation168_spill] sm:$0xff] %v17270_v42  ;;  %v20174_v2 = vld [vmem:[#allocation176_spill] sm:$0xff] }
 0x2cc   : > { %v4009_v41 = vpop.f32.mrf.mxu1  ;;  %v20192_v23 = vld [vmem:[#allocation224_spill] sm:$0xff] }
 0x2cd   : > { %20166 = vst [vmem:[#allocation159_spill] sm:$0xff] %v17258_v57  ;;  %v17265_v56 = vadd.f32 %v13271_v30, %v4018_v17  ;;  %v4010_v3 = vadd.f32 %v4009_v41, %v20171_v15  ;;  %v5461_v43 = vpop.f32.mrf.mxu0  ;;  %v20175_v30 = vld [vmem:[#allocation25_spill] sm:$0xff]  ;;  %v20177_v17 = vld [vmem:[#allocation180_spill] sm:$0xff]  ;;  %v20179_v15 = vld [vmem:[#allocation182_spill] sm:$0xff] }
 0x2ce   : > { %v13142_v59 = vpop.f32.mrf.mxu1 }
 0x2cf   : > { %20170 = vst [vmem:[#allocation165_spill] sm:$0xff] %v17265_v56  ;;  %v17272_v61 = vadd.f32 %v5458_v25, %v4010_v3  ;;  %v4021_v62 = vadd.f32 %v13142_v59, %v20174_v2  ;;  %v13275_v31 = vpop.f32.mrf.mxu0  ;;  %13502 = vmatmul.mubr.msk.bf16.gmra.mxu0 %vm2302_vm4, %v17263_v18  ;;  %v20180_v2 = vld [vmem:[#allocation216_spill] sm:$0xff] }
 0x2d0   : > { %v4012_v6 = vpop.f32.mrf.mxu1  ;;  %13505 = vmatprep.mubr.msk.bf16.mxu0 %vm2302_vm4, %v20175_v30 }
 0x2d1   : > { %20173 = vst [vmem:[#allocation173_spill] sm:$0xff] %v17272_v61  ;;  %v17279_v54 = vadd.f32 %v13272_v20, %v4021_v62  ;;  %v4013_v41 = vadd.f32 %v4012_v6, %v20177_v17  ;;  %v5474_v4 = vpop.f32.mrf.mxu0  ;;  %v20182_v20 = vld [vmem:[#allocation187_spill] sm:$0xff]  ;;  %v17293_v6 = vld [vmem:[%s14657_s17 + $0x498] sm:$0xf]  ;;  %v17296_v17 = vld [vmem:[%s14657_s17 + $0x49c] sm:$0xf] }
 0x2d2   : > { %v13145_v60 = vpop.f32.mrf.mxu1  ;;  %13372 = vmatmul.mubr.msk.bf16.gmra.mxu1 %vm2302_vm4, %v17270_v42 }
 0x2d3   : > { %20176 = vst [vmem:[#allocation176_spill] sm:$0xff] %v17279_v54  ;;  %v17284_v25 = vadd.f32 %v5461_v43, %v4013_v41  ;;  %v4034_v3 = vadd.f32 %v13145_v60, %v20179_v15  ;;  %v13276_v59 = vpop.f32.mrf.mxu0  ;;  %13375 = vmatprep.mubr.msk.bf16.mxu1 %vm2302_vm4, %v20180_v2  ;;  %v20184_v43 = vld [vmem:[#allocation190_spill] sm:$0xff]  ;;  %v20185_v15 = vld [vmem:[#allocation27_spill] sm:$0xff] }
 0x2d4   : > { %v4025_v18 = vpop.f32.mrf.mxu1 }
 0x2d5   : > { %20178 = vst [vmem:[#allocation25_spill] sm:$0xff] %v17284_v25  ;;  %v17289_v61 = vadd.f32 %v13275_v31, %v4034_v3  ;;  %v4026_v62 = vadd.f32 %v4025_v18, %v20182_v20  ;;  %v5477_v30 = vpop.f32.mrf.mxu0  ;;  %v20186_v25 = vld [vmem:[#allocation29_spill] sm:$0xff]  ;;  %v6544_v18 = vshrl.u32 %v17293_v6, 16  ;;  %v6547_v31 = vshll.u32 %v17293_v6, 16 }
 0x2d6   : > { %v13146_v54 = vpop.f32.mrf.mxu1  ;;  %v6557_v3 = vshrl.u32 %v17296_v17, 16  ;;  %v6553_v20 = vshll.u32 %v17296_v17, 16 }
 0x2d7   : > { %20181 = vst [vmem:[#allocation180_spill] sm:$0xff] %v17289_v61  ;;  %v17298_v56 = vadd.f32 %v5474_v4, %v4026_v62  ;;  %v4037_v41 = vadd.f32 %v13146_v54, %v20184_v43  ;;  %v13279_v60 = vpop.f32.mrf.mxu0  ;;  %13506 = vmatmul.mubr.msk.bf16.gmra.mxu0 %vm2302_vm4, %v20185_v15  ;;  %v20188_v62 = vld [vmem:[#allocation195_spill] sm:$0xff]  ;;  %v20189_v15 = vld [vmem:[#allocation218_spill] sm:$0xff]  ;;  %v6546_v58 = vrot.slane %v6544_v18, 4  ;;  %v20198_v18 = vld [vmem:[#allocation33_spill] sm:$0xff] }
 0x2d8   : > { %v4028_v2 = vpop.f32.mrf.mxu1  ;;  %13509 = vmatprep.mubr.msk.bf16.mxu0 %vm2302_vm4, %v20186_v25  ;;  %v20191_v25 = vld [vmem:[#allocation198_spill] sm:$0xff] }
 0x2d9   : > { %20183 = vst [vmem:[#allocation182_spill] sm:$0xff] %v17298_v56  ;;  %v17309_v4 = vadd.f32 %v13276_v59, %v4037_v41  ;;  %v4029_v54 = vadd.f32 %v4028_v2, %v20188_v62  ;;  %v5490_v43 = vpop.f32.mrf.mxu0  ;;  %v6549_v59 = vrot.slane %v6547_v31, 5  ;;  %v6555_v41 = vrot.slane %v6553_v20, 5  ;;  %v20194_v62 = vld [vmem:[#allocation203_spill] sm:$0xff] }
 0x2da   : > { %v13149_v56 = vpop.f32.mrf.mxu1  ;;  %13376 = vmatmul.mubr.msk.bf16.gmra.mxu1 %vm2302_vm4, %v20189_v15 }
 0x2db   : > { %20187 = vst [vmem:[#allocation216_spill] sm:$0xff] %v17309_v4  ;;  %v17314_v61 = vadd.f32 %v5477_v30, %v4029_v54  ;;  %v4050_v57 = vadd.f32 %v13149_v56, %v20191_v25  ;;  %v13280_v42 = vpop.f32.mrf.mxu0  ;;  %13379 = vmatprep.mubr.msk.bf16.mxu1 %vm2302_vm4, %v20192_v23  ;;  %v6559_v4 = vrot.slane %v6557_v3, 4  ;;  %v20196_v54 = vld [vmem:[#allocation206_spill] sm:$0xff]  ;;  %v6550_v31 = vor.u32 %v6549_v59, %v6546_v58 }
 0x2dc   : > { %v4041_v40 = vpop.f32.mrf.mxu1 }
 0x2dd   : > { %20190 = vst [vmem:[#allocation187_spill] sm:$0xff] %v17314_v61  ;;  %v17319_v2 = vadd.f32 %v13279_v60, %v4050_v57  ;;  %v4042_v14 = vadd.f32 %v4041_v40, %v20194_v62  ;;  %v5493_v35 = vpop.f32.mrf.mxu0  ;;  %v20197_v61 = vld [vmem:[#allocation31_spill] sm:$0xff]  ;;  %v6560_v57 = vor.u32 %v6559_v4, %v6555_v41  ;;  %v6563_v60 = vshll.u32 %v504_v8, 16  ;;  %v20200_v40 = vld [vmem:[#allocation210_spill] sm:$0xff] }
 0x2de   : > { %v13150_v15 = vpop.f32.mrf.mxu1  ;;  %v6551_v4 = vrot.slane %v6550_v31, 4 }
 0x2df   : > { %20193 = vst [vmem:[#allocation190_spill] sm:$0xff] %v17319_v2  ;;  %v17323_v30 = vadd.f32 %v5490_v43, %v4042_v14  ;;  %v4053_v56 = vadd.f32 %v13150_v15, %v20196_v54  ;;  %v13283_v25 = vpop.f32.mrf.mxu0  ;;  %13510 = vmatmul.mubr.msk.bf16.gmra.mxu0 %vm2302_vm4, %v20197_v61  ;;  %v20201_v43 = vld [vmem:[#allocation226_spill] sm:$0xff]  ;;  %v20203_v54 = vld [vmem:[#allocation212_spill] sm:$0xff]  ;;  %v6561_v8 = vrot.slane %v6560_v57, 4  ;;  %v20211_v57 = vld [vmem:[#allocation225_spill] sm:$0xff] }
 0x2e0   : > { %v4044_v23 = vpop.f32.mrf.mxu1  ;;  %13513 = vmatprep.mubr.msk.bf16.mxu0 %vm2302_vm4, %v20198_v18  ;;  %v20204_v2 = vld [vmem:[#allocation232_spill] sm:$0xff] }
 0x2e1   : > { %20195 = vst [vmem:[#allocation195_spill] sm:$0xff] %v17323_v30  ;;  %v17330_v3 = vadd.f32 %v13280_v42, %v4053_v56  ;;  %v4045_v20 = vadd.f32 %v4044_v23, %v20200_v40  ;;  %v5506_v62 = vpop.f32.mrf.mxu0  ;;  %v6565_v42 = vrot.slane %v6563_v60, 5  ;;  %v20205_v23 = vld [vmem:[#allocation217_spill] sm:$0xff] }
 0x2e2   : > { %v13153_v14 = vpop.f32.mrf.mxu1  ;;  %13380 = vmatmul.mubr.msk.bf16.gmra.mxu1 %vm2302_vm4, %v20201_v43 }
 0x2e3   : > { %20199 = vst [vmem:[#allocation198_spill] sm:$0xff] %v17330_v3  ;;  %v17335_v15 = vadd.f32 %v5493_v35, %v4045_v20  ;;  %v4066_v61 = vadd.f32 %v13153_v14, %v20203_v54  ;;  %v13284_v30 = vpop.f32.mrf.mxu0  ;;  %13383 = vmatprep.mubr.msk.bf16.mxu1 %vm2302_vm4, %v20204_v2  ;;  %v20207_v35 = vld [vmem:[#allocation220_spill] sm:$0xff]  ;;  %v20208_v14 = vld [vmem:[#allocation35_spill] sm:$0xff]  ;;  %v20209_v2 = vld [vmem:[#allocation37_spill] sm:$0xff] }
 0x2e4   : > { %v4057_v58 = vpop.f32.mrf.mxu1 }
 0x2e5   : > { %20202 = vst [vmem:[#allocation203_spill] sm:$0xff] %v17335_v15  ;;  %v17340_v59 = vadd.f32 %v13283_v25, %v4066_v61  ;;  %v4058_v56 = vadd.f32 %v4057_v58, %v20205_v23  ;;  %v5509_v40 = vpop.f32.mrf.mxu0  ;;  %v6556_v61 = vsel %vm14678_vm3, %v6551_v4, %v6555_v41  ;;  %v6566_v25 = vsel %vm14678_vm3, %v6561_v8, %v6565_v42  ;;  %v20212_v58 = vld [vmem:[#allocation235_spill] sm:$0xff]  ;;  %v20218_v8 = vld [vmem:[#allocation233_spill] sm:$0xff] }
 0x2e6   : > { %v13154_v18 = vpop.f32.mrf.mxu1  ;;  %v17364_v41 = vcombine.low %v6556_v61, %v6566_v25 }
 0x2e7   : > { %v17343_v3 = vadd.f32 %v5506_v62, %v4058_v56  ;;  %v4069_v20 = vadd.f32 %v13154_v18, %v20207_v35  ;;  %v13287_v15 = vpop.f32.mrf.mxu0  ;;  %13514 = vmatmul.mubr.msk.bf16.gmra.mxu0 %vm2302_vm4, %v20208_v14  ;;  %v20214_v56 = vld [vmem:[#allocation228_spill] sm:$0xff] }
 0x2e8   : > { %v4060_v54 = vpop.f32.mrf.mxu1  ;;  %13517 = vmatprep.mubr.msk.bf16.mxu0 %vm2302_vm4, %v20209_v2  ;;  %v20215_v14 = vld [vmem:[#allocation240_spill] sm:$0xff]  ;;  %20216 = vst [vmem:[#allocation212_spill] sm:$0xff] %v17364_v41 }
 0x2e9   : > { %20206 = vst [vmem:[#allocation206_spill] sm:$0xff] %v17343_v3  ;;  %v17354_v31 = vadd.f32 %v13284_v30, %v4069_v20  ;;  %v4061_v60 = vadd.f32 %v4060_v54, %v20211_v57  ;;  %v5522_v62 = vpop.f32.mrf.mxu0  ;;  %v17371_v57 = vcombine.low %v17293_v6, %v17296_v17  ;;  %v534_v3 = vld [vmem:[%s14657_s17 + $0x578] sm:$0x1] }
 0x2ea   : > { %v13157_v18 = vpop.f32.mrf.mxu1  ;;  %13384 = vmatmul.mubr.msk.bf16.gmra.mxu1 %vm2302_vm4, %v20212_v58 }
 0x2eb   : > { %20210 = vst [vmem:[#allocation210_spill] sm:$0xff] %v17354_v31  ;;  %v17359_v23 = vadd.f32 %v5509_v40, %v4061_v60  ;;  %v4082_v35 = vadd.f32 %v13157_v18, %v20214_v56  ;;  %v13288_v2 = vpop.f32.mrf.mxu0  ;;  %13387 = vmatprep.mubr.msk.bf16.mxu1 %vm2302_vm4, %v20215_v14  ;;  %20219 = vst [vmem:[#allocation220_spill] sm:$0xff] %v17371_v57  ;;  %v20221_v60 = vld [vmem:[#allocation236_spill] sm:$0xff] }
 0x2ec   : > { %v4073_v4 = vpop.f32.mrf.mxu1 }
 0x2ed   : > { %20213 = vst [vmem:[#allocation226_spill] sm:$0xff] %v17359_v23  ;;  %v17366_v30 = vadd.f32 %v13287_v15, %v4082_v35  ;;  %v4074_v42 = vadd.f32 %v4073_v4, %v20218_v8  ;;  %v5525_v20 = vpop.f32.mrf.mxu0  ;;  %v20222_v15 = vld [vmem:[#allocation39_spill] sm:$0xff] }
 0x2ee   : > { %v13158_v54 = vpop.f32.mrf.mxu1  ;;  %v20224_v35 = vld [vmem:[#allocation239_spill] sm:$0xff] }
 0x2ef   : > { %20217 = vst [vmem:[#allocation217_spill] sm:$0xff] %v17366_v30  ;;  %v17373_v40 = vadd.f32 %v5522_v62, %v4074_v42  ;;  %v4085_v18 = vadd.f32 %v13158_v54, %v20221_v60  ;;  %v13291_v56 = vpop.f32.mrf.mxu0  ;;  %13518 = vmatmul.mubr.msk.bf16.gmra.mxu0 %vm2302_vm4, %v17364_v41  ;;  %v20226_v8 = vld [vmem:[#allocation243_spill] sm:$0xff]  ;;  %v20227_v60 = vld [vmem:[#allocation250_spill] sm:$0xff] }
 0x2f0   : > { %v4076_v61 = vpop.f32.mrf.mxu1  ;;  %13521 = vmatprep.mubr.msk.bf16.mxu0 %vm2302_vm4, %v20222_v15 }
 0x2f1   : > { %20220 = vst [vmem:[#allocation225_spill] sm:$0xff] %v17373_v40  ;;  %v17380_v25 = vadd.f32 %v13288_v2, %v4085_v18  ;;  %v4077_v4 = vadd.f32 %v4076_v61, %v20224_v35  ;;  %v5538_v6 = vpop.f32.mrf.mxu0  ;;  %v20229_v2 = vld [vmem:[#allocation246_spill] sm:$0xff]  ;;  %v17394_v61 = vld [vmem:[%s14657_s17 + $0x570] sm:$0xf]  ;;  %v17397_v35 = vld [vmem:[%s14657_s17 + $0x574] sm:$0xf] }
 0x2f2   : > { %v13161_v17 = vpop.f32.mrf.mxu1  ;;  %13388 = vmatmul.mubr.msk.bf16.gmra.mxu1 %vm2302_vm4, %v17371_v57 }
 0x2f3   : > { %20223 = vst [vmem:[#allocation235_spill] sm:$0xff] %v17380_v25  ;;  %v17385_v62 = vadd.f32 %v5525_v20, %v4077_v4  ;;  %v4098_v42 = vadd.f32 %v13161_v17, %v20226_v8  ;;  %v13292_v54 = vpop.f32.mrf.mxu0  ;;  %13391 = vmatprep.mubr.msk.bf16.mxu1 %vm2302_vm4, %v20227_v60  ;;  %v20231_v20 = vld [vmem:[#allocation249_spill] sm:$0xff] }
 0x2f4   : > { %v4089_v41 = vpop.f32.mrf.mxu1  ;;  %v20232_v8 = vld [vmem:[#allocation41_spill] sm:$0xff] }
 0x2f5   : > { %20225 = vst [vmem:[#allocation228_spill] sm:$0xff] %v17385_v62  ;;  %v17390_v40 = vadd.f32 %v13291_v56, %v4098_v42  ;;  %v4090_v18 = vadd.f32 %v4089_v41, %v20229_v2  ;;  %v5541_v15 = vpop.f32.mrf.mxu0  ;;  %v20233_v62 = vld [vmem:[#allocation43_spill] sm:$0xff]  ;;  %v6568_v41 = vshrl.u32 %v17394_v61, 16  ;;  %v6571_v56 = vshll.u32 %v17394_v61, 16 }
 0x2f6   : > { %v13162_v25 = vpop.f32.mrf.mxu1  ;;  %v6581_v42 = vshrl.u32 %v17397_v35, 16  ;;  %v6577_v2 = vshll.u32 %v17397_v35, 16 }
 0x2f7   : > { %20228 = vst [vmem:[#allocation233_spill] sm:$0xff] %v17390_v40  ;;  %v17399_v30 = vadd.f32 %v5538_v6, %v4090_v18  ;;  %v4101_v4 = vadd.f32 %v13162_v25, %v20231_v20  ;;  %v13427_v17 = vpop.f32.mrf.mxu0  ;;  %13522 = vmatmul.mubr.msk.bf16.gmra.mxu0 %vm2302_vm4, %v20232_v8  ;;  %v20235_v18 = vld [vmem:[#allocation252_spill] sm:$0xff]  ;;  %v20236_v8 = vld [vmem:[#allocation251_spill] sm:$0xff]  ;;  %v6570_v14 = vrot.slane %v6568_v41, 4 }
 0x2f8   : > { %v4092_v60 = vpop.f32.mrf.mxu1  ;;  %13525 = vmatprep.mubr.msk.bf16.mxu0 %vm2302_vm4, %v20233_v62  ;;  %v20239_v41 = vld [vmem:[#allocation47_spill] sm:$0xff] }
 0x2f9   : > { %20230 = vst [vmem:[#allocation236_spill] sm:$0xff] %v17399_v30  ;;  %v17410_v6 = vadd.f32 %v13292_v54, %v4101_v4  ;;  %v4093_v25 = vadd.f32 %v4092_v60, %v20235_v18  ;;  %v6702_v20 = vpop.f32.mrf.mxu0  ;;  %v6573_v54 = vrot.slane %v6571_v56, 5  ;;  %v6579_v4 = vrot.slane %v6577_v2, 5 }
 0x2fa   : > { %v13297_v30 = vpop.f32.mrf.mxu1  ;;  %13392 = vmatmul.mubr.msk.bf16.gmra.mxu1 %vm2302_vm4, %v20236_v8 }
 0x2fb   : > { %20234 = vst [vmem:[#allocation39_spill] sm:$0xff] %v17410_v6  ;;  %v17415_v40 = vadd.f32 %v5541_v15, %v4093_v25  ;;  %v6297_v62 = vadd.f32 %v13297_v30, %v16472_v24  ;;  %v13428_v23 = vpop.f32.mrf.mxu0  ;;  %13395 = vmatprep.mubr.msk.bf16.mxu1 %vm2302_vm4, %v16477_v22  ;;  %v6583_v6 = vrot.slane %v6581_v42, 4  ;;  %v20238_v25 = vld [vmem:[#allocation45_spill] sm:$0xff]  ;;  %v6574_v56 = vor.u32 %v6573_v54, %v6570_v14 }
 0x2fc   : > { %v5784_v57 = vpop.f32.mrf.mxu1 }
 0x2fd   : > { %20237 = vst [vmem:[#allocation239_spill] sm:$0xff] %v17415_v40  ;;  %v17420_v60 = vadd.f32 %v13427_v17, %v6297_v62  ;;  %v6295_v18 = vadd.f32 %v5784_v57, %v16479_v39  ;;  %v6705_v31 = vpop.f32.mrf.mxu0  ;;  %v6584_v62 = vor.u32 %v6583_v6, %v6579_v4  ;;  %v6587_v17 = vshll.u32 %v534_v3, 16  ;;  %v20240_v39 = vld [vmem:[#allocation256_spill] sm:$0xff] }
 0x2fe   : > { %v13298_v8 = vpop.f32.mrf.mxu1  ;;  %v6575_v6 = vrot.slane %v6574_v56, 4 }
 0x2ff   : > { %v17424_v15 = vadd.f32 %v6702_v20, %v6295_v18  ;;  %v6298_v24 = vadd.f32 %v13298_v8, %v16499_v10  ;;  %v13431_v30 = vpop.f32.mrf.mxu0  ;;  %13526 = vmatmul.mubr.msk.bf16.gmra.mxu0 %vm2302_vm4, %v20238_v25  ;;  %v20241_v18 = vld [vmem:[#allocation255_spill] sm:$0xff]  ;;  %v6585_v3 = vrot.slane %v6584_v62, 4  ;;  %v20246_v62 = vld [vmem:[#allocation261_spill] sm:$0xff] }
 0x300   : > { %v5787_v40 = vpop.f32.mrf.mxu1  ;;  %13529 = vmatprep.mubr.msk.bf16.mxu0 %vm2302_vm4, %v20239_v41 }
 0x301   : > { %v17431_v42 = vadd.f32 %v13428_v23, %v6298_v24  ;;  %v6296_v57 = vadd.f32 %v5787_v40, %v20240_v39  ;;  %v6718_v2 = vpop.f32.mrf.mxu0  ;;  %v6589_v23 = vrot.slane %v6587_v17, 5 }
 0x302   : > { %v13301_v20 = vpop.f32.mrf.mxu1  ;;  %13396 = vmatmul.mubr.msk.bf16.gmra.mxu1 %vm2302_vm4, %v20241_v18 }
 0x303   : > { %v17436_v10 = vadd.f32 %v6705_v31, %v6296_v57  ;;  %v6301_v8 = vadd.f32 %v13301_v20, %v16525_v45  ;;  %v13432_v25 = vpop.f32.mrf.mxu0  ;;  %13399 = vmatprep.mubr.msk.bf16.mxu1 %vm2302_vm4, %v16530_v38  ;;  %v20243_v31 = vld [vmem:[#allocation260_spill] sm:$0xff]  ;;  %v20244_v45 = vld [vmem:[#allocation49_spill] sm:$0xff]  ;;  %v20245_v38 = vld [vmem:[#allocation51_spill] sm:$0xff] }
 0x304   : > { %v5800_v14 = vpop.f32.mrf.mxu1 }
 0x305   : > { %20242 = vst [vmem:[#allocation243_spill] sm:$0xff] %v17436_v10  ;;  %v17441_v54 = vadd.f32 %v13431_v30, %v6301_v8  ;;  %v6299_v40 = vadd.f32 %v5800_v14, %v16532_v47  ;;  %v6721_v24 = vpop.f32.mrf.mxu0  ;;  %v6580_v30 = vsel %vm14678_vm3, %v6575_v6, %v6579_v4  ;;  %v6590_v47 = vsel %vm14678_vm3, %v6585_v3, %v6589_v23 }
 0x306   : > { %v13302_v39 = vpop.f32.mrf.mxu1  ;;  %v17465_v4 = vcombine.low %v6580_v30, %v6590_v47 }
 0x307   : > { %v17444_v41 = vadd.f32 %v6718_v2, %v6299_v40  ;;  %v6302_v57 = vadd.f32 %v13302_v39, %v20243_v31  ;;  %v13435_v10 = vpop.f32.mrf.mxu0  ;;  %13530 = vmatmul.mubr.msk.bf16.gmra.mxu0 %vm2302_vm4, %v20244_v45 }
 0x308   : > { %v5803_v20 = vpop.f32.mrf.mxu1  ;;  %13533 = vmatprep.mubr.msk.bf16.mxu0 %vm2302_vm4, %v20245_v38  ;;  %20247 = vst [vmem:[#allocation250_spill] sm:$0xff] %v17465_v4 }
 0x309   : > { %v17455_v56 = vadd.f32 %v13432_v25, %v6302_v57  ;;  %v6300_v17 = vadd.f32 %v5803_v20, %v20246_v62  ;;  %v6734_v2 = vpop.f32.mrf.mxu0  ;;  %v17472_v57 = vcombine.low %v17394_v61, %v17397_v35 }
 0x30a   : > { %v13305_v8 = vpop.f32.mrf.mxu1  ;;  %13400 = vmatmul.mubr.msk.bf16.gmra.mxu1 %vm2302_vm4, %v16538_v37 }
 0x30b   : > { %v17460_v14 = vadd.f32 %v6721_v24, %v6300_v17  ;;  %v6305_v40 = vadd.f32 %v13305_v8, %v16573_v28  ;;  %v13436_v39 = vpop.f32.mrf.mxu0  ;;  %13403 = vmatprep.mubr.msk.bf16.mxu1 %vm2302_vm4, %v16578_v16  ;;  %v20248_v28 = vld [vmem:[#allocation263_spill] sm:$0xff] }
 0x30c   : > { %v5816_v6 = vpop.f32.mrf.mxu1 }
 0x30d   : > { %v17467_v25 = vadd.f32 %v13435_v10, %v6305_v40  ;;  %v6303_v3 = vadd.f32 %v5816_v6, %v16580_v12  ;;  %v6737_v23 = vpop.f32.mrf.mxu0  ;;  %v20249_v10 = vld [vmem:[#allocation53_spill] sm:$0xff] }
 0x30e   : > { %v13306_v31 = vpop.f32.mrf.mxu1 }
 0x30f   : > { %v17474_v24 = vadd.f32 %v6734_v2, %v6303_v3  ;;  %v6306_v20 = vadd.f32 %v13306_v31, %v20248_v28  ;;  %v13439_v62 = vpop.f32.mrf.mxu0  ;;  %13534 = vmatmul.mubr.msk.bf16.gmra.mxu0 %vm2302_vm4, %v17465_v4  ;;  %v17498_v31 = vld [vmem:[%s14657_s17 + $0x64c] sm:$0xf] }
 0x310   : > { %v5819_v30 = vpop.f32.mrf.mxu1  ;;  %13537 = vmatprep.mubr.msk.bf16.mxu0 %vm2302_vm4, %v20249_v10  ;;  %v20254_v10 = vld [vmem:[#allocation60_spill] sm:$0xff] }
 0x311   : > { %v17481_v12 = vadd.f32 %v13436_v39, %v6306_v20  ;;  %v6304_v47 = vadd.f32 %v5819_v30, %v16610_v34  ;;  %v6750_v61 = vpop.f32.mrf.mxu0  ;;  %v17495_v34 = vld [vmem:[%s14657_s17 + $0x648] sm:$0xf]  ;;  %v20253_v30 = vld [vmem:[#allocation56_spill] sm:$0xff] }
 0x312   : > { %v13309_v35 = vpop.f32.mrf.mxu1  ;;  %13404 = vmatmul.mubr.msk.bf16.gmra.mxu1 %vm2302_vm4, %v17472_v57 }
 0x313   : > { %v17486_v17 = vadd.f32 %v6737_v23, %v6304_v47  ;;  %v6309_v2 = vadd.f32 %v13309_v35, %v16620_v33  ;;  %v13440_v8 = vpop.f32.mrf.mxu0  ;;  %13407 = vmatprep.mubr.msk.bf16.mxu1 %vm2302_vm4, %v16625_v13  ;;  %v6605_v47 = vshrl.u32 %v17498_v31, 16  ;;  %v6601_v35 = vshll.u32 %v17498_v31, 16 }
 0x314   : > { %v5832_v40 = vpop.f32.mrf.mxu1 }
 0x315   : > { %20250 = vst [vmem:[#allocation246_spill] sm:$0xff] %v17486_v17  ;;  %v17491_v6 = vadd.f32 %v13439_v62, %v6309_v2  ;;  %v6307_v39 = vadd.f32 %v5832_v40, %v16627_v48  ;;  %v6753_v3 = vpop.f32.mrf.mxu0  ;;  %v6592_v48 = vshrl.u32 %v17495_v34, 16  ;;  %v6595_v62 = vshll.u32 %v17495_v34, 16  ;;  %v20256_v2 = vld [vmem:[#allocation267_spill] sm:$0xff] }
 0x316   : > { %v13310_v28 = vpop.f32.mrf.mxu1 }
 0x317   : > { %20251 = vst [vmem:[#allocation249_spill] sm:$0xff] %v17491_v6  ;;  %v17500_v20 = vadd.f32 %v6750_v61, %v6307_v39  ;;  %v6310_v23 = vadd.f32 %v13310_v28, %v16647_v7  ;;  %v13443_v33 = vpop.f32.mrf.mxu0  ;;  %13538 = vmatmul.mubr.msk.bf16.gmra.mxu0 %vm2302_vm4, %v20253_v30  ;;  %v20257_v28 = vld [vmem:[#allocation266_spill] sm:$0xff]  ;;  %v6594_v45 = vrot.slane %v6592_v48, 4  ;;  %v564_v6 = vld [vmem:[%s14657_s17 + $0x650] sm:$0x1]  ;;  %v20260_v48 = vld [vmem:[#allocation69_spill] sm:$0xff] }
 0x318   : > { %v5835_v13 = vpop.f32.mrf.mxu1  ;;  %13541 = vmatprep.mubr.msk.bf16.mxu0 %vm2302_vm4, %v20254_v10 }
 0x319   : > { %20252 = vst [vmem:[#allocation252_spill] sm:$0xff] %v17500_v20  ;;  %v17511_v61 = vadd.f32 %v13440_v8, %v6310_v23  ;;  %v6308_v7 = vadd.f32 %v5835_v13, %v20256_v2  ;;  %v6766_v40 = vpop.f32.mrf.mxu0  ;;  %v6597_v8 = vrot.slane %v6595_v62, 5  ;;  %v6603_v23 = vrot.slane %v6601_v35, 5 }
 0x31a   : > { %v13313_v39 = vpop.f32.mrf.mxu1  ;;  %13408 = vmatmul.mubr.msk.bf16.gmra.mxu1 %vm2302_vm4, %v20257_v28 }
 0x31b   : > { %20255 = vst [vmem:[#allocation256_spill] sm:$0xff] %v17511_v61  ;;  %v17516_v30 = vadd.f32 %v6753_v3, %v6308_v7  ;;  %v6313_v10 = vadd.f32 %v13313_v39, %v16670_v55  ;;  %v13444_v4 = vpop.f32.mrf.mxu0  ;;  %13411 = vmatprep.mubr.msk.bf16.mxu1 %vm2302_vm4, %v16675_v52  ;;  %v6607_v61 = vrot.slane %v6605_v47, 4  ;;  %v20259_v39 = vld [vmem:[#allocation65_spill] sm:$0xff]  ;;  %v6598_v62 = vor.u32 %v6597_v8, %v6594_v45 }
 0x31c   : > { %v5848_v38 = vpop.f32.mrf.mxu1 }
 0x31d   : > { %20258 = vst [vmem:[#allocation255_spill] sm:$0xff] %v17516_v30  ;;  %v17521_v13 = vadd.f32 %v13443_v33, %v6313_v10  ;;  %v6311_v2 = vadd.f32 %v5848_v38, %v16677_v46  ;;  %v6769_v20 = vpop.f32.mrf.mxu0  ;;  %v6608_v33 = vor.u32 %v6607_v61, %v6603_v23  ;;  %v6611_v10 = vshll.u32 %v564_v6, 16 }
 0x31e   : > { %v13314_v17 = vpop.f32.mrf.mxu1  ;;  %v6599_v61 = vrot.slane %v6598_v62, 4 }
 0x31f   : > { %v17525_v3 = vadd.f32 %v6766_v40, %v6311_v2  ;;  %v6314_v55 = vadd.f32 %v13314_v17, %v16692_v32  ;;  %v13447_v7 = vpop.f32.mrf.mxu0  ;;  %13542 = vmatmul.mubr.msk.bf16.gmra.mxu0 %vm2302_vm4, %v20259_v39  ;;  %v6609_v6 = vrot.slane %v6608_v33, 4 }
 0x320   : > { %v5851_v30 = vpop.f32.mrf.mxu1  ;;  %13545 = vmatprep.mubr.msk.bf16.mxu0 %vm2302_vm4, %v20260_v48  ;;  %v20262_v48 = vld [vmem:[#allocation78_spill] sm:$0xff] }
 0x321   : > { %v17532_v47 = vadd.f32 %v13444_v4, %v6314_v55  ;;  %v6312_v38 = vadd.f32 %v5851_v30, %v16701_v50  ;;  %v6782_v46 = vpop.f32.mrf.mxu0  ;;  %v6613_v4 = vrot.slane %v6611_v10, 5 }
 0x322   : > { %v13317_v35 = vpop.f32.mrf.mxu1  ;;  %13412 = vmatmul.mubr.msk.bf16.gmra.mxu1 %vm2302_vm4, %v16683_v5 }
 0x323   : > { %v17537_v32 = vadd.f32 %v6769_v20, %v6312_v38  ;;  %v6317_v17 = vadd.f32 %v13317_v35, %v16712_v11  ;;  %v13448_v40 = vpop.f32.mrf.mxu0  ;;  %13415 = vmatprep.mubr.msk.bf16.mxu1 %vm2302_vm4, %v16716_v27  ;;  %v20261_v11 = vld [vmem:[#allocation73_spill] sm:$0xff] }
 0x324   : > { %v5864_v45 = vpop.f32.mrf.mxu1 }
 0x325   : > { %v17542_v8 = vadd.f32 %v13447_v7, %v6317_v17  ;;  %v6315_v50 = vadd.f32 %v5864_v45, %v16718_v53  ;;  %v6785_v30 = vpop.f32.mrf.mxu0  ;;  %v6604_v7 = vsel %vm14678_vm3, %v6599_v61, %v6603_v23  ;;  %v6614_v53 = vsel %vm14678_vm3, %v6609_v6, %v6613_v4 }
 0x326   : > { %v13318_v2 = vpop.f32.mrf.mxu1  ;;  %v17566_v23 = vcombine.low %v6604_v7, %v6614_v53 }
 0x327   : > { %v17545_v55 = vadd.f32 %v6782_v46, %v6315_v50  ;;  %v6318_v20 = vadd.f32 %v13318_v2, %v16732_v26  ;;  %v13451_v38 = vpop.f32.mrf.mxu0  ;;  %13546 = vmatmul.mubr.msk.bf16.gmra.mxu0 %vm2302_vm4, %v20261_v11  ;;  %v17573_v50 = vcombine.low %v17495_v34, %v17498_v31  ;;  %v20286_v11 = vld [vmem:[#allocation87_spill] sm:$0xff] }
 0x328   : > { %v5867_v35 = vpop.f32.mrf.mxu1  ;;  %13549 = vmatprep.mubr.msk.bf16.mxu0 %vm2302_vm4, %v20262_v48  ;;  %20263 = vst [vmem:[#allocation260_spill] sm:$0xff] %v17566_v23  ;;  %v20282_v48 = vld [vmem:[#allocation94_spill] sm:$0xff] }
 0x329   : > { %v17556_v62 = vadd.f32 %v13448_v40, %v6318_v20  ;;  %v6316_v33 = vadd.f32 %v5867_v35, %v16737_v44  ;;  %v6798_v10 = vpop.f32.mrf.mxu0 }
 0x32a   : > { %v13321_v26 = vpop.f32.mrf.mxu1  ;;  %13416 = vmatmul.mubr.msk.bf16.gmra.mxu1 %vm2302_vm4, %v16724_v36 }
 0x32b   : > { %v17561_v46 = vadd.f32 %v6785_v30, %v6316_v33  ;;  %v6321_v17 = vadd.f32 %v13321_v26, %v16744_v29  ;;  %v13452_v45 = vpop.f32.mrf.mxu0  ;;  %13419 = vmatprep.mubr.msk.bf16.mxu1 %vm2302_vm4, %v16747_v19  ;;  %v20265_v33 = vld [vmem:[#allocation80_spill] sm:$0xff] }
 0x32c   : > { %v5880_v61 = vpop.f32.mrf.mxu1 }
 0x32d   : > { %v17568_v40 = vadd.f32 %v13451_v38, %v6321_v17  ;;  %v6319_v44 = vadd.f32 %v5880_v61, %v16749_v21  ;;  %v6801_v6 = vpop.f32.mrf.mxu0 }
 0x32e   : > { %v13322_v4 = vpop.f32.mrf.mxu1 }
 0x32f   : > { %v17575_v30 = vadd.f32 %v6798_v10, %v6319_v44  ;;  %v6322_v29 = vadd.f32 %v13322_v4, %v16756_v1  ;;  %v13455_v2 = vpop.f32.mrf.mxu0  ;;  %13550 = vmatmul.mubr.msk.bf16.gmra.mxu0 %vm2302_vm4, %v17566_v23  ;;  %v20264_v1 = vld [vmem:[#allocation10_spill] sm:$0xff]  ;;  %v20281_v23 = vld [vmem:[#allocation135_spill] sm:$0xff] }
 0x330   : > { %v5883_v20 = vpop.f32.mrf.mxu1  ;;  %13685 = vmatprep.mubr.msk.bf16.mxu0 %vm2302_vm4, %v19951_v9  ;;  %v20267_v9 = vld [vmem:[#allocation121_spill] sm:$0xff] }
 0x331   : > { %v17582_v38 = vadd.f32 %v13452_v45, %v6322_v29  ;;  %v6320_v21 = vadd.f32 %v5883_v20, %v16761_v0  ;;  %v6814_v35 = vpop.f32.mrf.mxu0  ;;  %v9906_v0 = vsel %vm2495_vm0, %v17218_v49, 0  ;;  %v20270_v20 = vld [vmem:[#allocation88_spill] sm:$0xff]  ;;  %v20273_v49 = vld [vmem:[#allocation81_spill] sm:$0xff] }
 0x332   : > { %v13325_v7 = vpop.f32.mrf.mxu1  ;;  %13420 = vmatmul.mubr.msk.bf16.gmra.mxu1 %vm2302_vm4, %v17573_v50 }
 0x333   : > { %v17587_v34 = vadd.f32 %v6801_v6, %v6320_v21  ;;  %v6325_v31 = vadd.f32 %v13325_v7, %v20264_v1  ;;  %v13456_v53 = vpop.f32.mrf.mxu0  ;;  %13555 = vmatprep.mubr.msk.bf16.mxu1 %vm2302_vm4, %v20265_v33  ;;  %v20269_v6 = vld [vmem:[#allocation124_spill] sm:$0xff]  ;;  %v20271_v7 = vld [vmem:[#allocation90_spill] sm:$0xff] }
 0x334   : > { %v5896_v10 = vpop.f32.mrf.mxu1 }
 0x335   : > { %v17592_v26 = vadd.f32 %v13455_v2, %v6325_v31  ;;  %v6323_v17 = vadd.f32 %v5896_v10, %v20267_v9  ;;  %v6817_v45 = vpop.f32.mrf.mxu0  ;;  %v9116_v2 = vsel %vm2495_vm0, %v17207_v63, 0  ;;  %v20274_v10 = vld [vmem:[#allocation82_spill] sm:$0xff] }
 0x336   : > { %v13326_v61 = vpop.f32.mrf.mxu1  ;;  %v20277_v63 = vld [vmem:[#allocation86_spill] sm:$0xff] }
 0x337   : > { %20266 = vst [vmem:[#allocation261_spill] sm:$0xff] %v17592_v26  ;;  %v17597_v44 = vadd.f32 %v6814_v35, %v6323_v17  ;;  %v6326_v4 = vadd.f32 %v13326_v61, %v20269_v6  ;;  %v13459_v29 = vpop.f32.mrf.mxu0  ;;  %13686 = vmatmul.mubr.msk.bf16.vlgmr.msra.gmra.mxu0 %vm2302_vm4, %v20270_v20  ;;  %v20276_v17 = vld [vmem:[#allocation127_spill] sm:$0xff] }
 0x338   : > { %v5899_v21 = vpop.f32.mrf.mxu1  ;;  %13944 = vmatpush3.bf16.msra.mxu0 %v9906_v0  ;;  %13689 = vmatprep.mubr.msk.bf16.mxu0 %vm2302_vm4, %v20271_v7 }
 0x339   : > { %20268 = vst [vmem:[#allocation263_spill] sm:$0xff] %v17597_v44  ;;  %v17606_v1 = vadd.f32 %v13456_v53, %v6326_v4  ;;  %v6324_v31 = vadd.f32 %v5899_v21, %v20273_v49  ;;  %v6830_v35 = vpop.f32.mrf.mxu0  ;;  %v20279_v53 = vld [vmem:[#allocation132_spill] sm:$0xff] }
 0x33a   : > { %v13329_v33 = vpop.f32.mrf.mxu1  ;;  %13556 = vmatmul.mubr.msk.bf16.vlgmr.msra.gmra.mxu1 %vm2302_vm4, %v20274_v10 }
 0x33b   : > { %20272 = vst [vmem:[#allocation53_spill] sm:$0xff] %v17606_v1  ;;  %v17611_v9 = vadd.f32 %v6817_v45, %v6324_v31  ;;  %v6329_v61 = vadd.f32 %v13329_v33, %v20276_v17  ;;  %13814 = vmatpush3.bf16.msra.mxu1 %v9116_v2  ;;  %v13460_v6 = vpop.f32.mrf.mxu0  ;;  %13559 = vmatprep.mubr.msk.bf16.mxu1 %vm2302_vm4, %v20277_v63  ;;  %v20283_v33 = vld [vmem:[#allocation96_spill] sm:$0xff] }
 0x33c   : > { %v5912_v0 = vpop.f32.mrf.mxu1 }
 0x33d   : > { %20275 = vst [vmem:[#allocation267_spill] sm:$0xff] %v17611_v9  ;;  %v17616_v20 = vadd.f32 %v13459_v29, %v6329_v61  ;;  %v6327_v4 = vadd.f32 %v5912_v0, %v20279_v53  ;;  %v6833_v21 = vpop.f32.mrf.mxu0  ;;  %v20285_v29 = vld [vmem:[#allocation84_spill] sm:$0xff] }
 0x33e   : > { %v13330_v7 = vpop.f32.mrf.mxu1 }
 0x33f   : > { %20278 = vst [vmem:[#allocation266_spill] sm:$0xff] %v17616_v20  ;;  %v17619_v49 = vadd.f32 %v6830_v35, %v6327_v4  ;;  %v6330_v45 = vadd.f32 %v13330_v7, %v20281_v23  ;;  %v13463_v31 = vpop.f32.mrf.mxu0  ;;  %13690 = vmatmul.mubr.msk.bf16.gmra.mxu0 %vm2302_vm4, %v20282_v48  ;;  %v20288_v23 = vld [vmem:[#allocation140_spill] sm:$0xff]  ;;  %v20294_v20 = vld [vmem:[#allocation99_spill] sm:$0xff] }
 0x340   : > { %v5915_v2 = vpop.f32.mrf.mxu1  ;;  %13693 = vmatprep.mubr.msk.bf16.mxu0 %vm2302_vm4, %v20283_v33  ;;  %v20289_v48 = vld [vmem:[#allocation92_spill] sm:$0xff]  ;;  %v14433_v33 = vld [vmem:[%s14657_s17 + $0x64] sm:$0xf] }
 0x341   : > { %20280 = vst [vmem:[#allocation10_spill] sm:$0xff] %v17619_v49  ;;  %v17626_v17 = vadd.f32 %v13460_v6, %v6330_v45  ;;  %v6328_v61 = vadd.f32 %v5915_v2, %v20285_v29  ;;  %v6846_v0 = vpop.f32.mrf.mxu0  ;;  %v7351_v6 = vrot.slane %v14433_v33, 5  ;;  %v20291_v2 = vld [vmem:[#allocation143_spill] sm:$0xff] }
 0x342   : > { %v13333_v53 = vpop.f32.mrf.mxu1  ;;  %13560 = vmatmul.mubr.msk.bf16.gmra.mxu1 %vm2302_vm4, %v20286_v11 }
 0x343   : > { %20284 = vst [vmem:[#allocation80_spill] sm:$0xff] %v17626_v17  ;;  %v17631_v35 = vadd.f32 %v6833_v21, %v6328_v61  ;;  %v6333_v4 = vadd.f32 %v13333_v53, %v20288_v23  ;;  %v13464_v7 = vpop.f32.mrf.mxu0  ;;  %13563 = vmatprep.mubr.msk.bf16.mxu1 %vm2302_vm4, %v20289_v48  ;;  %v14434_v21 = vld [vmem:[%s14657_s17 + $0x60] sm:$0xf]  ;;  %v20293_v53 = vld [vmem:[#allocation148_spill] sm:$0xff]  ;;  %v7353_v33 = vrot.slane %v7351_v6, 4 }
 0x344   : > { %v5928_v45 = vpop.f32.mrf.mxu1  ;;  %v11965_v61 = vrot.slane %v14434_v21, 9  ;;  %v14435_v48 = vld [vmem:[%s14657_s17 + $0x68] sm:$0x1] }
 0x345   : > { %20287 = vst [vmem:[#allocation121_spill] sm:$0xff] %v17631_v35  ;;  %v17637_v39 = vadd.f32 %v13463_v31, %v6333_v4  ;;  %v6331_v29 = vadd.f32 %v5928_v45, %v20291_v2  ;;  %v6849_v51 = vpop.f32.mrf.mxu0  ;;  %v7354_v9 = vrot.slane %v14435_v48, 5  ;;  %v20295_v4 = vld [vmem:[#allocation170_spill] sm:$0xff]  ;;  %v355_v45 = vld [vmem:[%s14657_s17 + $0x6c] sm:$0xf] }
 0x346   : > { %v13334_v17 = vpop.f32.mrf.mxu1  ;;  %v356_v2 = vld [vmem:[%s14657_s17 + $0x70] sm:$0xf]  ;;  %v20297_v21 = vld [vmem:[#allocation151_spill] sm:$0xff] }
 0x347   : > { %20290 = vst [vmem:[#allocation124_spill] sm:$0xff] %v17637_v39  ;;  %v17641_v35 = vadd.f32 %v6846_v0, %v6331_v29  ;;  %v6334_v23 = vadd.f32 %v13334_v17, %v20293_v53  ;;  %v13467_v49 = vpop.f32.mrf.mxu0  ;;  %13694 = vmatmul.mubr.msk.bf16.gmra.mxu0 %vm2302_vm4, %v20294_v20  ;;  %v20298_v17 = vld [vmem:[#allocation93_spill] sm:$0xff]  ;;  %v7352_v20 = vsel %vm15439_vm7, %v11965_v61, %v7351_v6  ;;  %v20301_v48 = vld [vmem:[#allocation167_spill] sm:$0xff] }
 0x348   : > { %v5931_v31 = vpop.f32.mrf.mxu1  ;;  %13697 = vmatprep.mubr.msk.bf16.mxu0 %vm2302_vm4, %v20295_v4  ;;  %v20302_v4 = vld [vmem:[#allocation98_spill] sm:$0xff] }
 0x349   : > { %20292 = vst [vmem:[#allocation88_spill] sm:$0xff] %v17641_v35  ;;  %v17651_v39 = vadd.f32 %v13464_v7, %v6334_v23  ;;  %v6332_v0 = vadd.f32 %v5931_v31, %v20297_v21  ;;  %v6862_v29 = vpop.f32.mrf.mxu0  ;;  %v7355_v7 = vsel %vm15439_vm7, %v7353_v33, %v7354_v9  ;;  %v12047_v23 = vcombine.low %v355_v45, %v356_v2  ;;  %v20312_v2 = vld [vmem:[#allocation178_spill] sm:$0xff] }
 0x34a   : > { %v13337_v35 = vpop.f32.mrf.mxu1  ;;  %13564 = vmatmul.mubr.msk.bf16.gmra.mxu1 %vm2302_vm4, %v20298_v17  ;;  %v17668_v6 = vcombine.low %v7352_v20, %v7355_v7 }
 0x34b   : > { %20296 = vst [vmem:[#allocation90_spill] sm:$0xff] %v17651_v39  ;;  %v17658_v11 = vadd.f32 %v6849_v51, %v6332_v0  ;;  %v6337_v63 = vadd.f32 %v13337_v35, %v20301_v48  ;;  %v13468_v1 = vpop.f32.mrf.mxu0  ;;  %13567 = vmatprep.mubr.msk.bf16.mxu1 %vm2302_vm4, %v20302_v4  ;;  %v20304_v39 = vld [vmem:[#allocation273_spill] sm:$0xff]  ;;  %v20307_v35 = vld [vmem:[#allocation175_spill] sm:$0xff] }
 0x34c   : > { %v5944_v31 = vpop.f32.mrf.mxu1  ;;  %20305 = vst [vmem:[#allocation127_spill] sm:$0xff] %v17668_v6 }
 0x34d   : > { %20300 = vst [vmem:[#allocation81_spill] sm:$0xff] %v17658_v11  ;;  %v17665_v21 = vadd.f32 %v13467_v49, %v6337_v63  ;;  %v6335_v17 = vadd.f32 %v5944_v31, %v20304_v39  ;;  %v6865_v44 = vpop.f32.mrf.mxu0  ;;  %v20308_v11 = vld [vmem:[#allocation106_spill] sm:$0xff]  ;;  %v20310_v63 = vld [vmem:[#allocation24_spill] sm:$0xff] }
 0x34e   : > { %v13338_v26 = vpop.f32.mrf.mxu1 }
 0x34f   : > { %20303 = vst [vmem:[#allocation82_spill] sm:$0xff] %v17665_v21  ;;  %v17670_v51 = vadd.f32 %v6862_v29, %v6335_v17  ;;  %v6338_v61 = vadd.f32 %v13338_v26, %v20307_v35  ;;  %v13471_v0 = vpop.f32.mrf.mxu0  ;;  %13698 = vmatmul.mubr.msk.bf16.gmra.mxu0 %vm2302_vm4, %v12047_v23  ;;  %v20313_v17 = vld [vmem:[#allocation102_spill] sm:$0xff] }
 0x350   : > { %v5947_v48 = vpop.f32.mrf.mxu1  ;;  %13701 = vmatprep.mubr.msk.bf16.mxu0 %vm2302_vm4, %v20308_v11  ;;  %v20315_v11 = vld [vmem:[#allocation181_spill] sm:$0xff] }
 0x351   : > { %20306 = vst [vmem:[#allocation132_spill] sm:$0xff] %v17670_v51  ;;  %v17676_v9 = vadd.f32 %v13468_v1, %v6338_v61  ;;  %v6336_v49 = vadd.f32 %v5947_v48, %v20310_v63  ;;  %v6878_v39 = vpop.f32.mrf.mxu0  ;;  %v20317_v61 = vld [vmem:[#allocation104_spill] sm:$0xff] }
 0x352   : > { %v13341_v33 = vpop.f32.mrf.mxu1  ;;  %13568 = vmatmul.mubr.msk.bf16.gmra.mxu1 %vm2302_vm4, %v17668_v6 }
 0x353   : > { %20309 = vst [vmem:[#allocation135_spill] sm:$0xff] %v17676_v9  ;;  %v17681_v45 = vadd.f32 %v6865_v44, %v6336_v49  ;;  %v6341_v26 = vadd.f32 %v13341_v33, %v20312_v2  ;;  %v13472_v29 = vpop.f32.mrf.mxu0  ;;  %13571 = vmatprep.mubr.msk.bf16.mxu1 %vm2302_vm4, %v20313_v17  ;;  %v20318_v44 = vld [vmem:[#allocation110_spill] sm:$0xff]  ;;  %v20319_v33 = vld [vmem:[#allocation112_spill] sm:$0xff] }
 0x354   : > { %v5960_v20 = vpop.f32.mrf.mxu1 }
 0x355   : > { %20311 = vst [vmem:[#allocation94_spill] sm:$0xff] %v17681_v45  ;;  %v17686_v7 = vadd.f32 %v13471_v0, %v6341_v26  ;;  %v6339_v1 = vadd.f32 %v5960_v20, %v20315_v11  ;;  %v6881_v23 = vpop.f32.mrf.mxu0  ;;  %v20321_v0 = vld [vmem:[#allocation184_spill] sm:$0xff]  ;;  %v20322_v11 = vld [vmem:[#allocation103_spill] sm:$0xff] }
 0x356   : > { %v13342_v31 = vpop.f32.mrf.mxu1 }
 0x357   : > { %20314 = vst [vmem:[#allocation96_spill] sm:$0xff] %v17686_v7  ;;  %v17689_v35 = vadd.f32 %v6878_v39, %v6339_v1  ;;  %v6342_v48 = vadd.f32 %v13342_v31, %v20317_v61  ;;  %v13475_v63 = vpop.f32.mrf.mxu0  ;;  %13702 = vmatmul.mubr.msk.bf16.gmra.mxu0 %vm2302_vm4, %v20318_v44  ;;  %v20324_v1 = vld [vmem:[#allocation189_spill] sm:$0xff] }
 0x358   : > { %v5963_v49 = vpop.f32.mrf.mxu1  ;;  %13705 = vmatprep.mubr.msk.bf16.mxu0 %vm2302_vm4, %v20319_v33 }
 0x359   : > { %20316 = vst [vmem:[#allocation84_spill] sm:$0xff] %v17689_v35  ;;  %v17696_v2 = vadd.f32 %v13472_v29, %v6342_v48  ;;  %v6340_v26 = vadd.f32 %v5963_v49, %v20321_v0  ;;  %v6894_v17 = vpop.f32.mrf.mxu0  ;;  %v20325_v35 = vld [vmem:[#allocation108_spill] sm:$0xff] }
 0x35a   : > { %v13345_v20 = vpop.f32.mrf.mxu1  ;;  %13572 = vmatmul.mubr.msk.bf16.gmra.mxu1 %vm2302_vm4, %v20322_v11  ;;  %v20327_v29 = vld [vmem:[#allocation192_spill] sm:$0xff]  ;;  %v20342_v11 = vld [vmem:[#allocation122_spill] sm:$0xff] }
 0x35b   : > { %20320 = vst [vmem:[#allocation140_spill] sm:$0xff] %v17696_v2  ;;  %v17701_v39 = vadd.f32 %v6881_v23, %v6340_v26  ;;  %v6345_v31 = vadd.f32 %v13345_v20, %v20324_v1  ;;  %v13476_v61 = vpop.f32.mrf.mxu0  ;;  %13575 = vmatprep.mubr.msk.bf16.mxu1 %vm2302_vm4, %v20325_v35  ;;  %v20329_v2 = vld [vmem:[#allocation197_spill] sm:$0xff]  ;;  %v20330_v26 = vld [vmem:[#allocation116_spill] sm:$0xff]  ;;  %v20331_v1 = vld [vmem:[#allocation118_spill] sm:$0xff] }
 0x35c   : > { %v5976_v44 = vpop.f32.mrf.mxu1 }
 0x35d   : > { %20323 = vst [vmem:[#allocation143_spill] sm:$0xff] %v17701_v39  ;;  %v17706_v7 = vadd.f32 %v13475_v63, %v6345_v31  ;;  %v6343_v48 = vadd.f32 %v5976_v44, %v20327_v29  ;;  %v6897_v33 = vpop.f32.mrf.mxu0  ;;  %v20333_v63 = vld [vmem:[#allocation200_spill] sm:$0xff] }
 0x35e   : > { %v13346_v49 = vpop.f32.mrf.mxu1 }
 0x35f   : > { %20326 = vst [vmem:[#allocation148_spill] sm:$0xff] %v17706_v7  ;;  %v17709_v0 = vadd.f32 %v6894_v17, %v6343_v48  ;;  %v6346_v45 = vadd.f32 %v13346_v49, %v20329_v2  ;;  %v13479_v23 = vpop.f32.mrf.mxu0  ;;  %13706 = vmatmul.mubr.msk.bf16.gmra.mxu0 %vm2302_vm4, %v20330_v26  ;;  %v20334_v7 = vld [vmem:[#allocation109_spill] sm:$0xff]  ;;  %v20337_v26 = vld [vmem:[#allocation114_spill] sm:$0xff] }
 0x360   : > { %v5979_v20 = vpop.f32.mrf.mxu1  ;;  %13709 = vmatprep.mubr.msk.bf16.mxu0 %vm2302_vm4, %v20331_v1  ;;  %v20336_v2 = vld [vmem:[#allocation205_spill] sm:$0xff] }
 0x361   : > { %20328 = vst [vmem:[#allocation99_spill] sm:$0xff] %v17709_v0  ;;  %v17716_v39 = vadd.f32 %v13476_v61, %v6346_v45  ;;  %v6344_v31 = vadd.f32 %v5979_v20, %v20333_v63  ;;  %v6910_v44 = vpop.f32.mrf.mxu0  ;;  %v14436_v1 = vld [vmem:[%s14657_s17 + $0x13c] sm:$0xf]  ;;  %v20339_v20 = vld [vmem:[#allocation208_spill] sm:$0xff] }
 0x362   : > { %v13349_v29 = vpop.f32.mrf.mxu1  ;;  %13576 = vmatmul.mubr.msk.bf16.gmra.mxu1 %vm2302_vm4, %v20334_v7  ;;  %v7358_v45 = vrot.slane %v14436_v1, 5 }
 0x363   : > { %20332 = vst [vmem:[#allocation170_spill] sm:$0xff] %v17716_v39  ;;  %v17721_v17 = vadd.f32 %v6897_v33, %v6344_v31  ;;  %v6349_v48 = vadd.f32 %v13349_v29, %v20336_v2  ;;  %v13480_v49 = vpop.f32.mrf.mxu0  ;;  %13579 = vmatprep.mubr.msk.bf16.mxu1 %vm2302_vm4, %v20337_v26  ;;  %v14437_v33 = vld [vmem:[%s14657_s17 + $0x138] sm:$0xf]  ;;  %v20341_v29 = vld [vmem:[#allocation211_spill] sm:$0xff]  ;;  %v14438_v26 = vld [vmem:[%s14657_s17 + $0x140] sm:$0x1] }
 0x364   : > { %v5992_v61 = vpop.f32.mrf.mxu1  ;;  %v11966_v31 = vrot.slane %v14437_v33, 9  ;;  %v7360_v1 = vrot.slane %v7358_v45, 4  ;;  %v7361_v9 = vrot.slane %v14438_v26, 5  ;;  %v20345_v33 = vld [vmem:[#allocation214_spill] sm:$0xff] }
 0x365   : > { %20335 = vst [vmem:[#allocation151_spill] sm:$0xff] %v17721_v17  ;;  %v17727_v39 = vadd.f32 %v13479_v23, %v6349_v48  ;;  %v6347_v63 = vadd.f32 %v5992_v61, %v20339_v20  ;;  %v6913_v0 = vpop.f32.mrf.mxu0  ;;  %v20343_v48 = vld [vmem:[#allocation227_spill] sm:$0xff]  ;;  %v385_v61 = vld [vmem:[%s14657_s17 + $0x144] sm:$0xf] }
 0x366   : > { %v13350_v7 = vpop.f32.mrf.mxu1  ;;  %v386_v20 = vld [vmem:[%s14657_s17 + $0x148] sm:$0xf]  ;;  %v20348_v26 = vld [vmem:[#allocation222_spill] sm:$0xff] }
 0x367   : > { %20338 = vst [vmem:[#allocation75_spill] sm:$0xff] %v17727_v39  ;;  %v17731_v17 = vadd.f32 %v6910_v44, %v6347_v63  ;;  %v6350_v2 = vadd.f32 %v13350_v7, %v20341_v29  ;;  %v13483_v35 = vpop.f32.mrf.mxu0  ;;  %13710 = vmatmul.mubr.msk.bf16.gmra.mxu0 %vm2302_vm4, %v20342_v11  ;;  %v20346_v7 = vld [vmem:[#allocation115_spill] sm:$0xff]  ;;  %v7359_v11 = vsel %vm15439_vm7, %v11966_v31, %v7358_v45 }
 0x368   : > { %v5995_v23 = vpop.f32.mrf.mxu1  ;;  %13713 = vmatprep.mubr.msk.bf16.mxu0 %vm2302_vm4, %v20343_v48  ;;  %v20349_v48 = vld [vmem:[#allocation120_spill] sm:$0xff] }
 0x369   : > { %20340 = vst [vmem:[#allocation167_spill] sm:$0xff] %v17731_v17  ;;  %v17741_v39 = vadd.f32 %v13480_v49, %v6350_v2  ;;  %v6348_v44 = vadd.f32 %v5995_v23, %v20345_v33  ;;  %v6926_v63 = vpop.f32.mrf.mxu0  ;;  %v7362_v49 = vsel %vm15439_vm7, %v7360_v1, %v7361_v9  ;;  %v12048_v2 = vcombine.low %v385_v61, %v386_v20  ;;  %v20359_v20 = vld [vmem:[#allocation237_spill] sm:$0xff] }
 0x36a   : > { %v13353_v17 = vpop.f32.mrf.mxu1  ;;  %13580 = vmatmul.mubr.msk.bf16.gmra.mxu1 %vm2302_vm4, %v20346_v7  ;;  %v17758_v45 = vcombine.low %v7359_v11, %v7362_v49 }
 0x36b   : > { %20344 = vst [vmem:[#allocation273_spill] sm:$0xff] %v17741_v39  ;;  %v17748_v29 = vadd.f32 %v6913_v0, %v6348_v44  ;;  %v6353_v51 = vadd.f32 %v13353_v17, %v20348_v26  ;;  %v13484_v21 = vpop.f32.mrf.mxu0  ;;  %13583 = vmatprep.mubr.msk.bf16.mxu1 %vm2302_vm4, %v20349_v48  ;;  %v20351_v39 = vld [vmem:[#allocation230_spill] sm:$0xff] }
 0x36c   : > { %v6008_v23 = vpop.f32.mrf.mxu1  ;;  %20352 = vst [vmem:[#allocation24_spill] sm:$0xff] %v17758_v45  ;;  %v20354_v17 = vld [vmem:[#allocation234_spill] sm:$0xff] }
 0x36d   : > { %20347 = vst [vmem:[#allocation175_spill] sm:$0xff] %v17748_v29  ;;  %v17755_v33 = vadd.f32 %v13483_v35, %v6353_v51  ;;  %v6351_v7 = vadd.f32 %v6008_v23, %v20351_v39  ;;  %v6929_v6 = vpop.f32.mrf.mxu0  ;;  %v20355_v29 = vld [vmem:[#allocation131_spill] sm:$0xff]  ;;  %v20357_v51 = vld [vmem:[#allocation38_spill] sm:$0xff] }
 0x36e   : > { %v13354_v4 = vpop.f32.mrf.mxu1 }
 0x36f   : > { %20350 = vst [vmem:[#allocation106_spill] sm:$0xff] %v17755_v33  ;;  %v17760_v0 = vadd.f32 %v6926_v63, %v6351_v7  ;;  %v6354_v31 = vadd.f32 %v13354_v4, %v20354_v17  ;;  %v13487_v44 = vpop.f32.mrf.mxu0  ;;  %13714 = vmatmul.mubr.msk.bf16.gmra.mxu0 %vm2302_vm4, %v12048_v2  ;;  %v20360_v7 = vld [vmem:[#allocation126_spill] sm:$0xff] }
 0x370   : > { %v6011_v26 = vpop.f32.mrf.mxu1  ;;  %13717 = vmatprep.mubr.msk.bf16.mxu0 %vm2302_vm4, %v20355_v29 }
 0x371   : > { %20353 = vst [vmem:[#allocation178_spill] sm:$0xff] %v17760_v0  ;;  %v17766_v9 = vadd.f32 %v13484_v21, %v6354_v31  ;;  %v6352_v35 = vadd.f32 %v6011_v26, %v20357_v51  ;;  %v6942_v39 = vpop.f32.mrf.mxu0  ;;  %v20362_v21 = vld [vmem:[#allocation241_spill] sm:$0xff] }
 0x372   : > { %v13357_v1 = vpop.f32.mrf.mxu1  ;;  %13584 = vmatmul.mubr.msk.bf16.gmra.mxu1 %vm2302_vm4, %v17758_v45  ;;  %v20364_v31 = vld [vmem:[#allocation129_spill] sm:$0xff] }
 0x373   : > { %20356 = vst [vmem:[#allocation102_spill] sm:$0xff] %v17766_v9  ;;  %v17771_v61 = vadd.f32 %v6929_v6, %v6352_v35  ;;  %v6357_v4 = vadd.f32 %v13357_v1, %v20359_v20  ;;  %v13488_v63 = vpop.f32.mrf.mxu0  ;;  %13587 = vmatprep.mubr.msk.bf16.mxu1 %vm2302_vm4, %v20360_v7  ;;  %v20365_v6 = vld [vmem:[#allocation137_spill] sm:$0xff]  ;;  %v20366_v1 = vld [vmem:[#allocation139_spill] sm:$0xff] }
 0x374   : > { %v6024_v11 = vpop.f32.mrf.mxu1 }
 0x375   : > { %20358 = vst [vmem:[#allocation181_spill] sm:$0xff] %v17771_v61  ;;  %v17776_v49 = vadd.f32 %v13487_v44, %v6357_v4  ;;  %v6355_v29 = vadd.f32 %v6024_v11, %v20362_v21  ;;  %v6945_v2 = vpop.f32.mrf.mxu0  ;;  %v20368_v44 = vld [vmem:[#allocation242_spill] sm:$0xff]  ;;  %v20369_v21 = vld [vmem:[#allocation128_spill] sm:$0xff] }
 0x376   : > { %v13358_v23 = vpop.f32.mrf.mxu1 }
 0x377   : > { %20361 = vst [vmem:[#allocation104_spill] sm:$0xff] %v17776_v49  ;;  %v17779_v17 = vadd.f32 %v6942_v39, %v6355_v29  ;;  %v6358_v26 = vadd.f32 %v13358_v23, %v20364_v31  ;;  %v13491_v51 = vpop.f32.mrf.mxu0  ;;  %13718 = vmatmul.mubr.msk.bf16.gmra.mxu0 %vm2302_vm4, %v20365_v6  ;;  %v20371_v29 = vld [vmem:[#allocation244_spill] sm:$0xff] }
 0x378   : > { %v6027_v35 = vpop.f32.mrf.mxu1  ;;  %13721 = vmatprep.mubr.msk.bf16.mxu0 %vm2302_vm4, %v20366_v1 }
 0x379   : > { %20363 = vst [vmem:[#allocation110_spill] sm:$0xff] %v17779_v17  ;;  %v17786_v20 = vadd.f32 %v13488_v63, %v6358_v26  ;;  %v6356_v4 = vadd.f32 %v6027_v35, %v20368_v44  ;;  %v6958_v7 = vpop.f32.mrf.mxu0  ;;  %v20372_v17 = vld [vmem:[#allocation134_spill] sm:$0xff]  ;;  %v20374_v63 = vld [vmem:[#allocation248_spill] sm:$0xff] }
 0x37a   : > { %v13361_v11 = vpop.f32.mrf.mxu1  ;;  %13588 = vmatmul.mubr.msk.bf16.gmra.mxu1 %vm2302_vm4, %v20369_v21  ;;  %v20389_v21 = vld [vmem:[#allocation152_spill] sm:$0xff] }
 0x37b   : > { %20367 = vst [vmem:[#allocation112_spill] sm:$0xff] %v17786_v20  ;;  %v17791_v39 = vadd.f32 %v6945_v2, %v6356_v4  ;;  %v6361_v23 = vadd.f32 %v13361_v11, %v20371_v29  ;;  %v13492_v31 = vpop.f32.mrf.mxu0  ;;  %13591 = vmatprep.mubr.msk.bf16.mxu1 %vm2302_vm4, %v20372_v17  ;;  %v20376_v20 = vld [vmem:[#allocation55_spill] sm:$0xff]  ;;  %v20377_v4 = vld [vmem:[#allocation145_spill] sm:$0xff] }
 0x37c   : > { %v6040_v6 = vpop.f32.mrf.mxu1  ;;  %v20378_v29 = vld [vmem:[#allocation147_spill] sm:$0xff] }
 0x37d   : > { %20370 = vst [vmem:[#allocation184_spill] sm:$0xff] %v17791_v39  ;;  %v17796_v49 = vadd.f32 %v13491_v51, %v6361_v23  ;;  %v6359_v26 = vadd.f32 %v6040_v6, %v20374_v63  ;;  %v6961_v1 = vpop.f32.mrf.mxu0  ;;  %v20380_v51 = vld [vmem:[#allocation57_spill] sm:$0xff] }
 0x37e   : > { %v13362_v35 = vpop.f32.mrf.mxu1 }
 0x37f   : > { %20373 = vst [vmem:[#allocation189_spill] sm:$0xff] %v17796_v49  ;;  %v17799_v44 = vadd.f32 %v6958_v7, %v6359_v26  ;;  %v6362_v61 = vadd.f32 %v13362_v35, %v20376_v20  ;;  %v13495_v2 = vpop.f32.mrf.mxu0  ;;  %13722 = vmatmul.mubr.msk.bf16.gmra.mxu0 %vm2302_vm4, %v20377_v4  ;;  %v20381_v49 = vld [vmem:[#allocation136_spill] sm:$0xff]  ;;  %v20383_v20 = vld [vmem:[#allocation59_spill] sm:$0xff]  ;;  %v20384_v4 = vld [vmem:[#allocation142_spill] sm:$0xff] }
 0x380   : > { %v6043_v11 = vpop.f32.mrf.mxu1  ;;  %13725 = vmatprep.mubr.msk.bf16.mxu0 %vm2302_vm4, %v20378_v29  ;;  %v14439_v29 = vld [vmem:[%s14657_s17 + $0x214] sm:$0xf] }
 0x381   : > { %20375 = vst [vmem:[#allocation192_spill] sm:$0xff] %v17799_v44  ;;  %v17806_v39 = vadd.f32 %v13492_v31, %v6362_v61  ;;  %v6360_v23 = vadd.f32 %v6043_v11, %v20380_v51  ;;  %v6974_v6 = vpop.f32.mrf.mxu0  ;;  %v7365_v61 = vrot.slane %v14439_v29, 5  ;;  %v20386_v11 = vld [vmem:[#allocation61_spill] sm:$0xff] }
 0x382   : > { %v13365_v63 = vpop.f32.mrf.mxu1  ;;  %13592 = vmatmul.mubr.msk.bf16.gmra.mxu1 %vm2302_vm4, %v20381_v49 }
 0x383   : > { %20379 = vst [vmem:[#allocation197_spill] sm:$0xff] %v17806_v39  ;;  %v17811_v7 = vadd.f32 %v6961_v1, %v6360_v23  ;;  %v6365_v26 = vadd.f32 %v13365_v63, %v20383_v20  ;;  %v13496_v35 = vpop.f32.mrf.mxu0  ;;  %13595 = vmatprep.mubr.msk.bf16.mxu1 %vm2302_vm4, %v20384_v4  ;;  %v14440_v1 = vld [vmem:[%s14657_s17 + $0x210] sm:$0xf]  ;;  %v20388_v63 = vld [vmem:[#allocation62_spill] sm:$0xff]  ;;  %v7367_v29 = vrot.slane %v7365_v61, 4 }
 0x384   : > { %v6056_v31 = vpop.f32.mrf.mxu1  ;;  %v11967_v23 = vrot.slane %v14440_v1, 9  ;;  %v14441_v4 = vld [vmem:[%s14657_s17 + $0x218] sm:$0x1]  ;;  %v20392_v1 = vld [vmem:[#allocation64_spill] sm:$0xff] }
 0x385   : > { %20382 = vst [vmem:[#allocation116_spill] sm:$0xff] %v17811_v7  ;;  %v17817_v39 = vadd.f32 %v13495_v2, %v6365_v26  ;;  %v6363_v51 = vadd.f32 %v6056_v31, %v20386_v11  ;;  %v6977_v44 = vpop.f32.mrf.mxu0  ;;  %v7368_v9 = vrot.slane %v14441_v4, 5  ;;  %v20390_v26 = vld [vmem:[#allocation70_spill] sm:$0xff]  ;;  %v415_v31 = vld [vmem:[%s14657_s17 + $0x21c] sm:$0xf]  ;;  %v20395_v4 = vld [vmem:[#allocation68_spill] sm:$0xff] }
 0x386   : > { %v13366_v49 = vpop.f32.mrf.mxu1  ;;  %v416_v11 = vld [vmem:[%s14657_s17 + $0x220] sm:$0xf] }
 0x387   : > { %20385 = vst [vmem:[#allocation118_spill] sm:$0xff] %v17817_v39  ;;  %v17821_v7 = vadd.f32 %v6974_v6, %v6363_v51  ;;  %v6366_v20 = vadd.f32 %v13366_v49, %v20388_v63  ;;  %v13499_v17 = vpop.f32.mrf.mxu0  ;;  %13726 = vmatmul.mubr.msk.bf16.gmra.mxu0 %vm2302_vm4, %v20389_v21  ;;  %v20393_v49 = vld [vmem:[#allocation144_spill] sm:$0xff]  ;;  %v7366_v21 = vsel %vm15439_vm7, %v11967_v23, %v7365_v61 }
 0x388   : > { %v6059_v2 = vpop.f32.mrf.mxu1  ;;  %13729 = vmatprep.mubr.msk.bf16.mxu0 %vm2302_vm4, %v20390_v26  ;;  %v20396_v26 = vld [vmem:[#allocation150_spill] sm:$0xff] }
 0x389   : > { %20387 = vst [vmem:[#allocation200_spill] sm:$0xff] %v17821_v7  ;;  %v17831_v39 = vadd.f32 %v13496_v35, %v6366_v20  ;;  %v6364_v6 = vadd.f32 %v6059_v2, %v20392_v1  ;;  %v6990_v51 = vpop.f32.mrf.mxu0  ;;  %v7369_v35 = vsel %vm15439_vm7, %v7367_v29, %v7368_v9  ;;  %v12049_v20 = vcombine.low %v415_v31, %v416_v11  ;;  %v20406_v11 = vld [vmem:[#allocation77_spill] sm:$0xff] }
 0x38a   : > { %v13369_v7 = vpop.f32.mrf.mxu1  ;;  %13596 = vmatmul.mubr.msk.bf16.gmra.mxu1 %vm2302_vm4, %v20393_v49  ;;  %v17848_v61 = vcombine.low %v7366_v21, %v7369_v35 }
 0x38b   : > { %20391 = vst [vmem:[#allocation205_spill] sm:$0xff] %v17831_v39  ;;  %v17838_v63 = vadd.f32 %v6977_v44, %v6364_v6  ;;  %v6369_v0 = vadd.f32 %v13369_v7, %v20395_v4  ;;  %v13500_v33 = vpop.f32.mrf.mxu0  ;;  %13599 = vmatprep.mubr.msk.bf16.mxu1 %vm2302_vm4, %v20396_v26  ;;  %v20398_v39 = vld [vmem:[#allocation72_spill] sm:$0xff]  ;;  %v20401_v7 = vld [vmem:[#allocation74_spill] sm:$0xff] }
 0x38c   : > { %v6072_v2 = vpop.f32.mrf.mxu1  ;;  %20399 = vst [vmem:[#allocation122_spill] sm:$0xff] %v17848_v61 }
 0x38d   : > { %20394 = vst [vmem:[#allocation208_spill] sm:$0xff] %v17838_v63  ;;  %v17845_v1 = vadd.f32 %v13499_v17, %v6369_v0  ;;  %v6367_v49 = vadd.f32 %v6072_v2, %v20398_v39  ;;  %v6993_v45 = vpop.f32.mrf.mxu0  ;;  %v20402_v63 = vld [vmem:[#allocation160_spill] sm:$0xff] }
 0x38e   : > { %v13370_v48 = vpop.f32.mrf.mxu1  ;;  %v20404_v0 = vld [vmem:[#allocation52_spill] sm:$0xff] }
 0x38f   : > { %20397 = vst [vmem:[#allocation211_spill] sm:$0xff] %v17845_v1  ;;  %v17850_v44 = vadd.f32 %v6990_v51, %v6367_v49  ;;  %v6370_v23 = vadd.f32 %v13370_v48, %v20401_v7  ;;  %v13503_v6 = vpop.f32.mrf.mxu0  ;;  %13730 = vmatmul.mubr.msk.bf16.gmra.mxu0 %vm2302_vm4, %v12049_v20  ;;  %v20407_v49 = vld [vmem:[#allocation156_spill] sm:$0xff] }
 0x390   : > { %v6075_v4 = vpop.f32.mrf.mxu1  ;;  %13733 = vmatprep.mubr.msk.bf16.mxu0 %vm2302_vm4, %v20402_v63 }
 0x391   : > { %20400 = vst [vmem:[#allocation227_spill] sm:$0xff] %v17850_v44  ;;  %v17856_v9 = vadd.f32 %v13500_v33, %v6370_v23  ;;  %v6368_v17 = vadd.f32 %v6075_v4, %v20404_v0  ;;  %v7006_v39 = vpop.f32.mrf.mxu0  ;;  %v20409_v33 = vld [vmem:[#allocation79_spill] sm:$0xff]  ;;  %v20411_v23 = vld [vmem:[#allocation158_spill] sm:$0xff] }
 0x392   : > { %v13373_v29 = vpop.f32.mrf.mxu1  ;;  %13600 = vmatmul.mubr.msk.bf16.gmra.mxu1 %vm2302_vm4, %v17848_v61 }
 0x393   : > { %20403 = vst [vmem:[#allocation214_spill] sm:$0xff] %v17856_v9  ;;  %v17861_v31 = vadd.f32 %v6993_v45, %v6368_v17  ;;  %v6373_v48 = vadd.f32 %v13373_v29, %v20406_v11  ;;  %v13504_v51 = vpop.f32.mrf.mxu0  ;;  %13603 = vmatprep.mubr.msk.bf16.mxu1 %vm2302_vm4, %v20407_v49  ;;  %v20412_v45 = vld [vmem:[#allocation164_spill] sm:$0xff]  ;;  %v20413_v29 = vld [vmem:[#allocation166_spill] sm:$0xff] }
 0x394   : > { %v6088_v21 = vpop.f32.mrf.mxu1 }
 0x395   : > { %20405 = vst [vmem:[#allocation222_spill] sm:$0xff] %v17861_v31  ;;  %v17866_v35 = vadd.f32 %v13503_v6, %v6373_v48  ;;  %v6371_v63 = vadd.f32 %v6088_v21, %v20409_v33  ;;  %v7009_v20 = vpop.f32.mrf.mxu0  ;;  %v20415_v6 = vld [vmem:[#allocation83_spill] sm:$0xff]  ;;  %v20416_v33 = vld [vmem:[#allocation157_spill] sm:$0xff] }
 0x396   : > { %v13374_v2 = vpop.f32.mrf.mxu1 }
 0x397   : > { %20408 = vst [vmem:[#allocation230_spill] sm:$0xff] %v17866_v35  ;;  %v17869_v7 = vadd.f32 %v7006_v39, %v6371_v63  ;;  %v6374_v4 = vadd.f32 %v13374_v2, %v20411_v23  ;;  %v13507_v0 = vpop.f32.mrf.mxu0  ;;  %13734 = vmatmul.mubr.msk.bf16.gmra.mxu0 %vm2302_vm4, %v20412_v45  ;;  %v20418_v63 = vld [vmem:[#allocation85_spill] sm:$0xff] }
 0x398   : > { %v6091_v17 = vpop.f32.mrf.mxu1  ;;  %13737 = vmatprep.mubr.msk.bf16.mxu0 %vm2302_vm4, %v20413_v29 }
 0x399   : > { %20410 = vst [vmem:[#allocation234_spill] sm:$0xff] %v17869_v7  ;;  %v17876_v11 = vadd.f32 %v13504_v51, %v6374_v4  ;;  %v6372_v48 = vadd.f32 %v6091_v17, %v20415_v6  ;;  %v7022_v49 = vpop.f32.mrf.mxu0  ;;  %v20419_v7 = vld [vmem:[#allocation162_spill] sm:$0xff]  ;;  %v20421_v51 = vld [vmem:[#allocation89_spill] sm:$0xff] }
 0x39a   : > { %v13377_v21 = vpop.f32.mrf.mxu1  ;;  %13604 = vmatmul.mubr.msk.bf16.gmra.mxu1 %vm2302_vm4, %v20416_v33  ;;  %v20436_v33 = vld [vmem:[#allocation179_spill] sm:$0xff] }
 0x39b   : > { %20414 = vst [vmem:[#allocation131_spill] sm:$0xff] %v17876_v11  ;;  %v17881_v39 = vadd.f32 %v7009_v20, %v6372_v48  ;;  %v6377_v2 = vadd.f32 %v13377_v21, %v20418_v63  ;;  %v13508_v23 = vpop.f32.mrf.mxu0  ;;  %13607 = vmatprep.mubr.msk.bf16.mxu1 %vm2302_vm4, %v20419_v7  ;;  %v20423_v11 = vld [vmem:[#allocation91_spill] sm:$0xff]  ;;  %v20424_v48 = vld [vmem:[#allocation172_spill] sm:$0xff]  ;;  %v20425_v63 = vld [vmem:[#allocation174_spill] sm:$0xff] }
 0x39c   : > { %v6104_v45 = vpop.f32.mrf.mxu1 }
 0x39d   : > { %20417 = vst [vmem:[#allocation38_spill] sm:$0xff] %v17881_v39  ;;  %v17886_v35 = vadd.f32 %v13507_v0, %v6377_v2  ;;  %v6375_v4 = vadd.f32 %v6104_v45, %v20421_v51  ;;  %v7025_v29 = vpop.f32.mrf.mxu0  ;;  %v20427_v0 = vld [vmem:[#allocation95_spill] sm:$0xff] }
 0x39e   : > { %v13378_v17 = vpop.f32.mrf.mxu1 }
 0x39f   : > { %20420 = vst [vmem:[#allocation237_spill] sm:$0xff] %v17886_v35  ;;  %v17889_v6 = vadd.f32 %v7022_v49, %v6375_v4  ;;  %v6378_v31 = vadd.f32 %v13378_v17, %v20423_v11  ;;  %v13511_v20 = vpop.f32.mrf.mxu0  ;;  %13738 = vmatmul.mubr.msk.bf16.gmra.mxu0 %vm2302_vm4, %v20424_v48  ;;  %v20428_v35 = vld [vmem:[#allocation163_spill] sm:$0xff]  ;;  %v20430_v11 = vld [vmem:[#allocation97_spill] sm:$0xff] }
 0x3a0   : > { %v6107_v21 = vpop.f32.mrf.mxu1  ;;  %13741 = vmatprep.mubr.msk.bf16.mxu0 %vm2302_vm4, %v20425_v63  ;;  %v20431_v48 = vld [vmem:[#allocation169_spill] sm:$0xff]  ;;  %v14442_v63 = vld [vmem:[%s14657_s17 + $0x2ec] sm:$0xf] }
 0x3a1   : > { %20422 = vst [vmem:[#allocation126_spill] sm:$0xff] %v17889_v6  ;;  %v17896_v39 = vadd.f32 %v13508_v23, %v6378_v31  ;;  %v6376_v2 = vadd.f32 %v6107_v21, %v20427_v0  ;;  %v7038_v45 = vpop.f32.mrf.mxu0  ;;  %v7372_v31 = vrot.slane %v14442_v63, 5  ;;  %v20433_v21 = vld [vmem:[#allocation100_spill] sm:$0xff] }
 0x3a2   : > { %v13381_v51 = vpop.f32.mrf.mxu1  ;;  %13608 = vmatmul.mubr.msk.bf16.gmra.mxu1 %vm2302_vm4, %v20428_v35 }
 0x3a3   : > { %20426 = vst [vmem:[#allocation241_spill] sm:$0xff] %v17896_v39  ;;  %v17901_v49 = vadd.f32 %v7025_v29, %v6376_v2  ;;  %v6381_v4 = vadd.f32 %v13381_v51, %v20430_v11  ;;  %v13512_v17 = vpop.f32.mrf.mxu0  ;;  %13611 = vmatprep.mubr.msk.bf16.mxu1 %vm2302_vm4, %v20431_v48  ;;  %v14443_v29 = vld [vmem:[%s14657_s17 + $0x2e8] sm:$0xf]  ;;  %v20435_v51 = vld [vmem:[#allocation101_spill] sm:$0xff]  ;;  %v7374_v63 = vrot.slane %v7372_v31, 4 }
 0x3a4   : > { %v6120_v23 = vpop.f32.mrf.mxu1  ;;  %v11968_v2 = vrot.slane %v14443_v29, 9  ;;  %v14444_v48 = vld [vmem:[%s14657_s17 + $0x2f0] sm:$0x1]  ;;  %v20439_v29 = vld [vmem:[#allocation105_spill] sm:$0xff] }
 0x3a5   : > { %20429 = vst [vmem:[#allocation129_spill] sm:$0xff] %v17901_v49  ;;  %v17907_v39 = vadd.f32 %v13511_v20, %v6381_v4  ;;  %v6379_v0 = vadd.f32 %v6120_v23, %v20433_v21  ;;  %v7041_v6 = vpop.f32.mrf.mxu0  ;;  %v7375_v9 = vrot.slane %v14444_v48, 5  ;;  %v20437_v4 = vld [vmem:[#allocation113_spill] sm:$0xff]  ;;  %v445_v23 = vld [vmem:[%s14657_s17 + $0x2f4] sm:$0xf]  ;;  %v20442_v48 = vld [vmem:[#allocation111_spill] sm:$0xff] }
 0x3a6   : > { %v13382_v35 = vpop.f32.mrf.mxu1  ;;  %v446_v21 = vld [vmem:[%s14657_s17 + $0x2f8] sm:$0xf] }
 0x3a7   : > { %20432 = vst [vmem:[#allocation137_spill] sm:$0xff] %v17907_v39  ;;  %v17911_v49 = vadd.f32 %v7038_v45, %v6379_v0  ;;  %v6382_v11 = vadd.f32 %v13382_v35, %v20435_v51  ;;  %v13515_v7 = vpop.f32.mrf.mxu0  ;;  %13742 = vmatmul.mubr.msk.bf16.gmra.mxu0 %vm2302_vm4, %v20436_v33  ;;  %v20440_v35 = vld [vmem:[#allocation171_spill] sm:$0xff]  ;;  %v7373_v33 = vsel %vm15439_vm7, %v11968_v2, %v7372_v31 }
 0x3a8   : > { %v6123_v20 = vpop.f32.mrf.mxu1  ;;  %13745 = vmatprep.mubr.msk.bf16.mxu0 %vm2302_vm4, %v20437_v4  ;;  %v20443_v4 = vld [vmem:[#allocation177_spill] sm:$0xff] }
 0x3a9   : > { %20434 = vst [vmem:[#allocation139_spill] sm:$0xff] %v17911_v49  ;;  %v17921_v39 = vadd.f32 %v13512_v17, %v6382_v11  ;;  %v6380_v45 = vadd.f32 %v6123_v20, %v20439_v29  ;;  %v7054_v0 = vpop.f32.mrf.mxu0  ;;  %v7376_v17 = vsel %vm15439_vm7, %v7374_v63, %v7375_v9  ;;  %v12050_v11 = vcombine.low %v445_v23, %v446_v21  ;;  %v20453_v21 = vld [vmem:[#allocation123_spill] sm:$0xff] }
 0x3aa   : > { %v13385_v49 = vpop.f32.mrf.mxu1  ;;  %13612 = vmatmul.mubr.msk.bf16.gmra.mxu1 %vm2302_vm4, %v20440_v35  ;;  %v17938_v31 = vcombine.low %v7373_v33, %v7376_v17 }
 0x3ab   : > { %20438 = vst [vmem:[#allocation242_spill] sm:$0xff] %v17921_v39  ;;  %v17928_v51 = vadd.f32 %v7041_v6, %v6380_v45  ;;  %v6385_v44 = vadd.f32 %v13385_v49, %v20442_v48  ;;  %v13516_v1 = vpop.f32.mrf.mxu0  ;;  %13615 = vmatprep.mubr.msk.bf16.mxu1 %vm2302_vm4, %v20443_v4  ;;  %v20445_v39 = vld [vmem:[#allocation117_spill] sm:$0xff]  ;;  %v20448_v49 = vld [vmem:[#allocation119_spill] sm:$0xff] }
 0x3ac   : > { %v6136_v20 = vpop.f32.mrf.mxu1  ;;  %20446 = vst [vmem:[#allocation55_spill] sm:$0xff] %v17938_v31 }
 0x3ad   : > { %20441 = vst [vmem:[#allocation244_spill] sm:$0xff] %v17928_v51  ;;  %v17935_v29 = vadd.f32 %v13515_v7, %v6385_v44  ;;  %v6383_v35 = vadd.f32 %v6136_v20, %v20445_v39  ;;  %v7057_v61 = vpop.f32.mrf.mxu0  ;;  %v20449_v51 = vld [vmem:[#allocation188_spill] sm:$0xff]  ;;  %v20451_v44 = vld [vmem:[#allocation11_spill] sm:$0xff] }
 0x3ae   : > { %v13386_v26 = vpop.f32.mrf.mxu1 }
 0x3af   : > { %20444 = vst [vmem:[#allocation248_spill] sm:$0xff] %v17935_v29  ;;  %v17940_v6 = vadd.f32 %v7054_v0, %v6383_v35  ;;  %v6386_v2 = vadd.f32 %v13386_v26, %v20448_v49  ;;  %v13519_v45 = vpop.f32.mrf.mxu0  ;;  %13746 = vmatmul.mubr.msk.bf16.gmra.mxu0 %vm2302_vm4, %v12050_v11  ;;  %v20454_v35 = vld [vmem:[#allocation183_spill] sm:$0xff] }
 0x3b0   : > { %v6139_v48 = vpop.f32.mrf.mxu1  ;;  %13749 = vmatprep.mubr.msk.bf16.mxu0 %vm2302_vm4, %v20449_v51 }
 0x3b1   : > { %20447 = vst [vmem:[#allocation145_spill] sm:$0xff] %v17940_v6  ;;  %v17946_v9 = vadd.f32 %v13516_v1, %v6386_v2  ;;  %v6384_v7 = vadd.f32 %v6139_v48, %v20451_v44  ;;  %v7070_v39 = vpop.f32.mrf.mxu0  ;;  %v20456_v1 = vld [vmem:[#allocation125_spill] sm:$0xff]  ;;  %v20458_v2 = vld [vmem:[#allocation186_spill] sm:$0xff] }
 0x3b2   : > { %v13389_v63 = vpop.f32.mrf.mxu1  ;;  %13616 = vmatmul.mubr.msk.bf16.gmra.mxu1 %vm2302_vm4, %v17938_v31 }
 0x3b3   : > { %20450 = vst [vmem:[#allocation147_spill] sm:$0xff] %v17946_v9  ;;  %v17951_v23 = vadd.f32 %v7057_v61, %v6384_v7  ;;  %v6389_v26 = vadd.f32 %v13389_v63, %v20453_v21  ;;  %v13520_v0 = vpop.f32.mrf.mxu0  ;;  %13619 = vmatprep.mubr.msk.bf16.mxu1 %vm2302_vm4, %v20454_v35  ;;  %v20459_v61 = vld [vmem:[#allocation194_spill] sm:$0xff]  ;;  %v20460_v63 = vld [vmem:[#allocation196_spill] sm:$0xff] }
 0x3b4   : > { %v6152_v33 = vpop.f32.mrf.mxu1 }
 0x3b5   : > { %20452 = vst [vmem:[#allocation57_spill] sm:$0xff] %v17951_v23  ;;  %v17956_v17 = vadd.f32 %v13519_v45, %v6389_v26  ;;  %v6387_v51 = vadd.f32 %v6152_v33, %v20456_v1  ;;  %v7073_v11 = vpop.f32.mrf.mxu0  ;;  %v20462_v45 = vld [vmem:[#allocation130_spill] sm:$0xff]  ;;  %v20463_v1 = vld [vmem:[#allocation185_spill] sm:$0xff] }
 0x3b6   : > { %v13390_v20 = vpop.f32.mrf.mxu1 }
 0x3b7   : > { %20455 = vst [vmem:[#allocation59_spill] sm:$0xff] %v17956_v17  ;;  %v17959_v49 = vadd.f32 %v7070_v39, %v6387_v51  ;;  %v6390_v48 = vadd.f32 %v13390_v20, %v20458_v2  ;;  %v13523_v44 = vpop.f32.mrf.mxu0  ;;  %13750 = vmatmul.mubr.msk.bf16.gmra.mxu0 %vm2302_vm4, %v20459_v61  ;;  %v20465_v51 = vld [vmem:[#allocation133_spill] sm:$0xff] }
 0x3b8   : > { %v6155_v7 = vpop.f32.mrf.mxu1  ;;  %13753 = vmatprep.mubr.msk.bf16.mxu0 %vm2302_vm4, %v20460_v63 }
 0x3b9   : > { %20457 = vst [vmem:[#allocation61_spill] sm:$0xff] %v17959_v49  ;;  %v17966_v21 = vadd.f32 %v13520_v0, %v6390_v48  ;;  %v6388_v26 = vadd.f32 %v6155_v7, %v20462_v45  ;;  %v7086_v35 = vpop.f32.mrf.mxu0  ;;  %v20466_v49 = vld [vmem:[#allocation191_spill] sm:$0xff]  ;;  %v20468_v0 = vld [vmem:[#allocation138_spill] sm:$0xff] }
 0x3ba   : > { %v13393_v33 = vpop.f32.mrf.mxu1  ;;  %13620 = vmatmul.mubr.msk.bf16.gmra.mxu1 %vm2302_vm4, %v20463_v1  ;;  %v20483_v1 = vld [vmem:[#allocation209_spill] sm:$0xff] }
 0x3bb   : > { %20461 = vst [vmem:[#allocation62_spill] sm:$0xff] %v17966_v21  ;;  %v17971_v39 = vadd.f32 %v7073_v11, %v6388_v26  ;;  %v6393_v20 = vadd.f32 %v13393_v33, %v20465_v51  ;;  %v13524_v2 = vpop.f32.mrf.mxu0  ;;  %13623 = vmatprep.mubr.msk.bf16.mxu1 %vm2302_vm4, %v20466_v49  ;;  %v20470_v21 = vld [vmem:[#allocation141_spill] sm:$0xff]  ;;  %v20471_v26 = vld [vmem:[#allocation202_spill] sm:$0xff]  ;;  %v20472_v51 = vld [vmem:[#allocation204_spill] sm:$0xff] }
 0x3bc   : > { %v6168_v61 = vpop.f32.mrf.mxu1 }
 0x3bd   : > { %20464 = vst [vmem:[#allocation152_spill] sm:$0xff] %v17971_v39  ;;  %v17976_v17 = vadd.f32 %v13523_v44, %v6393_v20  ;;  %v6391_v48 = vadd.f32 %v6168_v61, %v20468_v0  ;;  %v7089_v63 = vpop.f32.mrf.mxu0  ;;  %v20474_v44 = vld [vmem:[#allocation146_spill] sm:$0xff] }
 0x3be   : > { %v13394_v7 = vpop.f32.mrf.mxu1 }
 0x3bf   : > { %20467 = vst [vmem:[#allocation70_spill] sm:$0xff] %v17976_v17  ;;  %v17979_v45 = vadd.f32 %v7086_v35, %v6391_v48  ;;  %v6394_v23 = vadd.f32 %v13394_v7, %v20470_v21  ;;  %v13527_v11 = vpop.f32.mrf.mxu0  ;;  %13754 = vmatmul.mubr.msk.bf16.gmra.mxu0 %vm2302_vm4, %v20471_v26  ;;  %v20475_v17 = vld [vmem:[#allocation193_spill] sm:$0xff]  ;;  %v20478_v26 = vld [vmem:[#allocation199_spill] sm:$0xff] }
 0x3c0   : > { %v6171_v33 = vpop.f32.mrf.mxu1  ;;  %13757 = vmatprep.mubr.msk.bf16.mxu0 %vm2302_vm4, %v20472_v51  ;;  %v20477_v21 = vld [vmem:[#allocation149_spill] sm:$0xff]  ;;  %v14445_v51 = vld [vmem:[%s14657_s17 + $0x3c4] sm:$0xf] }
 0x3c1   : > { %20469 = vst [vmem:[#allocation64_spill] sm:$0xff] %v17979_v45  ;;  %v17986_v39 = vadd.f32 %v13524_v2, %v6394_v23  ;;  %v6392_v20 = vadd.f32 %v6171_v33, %v20474_v44  ;;  %v7102_v61 = vpop.f32.mrf.mxu0  ;;  %v7379_v23 = vrot.slane %v14445_v51, 5  ;;  %v20480_v33 = vld [vmem:[#allocation153_spill] sm:$0xff] }
 0x3c2   : > { %v13397_v0 = vpop.f32.mrf.mxu1  ;;  %13624 = vmatmul.mubr.msk.bf16.gmra.mxu1 %vm2302_vm4, %v20475_v17 }
 0x3c3   : > { %20473 = vst [vmem:[#allocation68_spill] sm:$0xff] %v17986_v39  ;;  %v17991_v35 = vadd.f32 %v7089_v63, %v6392_v20  ;;  %v6397_v48 = vadd.f32 %v13397_v0, %v20477_v21  ;;  %v13528_v7 = vpop.f32.mrf.mxu0  ;;  %13627 = vmatprep.mubr.msk.bf16.mxu1 %vm2302_vm4, %v20478_v26  ;;  %v14446_v63 = vld [vmem:[%s14657_s17 + $0x3c0] sm:$0xf]  ;;  %v20482_v0 = vld [vmem:[#allocation155_spill] sm:$0xff]  ;;  %v7381_v51 = vrot.slane %v7379_v23, 4 }
 0x3c4   : > { %v6184_v2 = vpop.f32.mrf.mxu1  ;;  %v11969_v20 = vrot.slane %v14446_v63, 9  ;;  %v14447_v26 = vld [vmem:[%s14657_s17 + $0x3c8] sm:$0x1] }
 0x3c5   : > { %20476 = vst [vmem:[#allocation72_spill] sm:$0xff] %v17991_v35  ;;  %v17997_v39 = vadd.f32 %v13527_v11, %v6397_v48  ;;  %v6395_v44 = vadd.f32 %v6184_v2, %v20480_v33  ;;  %v7105_v45 = vpop.f32.mrf.mxu0  ;;  %v7382_v9 = vrot.slane %v14447_v26, 5  ;;  %v20484_v48 = vld [vmem:[#allocation168_spill] sm:$0xff]  ;;  %v475_v2 = vld [vmem:[%s14657_s17 + $0x3cc] sm:$0xf]  ;;  %v20489_v26 = vld [vmem:[#allocation165_spill] sm:$0xff] }
 0x3c6   : > { %v13398_v17 = vpop.f32.mrf.mxu1  ;;  %v476_v33 = vld [vmem:[%s14657_s17 + $0x3d0] sm:$0xf]  ;;  %v20486_v63 = vld [vmem:[#allocation159_spill] sm:$0xff] }
 0x3c7   : > { %20479 = vst [vmem:[#allocation74_spill] sm:$0xff] %v17997_v39  ;;  %v18001_v35 = vadd.f32 %v7102_v61, %v6395_v44  ;;  %v6398_v21 = vadd.f32 %v13398_v17, %v20482_v0  ;;  %v13531_v49 = vpop.f32.mrf.mxu0  ;;  %13758 = vmatmul.mubr.msk.bf16.gmra.mxu0 %vm2302_vm4, %v20483_v1  ;;  %v20487_v17 = vld [vmem:[#allocation201_spill] sm:$0xff]  ;;  %v7380_v1 = vsel %vm15439_vm7, %v11969_v20, %v7379_v23 }
 0x3c8   : > { %v6187_v11 = vpop.f32.mrf.mxu1  ;;  %13761 = vmatprep.mubr.msk.bf16.mxu0 %vm2302_vm4, %v20484_v48  ;;  %v20490_v48 = vld [vmem:[#allocation207_spill] sm:$0xff] }
 0x3c9   : > { %20481 = vst [vmem:[#allocation160_spill] sm:$0xff] %v18001_v35  ;;  %v18011_v39 = vadd.f32 %v13528_v7, %v6398_v21  ;;  %v6396_v61 = vadd.f32 %v6187_v11, %v20486_v63  ;;  %v7118_v44 = vpop.f32.mrf.mxu0  ;;  %v7383_v7 = vsel %vm15439_vm7, %v7381_v51, %v7382_v9  ;;  %v12051_v21 = vcombine.low %v475_v2, %v476_v33  ;;  %v20498_v33 = vld [vmem:[#allocation180_spill] sm:$0xff] }
 0x3ca   : > { %v13401_v35 = vpop.f32.mrf.mxu1  ;;  %13628 = vmatmul.mubr.msk.bf16.gmra.mxu1 %vm2302_vm4, %v20487_v17  ;;  %v18028_v23 = vcombine.low %v7380_v1, %v7383_v7 }
 0x3cb   : > { %20485 = vst [vmem:[#allocation52_spill] sm:$0xff] %v18011_v39  ;;  %v18018_v0 = vadd.f32 %v7105_v45, %v6396_v61  ;;  %v6401_v6 = vadd.f32 %v13401_v35, %v20489_v26  ;;  %v13532_v29 = vpop.f32.mrf.mxu0  ;;  %13631 = vmatprep.mubr.msk.bf16.mxu1 %vm2302_vm4, %v20490_v48  ;;  %v20491_v39 = vld [vmem:[#allocation173_spill] sm:$0xff]  ;;  %v20493_v35 = vld [vmem:[#allocation176_spill] sm:$0xff] }
 0x3cc   : > { %v6200_v11 = vpop.f32.mrf.mxu1 }
 0x3cd   : > { %20488 = vst [vmem:[#allocation77_spill] sm:$0xff] %v18018_v0  ;;  %v18025_v63 = vadd.f32 %v13531_v49, %v6401_v6  ;;  %v6399_v17 = vadd.f32 %v6200_v11, %v20491_v39  ;;  %v7121_v31 = vpop.f32.mrf.mxu0  ;;  %v20494_v0 = vld [vmem:[#allocation218_spill] sm:$0xff]  ;;  %v20496_v6 = vld [vmem:[#allocation25_spill] sm:$0xff] }
 0x3ce   : > { %v13402_v4 = vpop.f32.mrf.mxu1 }
 0x3cf   : > { %v18030_v45 = vadd.f32 %v7118_v44, %v6399_v17  ;;  %v6402_v20 = vadd.f32 %v13402_v4, %v20493_v35  ;;  %v13535_v61 = vpop.f32.mrf.mxu0  ;;  %13762 = vmatmul.mubr.msk.bf16.gmra.mxu0 %vm2302_vm4, %v12051_v21  ;;  %v20499_v17 = vld [vmem:[#allocation213_spill] sm:$0xff] }
 0x3d0   : > { %v6203_v26 = vpop.f32.mrf.mxu1  ;;  %13765 = vmatprep.mubr.msk.bf16.mxu0 %vm2302_vm4, %v20494_v0 }
 0x3d1   : > { %20492 = vst [vmem:[#allocation156_spill] sm:$0xff] %v18030_v45  ;;  %v18036_v9 = vadd.f32 %v13532_v29, %v6402_v20  ;;  %v6400_v49 = vadd.f32 %v6203_v26, %v20496_v6  ;;  %v7134_v39 = vpop.f32.mrf.mxu0  ;;  %v20501_v29 = vld [vmem:[#allocation182_spill] sm:$0xff]  ;;  %v20503_v20 = vld [vmem:[#allocation216_spill] sm:$0xff] }
 0x3d2   : > { %v13405_v51 = vpop.f32.mrf.mxu1  ;;  %13632 = vmatmul.mubr.msk.bf16.gmra.mxu1 %vm2302_vm4, %v18028_v23 }
 0x3d3   : > { %20495 = vst [vmem:[#allocation79_spill] sm:$0xff] %v18036_v9  ;;  %v18041_v2 = vadd.f32 %v7121_v31, %v6400_v49  ;;  %v6405_v4 = vadd.f32 %v13405_v51, %v20498_v33  ;;  %v13536_v44 = vpop.f32.mrf.mxu0  ;;  %13635 = vmatprep.mubr.msk.bf16.mxu1 %vm2302_vm4, %v20499_v17  ;;  %v20504_v31 = vld [vmem:[#allocation224_spill] sm:$0xff] }
 0x3d4   : > { %v6216_v1 = vpop.f32.mrf.mxu1 }
 0x3d5   : > { %20497 = vst [vmem:[#allocation158_spill] sm:$0xff] %v18041_v2  ;;  %v18046_v7 = vadd.f32 %v13535_v61, %v6405_v4  ;;  %v6403_v0 = vadd.f32 %v6216_v1, %v20501_v29  ;;  %v7137_v21 = vpop.f32.mrf.mxu0  ;;  %v20506_v61 = vld [vmem:[#allocation187_spill] sm:$0xff]  ;;  %v20509_v29 = vld [vmem:[#allocation190_spill] sm:$0xff] }
 0x3d6   : > { %v13406_v11 = vpop.f32.mrf.mxu1  ;;  %v20507_v1 = vld [vmem:[#allocation215_spill] sm:$0xff] }
 0x3d7   : > { %20500 = vst [vmem:[#allocation164_spill] sm:$0xff] %v18046_v7  ;;  %v18049_v35 = vadd.f32 %v7134_v39, %v6403_v0  ;;  %v6406_v26 = vadd.f32 %v13406_v11, %v20503_v20  ;;  %v13539_v6 = vpop.f32.mrf.mxu0  ;;  %13766 = vmatmul.mubr.msk.bf16.gmra.mxu0 %vm2302_vm4, %v20504_v31  ;;  %v20510_v20 = vld [vmem:[#allocation221_spill] sm:$0xff] }
 0x3d8   : > { %v6219_v49 = vpop.f32.mrf.mxu1  ;;  %13769 = vmatprep.mubr.msk.bf16.mxu0 %vm2302_vm4, %v20201_v43  ;;  %v20512_v43 = vld [vmem:[#allocation195_spill] sm:$0xff] }
 0x3d9   : > { %20502 = vst [vmem:[#allocation166_spill] sm:$0xff] %v18049_v35  ;;  %v18056_v51 = vadd.f32 %v13536_v44, %v6406_v26  ;;  %v6404_v33 = vadd.f32 %v6219_v49, %v20506_v61  ;;  %v7150_v4 = vpop.f32.mrf.mxu0 }
 0x3da   : > { %v13409_v17 = vpop.f32.mrf.mxu1  ;;  %13636 = vmatmul.mubr.msk.bf16.gmra.mxu1 %vm2302_vm4, %v20507_v1 }
 0x3db   : > { %20505 = vst [vmem:[#allocation83_spill] sm:$0xff] %v18056_v51  ;;  %v18061_v39 = vadd.f32 %v7137_v21, %v6404_v33  ;;  %v6409_v0 = vadd.f32 %v13409_v17, %v20509_v29  ;;  %v13540_v11 = vpop.f32.mrf.mxu0  ;;  %13639 = vmatprep.mubr.msk.bf16.mxu1 %vm2302_vm4, %v20510_v20  ;;  %v20514_v51 = vld [vmem:[#allocation198_spill] sm:$0xff]  ;;  %v20515_v33 = vld [vmem:[#allocation232_spill] sm:$0xff] }
 0x3dc   : > { %v6232_v31 = vpop.f32.mrf.mxu1 }
 0x3dd   : > { %20508 = vst [vmem:[#allocation85_spill] sm:$0xff] %v18061_v39  ;;  %v18066_v35 = vadd.f32 %v13539_v6, %v6409_v0  ;;  %v6407_v44 = vadd.f32 %v6232_v31, %v20512_v43  ;;  %v7153_v26 = vpop.f32.mrf.mxu0  ;;  %v20517_v6 = vld [vmem:[#allocation203_spill] sm:$0xff] }
 0x3de   : > { %v13410_v49 = vpop.f32.mrf.mxu1 }
 0x3df   : > { %20511 = vst [vmem:[#allocation89_spill] sm:$0xff] %v18066_v35  ;;  %v18069_v61 = vadd.f32 %v7150_v4, %v6407_v44  ;;  %v6410_v7 = vadd.f32 %v13410_v49, %v20514_v51  ;;  %v13543_v21 = vpop.f32.mrf.mxu0  ;;  %13770 = vmatmul.mubr.msk.bf16.gmra.mxu0 %vm2302_vm4, %v20515_v33  ;;  %v20518_v35 = vld [vmem:[#allocation223_spill] sm:$0xff]  ;;  %v20520_v49 = vld [vmem:[#allocation229_spill] sm:$0xff] }
 0x3e0   : > { %v6235_v17 = vpop.f32.mrf.mxu1  ;;  %13773 = vmatprep.mubr.msk.bf16.mxu0 %vm2302_vm4, %v20212_v58  ;;  %v14448_v58 = vld [vmem:[%s14657_s17 + $0x49c] sm:$0xf] }
 0x3e1   : > { %20513 = vst [vmem:[#allocation91_spill] sm:$0xff] %v18069_v61  ;;  %v18076_v29 = vadd.f32 %v13540_v11, %v6410_v7  ;;  %v6408_v0 = vadd.f32 %v6235_v17, %v20517_v6  ;;  %v7166_v31 = vpop.f32.mrf.mxu0  ;;  %v7386_v7 = vrot.slane %v14448_v58, 5  ;;  %v20522_v17 = vld [vmem:[#allocation206_spill] sm:$0xff] }
 0x3e2   : > { %v13413_v43 = vpop.f32.mrf.mxu1  ;;  %13640 = vmatmul.mubr.msk.bf16.gmra.mxu1 %vm2302_vm4, %v20518_v35  ;;  %v20525_v35 = vld [vmem:[#allocation240_spill] sm:$0xff] }
 0x3e3   : > { %20516 = vst [vmem:[#allocation172_spill] sm:$0xff] %v18076_v29  ;;  %v18081_v4 = vadd.f32 %v7153_v26, %v6408_v0  ;;  %v6413_v51 = vadd.f32 %v13413_v43, %v17340_v59  ;;  %v13544_v44 = vpop.f32.mrf.mxu0  ;;  %13643 = vmatprep.mubr.msk.bf16.mxu1 %vm2302_vm4, %v20520_v49  ;;  %v14449_v26 = vld [vmem:[%s14657_s17 + $0x498] sm:$0xf]  ;;  %v20524_v59 = vld [vmem:[#allocation210_spill] sm:$0xff]  ;;  %v7388_v58 = vrot.slane %v7386_v7, 4 }
 0x3e4   : > { %v6248_v11 = vpop.f32.mrf.mxu1  ;;  %v11970_v0 = vrot.slane %v14449_v26, 9  ;;  %v14450_v49 = vld [vmem:[%s14657_s17 + $0x4a0] sm:$0x1] }
 0x3e5   : > { %20519 = vst [vmem:[#allocation174_spill] sm:$0xff] %v18081_v4  ;;  %v18087_v33 = vadd.f32 %v13543_v21, %v6413_v51  ;;  %v6411_v6 = vadd.f32 %v6248_v11, %v20522_v17  ;;  %v7169_v29 = vpop.f32.mrf.mxu0  ;;  %v7389_v20 = vrot.slane %v14450_v49, 5  ;;  %v20526_v51 = vld [vmem:[#allocation220_spill] sm:$0xff]  ;;  %v505_v11 = vld [vmem:[%s14657_s17 + $0x4a4] sm:$0xf]  ;;  %v20531_v49 = vld [vmem:[#allocation217_spill] sm:$0xff] }
 0x3e6   : > { %v13414_v61 = vpop.f32.mrf.mxu1  ;;  %v506_v17 = vld [vmem:[%s14657_s17 + $0x4a8] sm:$0xf]  ;;  %v20528_v26 = vld [vmem:[#allocation226_spill] sm:$0xff] }
 0x3e7   : > { %20521 = vst [vmem:[#allocation95_spill] sm:$0xff] %v18087_v33  ;;  %v18091_v4 = vadd.f32 %v7166_v31, %v6411_v6  ;;  %v6414_v43 = vadd.f32 %v13414_v61, %v20524_v59  ;;  %v13547_v39 = vpop.f32.mrf.mxu0  ;;  %13774 = vmatmul.mubr.msk.bf16.gmra.mxu0 %vm2302_vm4, %v20525_v35  ;;  %v20529_v61 = vld [vmem:[#allocation231_spill] sm:$0xff]  ;;  %v7387_v35 = vsel %vm15439_vm7, %v11970_v0, %v7386_v7 }
 0x3e8   : > { %v6251_v21 = vpop.f32.mrf.mxu1  ;;  %13777 = vmatprep.mubr.msk.bf16.mxu0 %vm2302_vm4, %v20526_v51  ;;  %v20532_v51 = vld [vmem:[#allocation238_spill] sm:$0xff] }
 0x3e9   : > { %20523 = vst [vmem:[#allocation97_spill] sm:$0xff] %v18091_v4  ;;  %v18101_v33 = vadd.f32 %v13544_v44, %v6414_v43  ;;  %v6412_v31 = vadd.f32 %v6251_v21, %v20528_v26  ;;  %v7182_v6 = vpop.f32.mrf.mxu0  ;;  %v7390_v44 = vsel %vm15439_vm7, %v7388_v58, %v7389_v20  ;;  %v12052_v43 = vcombine.low %v505_v11, %v506_v17  ;;  %v20537_v17 = vld [vmem:[#allocation233_spill] sm:$0xff] }
 0x3ea   : > { %v13417_v4 = vpop.f32.mrf.mxu1  ;;  %13644 = vmatmul.mubr.msk.bf16.gmra.mxu1 %vm2302_vm4, %v20529_v61  ;;  %v18118_v7 = vcombine.low %v7387_v35, %v7390_v44 }
 0x3eb   : > { %20527 = vst [vmem:[#allocation100_spill] sm:$0xff] %v18101_v33  ;;  %v18108_v59 = vadd.f32 %v7169_v29, %v6412_v31  ;;  %v6417_v2 = vadd.f32 %v13417_v4, %v20531_v49  ;;  %v13548_v1 = vpop.f32.mrf.mxu0  ;;  %13647 = vmatprep.mubr.msk.bf16.mxu1 %vm2302_vm4, %v20532_v51  ;;  %v20533_v33 = vld [vmem:[#allocation225_spill] sm:$0xff]  ;;  %v20534_v4 = vld [vmem:[#allocation235_spill] sm:$0xff] }
 0x3ec   : > { %v6264_v21 = vpop.f32.mrf.mxu1 }
 0x3ed   : > { %20530 = vst [vmem:[#allocation101_spill] sm:$0xff] %v18108_v59  ;;  %v18115_v26 = vadd.f32 %v13547_v39, %v6417_v2  ;;  %v6415_v61 = vadd.f32 %v6264_v21, %v20533_v33  ;;  %v7185_v9 = vpop.f32.mrf.mxu0  ;;  %v20535_v59 = vld [vmem:[#allocation251_spill] sm:$0xff]  ;;  %v20536_v2 = vld [vmem:[#allocation228_spill] sm:$0xff] }
 0x3ee   : > { %v13418_v45 = vpop.f32.mrf.mxu1 }
 0x3ef   : > { %v18120_v29 = vadd.f32 %v7182_v6, %v6415_v61  ;;  %v6418_v0 = vadd.f32 %v13418_v45, %v20534_v4  ;;  %v13551_v31 = vpop.f32.mrf.mxu0  ;;  %13778 = vmatmul.mubr.msk.bf16.gmra.mxu0 %vm2302_vm4, %v12052_v43  ;;  %v20538_v61 = vld [vmem:[#allocation245_spill] sm:$0xff] }
 0x3f0   : > { %v6267_v49 = vpop.f32.mrf.mxu1  ;;  %13781 = vmatprep.mubr.msk.bf16.mxu0 %vm2302_vm4, %v20535_v59 }
 0x3f1   : > { %v18126_v20 = vadd.f32 %v13548_v1, %v6418_v0  ;;  %v6416_v39 = vadd.f32 %v6267_v49, %v20536_v2  ;;  %v7198_v33 = vpop.f32.mrf.mxu0  ;;  %v20539_v1 = vld [vmem:[#allocation236_spill] sm:$0xff]  ;;  %v20540_v0 = vld [vmem:[#allocation39_spill] sm:$0xff] }
 0x3f2   : > { %v13421_v58 = vpop.f32.mrf.mxu1  ;;  %13648 = vmatmul.mubr.msk.bf16.gmra.mxu1 %vm2302_vm4, %v18118_v7 }
 0x3f3   : > { %v18131_v11 = vadd.f32 %v7185_v9, %v6416_v39  ;;  %v6421_v45 = vadd.f32 %v13421_v58, %v20537_v17  ;;  %v13552_v6 = vpop.f32.mrf.mxu0  ;;  %13651 = vmatprep.mubr.msk.bf16.mxu1 %vm2302_vm4, %v20538_v61  ;;  %v20542_v61 = vld [vmem:[#allocation247_spill] sm:$0xff] }
 0x3f4   : > { %v6280_v35 = vpop.f32.mrf.mxu1 }
 0x3f5   : > { %v18136_v44 = vadd.f32 %v13551_v31, %v6421_v45  ;;  %v6419_v59 = vadd.f32 %v6280_v35, %v20539_v1  ;;  %v7201_v43 = vpop.f32.mrf.mxu0  ;;  %v20541_v31 = vld [vmem:[#allocation239_spill] sm:$0xff] }
 0x3f6   : > { %v13422_v21 = vpop.f32.mrf.mxu1 }
 0x3f7   : > { %v18139_v4 = vadd.f32 %v7198_v33, %v6419_v59  ;;  %v6422_v49 = vadd.f32 %v13422_v21, %v20540_v0  ;;  %v13687_v2 = vpop.f32.mrf.mxu0  ;;  %13782 = vmatmul.mubr.msk.bf16.gmra.mxu0 %vm2302_vm4, %v16477_v22  ;;  %v20543_v59 = vld [vmem:[#allocation253_spill] sm:$0xff] }
 0x3f8   : > { %v6283_v9 = vpop.f32.mrf.mxu1  ;;  %13785 = vmatprep.mubr.msk.bf16.mxu0 %vm2302_vm4, %v20241_v18 }
 0x3f9   : > { %v18146_v39 = vadd.f32 %v13552_v6, %v6422_v49  ;;  %v6420_v58 = vadd.f32 %v6283_v9, %v20541_v31  ;;  %v8234_v17 = vpop.f32.mrf.mxu0  ;;  %v20545_v31 = vld [vmem:[#allocation259_spill] sm:$0xff] }
 0x3fa   : > { %v13557_v45 = vpop.f32.mrf.mxu1  ;;  %13652 = vmatmul.mubr.msk.bf16.gmra.mxu1 %vm2302_vm4, %v20542_v61 }
 0x3fb   : > { %v18151_v33 = vadd.f32 %v7201_v43, %v6420_v58  ;;  %v8005_v35 = vadd.f32 %v13557_v45, %v17420_v60  ;;  %v13688_v1 = vpop.f32.mrf.mxu0  ;;  %13655 = vmatprep.mubr.msk.bf16.mxu1 %vm2302_vm4, %v20543_v59 }
 0x3fc   : > { %v7492_v22 = vpop.f32.mrf.mxu1 }
 0x3fd   : > { %v18156_v21 = vadd.f32 %v13687_v2, %v8005_v35  ;;  %v8003_v18 = vadd.f32 %v7492_v22, %v17424_v15  ;;  %v8237_v6 = vpop.f32.mrf.mxu0  ;;  %v20547_v2 = vld [vmem:[#allocation243_spill] sm:$0xff]  ;;  %v20548_v22 = vld [vmem:[#allocation254_spill] sm:$0xff] }
 0x3fe   : > { %v13558_v0 = vpop.f32.mrf.mxu1 }
 0x3ff   : > { %v18159_v49 = vadd.f32 %v8234_v17, %v8003_v18  ;;  %v8006_v9 = vadd.f32 %v13558_v0, %v17431_v42  ;;  %v13691_v43 = vpop.f32.mrf.mxu0  ;;  %13786 = vmatmul.mubr.msk.bf16.gmra.mxu0 %vm2302_vm4, %v20545_v31  ;;  %v20550_v0 = vld [vmem:[#allocation257_spill] sm:$0xff] }
 0x400   : > { %v7495_v60 = vpop.f32.mrf.mxu1  ;;  %13789 = vmatprep.mubr.msk.bf16.mxu0 %vm2302_vm4, %v16538_v37  ;;  %v14451_v37 = vld [vmem:[%s14657_s17 + $0x574] sm:$0xf] }
 0x401   : > { %20544 = vst [vmem:[#allocation179_spill] sm:$0xff] %v18159_v49  ;;  %v18166_v58 = vadd.f32 %v13688_v1, %v8006_v9  ;;  %v8004_v15 = vadd.f32 %v7495_v60, %v20547_v2  ;;  %v8250_v45 = vpop.f32.mrf.mxu0  ;;  %v7393_v1 = vrot.slane %v14451_v37, 5 }
 0x402   : > { %v13561_v35 = vpop.f32.mrf.mxu1  ;;  %13656 = vmatmul.mubr.msk.bf16.gmra.mxu1 %vm2302_vm4, %v20548_v22 }
 0x403   : > { %20546 = vst [vmem:[#allocation113_spill] sm:$0xff] %v18166_v58  ;;  %v18171_v17 = vadd.f32 %v8237_v6, %v8004_v15  ;;  %v8009_v42 = vadd.f32 %v13561_v35, %v17441_v54  ;;  %v13692_v18 = vpop.f32.mrf.mxu0  ;;  %13659 = vmatprep.mubr.msk.bf16.mxu1 %vm2302_vm4, %v20550_v0  ;;  %v14452_v6 = vld [vmem:[%s14657_s17 + $0x570] sm:$0xf]  ;;  %v7395_v37 = vrot.slane %v7393_v1, 4  ;;  %v14453_v0 = vld [vmem:[%s14657_s17 + $0x578] sm:$0x1] }
 0x404   : > { %v7508_v9 = vpop.f32.mrf.mxu1  ;;  %v11971_v15 = vrot.slane %v14452_v6, 9  ;;  %v7396_v49 = vrot.slane %v14453_v0, 5 }
 0x405   : > { %20549 = vst [vmem:[#allocation105_spill] sm:$0xff] %v18171_v17  ;;  %v18177_v31 = vadd.f32 %v13691_v43, %v8009_v42  ;;  %v8007_v60 = vadd.f32 %v7508_v9, %v17444_v41  ;;  %v8253_v2 = vpop.f32.mrf.mxu0  ;;  %v535_v41 = vld [vmem:[%s14657_s17 + $0x57c] sm:$0xf]  ;;  %v536_v42 = vld [vmem:[%s14657_s17 + $0x580] sm:$0xf] }
 0x406   : > { %v13562_v58 = vpop.f32.mrf.mxu1 }
 0x407   : > { %20551 = vst [vmem:[#allocation111_spill] sm:$0xff] %v18177_v31  ;;  %v18181_v17 = vadd.f32 %v8250_v45, %v8007_v60  ;;  %v8010_v54 = vadd.f32 %v13562_v58, %v17455_v56  ;;  %v13695_v35 = vpop.f32.mrf.mxu0  ;;  %13790 = vmatmul.mubr.msk.bf16.gmra.mxu0 %vm2302_vm4, %v16578_v16  ;;  %v20554_v56 = vld [vmem:[#allocation258_spill] sm:$0xff]  ;;  %v7394_v16 = vsel %vm15439_vm7, %v11971_v15, %v7393_v1 }
 0x408   : > { %v7511_v43 = vpop.f32.mrf.mxu1  ;;  %13793 = vmatprep.mubr.msk.bf16.mxu0 %vm2302_vm4, %v17472_v57  ;;  %v20555_v57 = vld [vmem:[#allocation262_spill] sm:$0xff] }
 0x409   : > { %20552 = vst [vmem:[#allocation117_spill] sm:$0xff] %v18181_v17  ;;  %v18191_v9 = vadd.f32 %v13692_v18, %v8010_v54  ;;  %v8008_v45 = vadd.f32 %v7511_v43, %v17460_v14  ;;  %v8266_v60 = vpop.f32.mrf.mxu0  ;;  %v7397_v18 = vsel %vm15439_vm7, %v7395_v37, %v7396_v49  ;;  %v12053_v14 = vcombine.low %v535_v41, %v536_v42 }
 0x40a   : > { %v13565_v6 = vpop.f32.mrf.mxu1  ;;  %13660 = vmatmul.mubr.msk.bf16.gmra.mxu1 %vm2302_vm4, %v20554_v56  ;;  %v18208_v1 = vcombine.low %v7394_v16, %v7397_v18 }
 0x40b   : > { %20553 = vst [vmem:[#allocation119_spill] sm:$0xff] %v18191_v9  ;;  %v18198_v58 = vadd.f32 %v8253_v2, %v8008_v45  ;;  %v8013_v0 = vadd.f32 %v13565_v6, %v17467_v25  ;;  %v13696_v17 = vpop.f32.mrf.mxu0  ;;  %13663 = vmatprep.mubr.msk.bf16.mxu1 %vm2302_vm4, %v20555_v57  ;;  %v20558_v6 = vld [vmem:[#allocation264_spill] sm:$0xff] }
 0x40c   : > { %v7524_v54 = vpop.f32.mrf.mxu1 }
 0x40d   : > { %v18205_v43 = vadd.f32 %v13695_v35, %v8013_v0  ;;  %v8011_v9 = vadd.f32 %v7524_v54, %v17474_v24  ;;  %v8269_v31 = vpop.f32.mrf.mxu0  ;;  %v20556_v35 = vld [vmem:[#allocation246_spill] sm:$0xff]  ;;  %v20560_v54 = vld [vmem:[#allocation256_spill] sm:$0xff] }
 0x40e   : > { %v13566_v56 = vpop.f32.mrf.mxu1 }
 0x40f   : > { %v18210_v2 = vadd.f32 %v8266_v60, %v8011_v9  ;;  %v8014_v25 = vadd.f32 %v13566_v56, %v17481_v12  ;;  %v13699_v15 = vpop.f32.mrf.mxu0  ;;  %13794 = vmatmul.mubr.msk.bf16.gmra.mxu0 %vm2302_vm4, %v12053_v14  ;;  %v20557_v9 = vld [vmem:[#allocation249_spill] sm:$0xff] }
 0x410   : > { %v7527_v45 = vpop.f32.mrf.mxu1  ;;  %13797 = vmatprep.mubr.msk.bf16.mxu0 %vm2302_vm4, %v20257_v28  ;;  %v20559_v28 = vld [vmem:[#allocation252_spill] sm:$0xff] }
 0x411   : > { %v18216_v49 = vadd.f32 %v13696_v17, %v8014_v25  ;;  %v8012_v37 = vadd.f32 %v7527_v45, %v20556_v35  ;;  %v8282_v24 = vpop.f32.mrf.mxu0 }
 0x412   : > { %v13569_v41 = vpop.f32.mrf.mxu1  ;;  %13664 = vmatmul.mubr.msk.bf16.gmra.mxu1 %vm2302_vm4, %v18208_v1 }
 0x413   : > { %v18221_v42 = vadd.f32 %v8269_v31, %v8012_v37  ;;  %v8017_v12 = vadd.f32 %v13569_v41, %v20557_v9  ;;  %v13700_v60 = vpop.f32.mrf.mxu0  ;;  %13667 = vmatprep.mubr.msk.bf16.mxu1 %vm2302_vm4, %v20558_v6 }
 0x414   : > { %v7540_v56 = vpop.f32.mrf.mxu1 }
 0x415   : > { %v18226_v16 = vadd.f32 %v13699_v15, %v8017_v12  ;;  %v8015_v17 = vadd.f32 %v7540_v56, %v20559_v28  ;;  %v8285_v0 = vpop.f32.mrf.mxu0  ;;  %v20561_v15 = vld [vmem:[#allocation255_spill] sm:$0xff]  ;;  %v20562_v12 = vld [vmem:[#allocation265_spill] sm:$0xff]  ;;  %v20563_v28 = vld [vmem:[#allocation268_spill] sm:$0xff] }
 0x416   : > { %v13570_v18 = vpop.f32.mrf.mxu1 }
 0x417   : > { %v18229_v14 = vadd.f32 %v8282_v24, %v8015_v17  ;;  %v8018_v25 = vadd.f32 %v13570_v18, %v20560_v54  ;;  %v13703_v45 = vpop.f32.mrf.mxu0  ;;  %13798 = vmatmul.mubr.msk.bf16.gmra.mxu0 %vm2302_vm4, %v16675_v52 }
 0x418   : > { %v7543_v31 = vpop.f32.mrf.mxu1  ;;  %13801 = vmatprep.mubr.msk.bf16.mxu0 %vm2302_vm4, %v16683_v5 }
 0x419   : > { %v18236_v35 = vadd.f32 %v13700_v60, %v8018_v25  ;;  %v8016_v37 = vadd.f32 %v7543_v31, %v20561_v15  ;;  %v8298_v41 = vpop.f32.mrf.mxu0 }
 0x41a   : > { %v13573_v9 = vpop.f32.mrf.mxu1  ;;  %13668 = vmatmul.mubr.msk.bf16.gmra.mxu1 %vm2302_vm4, %v20562_v12 }
 0x41b   : > { %v18241_v24 = vadd.f32 %v8285_v0, %v8016_v37  ;;  %v8021_v6 = vadd.f32 %v13573_v9, %v17521_v13  ;;  %v13704_v56 = vpop.f32.mrf.mxu0  ;;  %13671 = vmatprep.mubr.msk.bf16.mxu1 %vm2302_vm4, %v20563_v28  ;;  %v20565_v37 = vld [vmem:[#allocation269_spill] sm:$0xff] }
 0x41c   : > { %v7556_v52 = vpop.f32.mrf.mxu1 }
 0x41d   : > { %v18246_v17 = vadd.f32 %v13703_v45, %v8021_v6  ;;  %v8019_v5 = vadd.f32 %v7556_v52, %v17525_v3  ;;  %v8301_v60 = vpop.f32.mrf.mxu0 }
 0x41e   : > { %v13574_v18 = vpop.f32.mrf.mxu1 }
 0x41f   : > { %v18249_v54 = vadd.f32 %v8298_v41, %v8019_v5  ;;  %v8022_v25 = vadd.f32 %v13574_v18, %v17532_v47  ;;  %v13707_v0 = vpop.f32.mrf.mxu0  ;;  %13802 = vmatmul.mubr.msk.bf16.gmra.mxu0 %vm2302_vm4, %v16716_v27  ;;  %v20567_v27 = vld [vmem:[#allocation270_spill] sm:$0xff] }
 0x420   : > { %v7559_v13 = vpop.f32.mrf.mxu1  ;;  %13805 = vmatprep.mubr.msk.bf16.mxu0 %vm2302_vm4, %v16724_v36  ;;  %v14454_v36 = vld [vmem:[%s14657_s17 + $0x64c] sm:$0xf] }
 0x421   : > { %v18256_v31 = vadd.f32 %v13704_v56, %v8022_v25  ;;  %v8020_v3 = vadd.f32 %v7559_v13, %v17537_v32  ;;  %v8314_v45 = vpop.f32.mrf.mxu0  ;;  %v7400_v6 = vrot.slane %v14454_v36, 5  ;;  %v14456_v36 = vld [vmem:[%s14657_s17 + $0x650] sm:$0x1] }
 0x422   : > { %v13577_v15 = vpop.f32.mrf.mxu1  ;;  %13672 = vmatmul.mubr.msk.bf16.gmra.mxu1 %vm2302_vm4, %v20565_v37 }
 0x423   : > { %20564 = vst [vmem:[#allocation188_spill] sm:$0xff] %v18256_v31  ;;  %v18261_v41 = vadd.f32 %v8301_v60, %v8020_v3  ;;  %v8025_v47 = vadd.f32 %v13577_v15, %v17542_v8  ;;  %v13708_v9 = vpop.f32.mrf.mxu0  ;;  %13675 = vmatprep.mubr.msk.bf16.mxu1 %vm2302_vm4, %v20567_v27  ;;  %v14455_v60 = vld [vmem:[%s14657_s17 + $0x648] sm:$0xf]  ;;  %v7402_v15 = vrot.slane %v7400_v6, 4  ;;  %v20657_v31 = vld [vmem:[#allocation24_spill] sm:$0xff] }
 0x424   : > { %v7572_v56 = vpop.f32.mrf.mxu1  ;;  %v11972_v25 = vrot.slane %v14455_v60, 9  ;;  %v20610_v27 = vld [vmem:[#allocation127_spill] sm:$0xff] }
 0x425   : > { %20566 = vst [vmem:[#allocation11_spill] sm:$0xff] %v18261_v41  ;;  %v18267_v52 = vadd.f32 %v13707_v0, %v8025_v47  ;;  %v8023_v32 = vadd.f32 %v7572_v56, %v17545_v55  ;;  %v8317_v5 = vpop.f32.mrf.mxu0  ;;  %v7403_v41 = vrot.slane %v14456_v36, 5  ;;  %v565_v55 = vld [vmem:[%s14657_s17 + $0x654] sm:$0xf]  ;;  %v566_v47 = vld [vmem:[%s14657_s17 + $0x658] sm:$0xf] }
 0x426   : > { %v13578_v18 = vpop.f32.mrf.mxu1 }
 0x427   : > { %20568 = vst [vmem:[#allocation123_spill] sm:$0xff] %v18267_v52  ;;  %v18271_v13 = vadd.f32 %v8314_v45, %v8023_v32  ;;  %v8026_v8 = vadd.f32 %v13578_v18, %v17556_v62  ;;  %v13711_v3 = vpop.f32.mrf.mxu0  ;;  %13806 = vmatmul.mubr.msk.bf16.gmra.mxu0 %vm2302_vm4, %v16747_v19  ;;  %v20571_v62 = vld [vmem:[#allocation271_spill] sm:$0xff]  ;;  %v7401_v19 = vsel %vm15439_vm7, %v11972_v25, %v7400_v6 }
 0x428   : > { %v7575_v0 = vpop.f32.mrf.mxu1  ;;  %13809 = vmatprep.mubr.msk.bf16.mxu0 %vm2302_vm4, %v17573_v50  ;;  %v20573_v50 = vld [vmem:[#allocation272_spill] sm:$0xff] }
 0x429   : > { %20569 = vst [vmem:[#allocation183_spill] sm:$0xff] %v18271_v13  ;;  %v18281_v56 = vadd.f32 %v13708_v9, %v8026_v8  ;;  %v8024_v45 = vadd.f32 %v7575_v0, %v17561_v46  ;;  %v8330_v32 = vpop.f32.mrf.mxu0  ;;  %v7404_v9 = vsel %vm15439_vm7, %v7402_v15, %v7403_v41  ;;  %v12054_v46 = vcombine.low %v565_v55, %v566_v47  ;;  %v20579_v47 = vld [vmem:[#allocation261_spill] sm:$0xff] }
 0x42a   : > { %v13581_v60 = vpop.f32.mrf.mxu1  ;;  %13676 = vmatmul.mubr.msk.bf16.gmra.mxu1 %vm2302_vm4, %v20571_v62  ;;  %v18298_v6 = vcombine.low %v7401_v19, %v7404_v9  ;;  %v20584_v9 = vld [vmem:[#allocation53_spill] sm:$0xff] }
 0x42b   : > { %20570 = vst [vmem:[#allocation125_spill] sm:$0xff] %v18281_v56  ;;  %v18288_v18 = vadd.f32 %v8317_v5, %v8024_v45  ;;  %v8029_v36 = vadd.f32 %v13581_v60, %v17568_v40  ;;  %v13712_v13 = vpop.f32.mrf.mxu0  ;;  %13679 = vmatprep.mubr.msk.bf16.mxu1 %vm2302_vm4, %v20573_v50 }
 0x42c   : > { %v7588_v8 = vpop.f32.mrf.mxu1  ;;  %20575 = vst [vmem:[#allocation196_spill] sm:$0xff] %v18298_v6 }
 0x42d   : > { %20572 = vst [vmem:[#allocation186_spill] sm:$0xff] %v18288_v18  ;;  %v18295_v0 = vadd.f32 %v13711_v3, %v8029_v36  ;;  %v8027_v56 = vadd.f32 %v7588_v8, %v17575_v30  ;;  %v8333_v52 = vpop.f32.mrf.mxu0  ;;  %v20585_v8 = vld [vmem:[#allocation86_spill] sm:$0xff] }
 0x42e   : > { %v13582_v62 = vpop.f32.mrf.mxu1 }
 0x42f   : > { %20574 = vst [vmem:[#allocation194_spill] sm:$0xff] %v18295_v0  ;;  %v18300_v5 = vadd.f32 %v8330_v32, %v8027_v56  ;;  %v8030_v40 = vadd.f32 %v13582_v62, %v17582_v38  ;;  %v13715_v25 = vpop.f32.mrf.mxu0  ;;  %13810 = vmatmul.mubr.msk.bf16.gmra.mxu0 %vm2302_vm4, %v12054_v46  ;;  %v20580_v32 = vld [vmem:[#allocation12_spill] sm:$0xff] }
 0x430   : > { %v7591_v45 = vpop.f32.mrf.mxu1  ;;  %13945 = vmatprep.mubr.msk.bf16.mxu0 %vm2302_vm4, %v20274_v10 }
 0x431   : > { %20576 = vst [vmem:[#allocation130_spill] sm:$0xff] %v18300_v5  ;;  %v18306_v41 = vadd.f32 %v13712_v13, %v8030_v40  ;;  %v8028_v3 = vadd.f32 %v7591_v45, %v17587_v34  ;;  %v8346_v30 = vpop.f32.mrf.mxu0  ;;  %v20582_v13 = vld [vmem:[#allocation263_spill] sm:$0xff] }
 0x432   : > { %v13585_v15 = vpop.f32.mrf.mxu1  ;;  %13680 = vmatmul.mubr.msk.bf16.gmra.mxu1 %vm2302_vm4, %v18298_v6  ;;  %v20586_v45 = vld [vmem:[#allocation87_spill] sm:$0xff]  ;;  %v20598_v6 = vld [vmem:[#allocation93_spill] sm:$0xff] }
 0x433   : > { %20577 = vst [vmem:[#allocation133_spill] sm:$0xff] %v18306_v41  ;;  %v18311_v55 = vadd.f32 %v8333_v52, %v8028_v3  ;;  %v8033_v38 = vadd.f32 %v13585_v15, %v20579_v47  ;;  %v13716_v56 = vpop.f32.mrf.mxu0  ;;  %13815 = vmatprep.mubr.msk.bf16.mxu1 %vm2302_vm4, %v20580_v32 }
 0x434   : > { %v7604_v60 = vpop.f32.mrf.mxu1 }
 0x435   : > { %20578 = vst [vmem:[#allocation138_spill] sm:$0xff] %v18311_v55  ;;  %v18316_v10 = vadd.f32 %v13715_v25, %v8033_v38  ;;  %v8031_v62 = vadd.f32 %v7604_v60, %v20582_v13  ;;  %v8349_v34 = vpop.f32.mrf.mxu0  ;;  %v20588_v25 = vld [vmem:[#allocation267_spill] sm:$0xff]  ;;  %v20589_v13 = vld [vmem:[#allocation14_spill] sm:$0xff] }
 0x436   : > { %v13586_v19 = vpop.f32.mrf.mxu1  ;;  %v14457_v38 = vld [vmem:[%s14657_s17 + $0x6c] sm:$0xf] }
 0x437   : > { %20581 = vst [vmem:[#allocation141_spill] sm:$0xff] %v18316_v10  ;;  %v18319_v36 = vadd.f32 %v8346_v30, %v8031_v62  ;;  %v8034_v52 = vadd.f32 %v13586_v19, %v20584_v9  ;;  %v13719_v46 = vpop.f32.mrf.mxu0  ;;  %13946 = vmatmul.mubr.msk.bf16.vlgmr.msra.gmra.mxu0 %vm2302_vm4, %v20585_v8  ;;  %v8874_v32 = vshrl.u32 %v14457_v38, 16  ;;  %v8877_v60 = vshll.u32 %v14457_v38, 16  ;;  %v14458_v62 = vld [vmem:[%s14657_s17 + $0x70] sm:$0xf]  ;;  %v20591_v8 = vld [vmem:[#allocation266_spill] sm:$0xff] }
 0x438   : > { %v7607_v40 = vpop.f32.mrf.mxu1  ;;  %13949 = vmatprep.mubr.msk.bf16.mxu0 %vm2302_vm4, %v20586_v45  ;;  %v8887_v19 = vshrl.u32 %v14458_v62, 16  ;;  %v20592_v45 = vld [vmem:[#allocation16_spill] sm:$0xff] }
 0x439   : > { %20583 = vst [vmem:[#allocation202_spill] sm:$0xff] %v18319_v36  ;;  %v18326_v3 = vadd.f32 %v13716_v56, %v8034_v52  ;;  %v8032_v15 = vadd.f32 %v7607_v40, %v20588_v25  ;;  %v8362_v47 = vpop.f32.mrf.mxu0  ;;  %v8883_v56 = vshll.u32 %v14458_v62, 16  ;;  %v20594_v25 = vld [vmem:[#allocation10_spill] sm:$0xff]  ;;  %v8879_v5 = vrot.slane %v8877_v60, 5 }
 0x43a   : > { %v13589_v30 = vpop.f32.mrf.mxu1  ;;  %13816 = vmatmul.mubr.msk.bf16.vlgmr.msra.gmra.mxu1 %vm2302_vm4, %v20589_v13  ;;  %v8876_v13 = vrot.slane %v8874_v32, 4  ;;  %v20600_v32 = vld [vmem:[#allocation121_spill] sm:$0xff] }
 0x43b   : > { %20587 = vst [vmem:[#allocation204_spill] sm:$0xff] %v18326_v3  ;;  %v18333_v9 = vadd.f32 %v8349_v34, %v8032_v15  ;;  %v8037_v36 = vadd.f32 %v13589_v30, %v20591_v8  ;;  %v13720_v10 = vpop.f32.mrf.mxu0  ;;  %13819 = vmatprep.mubr.msk.bf16.mxu1 %vm2302_vm4, %v20592_v45  ;;  %v20596_v34 = vld [vmem:[#allocation80_spill] sm:$0xff]  ;;  %v8885_v45 = vrot.slane %v8883_v56, 5 }
 0x43c   : > { %v7620_v52 = vpop.f32.mrf.mxu1  ;;  %v20597_v8 = vld [vmem:[#allocation92_spill] sm:$0xff] }
 0x43d   : > { %20590 = vst [vmem:[#allocation146_spill] sm:$0xff] %v18333_v9  ;;  %v18338_v40 = vadd.f32 %v13719_v46, %v8037_v36  ;;  %v8035_v3 = vadd.f32 %v7620_v52, %v20594_v25  ;;  %v8365_v55 = vpop.f32.mrf.mxu0  ;;  %v8889_v9 = vrot.slane %v8887_v19, 4  ;;  %v357_v36 = vld [vmem:[%s14657_s17 + $0x74] sm:$0x1]  ;;  %v9801_v46 = vrot.slane %v14458_v62, 5  ;;  %v20601_v25 = vld [vmem:[#allocation18_spill] sm:$0xff] }
 0x43e   : > { %v13590_v41 = vpop.f32.mrf.mxu1  ;;  %v20603_v56 = vld [vmem:[#allocation124_spill] sm:$0xff]  ;;  %v8893_v62 = vshll.u32 %v357_v36, 16 }
 0x43f   : > { %20593 = vst [vmem:[#allocation149_spill] sm:$0xff] %v18338_v40  ;;  %v18341_v0 = vadd.f32 %v8362_v47, %v8035_v3  ;;  %v8038_v15 = vadd.f32 %v13590_v41, %v20596_v34  ;;  %v13723_v30 = vpop.f32.mrf.mxu0  ;;  %13950 = vmatmul.mubr.msk.bf16.gmra.mxu0 %vm2302_vm4, %v20597_v8  ;;  %v8880_v41 = vor.u32 %v8879_v5, %v8876_v13  ;;  %v20606_v40 = vld [vmem:[#allocation88_spill] sm:$0xff] }
 0x440   : > { %v7623_v18 = vpop.f32.mrf.mxu1  ;;  %13953 = vmatprep.mubr.msk.bf16.mxu0 %vm2302_vm4, %v20598_v6  ;;  %v8890_v6 = vor.u32 %v8889_v9, %v8885_v45  ;;  %v8895_v9 = vrot.slane %v8893_v62, 5 }
 0x441   : > { %20595 = vst [vmem:[#allocation153_spill] sm:$0xff] %v18341_v0  ;;  %v18349_v52 = vadd.f32 %v13720_v10, %v8038_v15  ;;  %v8036_v60 = vadd.f32 %v7623_v18, %v20600_v32  ;;  %v8378_v3 = vpop.f32.mrf.mxu0  ;;  %v20604_v0 = vld [vmem:[#allocation20_spill] sm:$0xff]  ;;  %v12192_v15 = vrot.slane %v14457_v38, 9  ;;  %v9804_v18 = vrot.slane %v357_v36, 5  ;;  %v20612_v36 = vld [vmem:[#allocation81_spill] sm:$0xff] }
 0x442   : > { %v13593_v47 = vpop.f32.mrf.mxu1  ;;  %13820 = vmatmul.mubr.msk.bf16.gmra.mxu1 %vm2302_vm4, %v20601_v25 }
 0x443   : > { %20599 = vst [vmem:[#allocation155_spill] sm:$0xff] %v18349_v52  ;;  %v18354_v34 = vadd.f32 %v8365_v55, %v8036_v60  ;;  %v8041_v19 = vadd.f32 %v13593_v47, %v20603_v56  ;;  %v13724_v8 = vpop.f32.mrf.mxu0  ;;  %13823 = vmatprep.mubr.msk.bf16.mxu1 %vm2302_vm4, %v20604_v0  ;;  %v9803_v52 = vrot.slane %v9801_v46, 4  ;;  %v8881_v55 = vrot.slane %v8880_v41, 4  ;;  %v20608_v60 = vld [vmem:[#allocation90_spill] sm:$0xff] }
 0x444   : > { %v7636_v10 = vpop.f32.mrf.mxu1  ;;  %v8891_v0 = vrot.slane %v8890_v6, 4 }
 0x445   : > { %20602 = vst [vmem:[#allocation209_spill] sm:$0xff] %v18354_v34  ;;  %v18359_v32 = vadd.f32 %v13723_v30, %v8041_v19  ;;  %v8039_v50 = vadd.f32 %v7636_v10, %v20606_v40  ;;  %v8381_v25 = vpop.f32.mrf.mxu0  ;;  %v20609_v34 = vld [vmem:[#allocation98_spill] sm:$0xff]  ;;  %v9802_v40 = vsel %vm15439_vm7, %v12192_v15, %v9801_v46  ;;  %v9805_v30 = vsel %vm15439_vm7, %v9803_v52, %v9804_v18 }
 0x446   : > { %v13594_v5 = vpop.f32.mrf.mxu1  ;;  %v20613_v10 = vld [vmem:[#allocation22_spill] sm:$0xff]  ;;  %v8886_v6 = vsel %vm14678_vm3, %v8881_v55, %v8885_v45  ;;  %v8896_v52 = vsel %vm14678_vm3, %v8891_v0, %v8895_v9  ;;  %v20621_v55 = vld [vmem:[#allocation135_spill] sm:$0xff] }
 0x447   : > { %20605 = vst [vmem:[#allocation168_spill] sm:$0xff] %v18359_v32  ;;  %v18362_v13 = vadd.f32 %v8378_v3, %v8039_v50  ;;  %v8042_v47 = vadd.f32 %v13594_v5, %v20608_v60  ;;  %v13727_v56 = vpop.f32.mrf.mxu0  ;;  %13954 = vmatmul.mubr.msk.bf16.gmra.mxu0 %vm2302_vm4, %v20609_v34  ;;  %v20617_v15 = vld [vmem:[#allocation154_spill] sm:$0xff]  ;;  %v12120_v45 = vcombine.low %v8886_v6, %v8896_v52 }
 0x448   : > { %v7639_v38 = vpop.f32.mrf.mxu1  ;;  %13957 = vmatprep.mubr.msk.bf16.mxu0 %vm2302_vm4, %v20610_v27  ;;  %v20616_v27 = vld [vmem:[#allocation82_spill] sm:$0xff] }
 0x449   : > { %20607 = vst [vmem:[#allocation159_spill] sm:$0xff] %v18362_v13  ;;  %v18373_v50 = vadd.f32 %v13724_v8, %v8042_v47  ;;  %v8040_v3 = vadd.f32 %v7639_v38, %v20612_v36  ;;  %v8394_v41 = vpop.f32.mrf.mxu0  ;;  %v12201_v8 = vcombine.low %v9802_v40, %v9805_v30  ;;  %v20619_v47 = vld [vmem:[#allocation132_spill] sm:$0xff]  ;;  %v20645_v13 = vld [vmem:[#allocation115_spill] sm:$0xff] }
 0x44a   : > { %v13597_v19 = vpop.f32.mrf.mxu1  ;;  %13824 = vmatmul.mubr.msk.bf16.gmra.mxu1 %vm2302_vm4, %v20613_v10 }
 0x44b   : > { %20611 = vst [vmem:[#allocation165_spill] sm:$0xff] %v18373_v50  ;;  %v18380_v62 = vadd.f32 %v8381_v25, %v8040_v3  ;;  %v8045_v5 = vadd.f32 %v13597_v19, %v20616_v27  ;;  %v13728_v46 = vpop.f32.mrf.mxu0  ;;  %13827 = vmatprep.mubr.msk.bf16.mxu1 %vm2302_vm4, %v20617_v15  ;;  %v20622_v15 = vld [vmem:[#allocation103_spill] sm:$0xff] }
 0x44c   : > { %v7652_v18 = vpop.f32.mrf.mxu1 }
 0x44d   : > { %20615 = vst [vmem:[#allocation207_spill] sm:$0xff] %v18380_v62  ;;  %v18387_v60 = vadd.f32 %v13727_v56, %v8045_v5  ;;  %v8043_v38 = vadd.f32 %v7652_v18, %v20619_v47  ;;  %v8397_v36 = vpop.f32.mrf.mxu0  ;;  %v20624_v56 = vld [vmem:[#allocation94_spill] sm:$0xff] }
 0x44e   : > { %v13598_v10 = vpop.f32.mrf.mxu1  ;;  %v20627_v18 = vld [vmem:[#allocation26_spill] sm:$0xff] }
 0x44f   : > { %20618 = vst [vmem:[#allocation173_spill] sm:$0xff] %v18387_v60  ;;  %v18390_v25 = vadd.f32 %v8394_v41, %v8043_v38  ;;  %v8046_v3 = vadd.f32 %v13598_v10, %v20621_v55  ;;  %v13731_v19 = vpop.f32.mrf.mxu0  ;;  %13958 = vmatmul.mubr.msk.bf16.gmra.mxu0 %vm2302_vm4, %v12201_v8  ;;  %v20626_v41 = vld [vmem:[#allocation96_spill] sm:$0xff] }
 0x450   : > { %v7655_v27 = vpop.f32.mrf.mxu1  ;;  %13961 = vmatprep.mubr.msk.bf16.mxu0 %vm2302_vm4, %v20622_v15  ;;  %v20632_v15 = vld [vmem:[#allocation108_spill] sm:$0xff] }
 0x451   : > { %20620 = vst [vmem:[#allocation176_spill] sm:$0xff] %v18390_v25  ;;  %v18396_v0 = vadd.f32 %v13728_v46, %v8046_v3  ;;  %v8044_v9 = vadd.f32 %v7655_v27, %v20624_v56  ;;  %v8410_v40 = vpop.f32.mrf.mxu0  ;;  %v20629_v46 = vld [vmem:[#allocation84_spill] sm:$0xff] }
 0x452   : > { %v13601_v30 = vpop.f32.mrf.mxu1  ;;  %13828 = vmatmul.mubr.msk.bf16.gmra.mxu1 %vm2302_vm4, %v12120_v45  ;;  %v20631_v45 = vld [vmem:[#allocation140_spill] sm:$0xff] }
 0x453   : > { %20623 = vst [vmem:[#allocation218_spill] sm:$0xff] %v18396_v0  ;;  %v18400_v6 = vadd.f32 %v8397_v36, %v8044_v9  ;;  %v8049_v5 = vadd.f32 %v13601_v30, %v20626_v41  ;;  %v13732_v52 = vpop.f32.mrf.mxu0  ;;  %13831 = vmatprep.mubr.msk.bf16.mxu1 %vm2302_vm4, %v20627_v18  ;;  %v20633_v9 = vld [vmem:[#allocation109_spill] sm:$0xff]  ;;  %v14459_v18 = vld [vmem:[%s14657_s17 + $0x144] sm:$0xf] }
 0x454   : > { %v7668_v8 = vpop.f32.mrf.mxu1 }
 0x455   : > { %20625 = vst [vmem:[#allocation25_spill] sm:$0xff] %v18400_v6  ;;  %v18405_v47 = vadd.f32 %v13731_v19, %v8049_v5  ;;  %v8047_v38 = vadd.f32 %v7668_v8, %v20629_v46  ;;  %v8413_v10 = vpop.f32.mrf.mxu0  ;;  %v20635_v19 = vld [vmem:[#allocation143_spill] sm:$0xff]  ;;  %v8898_v8 = vshrl.u32 %v14459_v18, 16  ;;  %v8901_v46 = vshll.u32 %v14459_v18, 16 }
 0x456   : > { %v13602_v55 = vpop.f32.mrf.mxu1 }
 0x457   : > { %20628 = vst [vmem:[#allocation180_spill] sm:$0xff] %v18405_v47  ;;  %v18408_v3 = vadd.f32 %v8410_v40, %v8047_v38  ;;  %v8050_v36 = vadd.f32 %v13602_v55, %v20631_v45  ;;  %v13735_v27 = vpop.f32.mrf.mxu0  ;;  %13962 = vmatmul.mubr.msk.bf16.gmra.mxu0 %vm2302_vm4, %v20632_v15  ;;  %v20636_v38 = vld [vmem:[#allocation28_spill] sm:$0xff]  ;;  %v14460_v55 = vld [vmem:[%s14657_s17 + $0x148] sm:$0xf]  ;;  %v8903_v60 = vrot.slane %v8901_v46, 5 }
 0x458   : > { %v7671_v56 = vpop.f32.mrf.mxu1  ;;  %13965 = vmatprep.mubr.msk.bf16.mxu0 %vm2302_vm4, %v20633_v9  ;;  %v8911_v45 = vshrl.u32 %v14460_v55, 16  ;;  %v20638_v15 = vld [vmem:[#allocation148_spill] sm:$0xff]  ;;  %v20639_v9 = vld [vmem:[#allocation30_spill] sm:$0xff] }
 0x459   : > { %20630 = vst [vmem:[#allocation213_spill] sm:$0xff] %v18408_v3  ;;  %v18415_v30 = vadd.f32 %v13732_v52, %v8050_v36  ;;  %v8048_v41 = vadd.f32 %v7671_v56, %v20635_v19  ;;  %v8426_v5 = vpop.f32.mrf.mxu0  ;;  %v8907_v52 = vshll.u32 %v14460_v55, 16  ;;  %v20641_v19 = vld [vmem:[#allocation99_spill] sm:$0xff] }
 0x45a   : > { %v13605_v40 = vpop.f32.mrf.mxu1  ;;  %13832 = vmatmul.mubr.msk.bf16.gmra.mxu1 %vm2302_vm4, %v20636_v38  ;;  %v8900_v38 = vrot.slane %v8898_v8, 4  ;;  %v20647_v8 = vld [vmem:[#allocation151_spill] sm:$0xff] }
 0x45b   : > { %20634 = vst [vmem:[#allocation182_spill] sm:$0xff] %v18415_v30  ;;  %v18422_v3 = vadd.f32 %v8413_v10, %v8048_v41  ;;  %v8053_v47 = vadd.f32 %v13605_v40, %v20638_v15  ;;  %v13736_v6 = vpop.f32.mrf.mxu0  ;;  %13835 = vmatprep.mubr.msk.bf16.mxu1 %vm2302_vm4, %v20639_v9  ;;  %v20643_v10 = vld [vmem:[#allocation170_spill] sm:$0xff]  ;;  %v8909_v9 = vrot.slane %v8907_v52, 5  ;;  %v20650_v52 = vld [vmem:[#allocation75_spill] sm:$0xff] }
 0x45c   : > { %v7684_v36 = vpop.f32.mrf.mxu1  ;;  %v20644_v15 = vld [vmem:[#allocation114_spill] sm:$0xff] }
 0x45d   : > { %20637 = vst [vmem:[#allocation216_spill] sm:$0xff] %v18422_v3  ;;  %v18427_v56 = vadd.f32 %v13735_v27, %v8053_v47  ;;  %v8051_v30 = vadd.f32 %v7684_v36, %v20641_v19  ;;  %v8429_v0 = vpop.f32.mrf.mxu0  ;;  %v8913_v3 = vrot.slane %v8911_v45, 4  ;;  %v387_v47 = vld [vmem:[%s14657_s17 + $0x14c] sm:$0x1]  ;;  %v9808_v27 = vrot.slane %v14460_v55, 5  ;;  %v20648_v19 = vld [vmem:[#allocation32_spill] sm:$0xff] }
 0x45e   : > { %v13606_v25 = vpop.f32.mrf.mxu1  ;;  %v8917_v55 = vshll.u32 %v387_v47, 16 }
 0x45f   : > { %20640 = vst [vmem:[#allocation224_spill] sm:$0xff] %v18427_v56  ;;  %v18430_v62 = vadd.f32 %v8426_v5, %v8051_v30  ;;  %v8054_v41 = vadd.f32 %v13606_v25, %v20643_v10  ;;  %v13739_v40 = vpop.f32.mrf.mxu0  ;;  %13966 = vmatmul.mubr.msk.bf16.gmra.mxu0 %vm2302_vm4, %v20644_v15  ;;  %v8904_v25 = vor.u32 %v8903_v60, %v8900_v38  ;;  %v20653_v56 = vld [vmem:[#allocation167_spill] sm:$0xff] }
 0x460   : > { %v7687_v50 = vpop.f32.mrf.mxu1  ;;  %13969 = vmatprep.mubr.msk.bf16.mxu0 %vm2302_vm4, %v20645_v13  ;;  %v8914_v13 = vor.u32 %v8913_v3, %v8909_v9  ;;  %v8919_v3 = vrot.slane %v8917_v55, 5 }
 0x461   : > { %20642 = vst [vmem:[#allocation187_spill] sm:$0xff] %v18430_v62  ;;  %v18438_v36 = vadd.f32 %v13736_v6, %v8054_v41  ;;  %v8052_v46 = vadd.f32 %v7687_v50, %v20647_v8  ;;  %v8442_v30 = vpop.f32.mrf.mxu0  ;;  %v20651_v62 = vld [vmem:[#allocation34_spill] sm:$0xff]  ;;  %v12193_v41 = vrot.slane %v14459_v18, 9  ;;  %v9811_v50 = vrot.slane %v387_v47, 5  ;;  %v20659_v47 = vld [vmem:[#allocation175_spill] sm:$0xff] }
 0x462   : > { %v13609_v5 = vpop.f32.mrf.mxu1  ;;  %13836 = vmatmul.mubr.msk.bf16.gmra.mxu1 %vm2302_vm4, %v20648_v19 }
 0x463   : > { %20646 = vst [vmem:[#allocation190_spill] sm:$0xff] %v18438_v36  ;;  %v18443_v10 = vadd.f32 %v8429_v0, %v8052_v46  ;;  %v8057_v45 = vadd.f32 %v13609_v5, %v20650_v52  ;;  %v13740_v15 = vpop.f32.mrf.mxu0  ;;  %13839 = vmatprep.mubr.msk.bf16.mxu1 %vm2302_vm4, %v20651_v62  ;;  %v9810_v36 = vrot.slane %v9808_v27, 4  ;;  %v8905_v0 = vrot.slane %v8904_v25, 4  ;;  %v20655_v46 = vld [vmem:[#allocation273_spill] sm:$0xff] }
 0x464   : > { %v7700_v6 = vpop.f32.mrf.mxu1  ;;  %v8915_v62 = vrot.slane %v8914_v13, 4 }
 0x465   : > { %20649 = vst [vmem:[#allocation195_spill] sm:$0xff] %v18443_v10  ;;  %v18448_v8 = vadd.f32 %v13739_v40, %v8057_v45  ;;  %v8055_v32 = vadd.f32 %v7700_v6, %v20653_v56  ;;  %v8445_v19 = vpop.f32.mrf.mxu0  ;;  %v20656_v10 = vld [vmem:[#allocation120_spill] sm:$0xff]  ;;  %v9809_v56 = vsel %vm15439_vm7, %v12193_v41, %v9808_v27  ;;  %v9812_v40 = vsel %vm15439_vm7, %v9810_v36, %v9811_v50  ;;  %v20663_v41 = vld [vmem:[#allocation219_spill] sm:$0xff] }
 0x466   : > { %v13610_v60 = vpop.f32.mrf.mxu1  ;;  %v20660_v6 = vld [vmem:[#allocation36_spill] sm:$0xff]  ;;  %v8920_v36 = vsel %vm14678_vm3, %v8915_v62, %v8919_v3 }
 0x467   : > { %20652 = vst [vmem:[#allocation198_spill] sm:$0xff] %v18448_v8  ;;  %v18451_v38 = vadd.f32 %v8442_v30, %v8055_v32  ;;  %v8058_v5 = vadd.f32 %v13610_v60, %v20655_v46  ;;  %v13743_v52 = vpop.f32.mrf.mxu0  ;;  %13970 = vmatmul.mubr.msk.bf16.gmra.mxu0 %vm2302_vm4, %v20656_v10  ;;  %v8910_v10 = vsel %vm14678_vm3, %v8905_v0, %v8909_v9  ;;  %v20665_v46 = vld [vmem:[#allocation178_spill] sm:$0xff] }
 0x468   : > { %v7703_v18 = vpop.f32.mrf.mxu1  ;;  %13973 = vmatprep.mubr.msk.bf16.mxu0 %vm2302_vm4, %v20657_v31  ;;  %v20662_v31 = vld [vmem:[#allocation106_spill] sm:$0xff]  ;;  %v12121_v9 = vcombine.low %v8910_v10, %v8920_v36  ;;  %v20673_v36 = vld [vmem:[#allocation40_spill] sm:$0xff] }
 0x469   : > { %20654 = vst [vmem:[#allocation232_spill] sm:$0xff] %v18451_v38  ;;  %v18462_v32 = vadd.f32 %v13740_v15, %v8058_v5  ;;  %v8056_v30 = vadd.f32 %v7703_v18, %v20659_v47  ;;  %v8458_v25 = vpop.f32.mrf.mxu0  ;;  %v12202_v15 = vcombine.low %v9809_v56, %v9812_v40  ;;  %v20667_v0 = vld [vmem:[#allocation102_spill] sm:$0xff] }
 0x46a   : > { %v13613_v45 = vpop.f32.mrf.mxu1  ;;  %13840 = vmatmul.mubr.msk.bf16.gmra.mxu1 %vm2302_vm4, %v20660_v6  ;;  %v20703_v8 = vld [vmem:[#allocation122_spill] sm:$0xff] }
 0x46b   : > { %20658 = vst [vmem:[#allocation203_spill] sm:$0xff] %v18462_v32  ;;  %v18469_v13 = vadd.f32 %v8445_v19, %v8056_v30  ;;  %v8061_v55 = vadd.f32 %v13613_v45, %v20662_v31  ;;  %v13744_v27 = vpop.f32.mrf.mxu0  ;;  %13843 = vmatprep.mubr.msk.bf16.mxu1 %vm2302_vm4, %v20663_v41  ;;  %v20668_v31 = vld [vmem:[#allocation128_spill] sm:$0xff] }
 0x46c   : > { %v7716_v50 = vpop.f32.mrf.mxu1  ;;  %v20691_v32 = vld [vmem:[#allocation144_spill] sm:$0xff] }
 0x46d   : > { %20661 = vst [vmem:[#allocation206_spill] sm:$0xff] %v18469_v13  ;;  %v18476_v60 = vadd.f32 %v13743_v52, %v8061_v55  ;;  %v8059_v5 = vadd.f32 %v7716_v50, %v20665_v46  ;;  %v8461_v18 = vpop.f32.mrf.mxu0  ;;  %v20670_v52 = vld [vmem:[#allocation181_spill] sm:$0xff] }
 0x46e   : > { %v13614_v47 = vpop.f32.mrf.mxu1 }
 0x46f   : > { %20664 = vst [vmem:[#allocation210_spill] sm:$0xff] %v18476_v60  ;;  %v18479_v19 = vadd.f32 %v8458_v25, %v8059_v5  ;;  %v8062_v30 = vadd.f32 %v13614_v47, %v20667_v0  ;;  %v13747_v45 = vpop.f32.mrf.mxu0  ;;  %13974 = vmatmul.mubr.msk.bf16.gmra.mxu0 %vm2302_vm4, %v12202_v15  ;;  %v20672_v25 = vld [vmem:[#allocation104_spill] sm:$0xff] }
 0x470   : > { %v7719_v6 = vpop.f32.mrf.mxu1  ;;  %13977 = vmatprep.mubr.msk.bf16.mxu0 %vm2302_vm4, %v20668_v31 }
 0x471   : > { %20666 = vst [vmem:[#allocation240_spill] sm:$0xff] %v18479_v19  ;;  %v18485_v62 = vadd.f32 %v13744_v27, %v8062_v30  ;;  %v8060_v3 = vadd.f32 %v7719_v6, %v20670_v52  ;;  %v8474_v56 = vpop.f32.mrf.mxu0  ;;  %v20675_v27 = vld [vmem:[#allocation110_spill] sm:$0xff]  ;;  %v20679_v52 = vld [vmem:[#allocation136_spill] sm:$0xff] }
 0x472   : > { %v13617_v40 = vpop.f32.mrf.mxu1  ;;  %13844 = vmatmul.mubr.msk.bf16.gmra.mxu1 %vm2302_vm4, %v12121_v9  ;;  %v20677_v9 = vld [vmem:[#allocation112_spill] sm:$0xff]  ;;  %v20678_v6 = vld [vmem:[#allocation134_spill] sm:$0xff] }
 0x473   : > { %20669 = vst [vmem:[#allocation220_spill] sm:$0xff] %v18485_v62  ;;  %v18489_v10 = vadd.f32 %v8461_v18, %v8060_v3  ;;  %v8065_v55 = vadd.f32 %v13617_v40, %v20672_v25  ;;  %v13748_v41 = vpop.f32.mrf.mxu0  ;;  %13847 = vmatprep.mubr.msk.bf16.mxu1 %vm2302_vm4, %v20673_v36 }
 0x474   : > { %v7732_v15 = vpop.f32.mrf.mxu1 }
 0x475   : > { %20671 = vst [vmem:[#allocation226_spill] sm:$0xff] %v18489_v10  ;;  %v18494_v50 = vadd.f32 %v13747_v45, %v8065_v55  ;;  %v8063_v46 = vadd.f32 %v7732_v15, %v20675_v27  ;;  %v8477_v5 = vpop.f32.mrf.mxu0  ;;  %v20681_v45 = vld [vmem:[#allocation184_spill] sm:$0xff]  ;;  %v14461_v55 = vld [vmem:[%s14657_s17 + $0x21c] sm:$0xf]  ;;  %v20682_v27 = vld [vmem:[#allocation42_spill] sm:$0xff] }
 0x476   : > { %v13618_v47 = vpop.f32.mrf.mxu1  ;;  %v8922_v36 = vshrl.u32 %v14461_v55, 16  ;;  %v8925_v15 = vshll.u32 %v14461_v55, 16 }
 0x477   : > { %20674 = vst [vmem:[#allocation217_spill] sm:$0xff] %v18494_v50  ;;  %v18497_v0 = vadd.f32 %v8474_v56, %v8063_v46  ;;  %v8066_v18 = vadd.f32 %v13618_v47, %v20677_v9  ;;  %v13751_v30 = vpop.f32.mrf.mxu0  ;;  %13978 = vmatmul.mubr.msk.bf16.gmra.mxu0 %vm2302_vm4, %v20678_v6  ;;  %v14462_v46 = vld [vmem:[%s14657_s17 + $0x220] sm:$0xf]  ;;  %v20684_v6 = vld [vmem:[#allocation189_spill] sm:$0xff] }
 0x478   : > { %v7735_v31 = vpop.f32.mrf.mxu1  ;;  %13981 = vmatprep.mubr.msk.bf16.mxu0 %vm2302_vm4, %v20679_v52  ;;  %v8935_v47 = vshrl.u32 %v14462_v46, 16  ;;  %v20685_v52 = vld [vmem:[#allocation44_spill] sm:$0xff]  ;;  %v8927_v19 = vrot.slane %v8925_v15, 5 }
 0x479   : > { %20676 = vst [vmem:[#allocation238_spill] sm:$0xff] %v18497_v0  ;;  %v18504_v3 = vadd.f32 %v13748_v41, %v8066_v18  ;;  %v8064_v40 = vadd.f32 %v7735_v31, %v20681_v45  ;;  %v8490_v25 = vpop.f32.mrf.mxu0  ;;  %v8931_v41 = vshll.u32 %v14462_v46, 16  ;;  %v20687_v45 = vld [vmem:[#allocation192_spill] sm:$0xff] }
 0x47a   : > { %v13621_v56 = vpop.f32.mrf.mxu1  ;;  %13848 = vmatmul.mubr.msk.bf16.gmra.mxu1 %vm2302_vm4, %v20682_v27  ;;  %v8924_v27 = vrot.slane %v8922_v36, 4  ;;  %v20693_v36 = vld [vmem:[#allocation116_spill] sm:$0xff] }
 0x47b   : > { %20680 = vst [vmem:[#allocation225_spill] sm:$0xff] %v18504_v3  ;;  %v18511_v9 = vadd.f32 %v8477_v5, %v8064_v40  ;;  %v8069_v0 = vadd.f32 %v13621_v56, %v20684_v6  ;;  %v13752_v50 = vpop.f32.mrf.mxu0  ;;  %13851 = vmatprep.mubr.msk.bf16.mxu1 %vm2302_vm4, %v20685_v52  ;;  %v20689_v5 = vld [vmem:[#allocation197_spill] sm:$0xff]  ;;  %v20690_v6 = vld [vmem:[#allocation142_spill] sm:$0xff]  ;;  %v8933_v52 = vrot.slane %v8931_v41, 5 }
 0x47c   : > { %v7748_v18 = vpop.f32.mrf.mxu1  ;;  %v20696_v41 = vld [vmem:[#allocation118_spill] sm:$0xff] }
 0x47d   : > { %20683 = vst [vmem:[#allocation235_spill] sm:$0xff] %v18511_v9  ;;  %v18516_v31 = vadd.f32 %v13751_v30, %v8069_v0  ;;  %v8067_v3 = vadd.f32 %v7748_v18, %v20687_v45  ;;  %v8493_v10 = vpop.f32.mrf.mxu0  ;;  %v8937_v9 = vrot.slane %v8935_v47, 4  ;;  %v417_v0 = vld [vmem:[%s14657_s17 + $0x224] sm:$0x1]  ;;  %v9815_v30 = vrot.slane %v14462_v46, 5 }
 0x47e   : > { %v13622_v62 = vpop.f32.mrf.mxu1  ;;  %v20694_v45 = vld [vmem:[#allocation46_spill] sm:$0xff]  ;;  %v8941_v46 = vshll.u32 %v417_v0, 16 }
 0x47f   : > { %20686 = vst [vmem:[#allocation251_spill] sm:$0xff] %v18516_v31  ;;  %v18519_v60 = vadd.f32 %v8490_v25, %v8067_v3  ;;  %v8070_v40 = vadd.f32 %v13622_v62, %v20689_v5  ;;  %v13755_v56 = vpop.f32.mrf.mxu0  ;;  %13982 = vmatmul.mubr.msk.bf16.gmra.mxu0 %vm2302_vm4, %v20690_v6  ;;  %v8928_v62 = vor.u32 %v8927_v19, %v8924_v27  ;;  %v20699_v31 = vld [vmem:[#allocation200_spill] sm:$0xff] }
 0x480   : > { %v7751_v13 = vpop.f32.mrf.mxu1  ;;  %13985 = vmatprep.mubr.msk.bf16.mxu0 %vm2302_vm4, %v20691_v32  ;;  %v8938_v32 = vor.u32 %v8937_v9, %v8933_v52  ;;  %v8943_v9 = vrot.slane %v8941_v46, 5 }
 0x481   : > { %20688 = vst [vmem:[#allocation228_spill] sm:$0xff] %v18519_v60  ;;  %v18527_v18 = vadd.f32 %v13752_v50, %v8070_v40  ;;  %v8068_v15 = vadd.f32 %v7751_v13, %v20693_v36  ;;  %v8506_v3 = vpop.f32.mrf.mxu0  ;;  %v20697_v60 = vld [vmem:[#allocation48_spill] sm:$0xff]  ;;  %v12194_v40 = vrot.slane %v14461_v55, 9  ;;  %v9818_v13 = vrot.slane %v417_v0, 5 }
 0x482   : > { %v13625_v25 = vpop.f32.mrf.mxu1  ;;  %13852 = vmatmul.mubr.msk.bf16.gmra.mxu1 %vm2302_vm4, %v20694_v45  ;;  %v20705_v0 = vld [vmem:[#allocation208_spill] sm:$0xff] }
 0x483   : > { %20692 = vst [vmem:[#allocation233_spill] sm:$0xff] %v18527_v18  ;;  %v18532_v5 = vadd.f32 %v8493_v10, %v8068_v15  ;;  %v8073_v47 = vadd.f32 %v13625_v25, %v20696_v41  ;;  %v13756_v6 = vpop.f32.mrf.mxu0  ;;  %13855 = vmatprep.mubr.msk.bf16.mxu1 %vm2302_vm4, %v20697_v60  ;;  %v9817_v18 = vrot.slane %v9815_v30, 4  ;;  %v8929_v10 = vrot.slane %v8928_v62, 4  ;;  %v20701_v15 = vld [vmem:[#allocation205_spill] sm:$0xff] }
 0x484   : > { %v7764_v50 = vpop.f32.mrf.mxu1  ;;  %v8939_v60 = vrot.slane %v8938_v32, 4 }
 0x485   : > { %20695 = vst [vmem:[#allocation245_spill] sm:$0xff] %v18532_v5  ;;  %v18537_v36 = vadd.f32 %v13755_v56, %v8073_v47  ;;  %v8071_v38 = vadd.f32 %v7764_v50, %v20699_v31  ;;  %v8509_v45 = vpop.f32.mrf.mxu0  ;;  %v20702_v5 = vld [vmem:[#allocation150_spill] sm:$0xff]  ;;  %v9816_v31 = vsel %vm15439_vm7, %v12194_v40, %v9815_v30  ;;  %v9819_v56 = vsel %vm15439_vm7, %v9817_v18, %v9818_v13  ;;  %v20709_v40 = vld [vmem:[#allocation67_spill] sm:$0xff] }
 0x486   : > { %v13626_v19 = vpop.f32.mrf.mxu1  ;;  %v20706_v50 = vld [vmem:[#allocation50_spill] sm:$0xff]  ;;  %v8944_v18 = vsel %vm14678_vm3, %v8939_v60, %v8943_v9 }
 0x487   : > { %20698 = vst [vmem:[#allocation236_spill] sm:$0xff] %v18537_v36  ;;  %v18540_v27 = vadd.f32 %v8506_v3, %v8071_v38  ;;  %v8074_v25 = vadd.f32 %v13626_v19, %v20701_v15  ;;  %v13759_v41 = vpop.f32.mrf.mxu0  ;;  %13986 = vmatmul.mubr.msk.bf16.gmra.mxu0 %vm2302_vm4, %v20702_v5  ;;  %v8934_v5 = vsel %vm14678_vm3, %v8929_v10, %v8933_v52  ;;  %v20711_v15 = vld [vmem:[#allocation227_spill] sm:$0xff]  ;;  %v20713_v10 = vld [vmem:[#allocation214_spill] sm:$0xff] }
 0x488   : > { %v7767_v55 = vpop.f32.mrf.mxu1  ;;  %13989 = vmatprep.mubr.msk.bf16.mxu0 %vm2302_vm4, %v20703_v8  ;;  %v20708_v8 = vld [vmem:[#allocation211_spill] sm:$0xff]  ;;  %v12122_v52 = vcombine.low %v8934_v5, %v8944_v18  ;;  %v20719_v18 = vld [vmem:[#allocation54_spill] sm:$0xff] }
 0x489   : > { %20700 = vst [vmem:[#allocation39_spill] sm:$0xff] %v18540_v27  ;;  %v18551_v38 = vadd.f32 %v13756_v6, %v8074_v25  ;;  %v8072_v3 = vadd.f32 %v7767_v55, %v20705_v0  ;;  %v8522_v62 = vpop.f32.mrf.mxu0  ;;  %v12203_v6 = vcombine.low %v9816_v31, %v9819_v56  ;;  %v20748_v36 = vld [vmem:[#allocation55_spill] sm:$0xff] }
 0x48a   : > { %v13629_v47 = vpop.f32.mrf.mxu1  ;;  %13856 = vmatmul.mubr.msk.bf16.gmra.mxu1 %vm2302_vm4, %v20706_v50 }
 0x48b   : > { %20704 = vst [vmem:[#allocation239_spill] sm:$0xff] %v18551_v38  ;;  %v18558_v32 = vadd.f32 %v8509_v45, %v8072_v3  ;;  %v8077_v46 = vadd.f32 %v13629_v47, %v20708_v8  ;;  %v13760_v30 = vpop.f32.mrf.mxu0  ;;  %13859 = vmatprep.mubr.msk.bf16.mxu1 %vm2302_vm4, %v20709_v40  ;;  %v20714_v8 = vld [vmem:[#allocation157_spill] sm:$0xff]  ;;  %v20737_v38 = vld [vmem:[#allocation171_spill] sm:$0xff] }
 0x48c   : > { %v7780_v13 = vpop.f32.mrf.mxu1 }
 0x48d   : > { %20707 = vst [vmem:[#allocation247_spill] sm:$0xff] %v18558_v32  ;;  %v18565_v19 = vadd.f32 %v13759_v41, %v8077_v46  ;;  %v8075_v25 = vadd.f32 %v7780_v13, %v20711_v15  ;;  %v8525_v55 = vpop.f32.mrf.mxu0  ;;  %v20716_v41 = vld [vmem:[#allocation222_spill] sm:$0xff] }
 0x48e   : > { %v13630_v0 = vpop.f32.mrf.mxu1 }
 0x48f   : > { %20710 = vst [vmem:[#allocation253_spill] sm:$0xff] %v18565_v19  ;;  %v18568_v45 = vadd.f32 %v8522_v62, %v8075_v25  ;;  %v8078_v3 = vadd.f32 %v13630_v0, %v20713_v10  ;;  %v13763_v47 = vpop.f32.mrf.mxu0  ;;  %13990 = vmatmul.mubr.msk.bf16.gmra.mxu0 %vm2302_vm4, %v12203_v6  ;;  %v20718_v62 = vld [vmem:[#allocation230_spill] sm:$0xff] }
 0x490   : > { %v7783_v50 = vpop.f32.mrf.mxu1  ;;  %13993 = vmatprep.mubr.msk.bf16.mxu0 %vm2302_vm4, %v20714_v8 }
 0x491   : > { %20712 = vst [vmem:[#allocation259_spill] sm:$0xff] %v18568_v45  ;;  %v18574_v60 = vadd.f32 %v13760_v30, %v8078_v3  ;;  %v8076_v9 = vadd.f32 %v7783_v50, %v20716_v41  ;;  %v8538_v31 = vpop.f32.mrf.mxu0  ;;  %v20721_v30 = vld [vmem:[#allocation234_spill] sm:$0xff]  ;;  %v20725_v41 = vld [vmem:[#allocation163_spill] sm:$0xff] }
 0x492   : > { %v13633_v56 = vpop.f32.mrf.mxu1  ;;  %13860 = vmatmul.mubr.msk.bf16.gmra.mxu1 %vm2302_vm4, %v12122_v52  ;;  %v20723_v52 = vld [vmem:[#allocation131_spill] sm:$0xff]  ;;  %v20724_v50 = vld [vmem:[#allocation162_spill] sm:$0xff] }
 0x493   : > { %20715 = vst [vmem:[#allocation243_spill] sm:$0xff] %v18574_v60  ;;  %v18578_v5 = vadd.f32 %v8525_v55, %v8076_v9  ;;  %v8081_v46 = vadd.f32 %v13633_v56, %v20718_v62  ;;  %v13764_v40 = vpop.f32.mrf.mxu0  ;;  %13863 = vmatprep.mubr.msk.bf16.mxu1 %vm2302_vm4, %v20719_v18 }
 0x494   : > { %v7796_v6 = vpop.f32.mrf.mxu1 }
 0x495   : > { %20717 = vst [vmem:[#allocation254_spill] sm:$0xff] %v18578_v5  ;;  %v18583_v13 = vadd.f32 %v13763_v47, %v8081_v46  ;;  %v8079_v15 = vadd.f32 %v7796_v6, %v20721_v30  ;;  %v8541_v25 = vpop.f32.mrf.mxu0  ;;  %v20727_v47 = vld [vmem:[#allocation38_spill] sm:$0xff]  ;;  %v14463_v46 = vld [vmem:[%s14657_s17 + $0x2f4] sm:$0xf] }
 0x496   : > { %v13634_v0 = vpop.f32.mrf.mxu1  ;;  %v8946_v18 = vshrl.u32 %v14463_v46, 16  ;;  %v8949_v6 = vshll.u32 %v14463_v46, 16  ;;  %v20728_v30 = vld [vmem:[#allocation58_spill] sm:$0xff] }
 0x497   : > { %20720 = vst [vmem:[#allocation262_spill] sm:$0xff] %v18583_v13  ;;  %v18586_v10 = vadd.f32 %v8538_v31, %v8079_v15  ;;  %v8082_v55 = vadd.f32 %v13634_v0, %v20723_v52  ;;  %v13767_v3 = vpop.f32.mrf.mxu0  ;;  %13994 = vmatmul.mubr.msk.bf16.gmra.mxu0 %vm2302_vm4, %v20724_v50  ;;  %v14464_v15 = vld [vmem:[%s14657_s17 + $0x2f8] sm:$0xf] }
 0x498   : > { %v7799_v8 = vpop.f32.mrf.mxu1  ;;  %13997 = vmatprep.mubr.msk.bf16.mxu0 %vm2302_vm4, %v20725_v41  ;;  %v8959_v0 = vshrl.u32 %v14464_v15, 16  ;;  %v20730_v50 = vld [vmem:[#allocation237_spill] sm:$0xff]  ;;  %v20731_v41 = vld [vmem:[#allocation63_spill] sm:$0xff]  ;;  %v8951_v45 = vrot.slane %v8949_v6, 5 }
 0x499   : > { %20722 = vst [vmem:[#allocation246_spill] sm:$0xff] %v18586_v10  ;;  %v18593_v9 = vadd.f32 %v13764_v40, %v8082_v55  ;;  %v8080_v56 = vadd.f32 %v7799_v8, %v20727_v47  ;;  %v8554_v62 = vpop.f32.mrf.mxu0  ;;  %v8955_v40 = vshll.u32 %v14464_v15, 16  ;;  %v20733_v47 = vld [vmem:[#allocation126_spill] sm:$0xff] }
 0x49a   : > { %v13637_v31 = vpop.f32.mrf.mxu1  ;;  %13864 = vmatmul.mubr.msk.bf16.gmra.mxu1 %vm2302_vm4, %v20728_v30  ;;  %v8948_v30 = vrot.slane %v8946_v18, 4  ;;  %v20739_v18 = vld [vmem:[#allocation129_spill] sm:$0xff] }
 0x49b   : > { %20726 = vst [vmem:[#allocation249_spill] sm:$0xff] %v18593_v9  ;;  %v18600_v52 = vadd.f32 %v8541_v25, %v8080_v56  ;;  %v8085_v10 = vadd.f32 %v13637_v31, %v20730_v50  ;;  %v13768_v13 = vpop.f32.mrf.mxu0  ;;  %13867 = vmatprep.mubr.msk.bf16.mxu1 %vm2302_vm4, %v20731_v41  ;;  %v20735_v25 = vld [vmem:[#allocation241_spill] sm:$0xff]  ;;  %v8957_v41 = vrot.slane %v8955_v40, 5 }
 0x49c   : > { %v7812_v55 = vpop.f32.mrf.mxu1  ;;  %v20736_v50 = vld [vmem:[#allocation169_spill] sm:$0xff] }
 0x49d   : > { %20729 = vst [vmem:[#allocation264_spill] sm:$0xff] %v18600_v52  ;;  %v18605_v8 = vadd.f32 %v13767_v3, %v8085_v10  ;;  %v8083_v9 = vadd.f32 %v7812_v55, %v20733_v47  ;;  %v8557_v5 = vpop.f32.mrf.mxu0  ;;  %v8961_v52 = vrot.slane %v8959_v0, 4  ;;  %v447_v10 = vld [vmem:[%s14657_s17 + $0x2fc] sm:$0x1]  ;;  %v9822_v3 = vrot.slane %v14464_v15, 5  ;;  %v20740_v47 = vld [vmem:[#allocation66_spill] sm:$0xff] }
 0x49e   : > { %v13638_v60 = vpop.f32.mrf.mxu1  ;;  %v20742_v40 = vld [vmem:[#allocation137_spill] sm:$0xff]  ;;  %v8965_v15 = vshll.u32 %v447_v10, 16 }
 0x49f   : > { %20732 = vst [vmem:[#allocation252_spill] sm:$0xff] %v18605_v8  ;;  %v18608_v19 = vadd.f32 %v8554_v62, %v8083_v9  ;;  %v8086_v56 = vadd.f32 %v13638_v60, %v20735_v25  ;;  %v13771_v31 = vpop.f32.mrf.mxu0  ;;  %13998 = vmatmul.mubr.msk.bf16.gmra.mxu0 %vm2302_vm4, %v20736_v50  ;;  %v8952_v60 = vor.u32 %v8951_v45, %v8948_v30  ;;  %v20744_v8 = vld [vmem:[#allocation139_spill] sm:$0xff] }
 0x4a0   : > { %v7815_v32 = vpop.f32.mrf.mxu1  ;;  %14001 = vmatprep.mubr.msk.bf16.mxu0 %vm2302_vm4, %v20737_v38  ;;  %v8962_v38 = vor.u32 %v8961_v52, %v8957_v41  ;;  %v8967_v52 = vrot.slane %v8965_v15, 5 }
 0x4a1   : > { %20734 = vst [vmem:[#allocation256_spill] sm:$0xff] %v18608_v19  ;;  %v18616_v55 = vadd.f32 %v13768_v13, %v8086_v56  ;;  %v8084_v6 = vadd.f32 %v7815_v32, %v20739_v18  ;;  %v8570_v9 = vpop.f32.mrf.mxu0  ;;  %v20743_v19 = vld [vmem:[#allocation71_spill] sm:$0xff]  ;;  %v12195_v56 = vrot.slane %v14463_v46, 9  ;;  %v9825_v32 = vrot.slane %v447_v10, 5  ;;  %v20750_v10 = vld [vmem:[#allocation244_spill] sm:$0xff] }
 0x4a2   : > { %v13641_v62 = vpop.f32.mrf.mxu1  ;;  %13868 = vmatmul.mubr.msk.bf16.gmra.mxu1 %vm2302_vm4, %v20740_v47 }
 0x4a3   : > { %20738 = vst [vmem:[#allocation255_spill] sm:$0xff] %v18616_v55  ;;  %v18621_v25 = vadd.f32 %v8557_v5, %v8084_v6  ;;  %v8089_v0 = vadd.f32 %v13641_v62, %v20742_v40  ;;  %v13772_v50 = vpop.f32.mrf.mxu0  ;;  %13871 = vmatprep.mubr.msk.bf16.mxu1 %vm2302_vm4, %v20743_v19  ;;  %v9824_v55 = vrot.slane %v9822_v3, 4  ;;  %v8953_v5 = vrot.slane %v8952_v60, 4  ;;  %v20746_v6 = vld [vmem:[#allocation242_spill] sm:$0xff] }
 0x4a4   : > { %v7828_v13 = vpop.f32.mrf.mxu1  ;;  %v8963_v19 = vrot.slane %v8962_v38, 4 }
 0x4a5   : > { %20741 = vst [vmem:[#allocation265_spill] sm:$0xff] %v18621_v25  ;;  %v18626_v18 = vadd.f32 %v13771_v31, %v8089_v0  ;;  %v8087_v27 = vadd.f32 %v7828_v13, %v20744_v8  ;;  %v8573_v47 = vpop.f32.mrf.mxu0  ;;  %v20747_v25 = vld [vmem:[#allocation177_spill] sm:$0xff]  ;;  %v9823_v8 = vsel %vm15439_vm7, %v12195_v56, %v9822_v3  ;;  %v9826_v31 = vsel %vm15439_vm7, %v9824_v55, %v9825_v32  ;;  %v20751_v13 = vld [vmem:[#allocation76_spill] sm:$0xff]  ;;  %v20754_v56 = vld [vmem:[#allocation107_spill] sm:$0xff] }
 0x4a6   : > { %v13642_v45 = vpop.f32.mrf.mxu1  ;;  %v8968_v55 = vsel %vm14678_vm3, %v8963_v19, %v8967_v52 }
 0x4a7   : > { %v18629_v30 = vadd.f32 %v8570_v9, %v8087_v27  ;;  %v8090_v62 = vadd.f32 %v13642_v45, %v20746_v6  ;;  %v13775_v40 = vpop.f32.mrf.mxu0  ;;  %14002 = vmatmul.mubr.msk.bf16.gmra.mxu0 %vm2302_vm4, %v20747_v25  ;;  %v8958_v25 = vsel %vm14678_vm3, %v8953_v5, %v8957_v41  ;;  %v20756_v6 = vld [vmem:[#allocation145_spill] sm:$0xff]  ;;  %v20758_v5 = vld [vmem:[#allocation147_spill] sm:$0xff] }
 0x4a8   : > { %v7831_v46 = vpop.f32.mrf.mxu1  ;;  %14005 = vmatprep.mubr.msk.bf16.mxu0 %vm2302_vm4, %v20748_v36  ;;  %v20753_v36 = vld [vmem:[#allocation248_spill] sm:$0xff]  ;;  %v12123_v41 = vcombine.low %v8958_v25, %v8968_v55  ;;  %v20764_v55 = vld [vmem:[#allocation13_spill] sm:$0xff] }
 0x4a9   : > { %20745 = vst [vmem:[#allocation268_spill] sm:$0xff] %v18629_v30  ;;  %v18640_v27 = vadd.f32 %v13772_v50, %v8090_v62  ;;  %v8088_v9 = vadd.f32 %v7831_v46, %v20750_v10  ;;  %v8586_v60 = vpop.f32.mrf.mxu0  ;;  %v12204_v50 = vcombine.low %v9823_v8, %v9826_v31 }
 0x4aa   : > { %v13645_v0 = vpop.f32.mrf.mxu1  ;;  %13872 = vmatmul.mubr.msk.bf16.gmra.mxu1 %vm2302_vm4, %v20751_v13 }
 0x4ab   : > { %20749 = vst [vmem:[#allocation269_spill] sm:$0xff] %v18640_v27  ;;  %v18647_v38 = vadd.f32 %v8573_v47, %v8088_v9  ;;  %v8093_v15 = vadd.f32 %v13645_v0, %v20753_v36  ;;  %v13776_v3 = vpop.f32.mrf.mxu0  ;;  %13875 = vmatprep.mubr.msk.bf16.mxu1 %vm2302_vm4, %v20754_v56  ;;  %v20759_v36 = vld [vmem:[#allocation185_spill] sm:$0xff] }
 0x4ac   : > { %v7844_v32 = vpop.f32.mrf.mxu1  ;;  %v20782_v27 = vld [vmem:[#allocation201_spill] sm:$0xff] }
 0x4ad   : > { %20752 = vst [vmem:[#allocation261_spill] sm:$0xff] %v18647_v38  ;;  %v18654_v45 = vadd.f32 %v13775_v40, %v8093_v15  ;;  %v8091_v62 = vadd.f32 %v7844_v32, %v20756_v6  ;;  %v8589_v46 = vpop.f32.mrf.mxu0  ;;  %v20761_v40 = vld [vmem:[#allocation57_spill] sm:$0xff] }
 0x4ae   : > { %v13646_v10 = vpop.f32.mrf.mxu1 }
 0x4af   : > { %20755 = vst [vmem:[#allocation12_spill] sm:$0xff] %v18654_v45  ;;  %v18657_v47 = vadd.f32 %v8586_v60, %v8091_v62  ;;  %v8094_v9 = vadd.f32 %v13646_v10, %v20758_v5  ;;  %v13779_v0 = vpop.f32.mrf.mxu0  ;;  %14006 = vmatmul.mubr.msk.bf16.gmra.mxu0 %vm2302_vm4, %v12204_v50  ;;  %v20763_v60 = vld [vmem:[#allocation59_spill] sm:$0xff] }
 0x4b0   : > { %v7847_v13 = vpop.f32.mrf.mxu1  ;;  %14009 = vmatprep.mubr.msk.bf16.mxu0 %vm2302_vm4, %v20759_v36 }
 0x4b1   : > { %20757 = vst [vmem:[#allocation263_spill] sm:$0xff] %v18657_v47  ;;  %v18663_v19 = vadd.f32 %v13776_v3, %v8094_v9  ;;  %v8092_v52 = vadd.f32 %v7847_v13, %v20761_v40  ;;  %v8602_v8 = vpop.f32.mrf.mxu0  ;;  %v20766_v3 = vld [vmem:[#allocation61_spill] sm:$0xff]  ;;  %v20769_v13 = vld [vmem:[#allocation191_spill] sm:$0xff] }
 0x4b2   : > { %v13649_v31 = vpop.f32.mrf.mxu1  ;;  %13876 = vmatmul.mubr.msk.bf16.gmra.mxu1 %vm2302_vm4, %v12123_v41  ;;  %v20768_v41 = vld [vmem:[#allocation62_spill] sm:$0xff]  ;;  %v20770_v40 = vld [vmem:[#allocation193_spill] sm:$0xff] }
 0x4b3   : > { %20760 = vst [vmem:[#allocation53_spill] sm:$0xff] %v18663_v19  ;;  %v18667_v25 = vadd.f32 %v8589_v46, %v8092_v52  ;;  %v8097_v15 = vadd.f32 %v13649_v31, %v20763_v60  ;;  %v13780_v56 = vpop.f32.mrf.mxu0  ;;  %13879 = vmatprep.mubr.msk.bf16.mxu1 %vm2302_vm4, %v20764_v55 }
 0x4b4   : > { %v7860_v50 = vpop.f32.mrf.mxu1 }
 0x4b5   : > { %20762 = vst [vmem:[#allocation86_spill] sm:$0xff] %v18667_v25  ;;  %v18672_v32 = vadd.f32 %v13779_v0, %v8097_v15  ;;  %v8095_v6 = vadd.f32 %v7860_v50, %v20766_v3  ;;  %v8605_v62 = vpop.f32.mrf.mxu0  ;;  %v20772_v0 = vld [vmem:[#allocation152_spill] sm:$0xff]  ;;  %v14465_v15 = vld [vmem:[%s14657_s17 + $0x3cc] sm:$0xf] }
 0x4b6   : > { %v13650_v10 = vpop.f32.mrf.mxu1  ;;  %v8970_v55 = vshrl.u32 %v14465_v15, 16  ;;  %v8973_v50 = vshll.u32 %v14465_v15, 16  ;;  %v20773_v3 = vld [vmem:[#allocation15_spill] sm:$0xff] }
 0x4b7   : > { %20765 = vst [vmem:[#allocation87_spill] sm:$0xff] %v18672_v32  ;;  %v18675_v5 = vadd.f32 %v8602_v8, %v8095_v6  ;;  %v8098_v46 = vadd.f32 %v13650_v10, %v20768_v41  ;;  %v13783_v9 = vpop.f32.mrf.mxu0  ;;  %14010 = vmatmul.mubr.msk.bf16.gmra.mxu0 %vm2302_vm4, %v20769_v13  ;;  %v14466_v6 = vld [vmem:[%s14657_s17 + $0x3d0] sm:$0xf]  ;;  %v20775_v13 = vld [vmem:[#allocation70_spill] sm:$0xff] }
 0x4b8   : > { %v7863_v36 = vpop.f32.mrf.mxu1  ;;  %14013 = vmatprep.mubr.msk.bf16.mxu0 %vm2302_vm4, %v20770_v40  ;;  %v8983_v10 = vshrl.u32 %v14466_v6, 16  ;;  %v20776_v40 = vld [vmem:[#allocation17_spill] sm:$0xff]  ;;  %v8975_v47 = vrot.slane %v8973_v50, 5 }
 0x4b9   : > { %20767 = vst [vmem:[#allocation267_spill] sm:$0xff] %v18675_v5  ;;  %v18682_v52 = vadd.f32 %v13780_v56, %v8098_v46  ;;  %v8096_v31 = vadd.f32 %v7863_v36, %v20772_v0  ;;  %v8618_v60 = vpop.f32.mrf.mxu0  ;;  %v8979_v56 = vshll.u32 %v14466_v6, 16  ;;  %v20778_v0 = vld [vmem:[#allocation64_spill] sm:$0xff] }
 0x4ba   : > { %v13653_v8 = vpop.f32.mrf.mxu1  ;;  %13880 = vmatmul.mubr.msk.bf16.gmra.mxu1 %vm2302_vm4, %v20773_v3  ;;  %v8972_v3 = vrot.slane %v8970_v55, 4  ;;  %v20784_v55 = vld [vmem:[#allocation72_spill] sm:$0xff] }
 0x4bb   : > { %20771 = vst [vmem:[#allocation14_spill] sm:$0xff] %v18682_v52  ;;  %v18689_v41 = vadd.f32 %v8605_v62, %v8096_v31  ;;  %v8101_v5 = vadd.f32 %v13653_v8, %v20775_v13  ;;  %v13784_v32 = vpop.f32.mrf.mxu0  ;;  %13883 = vmatprep.mubr.msk.bf16.mxu1 %vm2302_vm4, %v20776_v40  ;;  %v20780_v62 = vld [vmem:[#allocation68_spill] sm:$0xff]  ;;  %v20781_v13 = vld [vmem:[#allocation199_spill] sm:$0xff]  ;;  %v8981_v40 = vrot.slane %v8979_v56, 5  ;;  %v20786_v56 = vld [vmem:[#allocation74_spill] sm:$0xff] }
 0x4bc   : > { %v7876_v46 = vpop.f32.mrf.mxu1 }
 0x4bd   : > { %20774 = vst [vmem:[#allocation266_spill] sm:$0xff] %v18689_v41  ;;  %v18694_v36 = vadd.f32 %v13783_v9, %v8101_v5  ;;  %v8099_v52 = vadd.f32 %v7876_v46, %v20778_v0  ;;  %v8621_v25 = vpop.f32.mrf.mxu0  ;;  %v8985_v41 = vrot.slane %v8983_v10, 4  ;;  %v477_v5 = vld [vmem:[%s14657_s17 + $0x3d4] sm:$0x1]  ;;  %v9829_v9 = vrot.slane %v14466_v6, 5  ;;  %v20785_v0 = vld [vmem:[#allocation19_spill] sm:$0xff] }
 0x4be   : > { %v13654_v19 = vpop.f32.mrf.mxu1  ;;  %v8989_v6 = vshll.u32 %v477_v5, 16 }
 0x4bf   : > { %20777 = vst [vmem:[#allocation16_spill] sm:$0xff] %v18694_v36  ;;  %v18697_v45 = vadd.f32 %v8618_v60, %v8099_v52  ;;  %v8102_v31 = vadd.f32 %v13654_v19, %v20780_v62  ;;  %v13787_v8 = vpop.f32.mrf.mxu0  ;;  %14014 = vmatmul.mubr.msk.bf16.gmra.mxu0 %vm2302_vm4, %v20781_v13  ;;  %v8976_v19 = vor.u32 %v8975_v47, %v8972_v3  ;;  %v20788_v36 = vld [vmem:[#allocation160_spill] sm:$0xff] }
 0x4c0   : > { %v7879_v38 = vpop.f32.mrf.mxu1  ;;  %14017 = vmatprep.mubr.msk.bf16.mxu0 %vm2302_vm4, %v20782_v27  ;;  %v8986_v27 = vor.u32 %v8985_v41, %v8981_v40  ;;  %v8991_v41 = vrot.slane %v8989_v6, 5  ;;  %v20794_v6 = vld [vmem:[#allocation161_spill] sm:$0xff] }
 0x4c1   : > { %20779 = vst [vmem:[#allocation10_spill] sm:$0xff] %v18697_v45  ;;  %v18705_v46 = vadd.f32 %v13784_v32, %v8102_v31  ;;  %v8100_v50 = vadd.f32 %v7879_v38, %v20784_v55  ;;  %v8634_v52 = vpop.f32.mrf.mxu0  ;;  %v20787_v45 = vld [vmem:[#allocation21_spill] sm:$0xff]  ;;  %v12196_v31 = vrot.slane %v14465_v15, 9  ;;  %v9832_v38 = vrot.slane %v477_v5, 5 }
 0x4c2   : > { %v13657_v60 = vpop.f32.mrf.mxu1  ;;  %13884 = vmatmul.mubr.msk.bf16.gmra.mxu1 %vm2302_vm4, %v20785_v0  ;;  %v20791_v5 = vld [vmem:[#allocation77_spill] sm:$0xff] }
 0x4c3   : > { %20783 = vst [vmem:[#allocation80_spill] sm:$0xff] %v18705_v46  ;;  %v18710_v62 = vadd.f32 %v8621_v25, %v8100_v50  ;;  %v8105_v10 = vadd.f32 %v13657_v60, %v20786_v56  ;;  %v13788_v13 = vpop.f32.mrf.mxu0  ;;  %13887 = vmatprep.mubr.msk.bf16.mxu1 %vm2302_vm4, %v20787_v45  ;;  %v9831_v46 = vrot.slane %v9829_v9, 4  ;;  %v8977_v25 = vrot.slane %v8976_v19, 4  ;;  %v20789_v50 = vld [vmem:[#allocation52_spill] sm:$0xff] }
 0x4c4   : > { %v7892_v32 = vpop.f32.mrf.mxu1  ;;  %v8987_v45 = vrot.slane %v8986_v27, 4 }
 0x4c5   : > { %v18715_v55 = vadd.f32 %v13787_v8, %v8105_v10  ;;  %v8103_v30 = vadd.f32 %v7892_v32, %v20788_v36  ;;  %v8637_v0 = vpop.f32.mrf.mxu0  ;;  %v9830_v36 = vsel %vm15439_vm7, %v12196_v31, %v9829_v9  ;;  %v9833_v8 = vsel %vm15439_vm7, %v9831_v46, %v9832_v38  ;;  %v20792_v32 = vld [vmem:[#allocation23_spill] sm:$0xff] }
 0x4c6   : > { %v13658_v47 = vpop.f32.mrf.mxu1  ;;  %v8992_v46 = vsel %vm14678_vm3, %v8987_v45, %v8991_v41 }
 0x4c7   : > { %v18718_v3 = vadd.f32 %v8634_v52, %v8103_v30  ;;  %v8106_v60 = vadd.f32 %v13658_v47, %v20789_v50  ;;  %v13791_v56 = vpop.f32.mrf.mxu0  ;;  %14018 = vmatmul.mubr.msk.bf16.gmra.mxu0 %vm2302_vm4, %v20490_v48  ;;  %v8982_v48 = vsel %vm14678_vm3, %v8977_v25, %v8981_v40  ;;  %v20796_v47 = vld [vmem:[#allocation156_spill] sm:$0xff]  ;;  %v20798_v25 = vld [vmem:[#allocation79_spill] sm:$0xff] }
 0x4c8   : > { %v7895_v15 = vpop.f32.mrf.mxu1  ;;  %14021 = vmatprep.mubr.msk.bf16.mxu0 %vm2302_vm4, %v18028_v23  ;;  %v12124_v40 = vcombine.low %v8982_v48, %v8992_v46 }
 0x4c9   : > { %v18729_v30 = vadd.f32 %v13788_v13, %v8106_v60  ;;  %v8104_v52 = vadd.f32 %v7895_v15, %v20791_v5  ;;  %v8650_v19 = vpop.f32.mrf.mxu0  ;;  %v12205_v13 = vcombine.low %v9830_v36, %v9833_v8 }
 0x4ca   : > { %v13661_v10 = vpop.f32.mrf.mxu1  ;;  %13888 = vmatmul.mubr.msk.bf16.gmra.mxu1 %vm2302_vm4, %v20792_v32 }
 0x4cb   : > { %20790 = vst [vmem:[#allocation92_spill] sm:$0xff] %v18729_v30  ;;  %v18736_v27 = vadd.f32 %v8637_v0, %v8104_v52  ;;  %v8109_v23 = vadd.f32 %v13661_v10, %v18025_v63  ;;  %v13792_v9 = vpop.f32.mrf.mxu0  ;;  %13891 = vmatprep.mubr.msk.bf16.mxu1 %vm2302_vm4, %v20794_v6  ;;  %v20799_v10 = vld [vmem:[#allocation215_spill] sm:$0xff] }
 0x4cc   : > { %v7908_v31 = vpop.f32.mrf.mxu1  ;;  %v20804_v6 = vld [vmem:[#allocation27_spill] sm:$0xff] }
 0x4cd   : > { %20793 = vst [vmem:[#allocation93_spill] sm:$0xff] %v18736_v27  ;;  %v18743_v38 = vadd.f32 %v13791_v56, %v8109_v23  ;;  %v8107_v50 = vadd.f32 %v7908_v31, %v20796_v47  ;;  %v8653_v60 = vpop.f32.mrf.mxu0  ;;  %v20801_v56 = vld [vmem:[#allocation158_spill] sm:$0xff]  ;;  %v20822_v27 = vld [vmem:[#allocation231_spill] sm:$0xff] }
 0x4ce   : > { %v13662_v15 = vpop.f32.mrf.mxu1 }
 0x4cf   : > { %20795 = vst [vmem:[#allocation121_spill] sm:$0xff] %v18743_v38  ;;  %v18746_v0 = vadd.f32 %v8650_v19, %v8107_v50  ;;  %v8110_v63 = vadd.f32 %v13662_v15, %v20798_v25  ;;  %v13795_v5 = vpop.f32.mrf.mxu0  ;;  %14022 = vmatmul.mubr.msk.bf16.gmra.mxu0 %vm2302_vm4, %v12205_v13  ;;  %v20803_v19 = vld [vmem:[#allocation164_spill] sm:$0xff] }
 0x4d0   : > { %v7911_v52 = vpop.f32.mrf.mxu1  ;;  %14025 = vmatprep.mubr.msk.bf16.mxu0 %vm2302_vm4, %v20799_v10  ;;  %v20810_v10 = vld [vmem:[#allocation223_spill] sm:$0xff] }
 0x4d1   : > { %20797 = vst [vmem:[#allocation18_spill] sm:$0xff] %v18746_v0  ;;  %v18752_v45 = vadd.f32 %v13792_v9, %v8110_v63  ;;  %v8108_v41 = vadd.f32 %v7911_v52, %v20801_v56  ;;  %v8666_v36 = vpop.f32.mrf.mxu0  ;;  %v20806_v9 = vld [vmem:[#allocation166_spill] sm:$0xff]  ;;  %v20809_v63 = vld [vmem:[#allocation221_spill] sm:$0xff] }
 0x4d2   : > { %v13665_v8 = vpop.f32.mrf.mxu1  ;;  %13892 = vmatmul.mubr.msk.bf16.gmra.mxu1 %vm2302_vm4, %v12124_v40  ;;  %v20808_v40 = vld [vmem:[#allocation83_spill] sm:$0xff] }
 0x4d3   : > { %20800 = vst [vmem:[#allocation124_spill] sm:$0xff] %v18752_v45  ;;  %v18756_v32 = vadd.f32 %v8653_v60, %v8108_v41  ;;  %v8113_v48 = vadd.f32 %v13665_v8, %v20803_v19  ;;  %v13796_v23 = vpop.f32.mrf.mxu0  ;;  %13895 = vmatprep.mubr.msk.bf16.mxu1 %vm2302_vm4, %v20804_v6  ;;  %v14467_v19 = vld [vmem:[%s14657_s17 + $0x4a4] sm:$0xf] }
 0x4d4   : > { %v7924_v46 = vpop.f32.mrf.mxu1  ;;  %v8997_v6 = vshll.u32 %v14467_v19, 16 }
 0x4d5   : > { %20802 = vst [vmem:[#allocation20_spill] sm:$0xff] %v18756_v32  ;;  %v18761_v13 = vadd.f32 %v13795_v5, %v8113_v48  ;;  %v8111_v31 = vadd.f32 %v7924_v46, %v20806_v9  ;;  %v8669_v47 = vpop.f32.mrf.mxu0  ;;  %v20812_v5 = vld [vmem:[#allocation85_spill] sm:$0xff]  ;;  %v8994_v48 = vshrl.u32 %v14467_v19, 16  ;;  %v14468_v9 = vld [vmem:[%s14657_s17 + $0x4a8] sm:$0xf] }
 0x4d6   : > { %v13666_v50 = vpop.f32.mrf.mxu1  ;;  %v20813_v46 = vld [vmem:[#allocation29_spill] sm:$0xff]  ;;  %v8999_v45 = vrot.slane %v8997_v6, 5 }
 0x4d7   : > { %20805 = vst [vmem:[#allocation88_spill] sm:$0xff] %v18761_v13  ;;  %v18764_v15 = vadd.f32 %v8666_v36, %v8111_v31  ;;  %v8114_v60 = vadd.f32 %v13666_v50, %v20808_v40  ;;  %v13799_v25 = vpop.f32.mrf.mxu0  ;;  %14026 = vmatmul.mubr.msk.bf16.gmra.mxu0 %vm2302_vm4, %v20809_v63  ;;  %v9007_v31 = vshrl.u32 %v14468_v9, 16  ;;  %v20815_v40 = vld [vmem:[#allocation89_spill] sm:$0xff] }
 0x4d8   : > { %v7927_v52 = vpop.f32.mrf.mxu1  ;;  %14029 = vmatprep.mubr.msk.bf16.mxu0 %vm2302_vm4, %v20810_v10  ;;  %v20816_v10 = vld [vmem:[#allocation31_spill] sm:$0xff] }
 0x4d9   : > { %20807 = vst [vmem:[#allocation90_spill] sm:$0xff] %v18764_v15  ;;  %v18771_v56 = vadd.f32 %v13796_v23, %v8114_v60  ;;  %v8112_v41 = vadd.f32 %v7927_v52, %v20812_v5  ;;  %v8682_v8 = vpop.f32.mrf.mxu0  ;;  %v9003_v23 = vshll.u32 %v14468_v9, 16  ;;  %v20818_v5 = vld [vmem:[#allocation91_spill] sm:$0xff] }
 0x4da   : > { %v13669_v36 = vpop.f32.mrf.mxu1  ;;  %13896 = vmatmul.mubr.msk.bf16.gmra.mxu1 %vm2302_vm4, %v20813_v46  ;;  %v8996_v46 = vrot.slane %v8994_v48, 4  ;;  %v20824_v48 = vld [vmem:[#allocation174_spill] sm:$0xff] }
 0x4db   : > { %20811 = vst [vmem:[#allocation98_spill] sm:$0xff] %v18771_v56  ;;  %v18778_v50 = vadd.f32 %v8669_v47, %v8112_v41  ;;  %v8117_v63 = vadd.f32 %v13669_v36, %v20815_v40  ;;  %v13800_v13 = vpop.f32.mrf.mxu0  ;;  %13899 = vmatprep.mubr.msk.bf16.mxu1 %vm2302_vm4, %v20816_v10  ;;  %v20820_v47 = vld [vmem:[#allocation172_spill] sm:$0xff]  ;;  %v20821_v40 = vld [vmem:[#allocation229_spill] sm:$0xff]  ;;  %v9005_v10 = vrot.slane %v9003_v23, 5  ;;  %v20826_v23 = vld [vmem:[#allocation95_spill] sm:$0xff] }
 0x4dc   : > { %v7940_v60 = vpop.f32.mrf.mxu1 }
 0x4dd   : > { %20814 = vst [vmem:[#allocation127_spill] sm:$0xff] %v18778_v50  ;;  %v18783_v52 = vadd.f32 %v13799_v25, %v8117_v63  ;;  %v8115_v56 = vadd.f32 %v7940_v60, %v20818_v5  ;;  %v8685_v15 = vpop.f32.mrf.mxu0  ;;  %v9009_v50 = vrot.slane %v9007_v31, 4  ;;  %v507_v25 = vld [vmem:[%s14657_s17 + $0x4ac] sm:$0x1]  ;;  %v9836_v63 = vrot.slane %v14468_v9, 5  ;;  %v20825_v5 = vld [vmem:[#allocation33_spill] sm:$0xff] }
 0x4de   : > { %v13670_v32 = vpop.f32.mrf.mxu1  ;;  %v9013_v9 = vshll.u32 %v507_v25, 16 }
 0x4df   : > { %20817 = vst [vmem:[#allocation81_spill] sm:$0xff] %v18783_v52  ;;  %v18786_v38 = vadd.f32 %v8682_v8, %v8115_v56  ;;  %v8118_v41 = vadd.f32 %v13670_v32, %v20820_v47  ;;  %v13803_v36 = vpop.f32.mrf.mxu0  ;;  %14030 = vmatmul.mubr.msk.bf16.gmra.mxu0 %vm2302_vm4, %v20821_v40  ;;  %v9000_v32 = vor.u32 %v8999_v45, %v8996_v46  ;;  %v20828_v52 = vld [vmem:[#allocation97_spill] sm:$0xff] }
 0x4e0   : > { %v7943_v0 = vpop.f32.mrf.mxu1  ;;  %14033 = vmatprep.mubr.msk.bf16.mxu0 %vm2302_vm4, %v20822_v27  ;;  %v9010_v27 = vor.u32 %v9009_v50, %v9005_v10  ;;  %v9015_v50 = vrot.slane %v9013_v9, 5  ;;  %v20832_v9 = vld [vmem:[#allocation212_spill] sm:$0xff] }
 0x4e1   : > { %20819 = vst [vmem:[#allocation22_spill] sm:$0xff] %v18786_v38  ;;  %v18794_v60 = vadd.f32 %v13800_v13, %v8118_v41  ;;  %v8116_v6 = vadd.f32 %v7943_v0, %v20824_v48  ;;  %v8698_v56 = vpop.f32.mrf.mxu0  ;;  %v20827_v38 = vld [vmem:[#allocation35_spill] sm:$0xff]  ;;  %v12197_v41 = vrot.slane %v14467_v19, 9  ;;  %v9839_v0 = vrot.slane %v507_v25, 5  ;;  %v20830_v25 = vld [vmem:[#allocation101_spill] sm:$0xff] }
 0x4e2   : > { %v13673_v8 = vpop.f32.mrf.mxu1  ;;  %13900 = vmatmul.mubr.msk.bf16.gmra.mxu1 %vm2302_vm4, %v20825_v5 }
 0x4e3   : > { %20823 = vst [vmem:[#allocation9_spill] sm:$0xff] %v18794_v60  ;;  %v18799_v47 = vadd.f32 %v8685_v15, %v8116_v6  ;;  %v8121_v31 = vadd.f32 %v13673_v8, %v20826_v23  ;;  %v13804_v40 = vpop.f32.mrf.mxu0  ;;  %13903 = vmatprep.mubr.msk.bf16.mxu1 %vm2302_vm4, %v20827_v38  ;;  %v9838_v60 = vrot.slane %v9836_v63, 4  ;;  %v9001_v15 = vrot.slane %v9000_v32, 4  ;;  %v20829_v6 = vld [vmem:[#allocation100_spill] sm:$0xff] }
 0x4e4   : > { %v7956_v13 = vpop.f32.mrf.mxu1  ;;  %v9011_v38 = vrot.slane %v9010_v27, 4 }
 0x4e5   : > { %v18804_v48 = vadd.f32 %v13803_v36, %v8121_v31  ;;  %v8119_v30 = vadd.f32 %v7956_v13, %v20828_v52  ;;  %v8701_v5 = vpop.f32.mrf.mxu0  ;;  %v9837_v52 = vsel %vm15439_vm7, %v12197_v41, %v9836_v63  ;;  %v9840_v36 = vsel %vm15439_vm7, %v9838_v60, %v9839_v0  ;;  %v20831_v13 = vld [vmem:[#allocation37_spill] sm:$0xff] }
 0x4e6   : > { %v13674_v45 = vpop.f32.mrf.mxu1  ;;  %v9016_v60 = vsel %vm14678_vm3, %v9011_v38, %v9015_v50 }
 0x4e7   : > { %v18807_v46 = vadd.f32 %v8698_v56, %v8119_v30  ;;  %v8122_v8 = vadd.f32 %v13674_v45, %v20829_v6  ;;  %v13807_v23 = vpop.f32.mrf.mxu0  ;;  %14034 = vmatmul.mubr.msk.bf16.gmra.mxu0 %vm2302_vm4, %v20532_v51  ;;  %v9006_v51 = vsel %vm14678_vm3, %v9001_v15, %v9005_v10 }
 0x4e8   : > { %v7959_v19 = vpop.f32.mrf.mxu1  ;;  %14037 = vmatprep.mubr.msk.bf16.mxu0 %vm2302_vm4, %v18118_v7  ;;  %v12125_v10 = vcombine.low %v9006_v51, %v9016_v60 }
 0x4e9   : > { %v18818_v30 = vadd.f32 %v13804_v40, %v8122_v8  ;;  %v8120_v56 = vadd.f32 %v7959_v19, %v20830_v25  ;;  %v8714_v32 = vpop.f32.mrf.mxu0  ;;  %v12206_v40 = vcombine.low %v9837_v52, %v9840_v36  ;;  %v20835_v25 = vld [vmem:[#allocation41_spill] sm:$0xff] }
 0x4ea   : > { %v13677_v31 = vpop.f32.mrf.mxu1  ;;  %13904 = vmatmul.mubr.msk.bf16.gmra.mxu1 %vm2302_vm4, %v20831_v13 }
 0x4eb   : > { %v18825_v27 = vadd.f32 %v8701_v5, %v8120_v56  ;;  %v8125_v7 = vadd.f32 %v13677_v31, %v18115_v26  ;;  %v13808_v63 = vpop.f32.mrf.mxu0  ;;  %13907 = vmatprep.mubr.msk.bf16.mxu1 %vm2302_vm4, %v20832_v9 }
 0x4ec   : > { %v7972_v41 = vpop.f32.mrf.mxu1 }
 0x4ed   : > { %v18832_v0 = vadd.f32 %v13807_v23, %v8125_v7  ;;  %v8123_v45 = vadd.f32 %v7972_v41, %v18120_v29  ;;  %v8717_v6 = vpop.f32.mrf.mxu0 }
 0x4ee   : > { %v13678_v8 = vpop.f32.mrf.mxu1 }
 0x4ef   : > { %v18835_v5 = vadd.f32 %v8714_v32, %v8123_v45  ;;  %v8126_v26 = vadd.f32 %v13678_v8, %v18126_v20  ;;  %v13811_v15 = vpop.f32.mrf.mxu0  ;;  %14038 = vmatmul.mubr.msk.bf16.gmra.mxu0 %vm2302_vm4, %v12206_v40 }
 0x4f0   : > { %v7975_v19 = vpop.f32.mrf.mxu1  ;;  %14041 = vmatprep.mubr.msk.bf16.mxu0 %vm2302_vm4, %v20542_v61 }
 0x4f1   : > { %v18841_v38 = vadd.f32 %v13808_v63, %v8126_v26  ;;  %v8124_v23 = vadd.f32 %v7975_v19, %v18131_v11  ;;  %v8730_v50 = vpop.f32.mrf.mxu0  ;;  %v20841_v26 = vld [vmem:[#allocation45_spill] sm:$0xff] }
 0x4f2   : > { %v13681_v29 = vpop.f32.mrf.mxu1  ;;  %13908 = vmatmul.mubr.msk.bf16.gmra.mxu1 %vm2302_vm4, %v12125_v10 }
 0x4f3   : > { %20833 = vst [vmem:[#allocation82_spill] sm:$0xff] %v18841_v38  ;;  %v18845_v52 = vadd.f32 %v8717_v6, %v8124_v23  ;;  %v8129_v36 = vadd.f32 %v13681_v29, %v18136_v44  ;;  %v13812_v20 = vpop.f32.mrf.mxu0  ;;  %13911 = vmatprep.mubr.msk.bf16.mxu1 %vm2302_vm4, %v20835_v25  ;;  %v20839_v6 = vld [vmem:[#allocation43_spill] sm:$0xff] }
 0x4f4   : > { %v7988_v56 = vpop.f32.mrf.mxu1  ;;  %v20842_v23 = vld [vmem:[#allocation179_spill] sm:$0xff] }
 0x4f5   : > { %20834 = vst [vmem:[#allocation154_spill] sm:$0xff] %v18845_v52  ;;  %v18850_v32 = vadd.f32 %v13811_v15, %v8129_v36  ;;  %v8127_v61 = vadd.f32 %v7988_v56, %v18139_v4  ;;  %v8733_v11 = vpop.f32.mrf.mxu0  ;;  %v18864_v4 = vld [vmem:[%s14657_s17 + $0x57c] sm:$0xf] }
 0x4f6   : > { %v13682_v31 = vpop.f32.mrf.mxu1  ;;  %v9018_v40 = vshrl.u32 %v18864_v4, 16  ;;  %v9021_v41 = vshll.u32 %v18864_v4, 16 }
 0x4f7   : > { %20836 = vst [vmem:[#allocation132_spill] sm:$0xff] %v18850_v32  ;;  %v18853_v13 = vadd.f32 %v8730_v50, %v8127_v61  ;;  %v8130_v51 = vadd.f32 %v13682_v31, %v18146_v39  ;;  %v13947_v7 = vpop.f32.mrf.mxu0  ;;  %14042 = vmatmul.mubr.msk.bf16.gmra.mxu0 %vm2302_vm4, %v20543_v59  ;;  %v18869_v39 = vld [vmem:[%s14657_s17 + $0x580] sm:$0xf]  ;;  %v20843_v31 = vld [vmem:[#allocation113_spill] sm:$0xff] }
 0x4f8   : > { %v7991_v44 = vpop.f32.mrf.mxu1  ;;  %14045 = vmatprep.mubr.msk.bf16.mxu0 %vm2302_vm4, %v20548_v22  ;;  %v9031_v45 = vshrl.u32 %v18869_v39, 16  ;;  %v9027_v22 = vshll.u32 %v18869_v39, 16  ;;  %v9023_v25 = vrot.slane %v9021_v41, 5 }
 0x4f9   : > { %20837 = vst [vmem:[#allocation135_spill] sm:$0xff] %v18853_v13  ;;  %v18860_v63 = vadd.f32 %v13812_v20, %v8130_v51  ;;  %v8128_v9 = vadd.f32 %v7991_v44, %v18151_v33  ;;  %v9942_v60 = vpop.f32.mrf.mxu0  ;;  %v9020_v20 = vrot.slane %v9018_v40, 4  ;;  %v20844_v44 = vld [vmem:[#allocation257_spill] sm:$0xff]  ;;  %v18893_v40 = vld [vmem:[%s19346_s2] ss:$0 sm:$0xff] }
 0x4fa   : > { %v13817_v59 = vpop.f32.mrf.mxu1  ;;  %13912 = vmatmul.mubr.msk.bf16.gmra.mxu1 %vm2302_vm4, %v20839_v6  ;;  %v18881_v56 = vrot.slane %v9027_v22, 5  ;;  %v9033_v61 = vrot.slane %v9031_v45, 4  ;;  %v20845_v6 = vld [vmem:[#allocation258_spill] sm:$0xff] }
 0x4fb   : > { %20838 = vst [vmem:[#allocation103_spill] sm:$0xff] %v18860_v63  ;;  %v18875_v8 = vadd.f32 %v8733_v11, %v8128_v9  ;;  %v9665_v33 = vadd.f32 %v13817_v59, %v18156_v21  ;;  %v13948_v10 = vpop.f32.mrf.mxu0  ;;  %13915 = vmatprep.mubr.msk.bf16.mxu1 %vm2302_vm4, %v20841_v26  ;;  %v537_v9 = vld [vmem:[%s14657_s17 + $0x584] sm:$0x1] }
 0x4fc   : > { %v9152_v15 = vpop.f32.mrf.mxu1 }
 0x4fd   : > { %20840 = vst [vmem:[#allocation94_spill] sm:$0xff] %v18875_v8  ;;  %v10455_v19 = vadd.f32 %v13947_v7, %v9665_v33  ;;  %v9663_v50 = vadd.f32 %v9152_v15, %v20842_v23  ;;  %v9945_v29 = vpop.f32.mrf.mxu0  ;;  %v9843_v7 = vrot.slane %v18869_v39, 5  ;;  %v20847_v15 = vld [vmem:[#allocation47_spill] sm:$0xff]  ;;  %v9024_v23 = vor.u32 %v9023_v25, %v9020_v20  ;;  %v20849_v8 = vld [vmem:[#allocation49_spill] sm:$0xff] }
 0x4fe   : > { %v13818_v36 = vpop.f32.mrf.mxu1  ;;  %v20850_v25 = vld [vmem:[#allocation117_spill] sm:$0xff] }
 0x4ff   : > { %v10453_v11 = vadd.f32 %v9942_v60, %v9663_v50  ;;  %v9666_v51 = vadd.f32 %v13818_v36, %v20843_v31  ;;  %v13951_v21 = vpop.f32.mrf.mxu0  ;;  %14046 = vmatmul.mubr.msk.bf16.gmra.mxu0 %vm2302_vm4, %v20844_v44  ;;  %v20846_v60 = vld [vmem:[#allocation105_spill] sm:$0xff]  ;;  %v9034_v50 = vor.u32 %v9033_v61, %v18881_v56  ;;  %v9037_v36 = vshll.u32 %v537_v9, 16  ;;  %v20848_v31 = vld [vmem:[#allocation111_spill] sm:$0xff] }
 0x500   : > { %v9155_v59 = vpop.f32.mrf.mxu1  ;;  %14049 = vmatprep.mubr.msk.bf16.mxu0 %vm2302_vm4, %v20845_v6 }
 0x501   : > { %v10456_v41 = vadd.f32 %v13948_v10, %v9666_v51  ;;  %v9664_v45 = vadd.f32 %v9155_v59, %v20846_v60  ;;  %v9958_v22 = vpop.f32.mrf.mxu0  ;;  %v10588_v33 = vadd.f32 %v18893_v40, %v10453_v11  ;;  %v12198_v51 = vrot.slane %v18864_v4, 9  ;;  %v20851_v4 = vld [vmem:[#allocation119_spill] sm:$0xff] }
 0x502   : > { %v13821_v26 = vpop.f32.mrf.mxu1  ;;  %13916 = vmatmul.mubr.msk.bf16.gmra.mxu1 %vm2302_vm4, %v20847_v15  ;;  %v9845_v59 = vrot.slane %v9843_v7, 4  ;;  %v9846_v11 = vrot.slane %v537_v9, 5  ;;  %v10590_v60 = vadd.f32 %v18893_v40, %v10455_v19  ;;  %v9039_v32 = vrot.slane %v9037_v36, 5 }
 0x503   : > { %v10454_v39 = vadd.f32 %v9945_v29, %v9664_v45  ;;  %v9669_v44 = vadd.f32 %v13821_v26, %v20848_v31  ;;  %v13952_v6 = vpop.f32.mrf.mxu0  ;;  %13919 = vmatprep.mubr.msk.bf16.mxu1 %vm2302_vm4, %v20849_v8  ;;  %v10716_v29 = vmax.f32 %v10588_v33, 0.0  ;;  %v9025_v26 = vrot.slane %v9024_v23, 4 }
 0x504   : > { %v9168_v10 = vpop.f32.mrf.mxu1  ;;  %v9035_v31 = vrot.slane %v9034_v50, 4  ;;  %v10591_v8 = vadd.f32 %v18893_v40, %v10456_v41  ;;  %v9847_v33 = vsel %vm15439_vm7, %v9845_v59, %v9846_v11  ;;  %v10718_v23 = vmax.f32 %v10590_v60, 0.0 }
 0x505   : > { %v10589_v15 = vadd.f32 %v18893_v40, %v10454_v39  ;;  %v10459_v20 = vadd.f32 %v13951_v21, %v9669_v44  ;;  %v9667_v61 = vadd.f32 %v9168_v10, %v20850_v25  ;;  %v9961_v63 = vpop.f32.mrf.mxu0  ;;  %v9844_v21 = vsel %vm15439_vm7, %v12198_v51, %v9843_v7 }
 0x506   : > { %v13822_v45 = vpop.f32.mrf.mxu1  ;;  %v9040_v7 = vsel %vm14678_vm3, %v9035_v31, %v9039_v32  ;;  %v10719_v10 = vmax.f32 %v10591_v8, 0.0 }
 0x507   : > { %v10717_v13 = vmax.f32 %v10589_v15, 0.0  ;;  %v10457_v52 = vadd.f32 %v9958_v22, %v9667_v61  ;;  %v9670_v38 = vadd.f32 %v13822_v45, %v20851_v4  ;;  %v13955_v9 = vpop.f32.mrf.mxu0  ;;  %14050 = vmatmul.mubr.msk.bf16.gmra.mxu0 %vm2302_vm4, %v20555_v57  ;;  %v20852_v57 = vld [vmem:[#allocation51_spill] sm:$0xff]  ;;  %v10594_v61 = vadd.f32 %v18893_v40, %v10459_v20 }
 0x508   : > { %v9171_v19 = vpop.f32.mrf.mxu1  ;;  %14053 = vmatprep.mubr.msk.bf16.mxu0 %vm2302_vm4, %v18208_v1  ;;  %v9030_v1 = vsel %vm14678_vm3, %v9025_v26, %v18881_v56 }
 0x509   : > { %v10845_v41 = vadd.f32 %v10717_v13, %v10716_v29  ;;  %v10592_v22 = vadd.f32 %v18893_v40, %v10457_v52  ;;  %v10460_v50 = vadd.f32 %v13952_v6, %v9670_v38  ;;  %v9974_v36 = vpop.f32.mrf.mxu0  ;;  %v9668_v39 = vadd.f32 %v9171_v19, %v18198_v58  ;;  %v20853_v38 = vld [vmem:[#allocation250_spill] sm:$0xff] }
 0x50a   : > { %v13825_v44 = vpop.f32.mrf.mxu1  ;;  %13920 = vmatmul.mubr.msk.bf16.gmra.mxu1 %vm2302_vm4, %v20852_v57  ;;  %v12207_v58 = vcombine.low %v9844_v21, %v9847_v33  ;;  %v12126_v45 = vcombine.low %v9030_v1, %v9040_v7  ;;  %v10722_v21 = vmax.f32 %v10594_v61, 0.0 }
 0x50b   : > { %v10846_v51 = vadd.f32 %v10845_v41, %v10718_v23  ;;  %v9673_v13 = vadd.f32 %v13825_v44, %v18205_v43  ;;  %v13956_v52 = vpop.f32.mrf.mxu0  ;;  %13923 = vmatprep.mubr.msk.bf16.mxu1 %vm2302_vm4, %v20853_v38  ;;  %v10458_v6 = vadd.f32 %v9961_v63, %v9668_v39  ;;  %v10720_v11 = vmax.f32 %v10592_v22, 0.0 }
 0x50c   : > { %v9184_v59 = vpop.f32.mrf.mxu1  ;;  %v10595_v63 = vadd.f32 %v18893_v40, %v10460_v50 }
 0x50d   : > { %v10847_v60 = vadd.f32 %v10846_v51, %v10719_v10  ;;  %v10463_v15 = vadd.f32 %v13955_v9, %v9673_v13  ;;  %v9671_v25 = vadd.f32 %v9184_v59, %v18210_v2  ;;  %v9977_v56 = vpop.f32.mrf.mxu0  ;;  %v10593_v32 = vadd.f32 %v18893_v40, %v10458_v6  ;;  %v18946_v10 = vld [vmem:[%s14657_s17 + $0x654] sm:$0xf] }
 0x50e   : > { %v13826_v29 = vpop.f32.mrf.mxu1  ;;  %v9042_v51 = vshrl.u32 %v18946_v10, 16 }
 0x50f   : > { %v10848_v43 = vadd.f32 %v10847_v60, %v10720_v11  ;;  %v10461_v26 = vadd.f32 %v9974_v36, %v9671_v25  ;;  %v9674_v31 = vadd.f32 %v13826_v29, %v18216_v49  ;;  %v13959_v8 = vpop.f32.mrf.mxu0  ;;  %14054 = vmatmul.mubr.msk.bf16.gmra.mxu0 %vm2302_vm4, %v12207_v58  ;;  %v10721_v4 = vmax.f32 %v10593_v32, 0.0  ;;  %v20854_v36 = vld [vmem:[#allocation56_spill] sm:$0xff] }
 0x510   : > { %v9187_v9 = vpop.f32.mrf.mxu1  ;;  %14057 = vmatprep.mubr.msk.bf16.mxu0 %vm2302_vm4, %v20562_v12  ;;  %v10723_v12 = vmax.f32 %v10595_v63, 0.0  ;;  %v9045_v58 = vshll.u32 %v18946_v10, 16 }
 0x511   : > { %v10464_v2 = vadd.f32 %v13956_v52, %v9674_v31  ;;  %v9672_v20 = vadd.f32 %v9187_v9, %v18221_v42  ;;  %v9990_v19 = vpop.f32.mrf.mxu0  ;;  %v10849_v33 = vadd.f32 %v10848_v43, %v10721_v4  ;;  %v10596_v23 = vadd.f32 %v18893_v40, %v10461_v26  ;;  %v20856_v9 = vld [vmem:[#allocation65_spill] sm:$0xff] }
 0x512   : > { %v13829_v49 = vpop.f32.mrf.mxu1  ;;  %13924 = vmatmul.mubr.msk.bf16.gmra.mxu1 %vm2302_vm4, %v12126_v45 }
 0x513   : > { %v10462_v41 = vadd.f32 %v9977_v56, %v9672_v20  ;;  %v9677_v22 = vadd.f32 %v13829_v49, %v18226_v16  ;;  %v13960_v50 = vpop.f32.mrf.mxu0  ;;  %13927 = vmatprep.mubr.msk.bf16.mxu1 %vm2302_vm4, %v20854_v36  ;;  %v10850_v39 = vadd.f32 %v10849_v33, %v10722_v21  ;;  %v10598_v16 = vadd.f32 %v18893_v40, %v10463_v15  ;;  %v18958_v15 = vld [vmem:[%s14657_s17 + $0x658] sm:$0xf] }
 0x514   : > { %v9200_v44 = vpop.f32.mrf.mxu1  ;;  %v10724_v13 = vmax.f32 %v10596_v23, 0.0  ;;  %v10599_v25 = vadd.f32 %v18893_v40, %v10464_v2  ;;  %v9051_v61 = vshll.u32 %v18958_v15, 16  ;;  %v9055_v32 = vshrl.u32 %v18958_v15, 16 }
 0x515   : > { %v10597_v42 = vadd.f32 %v18893_v40, %v10462_v41  ;;  %v10467_v57 = vadd.f32 %v13959_v8, %v9677_v22  ;;  %v9675_v1 = vadd.f32 %v9200_v44, %v18229_v14  ;;  %v9993_v7 = vpop.f32.mrf.mxu0  ;;  %v10851_v52 = vadd.f32 %v10850_v39, %v10723_v12  ;;  %v20855_v8 = vld [vmem:[#allocation60_spill] sm:$0xff] }
 0x516   : > { %v13830_v38 = vpop.f32.mrf.mxu1  ;;  %v10726_v43 = vmax.f32 %v10598_v16, 0.0  ;;  %v9044_v2 = vrot.slane %v9042_v51, 4  ;;  %v9047_v20 = vrot.slane %v9045_v58, 5  ;;  %v18969_v33 = vrot.slane %v9051_v61, 5  ;;  %v20858_v16 = vld [vmem:[#allocation270_spill] sm:$0xff] }
 0x517   : > { %v10725_v6 = vmax.f32 %v10597_v42, 0.0  ;;  %v10465_v59 = vadd.f32 %v9990_v19, %v9675_v1  ;;  %v9678_v11 = vadd.f32 %v13830_v38, %v18236_v35  ;;  %v13963_v60 = vpop.f32.mrf.mxu0  ;;  %14058 = vmatmul.mubr.msk.bf16.gmra.mxu0 %vm2302_vm4, %v20563_v28  ;;  %v10852_v14 = vadd.f32 %v10851_v52, %v10724_v13  ;;  %v20857_v1 = vld [vmem:[#allocation188_spill] sm:$0xff]  ;;  %v567_v13 = vld [vmem:[%s14657_s17 + $0x65c] sm:$0x1] }
 0x518   : > { %v9203_v56 = vpop.f32.mrf.mxu1  ;;  %14061 = vmatprep.mubr.msk.bf16.mxu0 %vm2302_vm4, %v20565_v37  ;;  %v10727_v19 = vmax.f32 %v10599_v25, 0.0  ;;  %v9048_v52 = vor.u32 %v9047_v20, %v9044_v2  ;;  %v9853_v20 = vrot.slane %v567_v13, 5 }
 0x519   : > { %v10468_v29 = vadd.f32 %v13960_v50, %v9678_v11  ;;  %v9676_v35 = vadd.f32 %v9203_v56, %v18241_v24  ;;  %v10006_v45 = vpop.f32.mrf.mxu0  ;;  %v10853_v26 = vadd.f32 %v10852_v14, %v10725_v6  ;;  %v10600_v28 = vadd.f32 %v18893_v40, %v10465_v59  ;;  %v20859_v6 = vld [vmem:[#allocation271_spill] sm:$0xff] }
 0x51a   : > { %v13833_v31 = vpop.f32.mrf.mxu1  ;;  %13928 = vmatmul.mubr.msk.bf16.gmra.mxu1 %vm2302_vm4, %v20855_v8  ;;  %v9057_v50 = vrot.slane %v9055_v32, 4  ;;  %v20860_v11 = vld [vmem:[#allocation11_spill] sm:$0xff]  ;;  %v9049_v8 = vrot.slane %v9048_v52, 4 }
 0x51b   : > { %v10466_v63 = vadd.f32 %v9993_v7, %v9676_v35  ;;  %v9681_v37 = vadd.f32 %v13833_v31, %v18246_v17  ;;  %v13964_v4 = vpop.f32.mrf.mxu0  ;;  %13931 = vmatprep.mubr.msk.bf16.mxu1 %vm2302_vm4, %v20856_v9  ;;  %v10854_v24 = vadd.f32 %v10853_v26, %v10726_v43  ;;  %v10602_v17 = vadd.f32 %v18893_v40, %v10467_v57  ;;  %v20862_v26 = vld [vmem:[#allocation123_spill] sm:$0xff] }
 0x51c   : > { %v9216_v21 = vpop.f32.mrf.mxu1  ;;  %v10728_v36 = vmax.f32 %v10600_v28, 0.0  ;;  %v9850_v57 = vrot.slane %v18958_v15, 5  ;;  %v9058_v25 = vor.u32 %v9057_v50, %v18969_v33  ;;  %v20863_v15 = vld [vmem:[#allocation73_spill] sm:$0xff] }
 0x51d   : > { %v10601_v23 = vadd.f32 %v18893_v40, %v10466_v63  ;;  %v10471_v49 = vadd.f32 %v13963_v60, %v9681_v37  ;;  %v9679_v41 = vadd.f32 %v9216_v21, %v18249_v54  ;;  %v10009_v22 = vpop.f32.mrf.mxu0  ;;  %v10855_v12 = vadd.f32 %v10854_v24, %v10727_v19 }
 0x51e   : > { %v13834_v39 = vpop.f32.mrf.mxu1  ;;  %v10603_v54 = vadd.f32 %v18893_v40, %v10468_v29  ;;  %v10730_v56 = vmax.f32 %v10602_v17, 0.0  ;;  %v9061_v29 = vshll.u32 %v567_v13, 16  ;;  %v12199_v63 = vrot.slane %v18946_v10, 9  ;;  %v20867_v13 = vld [vmem:[#allocation196_spill] sm:$0xff] }
 0x51f   : > { %v10729_v44 = vmax.f32 %v10601_v23, 0.0  ;;  %v10469_v42 = vadd.f32 %v10006_v45, %v9679_v41  ;;  %v9682_v7 = vadd.f32 %v13834_v39, %v20857_v1  ;;  %v13967_v51 = vpop.f32.mrf.mxu0  ;;  %14062 = vmatmul.mubr.msk.bf16.gmra.mxu0 %vm2302_vm4, %v20858_v16  ;;  %v10856_v38 = vadd.f32 %v10855_v12, %v10728_v36  ;;  %v20861_v45 = vld [vmem:[#allocation69_spill] sm:$0xff]  ;;  %v20864_v23 = vld [vmem:[#allocation183_spill] sm:$0xff] }
 0x520   : > { %v9219_v58 = vpop.f32.mrf.mxu1  ;;  %14065 = vmatprep.mubr.msk.bf16.mxu0 %vm2302_vm4, %v20859_v6  ;;  %v10731_v37 = vmax.f32 %v10603_v54, 0.0  ;;  %v9852_v2 = vrot.slane %v9850_v57, 4  ;;  %v10606_v19 = vadd.f32 %v18893_v40, %v10471_v49  ;;  %v9059_v12 = vrot.slane %v9058_v25, 4  ;;  %v20865_v1 = vld [vmem:[#allocation125_spill] sm:$0xff]  ;;  %v20866_v49 = vld [vmem:[#allocation272_spill] sm:$0xff] }
 0x521   : > { %v10472_v59 = vadd.f32 %v13964_v4, %v9682_v7  ;;  %v9680_v60 = vadd.f32 %v9219_v58, %v20860_v11  ;;  %v10022_v14 = vpop.f32.mrf.mxu0  ;;  %v10857_v61 = vadd.f32 %v10856_v38, %v10729_v44  ;;  %v10604_v32 = vadd.f32 %v18893_v40, %v10469_v42 }
 0x522   : > { %v13837_v35 = vpop.f32.mrf.mxu1  ;;  %13932 = vmatmul.mubr.msk.bf16.gmra.mxu1 %vm2302_vm4, %v20861_v45  ;;  %v9063_v39 = vrot.slane %v9061_v29, 5  ;;  %v9851_v52 = vsel %vm15439_vm7, %v12199_v63, %v9850_v57  ;;  %v9854_v38 = vsel %vm15439_vm7, %v9852_v2, %v9853_v20  ;;  %v10734_v54 = vmax.f32 %v10606_v19, 0.0 }
 0x523   : > { %v10470_v43 = vadd.f32 %v10009_v22, %v9680_v60  ;;  %v9685_v28 = vadd.f32 %v13837_v35, %v20862_v26  ;;  %v13968_v31 = vpop.f32.mrf.mxu0  ;;  %13935 = vmatprep.mubr.msk.bf16.mxu1 %vm2302_vm4, %v20863_v15  ;;  %v10858_v4 = vadd.f32 %v10857_v61, %v10730_v56  ;;  %v10732_v17 = vmax.f32 %v10604_v32, 0.0  ;;  %v20868_v60 = vld [vmem:[#allocation186_spill] sm:$0xff] }
 0x524   : > { %v9232_v9 = vpop.f32.mrf.mxu1  ;;  %v10607_v10 = vadd.f32 %v18893_v40, %v10472_v59  ;;  %v20869_v56 = vld [vmem:[#allocation78_spill] sm:$0xff]  ;;  %v9054_v61 = vsel %vm14678_vm3, %v9049_v8, %v18969_v33  ;;  %v9064_v53 = vsel %vm14678_vm3, %v9059_v12, %v9063_v39  ;;  %v12208_v26 = vcombine.low %v9851_v52, %v9854_v38 }
 0x525   : > { %v10605_v24 = vadd.f32 %v18893_v40, %v10470_v43  ;;  %v10475_v21 = vadd.f32 %v13967_v51, %v9685_v28  ;;  %v9683_v41 = vadd.f32 %v9232_v9, %v20864_v23  ;;  %v10025_v22 = vpop.f32.mrf.mxu0  ;;  %v18994_v50 = vadd.f32 %v10858_v4, %v10731_v37  ;;  %v20870_v35 = vld [vmem:[#allocation194_spill] sm:$0xff]  ;;  %v20871_v43 = vld [vmem:[#allocation260_spill] sm:$0xff]  ;;  %v20873_v23 = vld [vmem:[#allocation133_spill] sm:$0xff] }
 0x526   : > { %v13838_v36 = vpop.f32.mrf.mxu1  ;;  %v10735_v57 = vmax.f32 %v10607_v10, 0.0  ;;  %v20872_v4 = vld [vmem:[#allocation130_spill] sm:$0xff]  ;;  %v12127_v20 = vcombine.low %v9054_v61, %v9064_v53 }
 0x527   : > { %v10733_v44 = vmax.f32 %v10605_v24, 0.0  ;;  %v10473_v42 = vadd.f32 %v10022_v14, %v9683_v41  ;;  %v9686_v7 = vadd.f32 %v13838_v36, %v20865_v1  ;;  %v13971_v16 = vpop.f32.mrf.mxu0  ;;  %14066 = vmatmul.mubr.msk.bf16.gmra.mxu0 %vm2302_vm4, %v20866_v49  ;;  %v10610_v34 = vadd.f32 %v18893_v40, %v10475_v21  ;;  %v20874_v10 = vld [vmem:[#allocation138_spill] sm:$0xff] }
 0x528   : > { %v9235_v51 = vpop.f32.mrf.mxu1  ;;  %14069 = vmatprep.mubr.msk.bf16.mxu0 %vm2302_vm4, %v20867_v13 }
 0x529   : > { %v10866_v58 = vadd.f32 %v10733_v44, %v10732_v17  ;;  %v10608_v6 = vadd.f32 %v18893_v40, %v10473_v42  ;;  %v10476_v59 = vadd.f32 %v13968_v31, %v9686_v7  ;;  %v10038_v11 = vpop.f32.mrf.mxu0  ;;  %v9684_v14 = vadd.f32 %v9235_v51, %v20868_v60  ;;  %v20875_v51 = vld [vmem:[#allocation141_spill] sm:$0xff] }
 0x52a   : > { %v13841_v25 = vpop.f32.mrf.mxu1  ;;  %13936 = vmatmul.mubr.msk.bf16.gmra.mxu1 %vm2302_vm4, %v20869_v56  ;;  %v10738_v21 = vmax.f32 %v10610_v34, 0.0 }
 0x52b   : > { %v10867_v32 = vadd.f32 %v10866_v58, %v10734_v54  ;;  %v9689_v45 = vadd.f32 %v13841_v25, %v20870_v35  ;;  %v13972_v29 = vpop.f32.mrf.mxu0  ;;  %13939 = vmatprep.mubr.msk.bf16.mxu1 %vm2302_vm4, %v20871_v43  ;;  %v10474_v28 = vadd.f32 %v10025_v22, %v9684_v14  ;;  %v10736_v15 = vmax.f32 %v10608_v6, 0.0  ;;  %v20877_v35 = vld [vmem:[#allocation204_spill] sm:$0xff] }
 0x52c   : > { %v9248_v31 = vpop.f32.mrf.mxu1  ;;  %v10611_v22 = vadd.f32 %v18893_v40, %v10476_v59 }
 0x52d   : > { %v10868_v63 = vadd.f32 %v10867_v32, %v10735_v57  ;;  %v10479_v37 = vadd.f32 %v13971_v16, %v9689_v45  ;;  %v9687_v9 = vadd.f32 %v9248_v31, %v20872_v4  ;;  %v10041_v33 = vpop.f32.mrf.mxu0  ;;  %v10609_v8 = vadd.f32 %v18893_v40, %v10474_v28 }
 0x52e   : > { %v13842_v2 = vpop.f32.mrf.mxu1  ;;  %v10739_v38 = vmax.f32 %v10611_v22, 0.0 }
 0x52f   : > { %v10869_v19 = vadd.f32 %v10868_v63, %v10736_v15  ;;  %v10477_v24 = vadd.f32 %v10038_v11, %v9687_v9  ;;  %v9690_v41 = vadd.f32 %v13842_v2, %v20873_v23  ;;  %v13975_v17 = vpop.f32.mrf.mxu0  ;;  %14070 = vmatmul.mubr.msk.bf16.gmra.mxu0 %vm2302_vm4, %v12208_v26  ;;  %v10737_v36 = vmax.f32 %v10609_v8, 0.0  ;;  %v20876_v11 = vld [vmem:[#allocation202_spill] sm:$0xff]  ;;  %v20879_v2 = vld [vmem:[#allocation149_spill] sm:$0xff] }
 0x530   : > { %v9251_v12 = vpop.f32.mrf.mxu1  ;;  %v10614_v25 = vadd.f32 %v18893_v40, %v10479_v37  ;;  %v20878_v15 = vld [vmem:[#allocation146_spill] sm:$0xff] }
 0x531   : > { %v10480_v39 = vadd.f32 %v13972_v29, %v9690_v41  ;;  %v9688_v44 = vadd.f32 %v9251_v12, %v20874_v10  ;;  %v10054_v42 = vpop.f32.mrf.mxu0  ;;  %v10870_v1 = vadd.f32 %v10869_v19, %v10737_v36  ;;  %v10612_v7 = vadd.f32 %v18893_v40, %v10477_v24  ;;  %v20880_v12 = vld [vmem:[#allocation153_spill] sm:$0xff] }
 0x532   : > { %v13845_v16 = vpop.f32.mrf.mxu1  ;;  %13940 = vmatmul.mubr.msk.bf16.gmra.mxu1 %vm2302_vm4, %v12127_v20  ;;  %v10742_v9 = vmax.f32 %v10614_v25, 0.0  ;;  %v10860_v24 = vrot.slane %v18994_v50, 4 }
 0x533   : > { %v10478_v49 = vadd.f32 %v10041_v33, %v9688_v44  ;;  %v9693_v13 = vadd.f32 %v13845_v16, %v20875_v51  ;;  %v13976_v52 = vpop.f32.mrf.mxu0  ;;  %v10871_v54 = vadd.f32 %v10870_v1, %v10738_v21  ;;  %v10740_v56 = vmax.f32 %v10612_v7, 0.0 }
 0x534   : > { %v9264_v58 = vpop.f32.mrf.mxu1  ;;  %v10615_v26 = vadd.f32 %v18893_v40, %v10480_v39 }
 0x535   : > { %v10613_v6 = vadd.f32 %v18893_v40, %v10478_v49  ;;  %v10483_v59 = vadd.f32 %v13975_v17, %v9693_v13  ;;  %v9691_v60 = vadd.f32 %v9264_v58, %v20876_v11  ;;  %v10057_v14 = vpop.f32.mrf.mxu0  ;;  %v10872_v61 = vadd.f32 %v10871_v54, %v10739_v38  ;;  %v20881_v49 = vld [vmem:[#allocation155_spill] sm:$0xff]  ;;  %v20882_v11 = vld [vmem:[#allocation209_spill] sm:$0xff] }
 0x536   : > { %v13846_v53 = vpop.f32.mrf.mxu1  ;;  %v10743_v23 = vmax.f32 %v10615_v26, 0.0 }
 0x537   : > { %v10741_v57 = vmax.f32 %v10613_v6, 0.0  ;;  %v10481_v32 = vadd.f32 %v10054_v42, %v9691_v60  ;;  %v9694_v45 = vadd.f32 %v13846_v53, %v20877_v35  ;;  %v13979_v29 = vpop.f32.mrf.mxu0  ;;  %v10873_v43 = vadd.f32 %v10872_v61, %v10740_v56 }
 0x538   : > { %v9267_v28 = vpop.f32.mrf.mxu1  ;;  %v10618_v44 = vadd.f32 %v18893_v40, %v10483_v59 }
 0x539   : > { %v10484_v31 = vadd.f32 %v13976_v52, %v9694_v45  ;;  %v9692_v63 = vadd.f32 %v9267_v28, %v20878_v15  ;;  %v10070_v4 = vpop.f32.mrf.mxu0  ;;  %v10874_v33 = vadd.f32 %v10873_v43, %v10741_v57  ;;  %v10616_v37 = vadd.f32 %v18893_v40, %v10481_v32  ;;  %v20883_v57 = vld [vmem:[#allocation168_spill] sm:$0xff]  ;;  %v20884_v15 = vld [vmem:[#allocation159_spill] sm:$0xff] }
 0x53a   : > { %v13849_v34 = vpop.f32.mrf.mxu1  ;;  %v10861_v52 = vadd.f32 %v10860_v24, %v18994_v50  ;;  %v10746_v25 = vmax.f32 %v10618_v44, 0.0 }
 0x53b   : > { %v10482_v8 = vadd.f32 %v10057_v14, %v9692_v63  ;;  %v9697_v20 = vadd.f32 %v13849_v34, %v20879_v2  ;;  %v13980_v19 = vpop.f32.mrf.mxu0  ;;  %v10875_v41 = vadd.f32 %v10874_v33, %v10742_v9  ;;  %v10744_v42 = vmax.f32 %v10616_v37, 0.0 }
 0x53c   : > { %v9280_v17 = vpop.f32.mrf.mxu1  ;;  %v10619_v54 = vadd.f32 %v18893_v40, %v10484_v31  ;;  %v10862_v45 = vrot.slane %v10861_v52, 2 }
 0x53d   : > { %v10617_v22 = vadd.f32 %v18893_v40, %v10482_v8  ;;  %v10487_v36 = vadd.f32 %v13979_v29, %v9697_v20  ;;  %v9695_v39 = vadd.f32 %v9280_v17, %v20880_v12  ;;  %v10073_v10 = vpop.f32.mrf.mxu0  ;;  %v10876_v21 = vadd.f32 %v10875_v41, %v10743_v23  ;;  %v20885_v20 = vld [vmem:[#allocation165_spill] sm:$0xff] }
 0x53e   : > { %v13850_v1 = vpop.f32.mrf.mxu1  ;;  %v10747_v29 = vmax.f32 %v10619_v54, 0.0  ;;  %v10863_v23 = vadd.f32 %v10862_v45, %v10861_v52  ;;  %v20889_v45 = vld [vmem:[#allocation218_spill] sm:$0xff] }
 0x53f   : > { %v10745_v7 = vmax.f32 %v10617_v22, 0.0  ;;  %v10485_v16 = vadd.f32 %v10070_v4, %v9695_v39  ;;  %v9698_v51 = vadd.f32 %v13850_v1, %v20881_v49  ;;  %v13983_v13 = vpop.f32.mrf.mxu0  ;;  %v10877_v38 = vadd.f32 %v10876_v21, %v10744_v42  ;;  %v20886_v42 = vld [vmem:[#allocation207_spill] sm:$0xff]  ;;  %v20887_v49 = vld [vmem:[#allocation173_spill] sm:$0xff] }
 0x540   : > { %v9283_v58 = vpop.f32.mrf.mxu1  ;;  %v10622_v26 = vadd.f32 %v18893_v40, %v10487_v36 }
 0x541   : > { %v10488_v6 = vadd.f32 %v13980_v19, %v9698_v51  ;;  %v9696_v60 = vadd.f32 %v9283_v58, %v20882_v11  ;;  %v10086_v14 = vpop.f32.mrf.mxu0  ;;  %v10878_v59 = vadd.f32 %v10877_v38, %v10745_v7  ;;  %v10620_v56 = vadd.f32 %v18893_v40, %v10485_v16 }
 0x542   : > { %v13853_v61 = vpop.f32.mrf.mxu1  ;;  %v10750_v22 = vmax.f32 %v10622_v26, 0.0  ;;  %v10864_v38 = vrot.slane %v10863_v23, 1 }
 0x543   : > { %v10486_v53 = vadd.f32 %v10073_v10, %v9696_v60  ;;  %v9701_v32 = vadd.f32 %v13853_v61, %v20883_v57  ;;  %v13984_v35 = vpop.f32.mrf.mxu0  ;;  %v10879_v50 = vadd.f32 %v10878_v59, %v10746_v25  ;;  %v10748_v33 = vmax.f32 %v10620_v56, 0.0 }
 0x544   : > { %v9296_v43 = vpop.f32.mrf.mxu1  ;;  %v10623_v34 = vadd.f32 %v18893_v40, %v10488_v6 }
 0x545   : > { %v10621_v28 = vadd.f32 %v18893_v40, %v10486_v53  ;;  %v10491_v31 = vadd.f32 %v13983_v13, %v9701_v32  ;;  %v9699_v63 = vadd.f32 %v9296_v43, %v20884_v15  ;;  %v10089_v4 = vpop.f32.mrf.mxu0  ;;  %v10880_v9 = vadd.f32 %v10879_v50, %v10747_v29 }
 0x546   : > { %v13854_v37 = vpop.f32.mrf.mxu1  ;;  %v10751_v7 = vmax.f32 %v10623_v34, 0.0 }
 0x547   : > { %v10749_v8 = vmax.f32 %v10621_v28, 0.0  ;;  %v10489_v2 = vadd.f32 %v10086_v14, %v9699_v63  ;;  %v9702_v19 = vadd.f32 %v13854_v37, %v20885_v20  ;;  %v13987_v24 = vpop.f32.mrf.mxu0  ;;  %v10881_v41 = vrot.slane %v10880_v9, 4  ;;  %v20888_v14 = vld [vmem:[#allocation176_spill] sm:$0xff] }
 0x548   : > { %v9299_v17 = vpop.f32.mrf.mxu1  ;;  %v10626_v61 = vadd.f32 %v18893_v40, %v10491_v31  ;;  %v10865_v63 = vadd.f32 %v10864_v38, %v10863_v23  ;;  %v20893_v38 = vld [vmem:[#allocation182_spill] sm:$0xff] }
 0x549   : > { %v10887_v36 = vadd.f32 %v10749_v8, %v10748_v33  ;;  %v10624_v12 = vadd.f32 %v18893_v40, %v10489_v2  ;;  %v10492_v39 = vadd.f32 %v13984_v35, %v9702_v19  ;;  %v10102_v10 = vpop.f32.mrf.mxu0  ;;  %v10882_v44 = vadd.f32 %v10881_v41, %v10880_v9  ;;  %v20890_v9 = vld [vmem:[#allocation25_spill] sm:$0xff] }
 0x54a   : > { %v9700_v21 = vadd.f32 %v9299_v17, %v20886_v42  ;;  %v13857_v1 = vpop.f32.mrf.mxu1  ;;  %v10754_v34 = vmax.f32 %v10626_v61, 0.0 }
 0x54b   : > { %v10888_v16 = vadd.f32 %v10887_v36, %v10750_v22  ;;  %v9705_v51 = vadd.f32 %v13857_v1, %v20887_v49  ;;  %v13988_v13 = vpop.f32.mrf.mxu0  ;;  %v10883_v54 = vrot.slane %v10882_v44, 2  ;;  %v10752_v6 = vmax.f32 %v10624_v12, 0.0 }
 0x54c   : > { %v10490_v52 = vadd.f32 %v10089_v4, %v9700_v21  ;;  %v9312_v58 = vpop.f32.mrf.mxu1  ;;  %v10627_v26 = vadd.f32 %v18893_v40, %v10492_v39 }
 0x54d   : > { %v10889_v11 = vadd.f32 %v10888_v16, %v10751_v7  ;;  %v10495_v60 = vadd.f32 %v13987_v24, %v9705_v51  ;;  %v9703_v25 = vadd.f32 %v9312_v58, %v20888_v14  ;;  %v10105_v59 = vpop.f32.mrf.mxu0  ;;  %v10884_v56 = vadd.f32 %v10883_v54, %v10882_v44  ;;  %v20891_v24 = vld [vmem:[#allocation180_spill] sm:$0xff]  ;;  %v20892_v44 = vld [vmem:[#allocation213_spill] sm:$0xff] }
 0x54e   : > { %v10625_v53 = vadd.f32 %v18893_v40, %v10490_v52  ;;  %v13858_v57 = vpop.f32.mrf.mxu1  ;;  %v10755_v36 = vmax.f32 %v10627_v26, 0.0 }
 0x54f   : > { %v10890_v32 = vadd.f32 %v10889_v11, %v10752_v6  ;;  %v10493_v35 = vadd.f32 %v10102_v10, %v9703_v25  ;;  %v9706_v29 = vadd.f32 %v13858_v57, %v20889_v45  ;;  %v13991_v50 = vpop.f32.mrf.mxu0  ;;  %v10885_v43 = vrot.slane %v10884_v56, 1  ;;  %v20894_v25 = vld [vmem:[#allocation216_spill] sm:$0xff] }
 0x550   : > { %v10753_v28 = vmax.f32 %v10625_v53, 0.0  ;;  %v9315_v15 = vpop.f32.mrf.mxu1  ;;  %v10630_v1 = vadd.f32 %v18893_v40, %v10495_v60 }
 0x551   : > { %v10496_v4 = vadd.f32 %v13988_v13, %v9706_v29  ;;  %v9704_v33 = vadd.f32 %v9315_v15, %v20890_v9  ;;  %v10118_v37 = vpop.f32.mrf.mxu0  ;;  %v10886_v31 = vadd.f32 %v10885_v43, %v10884_v56  ;;  %v10628_v2 = vadd.f32 %v18893_v40, %v10493_v35  ;;  %v20895_v35 = vld [vmem:[#allocation224_spill] sm:$0xff] }
 0x552   : > { %v10891_v8 = vadd.f32 %v10890_v32, %v10753_v28  ;;  %v13861_v20 = vpop.f32.mrf.mxu1  ;;  %v10758_v61 = vmax.f32 %v10630_v1, 0.0 }
 0x553   : > { %v10494_v19 = vadd.f32 %v10105_v59, %v9704_v33  ;;  %v9709_v41 = vadd.f32 %v13861_v20, %v20891_v24  ;;  %v13992_v17 = vpop.f32.mrf.mxu0  ;;  %v19062_v22 = vsel %vm11021_vm8, %v10886_v31, %v10865_v63  ;;  %v10756_v7 = vmax.f32 %v10628_v2, 0.0  ;;  %v20896_v63 = vld [vmem:[#allocation187_spill] sm:$0xff]  ;;  %v20897_v20 = vld [vmem:[#allocation190_spill] sm:$0xff] }
 0x554   : > { %v10892_v12 = vadd.f32 %v10891_v8, %v10754_v34  ;;  %v9328_v23 = vpop.f32.mrf.mxu1  ;;  %v10631_v6 = vadd.f32 %v18893_v40, %v10496_v4 }
 0x555   : > { %v10629_v39 = vadd.f32 %v18893_v40, %v10494_v19  ;;  %v10499_v10 = vadd.f32 %v13991_v50, %v9709_v41  ;;  %v9707_v42 = vadd.f32 %v9328_v23, %v20892_v44  ;;  %v10121_v21 = vpop.f32.mrf.mxu0  ;;  %v20898_v23 = vld [vmem:[#allocation195_spill] sm:$0xff] }
 0x556   : > { %v10893_v16 = vadd.f32 %v10892_v12, %v10755_v36  ;;  %v13862_v49 = vpop.f32.mrf.mxu1  ;;  %v10759_v50 = vmax.f32 %v10631_v6, 0.0 }
 0x557   : > { %v10757_v51 = vmax.f32 %v10629_v39, 0.0  ;;  %v10497_v13 = vadd.f32 %v10118_v37, %v9707_v42  ;;  %v9710_v54 = vadd.f32 %v13862_v49, %v20893_v38  ;;  %v13995_v52 = vpop.f32.mrf.mxu0  ;;  %v10634_v33 = vadd.f32 %v18893_v40, %v10499_v10 }
 0x558   : > { %v10894_v58 = vadd.f32 %v10893_v16, %v10756_v7  ;;  %v9331_v11 = vpop.f32.mrf.mxu1  ;;  %v20899_v16 = vld [vmem:[#allocation198_spill] sm:$0xff] }
 0x559   : > { %v10500_v14 = vadd.f32 %v13992_v17, %v9710_v54  ;;  %v9708_v59 = vadd.f32 %v9331_v11, %v20894_v25  ;;  %v10134_v56 = vpop.f32.mrf.mxu0  ;;  %v10632_v60 = vadd.f32 %v18893_v40, %v10497_v13  ;;  %v10762_v42 = vmax.f32 %v10634_v33, 0.0  ;;  %v20900_v11 = vld [vmem:[#allocation232_spill] sm:$0xff] }
 0x55a   : > { %v10895_v53 = vadd.f32 %v10894_v58, %v10757_v51  ;;  %v13865_v57 = vpop.f32.mrf.mxu1 }
 0x55b   : > { %v10498_v32 = vadd.f32 %v10121_v21, %v9708_v59  ;;  %v9713_v45 = vadd.f32 %v13865_v57, %v20895_v35  ;;  %v13996_v29 = vpop.f32.mrf.mxu0  ;;  %v10760_v37 = vmax.f32 %v10632_v60, 0.0  ;;  %v10635_v17 = vadd.f32 %v18893_v40, %v10500_v14 }
 0x55c   : > { %v10896_v43 = vadd.f32 %v10895_v53, %v10758_v61  ;;  %v9344_v26 = vpop.f32.mrf.mxu1 }
 0x55d   : > { %v10633_v28 = vadd.f32 %v18893_v40, %v10498_v32  ;;  %v10503_v15 = vadd.f32 %v13995_v52, %v9713_v45  ;;  %v9711_v4 = vadd.f32 %v9344_v26, %v20896_v63  ;;  %v10137_v9 = vpop.f32.mrf.mxu0  ;;  %v10763_v13 = vmax.f32 %v10635_v17, 0.0  ;;  %v20901_v32 = vld [vmem:[#allocation203_spill] sm:$0xff] }
 0x55e   : > { %v10897_v31 = vadd.f32 %v10896_v43, %v10759_v50  ;;  %v13866_v34 = vpop.f32.mrf.mxu1 }
 0x55f   : > { %v10761_v8 = vmax.f32 %v10633_v28, 0.0  ;;  %v10501_v2 = vadd.f32 %v10134_v56, %v9711_v4  ;;  %v9714_v19 = vadd.f32 %v13866_v34, %v20897_v20  ;;  %v13999_v24 = vpop.f32.mrf.mxu0  ;;  %v10638_v52 = vadd.f32 %v18893_v40, %v10503_v15 }
 0x560   : > { %v10898_v41 = vadd.f32 %v10897_v31, %v10760_v37  ;;  %v9347_v36 = vpop.f32.mrf.mxu1 }
 0x561   : > { %v10504_v12 = vadd.f32 %v13996_v29, %v9714_v19  ;;  %v9712_v39 = vadd.f32 %v9347_v36, %v20898_v23  ;;  %v10150_v44 = vpop.f32.mrf.mxu0  ;;  %v10636_v10 = vadd.f32 %v18893_v40, %v10501_v2  ;;  %v10766_v43 = vmax.f32 %v10638_v52, 0.0  ;;  %v20904_v23 = vld [vmem:[#allocation240_spill] sm:$0xff] }
 0x562   : > { %v10899_v21 = vadd.f32 %v10898_v41, %v10761_v8  ;;  %v13869_v1 = vpop.f32.mrf.mxu1  ;;  %v20903_v8 = vld [vmem:[#allocation210_spill] sm:$0xff] }
 0x563   : > { %v10502_v7 = vadd.f32 %v10137_v9, %v9712_v39  ;;  %v9717_v49 = vadd.f32 %v13869_v1, %v20899_v16  ;;  %v14000_v51 = vpop.f32.mrf.mxu0  ;;  %v10764_v56 = vmax.f32 %v10636_v10, 0.0  ;;  %v10639_v53 = vadd.f32 %v18893_v40, %v10504_v12  ;;  %v20902_v9 = vld [vmem:[#allocation206_spill] sm:$0xff] }
 0x564   : > { %v10900_v38 = vadd.f32 %v10899_v21, %v10762_v42  ;;  %v9360_v54 = vpop.f32.mrf.mxu1 }
 0x565   : > { %v10637_v58 = vadd.f32 %v18893_v40, %v10502_v7  ;;  %v10507_v6 = vadd.f32 %v13999_v24, %v9717_v49  ;;  %v9715_v14 = vadd.f32 %v9360_v54, %v20900_v11  ;;  %v10153_v25 = vpop.f32.mrf.mxu0  ;;  %v10767_v31 = vmax.f32 %v10639_v53, 0.0  ;;  %v20905_v49 = vld [vmem:[#allocation220_spill] sm:$0xff] }
 0x566   : > { %v10901_v59 = vadd.f32 %v10900_v38, %v10763_v13  ;;  %v13870_v61 = vpop.f32.mrf.mxu1 }
 0x567   : > { %v10765_v60 = vmax.f32 %v10637_v58, 0.0  ;;  %v10505_v57 = vadd.f32 %v10150_v44, %v9715_v14  ;;  %v9718_v35 = vadd.f32 %v13870_v61, %v20901_v32  ;;  %v14003_v45 = vpop.f32.mrf.mxu0  ;;  %v10642_v21 = vadd.f32 %v18893_v40, %v10507_v6  ;;  %v20906_v14 = vld [vmem:[#allocation226_spill] sm:$0xff]  ;;  %v20907_v32 = vld [vmem:[#allocation217_spill] sm:$0xff] }
 0x568   : > { %v10902_v29 = vrot.slane %v10901_v59, 4  ;;  %v9363_v50 = vpop.f32.mrf.mxu1 }
 0x569   : > { %v10908_v26 = vadd.f32 %v10765_v60, %v10764_v56  ;;  %v10640_v28 = vadd.f32 %v18893_v40, %v10505_v57  ;;  %v10508_v15 = vadd.f32 %v14000_v51, %v9718_v35  ;;  %v10166_v63 = vpop.f32.mrf.mxu0  ;;  %v9716_v33 = vadd.f32 %v9363_v50, %v20902_v9 }
 0x56a   : > { %v10903_v4 = vadd.f32 %v10902_v29, %v10901_v59  ;;  %v13873_v37 = vpop.f32.mrf.mxu1  ;;  %v10770_v6 = vmax.f32 %v10642_v21, 0.0 }
 0x56b   : > { %v10909_v34 = vadd.f32 %v10908_v26, %v10766_v43  ;;  %v9721_v2 = vadd.f32 %v13873_v37, %v20903_v8  ;;  %v14004_v20 = vpop.f32.mrf.mxu0  ;;  %v10506_v24 = vadd.f32 %v10153_v25, %v9716_v33  ;;  %v10768_v17 = vmax.f32 %v10640_v28, 0.0 }
 0x56c   : > { %v10904_v19 = vrot.slane %v10903_v4, 2  ;;  %v9376_v41 = vpop.f32.mrf.mxu1  ;;  %v10643_v54 = vadd.f32 %v18893_v40, %v10508_v15 }
 0x56d   : > { %v10910_v36 = vadd.f32 %v10909_v34, %v10767_v31  ;;  %v10511_v12 = vadd.f32 %v14003_v45, %v9721_v2  ;;  %v9719_v39 = vadd.f32 %v9376_v41, %v20904_v23  ;;  %v10169_v44 = vpop.f32.mrf.mxu0  ;;  %v10641_v10 = vadd.f32 %v18893_v40, %v10506_v24  ;;  %v20910_v23 = vld [vmem:[#allocation235_spill] sm:$0xff] }
 0x56e   : > { %v10905_v42 = vadd.f32 %v10904_v19, %v10903_v4  ;;  %v13874_v1 = vpop.f32.mrf.mxu1  ;;  %v10771_v50 = vmax.f32 %v10643_v54, 0.0 }
 0x56f   : > { %v10911_v7 = vadd.f32 %v10910_v36, %v10768_v17  ;;  %v10509_v16 = vadd.f32 %v10166_v63, %v9719_v39  ;;  %v9722_v51 = vadd.f32 %v13874_v1, %v20905_v49  ;;  %v14007_v13 = vpop.f32.mrf.mxu0  ;;  %v10769_v52 = vmax.f32 %v10641_v10, 0.0  ;;  %v20908_v63 = vld [vmem:[#allocation238_spill] sm:$0xff] }
 0x570   : > { %v10906_v38 = vrot.slane %v10905_v42, 1  ;;  %v9379_v58 = vpop.f32.mrf.mxu1  ;;  %v10646_v33 = vadd.f32 %v18893_v40, %v10511_v12 }
 0x571   : > { %v10512_v11 = vadd.f32 %v14004_v20, %v9722_v51  ;;  %v9720_v25 = vadd.f32 %v9379_v58, %v20906_v14  ;;  %v10182_v59 = vpop.f32.mrf.mxu0  ;;  %v10912_v61 = vadd.f32 %v10911_v7, %v10769_v52  ;;  %v10644_v53 = vadd.f32 %v18893_v40, %v10509_v16  ;;  %v20909_v20 = vld [vmem:[#allocation225_spill] sm:$0xff]  ;;  %v20911_v7 = vld [vmem:[#allocation251_spill] sm:$0xff]  ;;  %v20912_v58 = vld [vmem:[#allocation228_spill] sm:$0xff] }
 0x572   : > { %v10907_v56 = vadd.f32 %v10906_v38, %v10905_v42  ;;  %v13877_v60 = vpop.f32.mrf.mxu1  ;;  %v10774_v42 = vmax.f32 %v10646_v33, 0.0 }
 0x573   : > { %v10510_v57 = vadd.f32 %v10169_v44, %v9720_v25  ;;  %v9725_v35 = vadd.f32 %v13877_v60, %v20907_v32  ;;  %v14008_v45 = vpop.f32.mrf.mxu0  ;;  %v10913_v43 = vadd.f32 %v10912_v61, %v10770_v6  ;;  %v10772_v37 = vmax.f32 %v10644_v53, 0.0  ;;  %v19112_v25 = vld [vmem:[%s19346_s2] ss:$0 sm:$0xff] }
 0x574   : > { %v19097_v29 = vsel %vm11023_vm9, %v10907_v56, %v19062_v22  ;;  %v9392_v26 = vpop.f32.mrf.mxu1  ;;  %v10647_v41 = vadd.f32 %v18893_v40, %v10512_v11 }
 0x575   : > { %v10645_v28 = vadd.f32 %v18893_v40, %v10510_v57  ;;  %v10515_v15 = vadd.f32 %v14007_v13, %v9725_v35  ;;  %v9723_v4 = vadd.f32 %v9392_v26, %v20908_v63  ;;  %v10185_v9 = vpop.f32.mrf.mxu0  ;;  %v10914_v31 = vadd.f32 %v10913_v43, %v10771_v50  ;;  %v20913_v57 = vld [vmem:[#allocation233_spill] sm:$0xff] }
 0x576   : > { %v13878_v34 = vpop.f32.mrf.mxu1  ;;  %v10775_v51 = vmax.f32 %v10647_v41, 0.0  ;;  %v20914_v26 = vld [vmem:[#allocation245_spill] sm:$0xff] }
 0x577   : > { %v10773_v8 = vmax.f32 %v10645_v28, 0.0  ;;  %v10513_v2 = vadd.f32 %v10182_v59, %v9723_v4  ;;  %v9726_v19 = vadd.f32 %v13878_v34, %v20909_v20  ;;  %v14011_v22 = vpop.f32.mrf.mxu0  ;;  %v10915_v24 = vadd.f32 %v10914_v31, %v10772_v37  ;;  %v20915_v31 = vld [vmem:[#allocation236_spill] sm:$0xff] }
 0x578   : > { %v9395_v17 = vpop.f32.mrf.mxu1  ;;  %v10650_v59 = vadd.f32 %v19112_v25, %v10515_v15 }
 0x579   : > { %v10516_v36 = vadd.f32 %v14008_v45, %v9726_v19  ;;  %v9724_v39 = vadd.f32 %v9395_v17, %v20910_v23  ;;  %v10198_v44 = vpop.f32.mrf.mxu0  ;;  %v10916_v21 = vadd.f32 %v10915_v24, %v10773_v8  ;;  %v10648_v12 = vadd.f32 %v18893_v40, %v10513_v2  ;;  %v20916_v17 = vld [vmem:[#allocation39_spill] sm:$0xff] }
 0x57a   : > { %v13881_v10 = vpop.f32.mrf.mxu1  ;;  %v10778_v4 = vmax.f32 %v10650_v59, 0.0 }
 0x57b   : > { %v10514_v1 = vadd.f32 %v10185_v9, %v9724_v39  ;;  %v9729_v16 = vadd.f32 %v13881_v10, %v20911_v7  ;;  %v14012_v49 = vpop.f32.mrf.mxu0  ;;  %v10917_v13 = vadd.f32 %v10916_v21, %v10774_v42  ;;  %v10776_v56 = vmax.f32 %v10648_v12, 0.0 }
 0x57c   : > { %v9408_v38 = vpop.f32.mrf.mxu1  ;;  %v10651_v45 = vadd.f32 %v19112_v25, %v10516_v36 }
 0x57d   : > { %v10649_v54 = vadd.f32 %v18893_v40, %v10514_v1  ;;  %v10519_v52 = vadd.f32 %v14011_v22, %v9729_v16  ;;  %v9727_v11 = vadd.f32 %v9408_v38, %v20912_v58  ;;  %v10201_v14 = vpop.f32.mrf.mxu0  ;;  %v10918_v6 = vadd.f32 %v10917_v13, %v10775_v51  ;;  %v20917_v1 = vld [vmem:[#allocation239_spill] sm:$0xff] }
 0x57e   : > { %v13882_v61 = vpop.f32.mrf.mxu1  ;;  %v10779_v2 = vmax.f32 %v10651_v45, 0.0 }
 0x57f   : > { %v10777_v53 = vmax.f32 %v10649_v54, 0.0  ;;  %v10517_v60 = vadd.f32 %v10198_v44, %v9727_v11  ;;  %v9730_v32 = vadd.f32 %v13882_v61, %v20913_v57  ;;  %v14015_v35 = vpop.f32.mrf.mxu0  ;;  %v10919_v40 = vadd.f32 %v10918_v6, %v10776_v56 }
 0x580   : > { %v9411_v50 = vpop.f32.mrf.mxu1  ;;  %v10654_v22 = vadd.f32 %v19112_v25, %v10519_v52 }
 0x581   : > { %v10520_v43 = vadd.f32 %v14012_v49, %v9730_v32  ;;  %v9728_v28 = vadd.f32 %v9411_v50, %v20914_v26  ;;  %v10214_v63 = vpop.f32.mrf.mxu0  ;;  %v10920_v9 = vadd.f32 %v10919_v40, %v10777_v53  ;;  %v10652_v15 = vadd.f32 %v19112_v25, %v10517_v60  ;;  %v20919_v53 = vld [vmem:[#allocation253_spill] sm:$0xff]  ;;  %v20920_v26 = vld [vmem:[#allocation259_spill] sm:$0xff] }
 0x582   : > { %v13885_v33 = vpop.f32.mrf.mxu1  ;;  %v10782_v13 = vmax.f32 %v10654_v22, 0.0 }
 0x583   : > { %v10518_v37 = vadd.f32 %v10201_v14, %v9728_v28  ;;  %v9733_v34 = vadd.f32 %v13885_v33, %v20915_v31  ;;  %v14016_v8 = vpop.f32.mrf.mxu0  ;;  %v10921_v20 = vadd.f32 %v10920_v9, %v10778_v4  ;;  %v10780_v44 = vmax.f32 %v10652_v15, 0.0  ;;  %v20918_v14 = vld [vmem:[#allocation247_spill] sm:$0xff] }
 0x584   : > { %v9424_v19 = vpop.f32.mrf.mxu1  ;;  %v10655_v21 = vadd.f32 %v19112_v25, %v10520_v43 }
 0x585   : > { %v10653_v24 = vadd.f32 %v19112_v25, %v10518_v37  ;;  %v10523_v41 = vadd.f32 %v14015_v35, %v9733_v34  ;;  %v9731_v36 = vadd.f32 %v9424_v19, %v20916_v17  ;;  %v10217_v23 = vpop.f32.mrf.mxu0  ;;  %v10922_v39 = vadd.f32 %v10921_v20, %v10779_v2  ;;  %v20921_v34 = vld [vmem:[#allocation243_spill] sm:$0xff] }
 0x586   : > { %v13886_v42 = vpop.f32.mrf.mxu1  ;;  %v10783_v6 = vmax.f32 %v10655_v21, 0.0 }
 0x587   : > { %v10781_v12 = vmax.f32 %v10653_v24, 0.0  ;;  %v10521_v10 = vadd.f32 %v10214_v63, %v9731_v36  ;;  %v9734_v7 = vadd.f32 %v13886_v42, %v20917_v1  ;;  %v14019_v16 = vpop.f32.mrf.mxu0  ;;  %v10923_v49 = vrot.slane %v10922_v39, 4  ;;  %v20922_v36 = vld [vmem:[#allocation254_spill] sm:$0xff] }
 0x588   : > { %v9427_v51 = vpop.f32.mrf.mxu1  ;;  %v10658_v9 = vadd.f32 %v19112_v25, %v10523_v41  ;;  %v20923_v1 = vld [vmem:[#allocation262_spill] sm:$0xff] }
 0x589   : > { %v10929_v38 = vadd.f32 %v10781_v12, %v10780_v44  ;;  %v10656_v54 = vadd.f32 %v19112_v25, %v10521_v10  ;;  %v10524_v52 = vadd.f32 %v14016_v8, %v9734_v7  ;;  %v10230_v58 = vpop.f32.mrf.mxu0  ;;  %v10924_v11 = vadd.f32 %v10923_v49, %v10922_v39 }
 0x58a   : > { %v9732_v59 = vadd.f32 %v9427_v51, %v20918_v14  ;;  %v13889_v56 = vpop.f32.mrf.mxu1  ;;  %v10786_v41 = vmax.f32 %v10658_v9, 0.0 }
 0x58b   : > { %v10930_v61 = vadd.f32 %v10929_v38, %v10782_v13  ;;  %v9737_v60 = vadd.f32 %v13889_v56, %v20919_v53  ;;  %v14020_v57 = vpop.f32.mrf.mxu0  ;;  %v10925_v32 = vrot.slane %v10924_v11, 2  ;;  %v10784_v45 = vmax.f32 %v10656_v54, 0.0 }
 0x58c   : > { %v10522_v35 = vadd.f32 %v10217_v23, %v9732_v59  ;;  %v9440_v40 = vpop.f32.mrf.mxu1  ;;  %v10659_v19 = vadd.f32 %v19112_v25, %v10524_v52 }
 0x58d   : > { %v10931_v50 = vadd.f32 %v10930_v61, %v10783_v6  ;;  %v10527_v43 = vadd.f32 %v14019_v16, %v9737_v60  ;;  %v9735_v28 = vadd.f32 %v9440_v40, %v20920_v26  ;;  %v10233_v63 = vpop.f32.mrf.mxu0  ;;  %v10926_v4 = vadd.f32 %v10925_v32, %v10924_v11  ;;  %v20926_v26 = vld [vmem:[#allocation264_spill] sm:$0xff] }
 0x58e   : > { %v10657_v15 = vadd.f32 %v19112_v25, %v10522_v35  ;;  %v13890_v33 = vpop.f32.mrf.mxu1  ;;  %v10787_v51 = vmax.f32 %v10659_v19, 0.0 }
 0x58f   : > { %v10932_v37 = vadd.f32 %v10931_v50, %v10784_v45  ;;  %v10525_v31 = vadd.f32 %v10230_v58, %v9735_v28  ;;  %v9738_v8 = vadd.f32 %v13890_v33, %v20921_v34  ;;  %v14023_v2 = vpop.f32.mrf.mxu0  ;;  %v10927_v20 = vrot.slane %v10926_v4, 1  ;;  %v20924_v58 = vld [vmem:[#allocation246_spill] sm:$0xff] }
 0x590   : > { %v10785_v22 = vmax.f32 %v10657_v15, 0.0  ;;  %v9443_v24 = vpop.f32.mrf.mxu1  ;;  %v10662_v59 = vadd.f32 %v19112_v25, %v10527_v43 }
 0x591   : > { %v10528_v17 = vadd.f32 %v14020_v57, %v9738_v8  ;;  %v9736_v23 = vadd.f32 %v9443_v24, %v20922_v36  ;;  %v10246_v39 = vpop.f32.mrf.mxu0  ;;  %v10928_v44 = vadd.f32 %v10927_v20, %v10926_v4  ;;  %v10660_v21 = vadd.f32 %v19112_v25, %v10525_v31  ;;  %v20925_v57 = vld [vmem:[#allocation249_spill] sm:$0xff]  ;;  %v20928_v24 = vld [vmem:[#allocation256_spill] sm:$0xff] }
 0x592   : > { %v10933_v42 = vadd.f32 %v10932_v37, %v10785_v22  ;;  %v13893_v12 = vpop.f32.mrf.mxu1  ;;  %v10790_v4 = vmax.f32 %v10662_v59, 0.0  ;;  %v20927_v37 = vld [vmem:[#allocation252_spill] sm:$0xff] }
 0x593   : > { %v10526_v10 = vadd.f32 %v10233_v63, %v9736_v23  ;;  %v9741_v7 = vadd.f32 %v13893_v12, %v20923_v1  ;;  %v14024_v16 = vpop.f32.mrf.mxu0  ;;  %v19137_v49 = vsel %vm11025_vm10, %v10928_v44, %v19097_v29  ;;  %v10788_v56 = vmax.f32 %v10660_v21, 0.0  ;;  %v20929_v12 = vld [vmem:[#allocation255_spill] sm:$0xff] }
 0x594   : > { %v10934_v13 = vadd.f32 %v10933_v42, %v10786_v41  ;;  %v9456_v38 = vpop.f32.mrf.mxu1  ;;  %v10663_v40 = vadd.f32 %v19112_v25, %v10528_v17 }
 0x595   : > { %v10661_v54 = vadd.f32 %v19112_v25, %v10526_v10  ;;  %v10531_v52 = vadd.f32 %v14023_v2, %v9741_v7  ;;  %v9739_v11 = vadd.f32 %v9456_v38, %v20924_v58  ;;  %v10249_v14 = vpop.f32.mrf.mxu0  ;;  %v20930_v38 = vld [vmem:[#allocation265_spill] sm:$0xff] }
 0x596   : > { %v10935_v6 = vadd.f32 %v10934_v13, %v10787_v51  ;;  %v13894_v61 = vpop.f32.mrf.mxu1  ;;  %v10791_v8 = vmax.f32 %v10663_v40, 0.0  ;;  %v20931_v40 = vld [vmem:[#allocation268_spill] sm:$0xff] }
 0x597   : > { %v10789_v53 = vmax.f32 %v10661_v54, 0.0  ;;  %v10529_v60 = vadd.f32 %v10246_v39, %v9739_v11  ;;  %v9742_v32 = vadd.f32 %v13894_v61, %v20925_v57  ;;  %v14027_v29 = vpop.f32.mrf.mxu0  ;;  %v10666_v23 = vadd.f32 %v19112_v25, %v10531_v52 }
 0x598   : > { %v10936_v35 = vadd.f32 %v10935_v6, %v10788_v56  ;;  %v9459_v45 = vpop.f32.mrf.mxu1 }
 0x599   : > { %v10532_v50 = vadd.f32 %v14024_v16, %v9742_v32  ;;  %v9740_v28 = vadd.f32 %v9459_v45, %v20926_v26  ;;  %v10262_v63 = vpop.f32.mrf.mxu0  ;;  %v10664_v43 = vadd.f32 %v19112_v25, %v10529_v60  ;;  %v10794_v11 = vmax.f32 %v10666_v23, 0.0 }
 0x59a   : > { %v10937_v9 = vadd.f32 %v10936_v35, %v10789_v53  ;;  %v13897_v15 = vpop.f32.mrf.mxu1 }
 0x59b   : > { %v10530_v33 = vadd.f32 %v10249_v14, %v9740_v28  ;;  %v9745_v31 = vadd.f32 %v13897_v15, %v20927_v37  ;;  %v14028_v34 = vpop.f32.mrf.mxu0  ;;  %v10792_v39 = vmax.f32 %v10664_v43, 0.0  ;;  %v10667_v16 = vadd.f32 %v19112_v25, %v10532_v50 }
 0x59c   : > { %v10938_v2 = vadd.f32 %v10937_v9, %v10790_v4  ;;  %v9472_v20 = vpop.f32.mrf.mxu1 }
 0x59d   : > { %v10665_v19 = vadd.f32 %v19112_v25, %v10530_v33  ;;  %v10535_v22 = vadd.f32 %v14027_v29, %v9745_v31  ;;  %v9743_v17 = vadd.f32 %v9472_v20, %v20928_v24  ;;  %v10265_v36 = vpop.f32.mrf.mxu0  ;;  %v10795_v53 = vmax.f32 %v10667_v16, 0.0  ;;  %v20933_v24 = vld [vmem:[#allocation261_spill] sm:$0xff] }
 0x59e   : > { %v10939_v44 = vadd.f32 %v10938_v2, %v10791_v8  ;;  %v13898_v41 = vpop.f32.mrf.mxu1 }
 0x59f   : > { %v10793_v42 = vmax.f32 %v10665_v19, 0.0  ;;  %v10533_v21 = vadd.f32 %v10262_v63, %v9743_v17  ;;  %v9746_v10 = vadd.f32 %v13898_v41, %v20929_v12  ;;  %v14031_v1 = vpop.f32.mrf.mxu0  ;;  %v10670_v32 = vadd.f32 %v19112_v25, %v10535_v22 }
 0x5a0   : > { %v10940_v7 = vadd.f32 %v10939_v44, %v10792_v39  ;;  %v9475_v51 = vpop.f32.mrf.mxu1  ;;  %v20934_v44 = vld [vmem:[#allocation12_spill] sm:$0xff] }
 0x5a1   : > { %v10536_v13 = vadd.f32 %v14028_v34, %v9746_v10  ;;  %v9744_v54 = vadd.f32 %v9475_v51, %v20930_v38  ;;  %v10278_v58 = vpop.f32.mrf.mxu0  ;;  %v10668_v52 = vadd.f32 %v19112_v25, %v10533_v21  ;;  %v10798_v34 = vmax.f32 %v10670_v32, 0.0  ;;  %v20935_v51 = vld [vmem:[#allocation263_spill] sm:$0xff] }
 0x5a2   : > { %v10941_v14 = vadd.f32 %v10940_v7, %v10793_v42  ;;  %v13901_v59 = vpop.f32.mrf.mxu1 }
 0x5a3   : > { %v10534_v56 = vadd.f32 %v10265_v36, %v9744_v54  ;;  %v9749_v6 = vadd.f32 %v13901_v59, %v18626_v18  ;;  %v14032_v61 = vpop.f32.mrf.mxu0  ;;  %v10796_v28 = vmax.f32 %v10668_v52, 0.0  ;;  %v10671_v4 = vadd.f32 %v19112_v25, %v10536_v13  ;;  %v20932_v18 = vld [vmem:[#allocation269_spill] sm:$0xff] }
 0x5a4   : > { %v10942_v60 = vadd.f32 %v10941_v14, %v10794_v11  ;;  %v9488_v57 = vpop.f32.mrf.mxu1 }
 0x5a5   : > { %v10669_v29 = vadd.f32 %v19112_v25, %v10534_v56  ;;  %v10539_v35 = vadd.f32 %v14031_v1, %v9749_v6  ;;  %v9747_v45 = vadd.f32 %v9488_v57, %v20931_v40  ;;  %v10281_v50 = vpop.f32.mrf.mxu0  ;;  %v10799_v23 = vmax.f32 %v10671_v4, 0.0  ;;  %v20936_v56 = vld [vmem:[#allocation53_spill] sm:$0xff]  ;;  %v20937_v40 = vld [vmem:[#allocation86_spill] sm:$0xff] }
 0x5a6   : > { %v10943_v26 = vadd.f32 %v10942_v60, %v10795_v53  ;;  %v13902_v63 = vpop.f32.mrf.mxu1 }
 0x5a7   : > { %v10797_v9 = vmax.f32 %v10669_v29, 0.0  ;;  %v10537_v43 = vadd.f32 %v10278_v58, %v9747_v45  ;;  %v9750_v15 = vadd.f32 %v13902_v63, %v20932_v18  ;;  %v14035_v33 = vpop.f32.mrf.mxu0  ;;  %v10674_v58 = vadd.f32 %v19112_v25, %v10539_v35 }
 0x5a8   : > { %v10944_v37 = vrot.slane %v10943_v26, 4  ;;  %v9491_v31 = vpop.f32.mrf.mxu1 }
 0x5a9   : > { %v10950_v8 = vadd.f32 %v10797_v9, %v10796_v28  ;;  %v10672_v2 = vadd.f32 %v19112_v25, %v10537_v43  ;;  %v10540_v20 = vadd.f32 %v14032_v61, %v9750_v15  ;;  %v10294_v19 = vpop.f32.mrf.mxu0  ;;  %v9748_v17 = vadd.f32 %v9491_v31, %v20933_v24  ;;  %v20938_v43 = vld [vmem:[#allocation87_spill] sm:$0xff] }
 0x5aa   : > { %v10945_v22 = vadd.f32 %v10944_v37, %v10943_v26  ;;  %v13905_v36 = vpop.f32.mrf.mxu1  ;;  %v10802_v35 = vmax.f32 %v10674_v58, 0.0 }
 0x5ab   : > { %v10951_v39 = vadd.f32 %v10950_v8, %v10798_v34  ;;  %v9753_v41 = vadd.f32 %v13905_v36, %v20934_v44  ;;  %v14036_v42 = vpop.f32.mrf.mxu0  ;;  %v10538_v12 = vadd.f32 %v10281_v50, %v9748_v17  ;;  %v10800_v1 = vmax.f32 %v10672_v2, 0.0 }
 0x5ac   : > { %v10946_v21 = vrot.slane %v10945_v22, 2  ;;  %v9504_v10 = vpop.f32.mrf.mxu1  ;;  %v10675_v60 = vadd.f32 %v19112_v25, %v10540_v20  ;;  %v20939_v20 = vld [vmem:[#allocation267_spill] sm:$0xff] }
 0x5ad   : > { %v10952_v7 = vadd.f32 %v10951_v39, %v10799_v23  ;;  %v10543_v16 = vadd.f32 %v14035_v33, %v9753_v41  ;;  %v9751_v13 = vadd.f32 %v9504_v10, %v20935_v51  ;;  %v10297_v38 = vpop.f32.mrf.mxu0  ;;  %v10673_v11 = vadd.f32 %v19112_v25, %v10538_v12  ;;  %v20940_v41 = vld [vmem:[#allocation14_spill] sm:$0xff] }
 0x5ae   : > { %v10947_v54 = vadd.f32 %v10946_v21, %v10945_v22  ;;  %v13906_v14 = vpop.f32.mrf.mxu1  ;;  %v10803_v37 = vmax.f32 %v10675_v60, 0.0  ;;  %v20943_v60 = vld [vmem:[#allocation10_spill] sm:$0xff] }
 0x5af   : > { %v10953_v52 = vadd.f32 %v10952_v7, %v10800_v1  ;;  %v10541_v59 = vadd.f32 %v10294_v19, %v9751_v13  ;;  %v9754_v6 = vadd.f32 %v13906_v14, %v20936_v56  ;;  %v14039_v61 = vpop.f32.mrf.mxu0  ;;  %v10801_v57 = vmax.f32 %v10673_v11, 0.0  ;;  %v20941_v7 = vld [vmem:[#allocation266_spill] sm:$0xff] }
 0x5b0   : > { %v10948_v53 = vrot.slane %v10947_v54, 1  ;;  %v9507_v32 = vpop.f32.mrf.mxu1  ;;  %v10678_v24 = vadd.f32 %v19112_v25, %v10543_v16 }
 0x5b1   : > { %v10544_v29 = vadd.f32 %v14036_v42, %v9754_v6  ;;  %v9752_v45 = vadd.f32 %v9507_v32, %v20937_v40  ;;  %v10310_v50 = vpop.f32.mrf.mxu0  ;;  %v10954_v28 = vadd.f32 %v10953_v52, %v10801_v57  ;;  %v10676_v63 = vadd.f32 %v19112_v25, %v10541_v59 }
 0x5b2   : > { %v10949_v26 = vadd.f32 %v10948_v53, %v10947_v54  ;;  %v13909_v4 = vpop.f32.mrf.mxu1 }
 0x5b3   : > { %v10542_v9 = vadd.f32 %v10297_v38, %v9752_v45  ;;  %v9757_v18 = vadd.f32 %v13909_v4, %v20938_v43  ;;  %v14040_v15 = vpop.f32.mrf.mxu0  ;;  %v10955_v31 = vadd.f32 %v10954_v28, %v10802_v35  ;;  %v10804_v17 = vmax.f32 %v10676_v63, 0.0  ;;  %v20944_v28 = vld [vmem:[#allocation80_spill] sm:$0xff] }
 0x5b4   : > { %v19172_v33 = vsel %vm11027_vm11, %v10949_v26, %v19137_v49  ;;  %v9520_v34 = vpop.f32.mrf.mxu1  ;;  %v10679_v12 = vadd.f32 %v19112_v25, %v10544_v29  ;;  %v10806_v38 = vmax.f32 %v10678_v24, 0.0 }
 0x5b5   : > { %v10677_v8 = vadd.f32 %v19112_v25, %v10542_v9  ;;  %v10547_v2 = vadd.f32 %v14039_v61, %v9757_v18  ;;  %v9755_v19 = vadd.f32 %v9520_v34, %v20939_v20  ;;  %v10313_v22 = vpop.f32.mrf.mxu0  ;;  %v10956_v36 = vadd.f32 %v10955_v31, %v10803_v37  ;;  %v20942_v61 = vld [vmem:[#allocation16_spill] sm:$0xff] }
 0x5b6   : > { %v13910_v23 = vpop.f32.mrf.mxu1  ;;  %v10807_v52 = vmax.f32 %v10679_v12, 0.0 }
 0x5b7   : > { %v10805_v39 = vmax.f32 %v10677_v8, 0.0  ;;  %v10545_v44 = vadd.f32 %v10310_v50, %v9755_v19  ;;  %v9758_v42 = vadd.f32 %v13910_v23, %v20940_v41  ;;  %v14043_v49 = vpop.f32.mrf.mxu0  ;;  %v10957_v21 = vadd.f32 %v10956_v36, %v10804_v17 }
 0x5b8   : > { %v9523_v10 = vpop.f32.mrf.mxu1  ;;  %v10682_v29 = vadd.f32 %v19112_v25, %v10547_v2 }
 0x5b9   : > { %v10548_v1 = vadd.f32 %v14040_v15, %v9758_v42  ;;  %v9756_v51 = vadd.f32 %v9523_v10, %v20941_v7  ;;  %v10326_v13 = vpop.f32.mrf.mxu0  ;;  %v10958_v54 = vadd.f32 %v10957_v21, %v10805_v39  ;;  %v10680_v16 = vadd.f32 %v19112_v25, %v10545_v44 }
 0x5ba   : > { %v13913_v58 = vpop.f32.mrf.mxu1  ;;  %v10810_v34 = vmax.f32 %v10682_v29, 0.0 }
 0x5bb   : > { %v10546_v11 = vadd.f32 %v10313_v22, %v9756_v51  ;;  %v14044_v14 = vpop.f32.mrf.mxu0  ;;  %v10959_v59 = vadd.f32 %v10958_v54, %v10806_v38  ;;  %v9761_v53 = vadd.f32 %v13913_v58, %v20942_v61  ;;  %v10808_v40 = vmax.f32 %v10680_v16, 0.0  ;;  %v20945_v38 = vld [vmem:[#allocation92_spill] sm:$0xff] }
 0x5bc   : > { %v9536_v56 = vpop.f32.mrf.mxu1  ;;  %v10683_v43 = vadd.f32 %v19112_v25, %v10548_v1 }
 0x5bd   : > { %v10681_v6 = vadd.f32 %v19112_v25, %v10546_v11  ;;  %v9759_v57 = vadd.f32 %v9536_v56, %v20943_v60  ;;  %v10329_v32 = vpop.f32.mrf.mxu0  ;;  %v10960_v45 = vadd.f32 %v10959_v59, %v10807_v52  ;;  %v10551_v15 = vadd.f32 %v14043_v49, %v9761_v53  ;;  %v20946_v59 = vld [vmem:[#allocation93_spill] sm:$0xff] }
 0x5be   : > { %v13914_v50 = vpop.f32.mrf.mxu1  ;;  %v10811_v17 = vmax.f32 %v10683_v43, 0.0  ;;  %v20948_v43 = vld [vmem:[#allocation121_spill] sm:$0xff] }
 0x5bf   : > { %v10809_v26 = vmax.f32 %v10681_v6, 0.0  ;;  %v10549_v35 = vadd.f32 %v10326_v13, %v9759_v57  ;;  %v9762_v63 = vadd.f32 %v13914_v50, %v20944_v28  ;;  %v14047_v4 = vpop.f32.mrf.mxu0  ;;  %v10961_v9 = vadd.f32 %v10960_v45, %v10808_v40 }
 0x5c0   : > { %v9539_v18 = vpop.f32.mrf.mxu1  ;;  %v10686_v39 = vadd.f32 %v19112_v25, %v10551_v15 }
 0x5c1   : > { %v9760_v37 = vadd.f32 %v9539_v18, %v18710_v62  ;;  %v10342_v31 = vpop.f32.mrf.mxu0  ;;  %v10962_v8 = vadd.f32 %v10961_v9, %v10809_v26  ;;  %v10684_v2 = vadd.f32 %v19112_v25, %v10549_v35  ;;  %v10552_v19 = vadd.f32 %v14044_v14, %v9762_v63  ;;  %v20947_v35 = vld [vmem:[#allocation18_spill] sm:$0xff] }
 0x5c2   : > { %v13917_v20 = vpop.f32.mrf.mxu1  ;;  %v10814_v58 = vmax.f32 %v10686_v39, 0.0 }
 0x5c3   : > { %v10550_v22 = vadd.f32 %v10329_v32, %v9760_v37  ;;  %v14048_v24 = vpop.f32.mrf.mxu0  ;;  %v10963_v36 = vadd.f32 %v10962_v8, %v10810_v34  ;;  %v9765_v41 = vadd.f32 %v13917_v20, %v18715_v55  ;;  %v10812_v12 = vmax.f32 %v10684_v2, 0.0 }
 0x5c4   : > { %v9552_v23 = vpop.f32.mrf.mxu1  ;;  %v10687_v10 = vadd.f32 %v19112_v25, %v10552_v19  ;;  %v20949_v19 = vld [vmem:[#allocation124_spill] sm:$0xff] }
 0x5c5   : > { %v10685_v44 = vadd.f32 %v19112_v25, %v10550_v22  ;;  %v9763_v62 = vadd.f32 %v9552_v23, %v18718_v3  ;;  %v10345_v42 = vpop.f32.mrf.mxu0  ;;  %v10964_v49 = vadd.f32 %v10963_v36, %v10811_v17  ;;  %v10555_v14 = vadd.f32 %v14047_v4, %v9765_v41  ;;  %v20950_v36 = vld [vmem:[#allocation20_spill] sm:$0xff] }
 0x5c6   : > { %v13918_v21 = vpop.f32.mrf.mxu1  ;;  %v10815_v61 = vmax.f32 %v10687_v10, 0.0 }
 0x5c7   : > { %v10813_v1 = vmax.f32 %v10685_v44, 0.0  ;;  %v10553_v7 = vadd.f32 %v10342_v31, %v9763_v62  ;;  %v14051_v51 = vpop.f32.mrf.mxu0  ;;  %v10965_v13 = vrot.slane %v10964_v49, 4  ;;  %v9766_v54 = vadd.f32 %v13918_v21, %v20945_v38 }
 0x5c8   : > { %v9555_v16 = vpop.f32.mrf.mxu1  ;;  %v10690_v45 = vadd.f32 %v19112_v25, %v10555_v14 }
 0x5c9   : > { %v10971_v11 = vadd.f32 %v10813_v1, %v10812_v12  ;;  %v10688_v55 = vadd.f32 %v19112_v25, %v10553_v7  ;;  %v10358_v52 = vpop.f32.mrf.mxu0  ;;  %v10966_v3 = vadd.f32 %v10965_v13, %v10964_v49  ;;  %v9764_v56 = vadd.f32 %v9555_v16, %v20946_v59  ;;  %v20951_v16 = vld [vmem:[#allocation90_spill] sm:$0xff] }
 0x5ca   : > { %v13921_v6 = vpop.f32.mrf.mxu1  ;;  %v10556_v32 = vadd.f32 %v14048_v24, %v9766_v54  ;;  %v10818_v17 = vmax.f32 %v10690_v45, 0.0 }
 0x5cb   : > { %v10972_v53 = vadd.f32 %v10971_v11, %v10814_v58  ;;  %v14052_v60 = vpop.f32.mrf.mxu0  ;;  %v10967_v57 = vrot.slane %v10966_v3, 2  ;;  %v10554_v29 = vadd.f32 %v10345_v42, %v9764_v56  ;;  %v10816_v50 = vmax.f32 %v10688_v55, 0.0 }
 0x5cc   : > { %v9568_v40 = vpop.f32.mrf.mxu1  ;;  %v9769_v18 = vadd.f32 %v13921_v6, %v20948_v43  ;;  %v10691_v20 = vadd.f32 %v19112_v25, %v10556_v32 }
 0x5cd   : > { %v10973_v26 = vadd.f32 %v10972_v53, %v10815_v61  ;;  %v9767_v28 = vadd.f32 %v9568_v40, %v20947_v35  ;;  %v10361_v63 = vpop.f32.mrf.mxu0  ;;  %v10968_v4 = vadd.f32 %v10967_v57, %v10966_v3  ;;  %v10689_v9 = vadd.f32 %v19112_v25, %v10554_v29  ;;  %v20954_v29 = vld [vmem:[#allocation127_spill] sm:$0xff] }
 0x5ce   : > { %v13922_v15 = vpop.f32.mrf.mxu1  ;;  %v10559_v62 = vadd.f32 %v14051_v51, %v9769_v18  ;;  %v10819_v1 = vmax.f32 %v10691_v20, 0.0 }
 0x5cf   : > { %v10974_v37 = vadd.f32 %v10973_v26, %v10816_v50  ;;  %v10557_v31 = vadd.f32 %v10358_v52, %v9767_v28  ;;  %v14055_v34 = vpop.f32.mrf.mxu0  ;;  %v10969_v8 = vrot.slane %v10968_v4, 1  ;;  %v10817_v2 = vmax.f32 %v10689_v9, 0.0  ;;  %v20952_v52 = vld [vmem:[#allocation88_spill] sm:$0xff] }
 0x5d0   : > { %v9770_v22 = vadd.f32 %v13922_v15, %v20949_v19  ;;  %v9571_v24 = vpop.f32.mrf.mxu1  ;;  %v10694_v14 = vadd.f32 %v19112_v25, %v10559_v62 }
 0x5d1   : > { %v9768_v23 = vadd.f32 %v9571_v24, %v20950_v36  ;;  %v10374_v39 = vpop.f32.mrf.mxu0  ;;  %v10970_v44 = vadd.f32 %v10969_v8, %v10968_v4  ;;  %v10975_v41 = vadd.f32 %v10974_v37, %v10817_v2  ;;  %v10692_v42 = vadd.f32 %v19112_v25, %v10557_v31  ;;  %v20955_v8 = vld [vmem:[#allocation81_spill] sm:$0xff]  ;;  %v20956_v2 = vld [vmem:[#allocation22_spill] sm:$0xff] }
 0x5d2   : > { %v13925_v49 = vpop.f32.mrf.mxu1  ;;  %v10560_v13 = vadd.f32 %v14052_v60, %v9770_v22  ;;  %v20953_v60 = vld [vmem:[#allocation98_spill] sm:$0xff]  ;;  %v10822_v50 = vmax.f32 %v10694_v14, 0.0 }
 0x5d3   : > { %v10558_v21 = vadd.f32 %v10361_v63, %v9768_v23  ;;  %v14056_v12 = vpop.f32.mrf.mxu0  ;;  %v19206_v10 = vsel %vm11029_vm12, %v10970_v44, %v19172_v33  ;;  %v10976_v7 = vadd.f32 %v10975_v41, %v10818_v17  ;;  %v10820_v51 = vmax.f32 %v10692_v42, 0.0  ;;  %v20957_v44 = vld [vmem:[#allocation9_spill] sm:$0xff] }
 0x5d4   : > { %v9584_v38 = vpop.f32.mrf.mxu1  ;;  %v9773_v3 = vadd.f32 %v13925_v49, %v20952_v52  ;;  %v10695_v53 = vadd.f32 %v19112_v25, %v10560_v13 }
 0x5d5   : > { %v10693_v54 = vadd.f32 %v19112_v25, %v10558_v21  ;;  %v9771_v58 = vadd.f32 %v9584_v38, %v20951_v16  ;;  %v10377_v11 = vpop.f32.mrf.mxu0  ;;  %v10977_v55 = vadd.f32 %v10976_v7, %v10819_v1 }
 0x5d6   : > { %v13926_v59 = vpop.f32.mrf.mxu1  ;;  %v10563_v35 = vadd.f32 %v14055_v34, %v9773_v3  ;;  %v10823_v43 = vmax.f32 %v10695_v53, 0.0 }
 0x5d7   : > { %v10821_v56 = vmax.f32 %v10693_v54, 0.0  ;;  %v10561_v6 = vadd.f32 %v10374_v39, %v9771_v58  ;;  %v14059_v33 = vpop.f32.mrf.mxu0  ;;  %v10978_v61 = vadd.f32 %v10977_v55, %v10820_v51  ;;  %v9774_v57 = vadd.f32 %v13926_v59, %v20953_v60 }
 0x5d8   : > { %v9587_v32 = vpop.f32.mrf.mxu1  ;;  %v10698_v24 = vadd.f32 %v19112_v25, %v10563_v35 }
 0x5d9   : > { %v9772_v40 = vadd.f32 %v9587_v32, %v20954_v29  ;;  %v10390_v45 = vpop.f32.mrf.mxu0  ;;  %v10979_v26 = vadd.f32 %v10978_v61, %v10821_v56  ;;  %v10696_v28 = vadd.f32 %v19112_v25, %v10561_v6  ;;  %v10564_v15 = vadd.f32 %v14056_v12, %v9774_v57 }
 0x5da   : > { %v13929_v63 = vpop.f32.mrf.mxu1  ;;  %v10826_v13 = vmax.f32 %v10698_v24, 0.0 }
 0x5db   : > { %v10562_v4 = vadd.f32 %v10377_v11, %v9772_v40  ;;  %v14060_v9 = vpop.f32.mrf.mxu0  ;;  %v10980_v18 = vadd.f32 %v10979_v26, %v10822_v50  ;;  %v9777_v20 = vadd.f32 %v13929_v63, %v20955_v8  ;;  %v10824_v17 = vmax.f32 %v10696_v28, 0.0 }
 0x5dc   : > { %v9600_v37 = vpop.f32.mrf.mxu1  ;;  %v10699_v49 = vadd.f32 %v19112_v25, %v10564_v15 }
 0x5dd   : > { %v10697_v31 = vadd.f32 %v19112_v25, %v10562_v4  ;;  %v9775_v19 = vadd.f32 %v9600_v37, %v20956_v2  ;;  %v10393_v22 = vpop.f32.mrf.mxu0  ;;  %v10981_v34 = vadd.f32 %v10980_v18, %v10823_v43  ;;  %v10567_v12 = vadd.f32 %v14059_v33, %v9777_v20 }
 0x5de   : > { %v13930_v36 = vpop.f32.mrf.mxu1  ;;  %v10827_v51 = vmax.f32 %v10699_v49, 0.0  ;;  %v20958_v49 = vld [vmem:[#allocation82_spill] sm:$0xff] }
 0x5df   : > { %v10825_v23 = vmax.f32 %v10697_v31, 0.0  ;;  %v10565_v39 = vadd.f32 %v10390_v45, %v9775_v19  ;;  %v9778_v41 = vadd.f32 %v13930_v36, %v20957_v44  ;;  %v14063_v62 = vpop.f32.mrf.mxu0  ;;  %v10982_v42 = vadd.f32 %v10981_v34, %v10824_v17 }
 0x5e0   : > { %v9603_v21 = vpop.f32.mrf.mxu1  ;;  %v10702_v3 = vadd.f32 %v19112_v25, %v10567_v12 }
 0x5e1   : > { %v9776_v1 = vadd.f32 %v9603_v21, %v18799_v47  ;;  %v10406_v7 = vpop.f32.mrf.mxu0  ;;  %v10983_v38 = vadd.f32 %v10982_v42, %v10825_v23  ;;  %v10700_v16 = vadd.f32 %v19112_v25, %v10565_v39  ;;  %v10568_v58 = vadd.f32 %v14060_v9, %v9778_v41 }
 0x5e2   : > { %v13933_v54 = vpop.f32.mrf.mxu1  ;;  %v10830_v26 = vmax.f32 %v10702_v3, 0.0 }
 0x5e3   : > { %v10566_v11 = vadd.f32 %v10393_v22, %v9776_v1  ;;  %v14064_v14 = vpop.f32.mrf.mxu0  ;;  %v10984_v55 = vadd.f32 %v10983_v38, %v10826_v13  ;;  %v9781_v56 = vadd.f32 %v13933_v54, %v18804_v48  ;;  %v10828_v53 = vmax.f32 %v10700_v16, 0.0 }
 0x5e4   : > { %v9616_v52 = vpop.f32.mrf.mxu1  ;;  %v10703_v60 = vadd.f32 %v19112_v25, %v10568_v58 }
 0x5e5   : > { %v10701_v59 = vadd.f32 %v19112_v25, %v10566_v11  ;;  %v9779_v47 = vadd.f32 %v9616_v52, %v18807_v46  ;;  %v10409_v6 = vpop.f32.mrf.mxu0  ;;  %v10985_v33 = vadd.f32 %v10984_v55, %v10827_v51  ;;  %v10571_v28 = vadd.f32 %v14063_v62, %v9781_v56  ;;  %v20960_v56 = vld [vmem:[#allocation135_spill] sm:$0xff] }
 0x5e6   : > { %v13934_v61 = vpop.f32.mrf.mxu1  ;;  %v10831_v43 = vmax.f32 %v10703_v60, 0.0 }
 0x5e7   : > { %v10829_v57 = vmax.f32 %v10701_v59, 0.0  ;;  %v10569_v32 = vadd.f32 %v10406_v7, %v9779_v47  ;;  %v14067_v29 = vpop.f32.mrf.mxu0  ;;  %v10986_v40 = vrot.slane %v10985_v33, 4  ;;  %v9782_v45 = vadd.f32 %v13934_v61, %v18818_v30 }
 0x5e8   : > { %v9619_v50 = vpop.f32.mrf.mxu1  ;;  %v10706_v30 = vadd.f32 %v19112_v25, %v10571_v28  ;;  %v20963_v28 = vld [vmem:[#allocation94_spill] sm:$0xff] }
 0x5e9   : > { %v10992_v35 = vadd.f32 %v10829_v57, %v10828_v53  ;;  %v10704_v48 = vadd.f32 %v19112_v25, %v10569_v32  ;;  %v10422_v63 = vpop.f32.mrf.mxu0  ;;  %v10987_v46 = vadd.f32 %v10986_v40, %v10985_v33  ;;  %v9780_v4 = vadd.f32 %v9619_v50, %v18825_v27  ;;  %v20961_v53 = vld [vmem:[#allocation132_spill] sm:$0xff]  ;;  %v20962_v50 = vld [vmem:[#allocation103_spill] sm:$0xff] }
 0x5ea   : > { %v13937_v9 = vpop.f32.mrf.mxu1  ;;  %v10572_v31 = vadd.f32 %v14064_v14, %v9782_v45  ;;  %v10834_v1 = vmax.f32 %v10706_v30, 0.0 }
 0x5eb   : > { %v10993_v18 = vadd.f32 %v10992_v35, %v10830_v26  ;;  %v14068_v15 = vpop.f32.mrf.mxu0  ;;  %v10988_v37 = vrot.slane %v10987_v46, 2  ;;  %v10570_v8 = vadd.f32 %v10409_v6, %v9780_v4  ;;  %v10832_v2 = vmax.f32 %v10704_v48, 0.0 }
 0x5ec   : > { %v9632_v20 = vpop.f32.mrf.mxu1  ;;  %v9785_v27 = vadd.f32 %v13937_v9, %v18832_v0  ;;  %v10707_v62 = vadd.f32 %v19112_v25, %v10572_v31 }
 0x5ed   : > { %v10994_v19 = vadd.f32 %v10993_v18, %v10831_v43  ;;  %v9783_v22 = vadd.f32 %v9632_v20, %v18835_v5  ;;  %v10425_v24 = vpop.f32.mrf.mxu0  ;;  %v10989_v17 = vadd.f32 %v10988_v37, %v10987_v46  ;;  %v10705_v34 = vadd.f32 %v19112_v25, %v10570_v8  ;;  %v20959_v5 = vld [vmem:[#allocation154_spill] sm:$0xff] }
 0x5ee   : > { %v13938_v36 = vpop.f32.mrf.mxu1  ;;  %v10575_v54 = vadd.f32 %v14067_v29, %v9785_v27  ;;  %v10835_v51 = vmax.f32 %v10707_v62, 0.0 }
 0x5ef   : > { %v10995_v23 = vadd.f32 %v10994_v19, %v10832_v2  ;;  %v10573_v39 = vadd.f32 %v10422_v63, %v9783_v22  ;;  %v14071_v44 = vpop.f32.mrf.mxu0  ;;  %v10990_v41 = vrot.slane %v10989_v17, 1  ;;  %v10833_v42 = vmax.f32 %v10705_v34, 0.0 }
 0x5f0   : > { %v9786_v21 = vadd.f32 %v13938_v36, %v20958_v49  ;;  %v9635_v12 = vpop.f32.mrf.mxu1  ;;  %v10710_v6 = vadd.f32 %v19112_v25, %v10575_v54  ;;  %v10844_v49 = vld [vmem:[#allocation2] sm:$0xff] }
 0x5f1   : > { %v9784_v7 = vadd.f32 %v9635_v12, %v20959_v5  ;;  %v10991_v13 = vadd.f32 %v10990_v41, %v10989_v17  ;;  %v10996_v38 = vadd.f32 %v10995_v23, %v10833_v42  ;;  %v10708_v0 = vadd.f32 %v19112_v25, %v10573_v39  ;;  %v10438_v58 = vpop.f32.mrf.mxu0 }
 0x5f2   : > { %v13941_v16 = vpop.f32.mrf.mxu1  ;;  %v10576_v52 = vadd.f32 %v14068_v15, %v9786_v21  ;;  %v10838_v63 = vmax.f32 %v10710_v6, 0.0 }
 0x5f3   : > { %v10574_v11 = vadd.f32 %v10425_v24, %v9784_v7  ;;  %v11032_v14 = vsel %vm11031_vm13, %v10991_v13, %v19206_v10  ;;  %v10997_v55 = vadd.f32 %v10996_v38, %v10834_v1  ;;  %v10836_v33 = vmax.f32 %v10708_v0, 0.0  ;;  %v14072_v32 = vpop.f32.mrf.mxu0 }
 0x5f4   : > { %v9648_v3 = vpop.f32.mrf.mxu1  ;;  %v9789_v60 = vadd.f32 %v13941_v16, %v20961_v53  ;;  %v10711_v10 = vadd.f32 %v19112_v25, %v10576_v52 }
 0x5f5   : > { %v10709_v59 = vadd.f32 %v19112_v25, %v10574_v11  ;;  %v9787_v47 = vadd.f32 %v9648_v3, %v20960_v56  ;;  %v10998_v61 = vadd.f32 %v10997_v55, %v10835_v51  ;;  %v10441_v43 = vpop.f32.mrf.mxu0 }
 0x5f6   : > { %v13942_v57 = vpop.f32.mrf.mxu1  ;;  %v10579_v4 = vadd.f32 %v14071_v44, %v9789_v60  ;;  %v10839_v15 = vmax.f32 %v10711_v10, 0.0 }
 0x5f7   : > { %v10837_v29 = vmax.f32 %v10709_v59, 0.0  ;;  %v10577_v40 = vadd.f32 %v10438_v58, %v9787_v47  ;;  %v10999_v45 = vadd.f32 %v10998_v61, %v10836_v33  ;;  %v9790_v26 = vadd.f32 %v13942_v57, %v20962_v50 }
 0x5f8   : > { %v9651_v35 = vpop.f32.mrf.mxu1  ;;  %v10714_v20 = vadd.f32 %v19112_v25, %v10579_v4 }
 0x5f9   : > { %v9788_v48 = vadd.f32 %v9651_v35, %v20963_v28  ;;  %v11000_v46 = vadd.f32 %v10999_v45, %v10837_v29  ;;  %v10712_v9 = vadd.f32 %v19112_v25, %v10577_v40  ;;  %v10580_v31 = vadd.f32 %v14072_v32, %v9790_v26 }
 0x5fa   : > { %v10842_v17 = vmax.f32 %v10714_v20, 0.0 }
 0x5fb   : > { %v10578_v18 = vadd.f32 %v10441_v43, %v9788_v48  ;;  %v11001_v37 = vadd.f32 %v11000_v46, %v10838_v63  ;;  %v10840_v30 = vmax.f32 %v10712_v9, 0.0  ;;  %v10715_v24 = vadd.f32 %v19112_v25, %v10580_v31 }
 0x5fd   : > { %v10713_v8 = vadd.f32 %v19112_v25, %v10578_v18  ;;  %v11002_v2 = vadd.f32 %v11001_v37, %v10839_v15  ;;  %v10843_v27 = vmax.f32 %v10715_v24, 0.0 }
 0x5ff   : > { %v10841_v19 = vmax.f32 %v10713_v8, 0.0  ;;  %v11003_v22 = vadd.f32 %v11002_v2, %v10840_v30 }
 0x601   : > { %v11004_v34 = vadd.f32 %v11003_v22, %v10841_v19 }
 0x603   : > { %v11005_v36 = vadd.f32 %v11004_v34, %v10842_v17 }
 0x605   : > { %v11006_v23 = vadd.f32 %v11005_v36, %v10843_v27 }
 0x607   : > { %v11007_v39 = vrot.slane %v11006_v23, 4 }
 0x609   : > { %v11008_v44 = vadd.f32 %v11007_v39, %v11006_v23 }
 0x60b   : > { %v11009_v41 = vrot.slane %v11008_v44, 2 }
 0x60d   : > { %v11010_v62 = vadd.f32 %v11009_v41, %v11008_v44 }
 0x60f   : > { %v11011_v42 = vrot.slane %v11010_v62, 1 }
 0x611   : > { %v11012_v21 = vadd.f32 %v11011_v42, %v11010_v62 }
 0x612   : > { %11041 = sbr.rel (%p12274_p5) target bundleno = 1990 (0x7c6), region = 56 }
 0x613   : > { %v11034_v12 = vsel %vm11033_vm14, %v11012_v21, %v11032_v14 }
 0x614   : > { %v11036_v1 = vadd.f32 %v11034_v12, %v10844_v49 }
 0x616   : > { %11037 = vst [vmem:[#allocation2] sm:$0xff] %v11036_v1 }
 0x617   : > { %v14474_v25 = vld [vmem:[%s19347_s3 + $0x38] sm:$0xff]   ;;  %v14571_v5 = vmov 0.0   ;;  %v14475_v7 = vld [vmem:[%s19347_s3 + $0x30] sm:$0xff]   ;;  %vm14572_vm15 = vmmov 0   ;;  %v14476_v13 = vld [vmem:[%s19347_s3 + $0x28] sm:$0xff]  }
 0x618   : > { %14073 = vmatprep.subr.bf16.mxu0 %v14571_v5  ;;  %14093 = vmatprep.subr.bf16.mxu1 %v14571_v5  ;;  %v14482_v0 = vld [vmem:[%s19349_s5 + $0x38] sm:$0xff]   ;;  %v14477_v16 = vld [vmem:[%s19347_s3 + $0x20] sm:$0xff]   ;;  %v14483_v58 = vld [vmem:[%s19349_s5 + $0x30] sm:$0xff]  }
 0x619   : > { %14074 = vmatpush3.bf16.msra.mxu0 %v14474_v25  ;;  %14089 = vmatprep.mubr.msk.bf16.mxu0 %vm14572_vm15, %v14571_v5  ;;  %v14478_v11 = vld [vmem:[%s19347_s3 + $0x18] sm:$0xff]   ;;  %v14484_v14 = vld [vmem:[%s19349_s5 + $0x28] sm:$0xff]   ;;  %v14479_v51 = vld [vmem:[%s19347_s3 + $0x10] sm:$0xff]  }
 0x61a   : > { %14075 = vmatprep.subr.bf16.mxu0 %v14571_v5  ;;  %14109 = vmatprep.mubr.msk.bf16.mxu1 %vm14572_vm15, %v14571_v5  ;;  %v14485_v55 = vld [vmem:[%s19349_s5 + $0x20] sm:$0xff]   ;;  %v14480_v52 = vld [vmem:[%s19347_s3 + $0x8] sm:$0xff]   ;;  %v14486_v3 = vld [vmem:[%s19349_s5 + $0x18] sm:$0xff]  }
 0x61b   : > { %14094 = vmatpush3.bf16.msra.mxu1 %v14482_v0  ;;  %v14481_v59 = vld [vmem:[%s19347_s3] sm:$0xff]   ;;  %v14487_v56 = vld [vmem:[%s19349_s5 + $0x10] sm:$0xff]   ;;  %v14488_v6 = vld [vmem:[%s19349_s5 + $0x8] sm:$0xff]  }
 0x61c   : > { %14095 = vmatprep.subr.bf16.mxu1 %v14571_v5  ;;  %v14489_v33 = vld [vmem:[%s19349_s5] sm:$0xff]  }
 0x61d   : > { %14076 = vmatpush3.bf16.msra.mxu0 %v14475_v7  ;;  %v11042_v38 = vld [vmem:[#allocation2] sm:$0xff] }
 0x61e   : > { %14077 = vmatprep.subr.bf16.mxu0 %v14571_v5  ;;  %v11043_v54 = vmul.f32 0.00390625, %v11042_v38  ;;  %v12275_v61 = vld [vmem:[%s19348_s4] ss:$0 sm:$0xff] }
 0x61f   : > { %14096 = vmatpush3.bf16.msra.mxu1 %v14483_v58  ;;  %v12284_v10 = vld [vmem:[%s19350_s6] ss:$0 sm:$0xff] }
 0x620   : > { %11044 = vst [vmem:[#allocation3] sm:$0xff] %v11043_v54  ;;  %14097 = vmatprep.subr.bf16.mxu1 %v14571_v5  ;;  %v11045_v47 = vpack.c.bf16 %v11043_v54, %v11043_v54 }
 0x621   : > { %14078 = vmatpush3.bf16.msra.mxu0 %v14476_v13 }
 0x622   : > { %14079 = vmatprep.subr.bf16.mxu0 %v14571_v5 }
 0x623   : > { %14098 = vmatpush3.bf16.msra.mxu1 %v14484_v14 }
 0x624   : > { %14099 = vmatprep.subr.bf16.mxu1 %v14571_v5 }
 0x625   : > { %14080 = vmatpush3.bf16.msra.mxu0 %v14477_v16 }
 0x626   : > { %14081 = vmatprep.subr.bf16.mxu0 %v14571_v5 }
 0x627   : > { %14100 = vmatpush3.bf16.msra.mxu1 %v14485_v55 }
 0x628   : > { %14101 = vmatprep.subr.bf16.mxu1 %v14571_v5 }
 0x629   : > { %14082 = vmatpush3.bf16.msra.mxu0 %v14478_v11 }
 0x62a   : > { %14083 = vmatprep.subr.bf16.mxu0 %v14571_v5 }
 0x62b   : > { %14102 = vmatpush3.bf16.msra.mxu1 %v14486_v3 }
 0x62c   : > { %14103 = vmatprep.subr.bf16.mxu1 %v14571_v5 }
 0x62d   : > { %14084 = vmatpush3.bf16.msra.mxu0 %v14479_v51 }
 0x62e   : > { %14085 = vmatprep.subr.bf16.mxu0 %v14571_v5 }
 0x62f   : > { %14104 = vmatpush3.bf16.msra.mxu1 %v14487_v56 }
 0x630   : > { %14105 = vmatprep.subr.bf16.mxu1 %v14571_v5 }
 0x631   : > { %14086 = vmatpush3.bf16.msra.mxu0 %v14480_v52 }
 0x632   : > { %14087 = vmatprep.subr.bf16.mxu0 %v14571_v5 }
 0x633   : > { %14106 = vmatpush3.bf16.msra.mxu1 %v14488_v6 }
 0x634   : > { %14107 = vmatprep.subr.bf16.mxu1 %v14571_v5 }
 0x635   : > { %14088 = vmatpush3.bf16.msra.mxu0 %v14481_v59 }
 0x637   : > { %14108 = vmatpush3.bf16.msra.mxu1 %v14489_v33 }
 0x638   : > { %14090 = vmatmul.mubr.bf16.vlgmr.msra.gmra.mxu0 %v11045_v47 }
 0x6f8   : > { %v11151_v53 = vpop.f32.mrf.mxu0 }
 0x6f9   : > { %v11152_v60 = vadd.f32 %v12275_v61, %v11151_v53 }
 0x6fa   : > { %v14091_v57 = vpop.f32.mrf.mxu0 }
 0x6fb   : > { %v11157_v32 = vmax.f32 %v11152_v60, 0.0 }
 0x6fc   : > { %v11154_v29 = vpop.f32.mrf.mxu0 }
 0x6fd   : > { %v11158_v40 = vpack.c.bf16 %v11157_v32, %v11157_v32 }
 0x6fe   : > { %v14092_v45 = vpop.f32.mrf.mxu0 }
 0x6ff   : > { %14110 = vmatmul.mubr.bf16.vlgmr.msra.gmra.mxu1 %v11158_v40 }
 0x7bf   : > { %v11264_v50 = vpop.f32.mrf.mxu1 }
 0x7c0   : > { %v11265_v26 = vadd.f32 %v12284_v10, %v11264_v50 }
 0x7c1   : > { %v14111_v35 = vpop.f32.mrf.mxu1 }
 0x7c2   : > { %11270 = vst [vmem:[#allocation5] sm:$0xff] %v11265_v26 }
 0x7c3   : > { %v11267_v28 = vpop.f32.mrf.mxu1 }
 0x7c5   : > { %v14112_v48 = vpop.f32.mrf.mxu1 }
 0x7c6 PF: > { %p19309_p6 = scmp.eq.s32.totalorder %s11361_s30, 1  ;;  %s14573_s24 = smov [#allocation3]  }
 0x7c7   : > { %s11280_s25 = sshll.u32 %s14573_s24, 4  ;;  %s14574_s26 = smov [#allocation5]   ;;  %s11281_s25 = int_to_ptr.vmem [resolvable:$true] %s11280_s25 }
 0x7c8   : > { %s11293_s10 = sshll.u32 %s14574_s26, 4  ;;  %s14490_s27 = scalar_lea.vmem %s11281_s25, 128  ;;  %s11294_s10 = int_to_ptr.vmem [resolvable:$true] %s11293_s10 }
 0x7c9   : > { %p14491_p7 = scmp.ne.s32.totalorder %s11281_s25, %s14490_s27  ;;  %p14497_p10 = scmp.lt.s32.totalorder %s11281_s25, %s11281_s25 }
 0x7ca   : > { %p14498_p11 = scmp.lt.s32.totalorder %s14490_s27, %s14490_s27 }
 0x7cb   : > { %p14492_p8 = pnand %p14491_p7, %p19309_p6 }
 0x7cc   : > { %p14499_p12 = por %p14498_p11, %p14497_p10 }
 0x7cd   : > { %p14493_p9 = pneg %p14492_p8 }
 0x7cf   : > { %p14500_p13 = pnand %p14499_p12, %p14493_p9 }
 0x7d1   : > { %14503 = shalt.err (!%p14500_p13)
}
 0x7d2   : > { %14126 = dma.vmem_to_hbm [thread:$0]  (%p19309_p6), %s11281_s25, 128, %s19351_s7, [#allocation4]  }
 0x7d3   : > { %s14514_s12 = scalar_lea.vmem %s11294_s10, 128  ;;  %p14521_p3 = scmp.lt.s32.totalorder %s11294_s10, %s11294_s10 }
 0x7d4   : > { %p14515_p0 = scmp.ne.s32.totalorder %s11294_s10, %s14514_s12  ;;  %p14522_p4 = scmp.lt.s32.totalorder %s14514_s12, %s14514_s12 }
 0x7d6   : > { %p14516_p1 = pnand %p14515_p0, %p19309_p6  ;;  %p14523_p5 = por %p14522_p4, %p14521_p3 }
 0x7d8   : > { %p14517_p2 = pneg %p14516_p1 }
 0x7da   : > { %p14524_p7 = pnand %p14523_p5, %p14517_p2 }
 0x7dc   : > { %14527 = shalt.err (!%p14524_p7)
}
 0x7dd   : > { %14128 = dma.vmem_to_hbm [thread:$0]  (%p19309_p6), %s11294_s10, 128, %s19352_s8, [#allocation6]  }
 0x7de   : > { %14551 = dma.done.wait (%p19309_p6), [#allocation4], 128  }
 0x7df   : > { %14553 = vsyncadd (%p19309_p6), [#allocation4], 4294967168 }
 0x7e0   : > { %14555 = dma.done.wait (%p19309_p6), [#allocation6], 128  }
 0x7e1   : > { %14557 = vsyncadd (%p19309_p6), [#allocation6], 4294967168 }
 0x7e2 PF: > { %s21_s29 = sadd.s32 1, %s14568_s29   ;;  %s20965_s27 = smov %s14564_s28 }
 0x7e3   : > { %p18_p8 = scmp.ge.s32.totalorder %s21_s29, 4   ;;  %s20966_s28 = smov %s20968_s9 }
 0x7e5   :  { %20 = sbr.rel (!%p18_p8) target bundleno = 3 (0x3), region = 102 }
 0x7ea   :  { %11310 = vsyncpa [#allocation4], 1 }
 0x7eb   :  { %11312 = vsyncpa [#allocation4 + $0x1], 1 }
 0x7ec   :  { %11313 = vsyncpa [#allocation6], 1 }

</bundles_post_ra>
